<compile_context>
chip_gen: v7x
topology: tpu7x:2x2x1
jax: 0.10.0
libtpu: 0.0.40
codegen_flags: <defaults>
</compile_context>

<pallas_src>
import jax
import jax.numpy as jnp
from jax.experimental import pallas as pl
from jax.experimental.pallas import tpu as pltpu

# ----------------------- configuration (small shapes) -----------------------
HIDDEN = 32                # transformer.d_model
NUM_QUERIES = 10
NUM_EXTRA_TOKENS = 4
NUM_BIFUR_QUERIES = 4      # kept <= NUM_QUERIES so the first-step path is valid
NUM_CLASSES = 1
NUM_DEC_LAYERS = 6
NUM_PREV_POS = 1
NUM_PAST_TR_TOKENS = 3
PATCH = 2
FFN_DIM = 4 * HIDDEN       # 128
HEADS_PACK = 128           # lane-dense packed width of the heads output


# Fixed ordering of the fused kernel's inputs (21 consolidated arrays).
_IN_NAMES = (
    # per-call tensors
    "patches", "past_trs", "step", "qe", "mask",
    # patch embedding (+bias row) and positional encoding
    "patch_wb", "pos",
    # prev_pos_embed MLP (4 -> 3H -> 3H -> 3H), weights + packed biases
    "prev_w1", "prev_w23", "prev_b",
    # step_embed Linear(1, H): row0 = w, row1 = b
    "step_wb",
    # decoder (packed over L)
    "dec_wqo",     # (L, H, 2H)  bf16   [wq | wo]
    "dec_wkv",     # (2, H, L*H) bf16   [wk_all ; wv_all]
    "dec_bkv",     # (2, 1, L*H) f32
    "dec_w1",      # (L, H, F)   bf16
    "dec_w2",      # (L, F, H)   bf16
    "dec_bias",    # (L, 8, F)   f32    rows: bq,bo,b2,ln1_g,ln1_b,ln2_g,ln2_b,b1
    "dec_lnf",     # (2, H)      f32    final shared LayerNorm gamma / beta
    # fused prediction heads (packed over L)
    "head_w1",     # (L, H, 2H+C2)  bf16  [dir_w1 | rad_w1 | cls_w]
    "head_w23",    # (L, 2H, 2H+4)  bf16  [blockdiag(dir_w2,rad_w2) | blockdiag(dir_w3,rad_w3)]
    "head_b",      # (L, 3, 2H+C2)  f32   rows: b1, b2(pad), b3(pad)
)


# ------------------------------ fused kernel --------------------------------
def _fused_kernel(*refs):
    n_in = len(_IN_NAMES)
    ins = dict(zip(_IN_NAMES, refs[:n_in]))
    heads_ref, hsn_ref, mem_ref, x_scr = refs[n_in:]

    f32, bf16 = jnp.float32, jnp.bfloat16
    H, NB, E = HIDDEN, NUM_BIFUR_QUERIES, NUM_EXTRA_TOKENS
    Qt = NB + E
    L, C2 = NUM_DEC_LAYERS, NUM_CLASSES + 1
    B = ins["past_trs"].shape[0]
    S = ins["pos"].shape[0]
    Cin = ins["patches"].shape[-1]
    BT, BS = B * Qt, B * S
    scale = 1.0 / (float(H) ** 0.5)

    def mxu(a, w_bf16, b=None):
        # MXU operands in bf16, accumulation / bias add in f32.
        y = jnp.dot(a.astype(bf16), w_bf16, preferred_element_type=f32)
        return y if b is None else y + b

    def layernorm(v, g, b):
        mu = jnp.mean(v, axis=-1, keepdims=True)
        var = jnp.mean((v - mu) ** 2, axis=-1, keepdims=True)
        return (v - mu) * jax.lax.rsqrt(var + 1e-5) * g + b

    # ---------------- prologue: memory, K/V, past-traj, step token ----------
    pwb = ins["patch_wb"][...]                               # (Cin+1, H) f32
    mem2 = jnp.dot(ins["patches"][...], pwb[:Cin, :],
                   preferred_element_type=f32) + pwb[Cin:Cin + 1, :]   # (BS, H)
    mem3 = mem2.reshape(B, S, H)
    mem_ref[...] = mem3
    mem_pos2 = (mem3 + ins["pos"][...][None]).reshape(BS, H)

    # loop-invariant K/V projections for all L layers at once
    wkv, bkv = ins["dec_wkv"], ins["dec_bkv"]
    k_all = (mxu(mem_pos2, wkv[0]) + bkv[0]).reshape(B, S, L * H).astype(bf16)
    v_all = (mxu(mem2, wkv[1]) + bkv[1]).reshape(B, S, L * H).astype(bf16)

    # past-trajectory 3-layer MLP (prologue, f32)
    pb = ins["prev_b"][...]                                  # (3, 3H)
    pw23 = ins["prev_w23"]
    h = jnp.maximum(jnp.dot(ins["past_trs"][...], ins["prev_w1"][...],
                            preferred_element_type=f32) + pb[0:1, :], 0.0)
    h = jnp.maximum(jnp.dot(h, pw23[0], preferred_element_type=f32)
                    + pb[1:2, :], 0.0)
    past = jnp.dot(h, pw23[1], preferred_element_type=f32) + pb[2:3, :]  # (B,3H)

    # step token: scalar (SMEM) * w + b, pure VPU broadcast
    swb = ins["step_wb"][...]                                # (2, H)
    st = ins["step"][0, 0] * swb[0:1, :] + swb[1:2, :]       # (1, H)

    # assemble prev_hs (first-step path) directly into a VMEM scratch
    x_scr[...] = jnp.zeros((B, Qt, H), f32)
    for t in range(NUM_PAST_TR_TOKENS):
        x_scr[:, NB + t:NB + t + 1, :] = past[:, t * H:(t + 1) * H][:, None, :]
    x_scr[:, Qt - 1:Qt, :] = jnp.broadcast_to(st[None], (B, 1, H))
    x = x_scr[...].reshape(BT, H)                            # (BT, H) f32

    qe = ins["qe"][...]                                      # (BT, H)
    keep = 1.0 - ins["mask"][...]                            # (BT, 1); 1 = used

    lnf = ins["dec_lnf"][...]                                # (2, H)
    pad_z = jnp.zeros((BT, HEADS_PACK - (C2 + 3 + 1)), f32)  # hoisted once

    # ---------------- decoder: 6 layers, statically unrolled ----------------
    for l in range(L):
        wqo = ins["dec_wqo"][l]                              # (H, 2H) bf16
        bias = ins["dec_bias"][l]                            # (8, F) f32
        bq, bo, b2 = bias[0:1, :H], bias[1:2, :H], bias[2:3, :H]
        ln1_g, ln1_b = bias[3:4, :H], bias[4:5, :H]
        ln2_g, ln2_b = bias[5:6, :H], bias[6:7, :H]
        b1 = bias[7:8, :]                                    # (1, F)

        k_l = k_all[:, :, l * H:(l + 1) * H]                 # (B, S, H) bf16
        v_l = v_all[:, :, l * H:(l + 1) * H]

        # cross-attention (single head; Q from x+qe, K from mem+pos, V from mem)
        q = mxu(x + qe, wqo[:, :H], bq)                      # (BT, H)
        scores = jnp.einsum("bqh,bsh->bqs",
                            q.reshape(B, Qt, H).astype(bf16), k_l,
                            preferred_element_type=f32) * scale
        m = jnp.max(scores, axis=-1, keepdims=True)
        e = jnp.exp(scores - m)
        attn = e * pl.reciprocal(jnp.sum(e, axis=-1, keepdims=True), approx=True)
        ctx = jnp.einsum("bqs,bsh->bqh", attn.astype(bf16), v_l,
                         preferred_element_type=f32).reshape(BT, H)
        ctx = mxu(ctx, wqo[:, H:], bo)
        x = layernorm(x + ctx * keep, ln1_g, ln1_b)

        # FFN
        ff = jnp.maximum(mxu(x, ins["dec_w1"][l], b1), 0.0)
        ff = mxu(ff, ins["dec_w2"][l], b2)
        x = layernorm(x + ff * keep, ln2_g, ln2_b)

        # hs_l = final shared norm of this layer's output (DETR intermediate)
        hs_l = layernorm(x, lnf[0:1, :], lnf[1:2, :])

        # fused prediction heads: 3 matmuls for cls + dir + rad
        hw1 = ins["head_w1"][l]                              # (H, 2H+C2) bf16
        hw23 = ins["head_w23"][l]                            # (2H, 2H+4) bf16
        hb = ins["head_b"][l]                                # (3, 2H+C2) f32
        y1 = mxu(hs_l, hw1, hb[0:1, :])                      # (BT, 2H+C2)
        h12 = jnp.maximum(y1[:, :2 * H], 0.0)                # dir|rad hidden
        cls = y1[:, 2 * H:2 * H + C2]                        # (BT, C2)
        h2 = jnp.maximum(mxu(h12, hw23[:, :2 * H], hb[1:2, :2 * H]), 0.0)
        y3 = mxu(h2, hw23[:, 2 * H:2 * H + 4], hb[2:3, :4])  # (BT, 4)

        # [cls | dir | rad] contiguous, activations selected per lane
        raw = jnp.concatenate([cls, y3], axis=-1)            # (BT, 6)
        lane = jax.lax.broadcasted_iota(jnp.int32, raw.shape, 1)
        heads6 = jnp.where(lane < C2, raw,
                           jnp.where(lane < C2 + 3, jnp.tanh(raw),
                                     jax.nn.sigmoid(raw)))
        # single lane-dense, full-tile store per layer
        heads_ref[l] = jnp.concatenate([heads6, pad_z], axis=-1)

    hsn_ref[...] = x.reshape(B, Qt, H)                       # hs_without_norm[-1]


# ------------------------------ Pallas wrapper -------------------------------
def _fused_call(params, patches2, past_trs, step, qe2, mask2):
    B = past_trs.shape[0]
    BT = qe2.shape[0]
    Qt = BT // B
    S = params["pos"].shape[0]
    L = NUM_DEC_LAYERS

    args = [patches2, past_trs, step, qe2, mask2] + \
           [params[n] for n in _IN_NAMES[5:]]

    def full_spec(a):
        nd = a.ndim
        return pl.BlockSpec(a.shape, lambda *_, _nd=nd: (0,) * _nd)

    in_specs = []
    for name, a in zip(_IN_NAMES, args):
        if name == "step":
            in_specs.append(pl.BlockSpec(memory_space=pltpu.MemorySpace.SMEM))
        else:
            in_specs.append(full_spec(a))

    out_shapes = (
        jax.ShapeDtypeStruct((L, BT, HEADS_PACK), jnp.float32),   # packed heads
        jax.ShapeDtypeStruct((B, Qt, HIDDEN), jnp.float32),       # hs_without_norm[-1]
        jax.ShapeDtypeStruct((B, S, HIDDEN), jnp.float32),        # memory
    )
    out_specs = (
        pl.BlockSpec((L, BT, HEADS_PACK), lambda i: (0, 0, 0)),
        pl.BlockSpec((B, Qt, HIDDEN), lambda i: (0, 0, 0)),
        pl.BlockSpec((B, S, HIDDEN), lambda i: (0, 0, 0)),
    )
    return pl.pallas_call(
        _fused_kernel,
        out_shape=out_shapes,
        grid=(1,),
        in_specs=in_specs,
        out_specs=out_specs,
        scratch_shapes=[pltpu.VMEM((B, Qt, HIDDEN), jnp.float32)],
        compiler_params=pltpu.CompilerParams(
            dimension_semantics=("arbitrary",)),
    )(*args)


# ------------------------------ parameter init -------------------------------
def init_params(key, samples_shape):
    H, L, F = HIDDEN, NUM_DEC_LAYERS, FFN_DIM
    C2 = NUM_CLASSES + 1
    D_in = NUM_PREV_POS * 4
    D3 = NUM_PAST_TR_TOKENS * H
    B, C, Hh, Ww = samples_shape
    S = (Hh // PATCH) * (Ww // PATCH)
    Cin = C * PATCH * PATCH

    ks = iter(jax.random.split(key, 96))

    def nrm(shape, scale=0.1):
        return (scale * jax.random.normal(next(ks), shape)).astype(jnp.float32)

    p = {}
    # host-side embedding tables (query assembly happens outside the kernel)
    p["query_embed"] = nrm((1, H))
    p["extra_token_embed"] = nrm((NUM_EXTRA_TOKENS, H))
    p["query_embed_start"] = nrm((NUM_BIFUR_QUERIES, H))
    p["bifur_offset_embed"] = nrm((NUM_BIFUR_QUERIES, H))   # unused on first step
    p["pos"] = nrm((S, H))

    # patch embedding: rows 0..Cin-1 weight, row Cin bias
    p["patch_wb"] = jnp.concatenate([nrm((Cin, H)), nrm((1, H))], axis=0)

    # prev_pos_embed: MLP(4, 3H, 3H, 3 layers)
    p["prev_w1"] = nrm((D_in, D3))
    p["prev_w23"] = jnp.stack([nrm((D3, D3)), nrm((D3, D3))])
    p["prev_b"] = jnp.concatenate([nrm((1, D3)), nrm((1, D3)), nrm((1, D3))],
                                  axis=0)

    # step_embed: Linear(1, H)
    p["step_wb"] = jnp.concatenate([nrm((1, H)), nrm((1, H))], axis=0)

    # synthetic decoder (stand-in for the external SwinUNETR transformer)
    wq, wk, wv, wo = nrm((L, H, H)), nrm((L, H, H)), nrm((L, H, H)), nrm((L, H, H))
    bq, bk, bv, bo = nrm((L, 1, H)), nrm((L, 1, H)), nrm((L, 1, H)), nrm((L, 1, H))
    w1, b1 = nrm((L, H, F)), nrm((L, 1, F))
    w2, b2 = nrm((L, F, H)), nrm((L, 1, H))
    p["dec_wqo"] = jnp.concatenate([wq, wo], axis=-1).astype(jnp.bfloat16)
    p["dec_wkv"] = jnp.stack(
        [jnp.concatenate([wk[l] for l in range(L)], axis=-1),
         jnp.concatenate([wv[l] for l in range(L)], axis=-1)]).astype(jnp.bfloat16)
    p["dec_bkv"] = jnp.stack(
        [jnp.concatenate([bk[l] for l in range(L)], axis=-1),
         jnp.concatenate([bv[l] for l in range(L)], axis=-1)])
    p["dec_w1"] = w1.astype(jnp.bfloat16)
    p["dec_w2"] = w2.astype(jnp.bfloat16)

    ln1_g, ln1_b = jnp.ones((L, 1, H)), jnp.zeros((L, 1, H))
    ln2_g, ln2_b = jnp.ones((L, 1, H)), jnp.zeros((L, 1, H))

    def pad_to_f(a):  # (L,1,H) -> (L,1,F)
        return jnp.pad(a, ((0, 0), (0, 0), (0, F - H)))

    # one (8, F) tile per layer holding every per-layer bias / LN parameter
    p["dec_bias"] = jnp.concatenate(
        [pad_to_f(bq), pad_to_f(bo), pad_to_f(b2),
         pad_to_f(ln1_g), pad_to_f(ln1_b), pad_to_f(ln2_g), pad_to_f(ln2_b),
         b1], axis=1)                                        # (L, 8, F)
    p["dec_lnf"] = jnp.concatenate([jnp.ones((1, H)), jnp.zeros((1, H))], axis=0)

    # prediction heads — deepcopies share identical initial values, tile L times
    def tile(a):
        return jnp.tile(a[None], (L,) + (1,) * a.ndim)

    cls_w, cls_b = nrm((H, C2)), nrm((1, C2))
    dw1, db1 = nrm((H, H)), nrm((1, H))
    dw2, db2 = nrm((H, H)), nrm((1, H))
    dw3, db3 = nrm((H, 3)), nrm((1, 3))
    rw1, rb1 = nrm((H, H)), nrm((1, H))
    rw2, rb2 = nrm((H, H)), nrm((1, H))
    rw3, rb3 = nrm((H, 1)), nrm((1, 1))

    W1 = 2 * H + C2
    hw1 = jnp.concatenate([dw1, rw1, cls_w], axis=-1)        # (H, 2H+C2)
    z = jnp.zeros((H, H), jnp.float32)
    hw2 = jnp.concatenate(
        [jnp.concatenate([dw2, z], axis=-1),
         jnp.concatenate([z, rw2], axis=-1)], axis=0)        # (2H, 2H)
    hw3 = jnp.concatenate(
        [jnp.concatenate([dw3, jnp.zeros((H, 1))], axis=-1),
         jnp.concatenate([jnp.zeros((H, 3)), rw3], axis=-1)], axis=0)  # (2H, 4)
    hb1 = jnp.concatenate([db1, rb1, cls_b], axis=-1)        # (1, 2H+C2)
    hb2 = jnp.concatenate([db2, rb2], axis=-1)               # (1, 2H)
    hb3 = jnp.concatenate([db3, rb3], axis=-1)               # (1, 4)

    p["head_w1"] = tile(hw1).astype(jnp.bfloat16)
    p["head_w23"] = tile(jnp.concatenate([hw2, hw3], axis=-1)).astype(jnp.bfloat16)
    p["head_b"] = tile(jnp.concatenate(
        [hb1,
         jnp.pad(hb2, ((0, 0), (0, W1 - 2 * H))),
         jnp.pad(hb3, ((0, 0), (0, W1 - 4)))], axis=0))      # (L, 3, 2H+C2)
    return p


# ------------------------------- forward pass --------------------------------
def swin_detr_forward(params, samples, past_trs, step, prev_step_info):
    B, C, Hh, Ww = samples.shape
    H, Q, E, NB = HIDDEN, NUM_QUERIES, NUM_EXTRA_TOKENS, NUM_BIFUR_QUERIES
    L = NUM_DEC_LAYERS
    P = PATCH
    S = (Hh // P) * (Ww // P)
    C2 = NUM_CLASSES + 1

    # ---- patch extraction (pure layout glue), folded to 2D for the kernel ----
    patches = samples.reshape(B, C, Hh // P, P, Ww // P, P)
    patches = patches.transpose(0, 2, 4, 1, 3, 5).reshape(B * S, C * P * P)

    # ---- query embedding assembly (parameter-only glue, first-step path) ----
    qe = jnp.zeros((Q + E, H), jnp.float32)
    qe = qe.at[:Q].set(params["query_embed"])
    qe = qe.at[Q:].set(params["extra_token_embed"])
    qe = qe.at[:NB].add(params["query_embed_start"])
    used_indices = jnp.concatenate([jnp.arange(NB), jnp.arange(Q, Q + E)])
    queries_mask = jnp.ones((B, Q + E), bool).at[:, used_indices].set(False)

    max_used = NB                                            # first-step path
    qe = jnp.concatenate([qe[:max_used], qe[-E:]], axis=0)   # (Qt, H)
    queries_mask = jnp.concatenate(
        [queries_mask[:, :max_used], queries_mask[:, -E:]], axis=1)  # (B, Qt)
    Qt = max_used + E
    qe2 = jnp.broadcast_to(qe[None], (B, Qt, H)).reshape(B * Qt, H)
    mask2 = queries_mask.astype(jnp.float32).reshape(B * Qt, 1)

    # ---- fused Pallas kernel ----
    heads, hsn_last, memory = _fused_call(
        params, patches, past_trs, step, qe2, mask2)

    heads = heads.reshape(L, B, Qt, HEADS_PACK)[:, :, :max_used, :]
    outputs_class = heads[..., :C2]                          # (L, B, NB, 2)
    outputs_direc = heads[..., C2:C2 + 3]                    # (L, B, NB, 3)
    outputs_radius = heads[..., C2 + 3:C2 + 4]               # (L, B, NB, 1)

    pos_full = jnp.broadcast_to(params["pos"][None], (B, S, H))

    out = {
        "class_logits": outputs_class[-1],
        "direc_logits": outputs_direc[-1],
        "radius_logits": outputs_radius[-1],
        "query_mask": queries_mask[:, :max_used],
        "aux_outputs": [{"class_logits": outputs_class[i],
                         "direc_logits": outputs_direc[i],
                         "radius_logits": outputs_radius[i]}
                        for i in range(L - 1)],
    }

    info = dict(prev_step_info)
    info["old_indices"] = prev_step_info.get("indices", [])
    info["indices"] = prev_step_info.get("indices", [])
    info["bifur_list"] = None
    info["hs_without_norm"] = jax.lax.stop_gradient(hsn_last[:, :max_used])
    if prev_step_info.get("first_step", True):
        info["memory"] = memory
        info["pos"] = pos_full
        info["first_step"] = False
    info["out"] = out
    return out, info


# ----------------------------------- main ------------------------------------
if __name__ == "__main__":
    key = jax.random.PRNGKey(0)
    kp, kx, kt = jax.random.split(key, 3)

    samples = jax.random.normal(kx, (2, 4, 16, 16), jnp.float32)      # NCHW
    past_trs = jax.random.normal(kt, (2, NUM_PREV_POS * 4), jnp.float32)
    step = jnp.full((1, 1), 3.0, jnp.float32)

    params = init_params(kp, samples.shape)
    prev_step_info = {"first_step": True, "node_type": "root_node", "indices": []}

    out, info = swin_detr_forward(params, samples, past_trs, step, prev_step_info)

    jax.block_until_ready(out["class_logits"])
    jax.block_until_ready(out["direc_logits"])
    jax.block_until_ready(out["radius_logits"])
    jax.block_until_ready(info["hs_without_norm"])
    jax.block_until_ready(info["memory"])

    assert out["class_logits"].shape == (2, NUM_BIFUR_QUERIES, NUM_CLASSES + 1)
    assert out["direc_logits"].shape == (2, NUM_BIFUR_QUERIES, 3)
    assert out["radius_logits"].shape == (2, NUM_BIFUR_QUERIES, 1)
    assert len(out["aux_outputs"]) == NUM_DEC_LAYERS - 1
    assert info["hs_without_norm"].shape == (2, NUM_BIFUR_QUERIES, HIDDEN)
    assert info["memory"].shape == (2, 64, HIDDEN)
    assert not bool(jnp.any(jnp.isnan(out["class_logits"])))
    print("KERNEL_OK")
</pallas_src>

<mosaic_0001>
module attributes {stable_mosaic.version = 11 : i64} {
  func.func @_fused_kernel(%arg0: i32, %arg1: memref<128x16xf32, #tpu.memory_space<vmem>>, %arg2: memref<2x4xf32, #tpu.memory_space<vmem>>, %arg3: memref<1x1xf32, #tpu.memory_space<smem>>, %arg4: memref<16x32xf32, #tpu.memory_space<vmem>>, %arg5: memref<16x1xf32, #tpu.memory_space<vmem>>, %arg6: memref<17x32xf32, #tpu.memory_space<vmem>>, %arg7: memref<64x32xf32, #tpu.memory_space<vmem>>, %arg8: memref<4x96xf32, #tpu.memory_space<vmem>>, %arg9: memref<2x96x96xf32, #tpu.memory_space<vmem>>, %arg10: memref<3x96xf32, #tpu.memory_space<vmem>>, %arg11: memref<2x32xf32, #tpu.memory_space<vmem>>, %arg12: memref<6x32x64xbf16, #tpu.memory_space<vmem>>, %arg13: memref<2x32x192xbf16, #tpu.memory_space<vmem>>, %arg14: memref<2x1x192xf32, #tpu.memory_space<vmem>>, %arg15: memref<6x32x128xbf16, #tpu.memory_space<vmem>>, %arg16: memref<6x128x32xbf16, #tpu.memory_space<vmem>>, %arg17: memref<6x8x128xf32, #tpu.memory_space<vmem>>, %arg18: memref<2x32xf32, #tpu.memory_space<vmem>>, %arg19: memref<6x32x66xbf16, #tpu.memory_space<vmem>>, %arg20: memref<6x64x68xbf16, #tpu.memory_space<vmem>>, %arg21: memref<6x3x66xf32, #tpu.memory_space<vmem>>, %arg22: memref<6x16x128xf32, #tpu.memory_space<vmem>>, %arg23: memref<2x8x32xf32, #tpu.memory_space<vmem>>, %arg24: memref<2x64x32xf32, #tpu.memory_space<vmem>>, %arg25: memref<2x8x32xf32, #tpu.memory_space<vmem>>) attributes {dimension_semantics = [#tpu.dimension_semantics<arbitrary>], iteration_bounds = array<i64: 1>, scalar_prefetch = 0 : i64, scratch_operands = 1 : i64, tpu.core_type = #tpu.core_type<tc>, window_params = [{pipeline_mode = #tpu.pipeline_mode<synchronous>, transform_indices = @transform_0, window_bounds = array<i64: 128, 16>}, {pipeline_mode = #tpu.pipeline_mode<synchronous>, transform_indices = @transform_1, window_bounds = array<i64: 2, 4>}, {transform_indices = @transform_2, window_bounds = array<i64: 1, 1>}, {pipeline_mode = #tpu.pipeline_mode<synchronous>, transform_indices = @transform_3, window_bounds = array<i64: 16, 32>}, {pipeline_mode = #tpu.pipeline_mode<synchronous>, transform_indices = @transform_4, window_bounds = array<i64: 16, 1>}, {pipeline_mode = #tpu.pipeline_mode<synchronous>, transform_indices = @transform_5, window_bounds = array<i64: 17, 32>}, {pipeline_mode = #tpu.pipeline_mode<synchronous>, transform_indices = @transform_6, window_bounds = array<i64: 64, 32>}, {pipeline_mode = #tpu.pipeline_mode<synchronous>, transform_indices = @transform_7, window_bounds = array<i64: 4, 96>}, {pipeline_mode = #tpu.pipeline_mode<synchronous>, transform_indices = @transform_8, window_bounds = array<i64: 2, 96, 96>}, {pipeline_mode = #tpu.pipeline_mode<synchronous>, transform_indices = @transform_9, window_bounds = array<i64: 3, 96>}, {pipeline_mode = #tpu.pipeline_mode<synchronous>, transform_indices = @transform_10, window_bounds = array<i64: 2, 32>}, {pipeline_mode = #tpu.pipeline_mode<synchronous>, transform_indices = @transform_11, window_bounds = array<i64: 6, 32, 64>}, {pipeline_mode = #tpu.pipeline_mode<synchronous>, transform_indices = @transform_12, window_bounds = array<i64: 2, 32, 192>}, {pipeline_mode = #tpu.pipeline_mode<synchronous>, transform_indices = @transform_13, window_bounds = array<i64: 2, 1, 192>}, {pipeline_mode = #tpu.pipeline_mode<synchronous>, transform_indices = @transform_14, window_bounds = array<i64: 6, 32, 128>}, {pipeline_mode = #tpu.pipeline_mode<synchronous>, transform_indices = @transform_15, window_bounds = array<i64: 6, 128, 32>}, {pipeline_mode = #tpu.pipeline_mode<synchronous>, transform_indices = @transform_16, window_bounds = array<i64: 6, 8, 128>}, {pipeline_mode = #tpu.pipeline_mode<synchronous>, transform_indices = @transform_17, window_bounds = array<i64: 2, 32>}, {pipeline_mode = #tpu.pipeline_mode<synchronous>, transform_indices = @transform_18, window_bounds = array<i64: 6, 32, 66>}, {pipeline_mode = #tpu.pipeline_mode<synchronous>, transform_indices = @transform_19, window_bounds = array<i64: 6, 64, 68>}, {pipeline_mode = #tpu.pipeline_mode<synchronous>, transform_indices = @transform_20, window_bounds = array<i64: 6, 3, 66>}, {pipeline_mode = #tpu.pipeline_mode<synchronous>, transform_indices = @transform_21, window_bounds = array<i64: 6, 16, 128>}, {pipeline_mode = #tpu.pipeline_mode<synchronous>, transform_indices = @transform_22, window_bounds = array<i64: 2, 8, 32>}, {pipeline_mode = #tpu.pipeline_mode<synchronous>, transform_indices = @transform_23, window_bounds = array<i64: 2, 64, 32>}]} {
    %c0 = arith.constant 0 : index
    %c0_0 = arith.constant 0 : index
    %0 = vector.load %arg6[%c0, %c0_0] : memref<17x32xf32, #tpu.memory_space<vmem>>, vector<17x32xf32>
    %c0_1 = arith.constant 0 : index
    %c0_2 = arith.constant 0 : index
    %1 = vector.load %arg1[%c0_1, %c0_2] : memref<128x16xf32, #tpu.memory_space<vmem>>, vector<128x16xf32>
    %2 = vector.extract_strided_slice %0 {offsets = [0, 0], sizes = [16, 32], strides = [1, 1]} : vector<17x32xf32> to vector<16x32xf32>
    %cst = arith.constant dense<0.000000e+00> : vector<128x32xf32>
    %3 = tpu.matmul %1, %2, %cst {dimension_numbers = #tpu.dot_dimension_numbers<[1], [0], [0], [1], [0, 0, 1, 1], [], []>} : vector<128x16xf32>, vector<16x32xf32>, vector<128x32xf32> -> vector<128x32xf32>
    %4 = vector.extract_strided_slice %0 {offsets = [16, 0], sizes = [1, 32], strides = [1, 1]} : vector<17x32xf32> to vector<1x32xf32>
    %5 = vector.broadcast %4 : vector<1x32xf32> to vector<128x32xf32>
    %6 = arith.addf %3, %5 : vector<128x32xf32>
    %7 = vector.shape_cast %6 : vector<128x32xf32> to vector<2x64x32xf32>
    %c0_3 = arith.constant 0 : index
    %c0_4 = arith.constant 0 : index
    %c0_5 = arith.constant 0 : index
    %8 = vector.load %arg24[%c0_3, %c0_4, %c0_5] : memref<2x64x32xf32, #tpu.memory_space<vmem>>, vector<2x64x32xf32>
    tpu.vector_store %arg24[%c0_3, %c0_4, %c0_5], %7 {strides = array<i32>} : memref<2x64x32xf32, #tpu.memory_space<vmem>>, vector<2x64x32xf32>,
    %c0_6 = arith.constant 0 : index
    %c0_7 = arith.constant 0 : index
    %9 = vector.load %arg7[%c0_6, %c0_7] : memref<64x32xf32, #tpu.memory_space<vmem>>, vector<64x32xf32>
    %10 = vector.shape_cast %9 : vector<64x32xf32> to vector<1x64x32xf32>
    %11 = vector.broadcast %10 : vector<1x64x32xf32> to vector<2x64x32xf32>
    %12 = arith.addf %7, %11 : vector<2x64x32xf32>
    %13 = vector.shape_cast %12 : vector<2x64x32xf32> to vector<128x32xf32>
    %c0_8 = arith.constant 0 : index
    %c0_9 = arith.constant 0 : index
    %c0_10 = arith.constant 0 : index
    %14 = vector.load %arg13[%c0_8, %c0_9, %c0_10] : memref<2x32x192xbf16, #tpu.memory_space<vmem>>, vector<1x32x192xbf16>
    %15 = vector.shape_cast %14 : vector<1x32x192xbf16> to vector<32x192xbf16>
    %16 = arith.truncf %13 : vector<128x32xf32> to vector<128x32xbf16>
    %cst_11 = arith.constant dense<0.000000e+00> : vector<128x192xf32>
    %17 = tpu.matmul %16, %15, %cst_11 {dimension_numbers = #tpu.dot_dimension_numbers<[1], [0], [0], [1], [0, 0, 1, 1], [], []>} : vector<128x32xbf16>, vector<32x192xbf16>, vector<128x192xf32> -> vector<128x192xf32>
    %c0_12 = arith.constant 0 : index
    %c0_13 = arith.constant 0 : index
    %c0_14 = arith.constant 0 : index
    %18 = vector.load %arg14[%c0_12, %c0_13, %c0_14] : memref<2x1x192xf32, #tpu.memory_space<vmem>>, vector<1x1x192xf32>
    %19 = vector.shape_cast %18 : vector<1x1x192xf32> to vector<1x192xf32>
    %20 = vector.broadcast %19 : vector<1x192xf32> to vector<128x192xf32>
    %21 = arith.addf %17, %20 : vector<128x192xf32>
    %22 = vector.shape_cast %21 : vector<128x192xf32> to vector<2x64x192xf32>
    %23 = arith.truncf %22 : vector<2x64x192xf32> to vector<2x64x192xbf16>
    %c1 = arith.constant 1 : index
    %c0_15 = arith.constant 0 : index
    %c0_16 = arith.constant 0 : index
    %24 = vector.load %arg13[%c1, %c0_15, %c0_16] : memref<2x32x192xbf16, #tpu.memory_space<vmem>>, vector<1x32x192xbf16>
    %25 = vector.shape_cast %24 : vector<1x32x192xbf16> to vector<32x192xbf16>
    %26 = arith.truncf %6 : vector<128x32xf32> to vector<128x32xbf16>
    %cst_17 = arith.constant dense<0.000000e+00> : vector<128x192xf32>
    %27 = tpu.matmul %26, %25, %cst_17 {dimension_numbers = #tpu.dot_dimension_numbers<[1], [0], [0], [1], [0, 0, 1, 1], [], []>} : vector<128x32xbf16>, vector<32x192xbf16>, vector<128x192xf32> -> vector<128x192xf32>
    %c1_18 = arith.constant 1 : index
    %c0_19 = arith.constant 0 : index
    %c0_20 = arith.constant 0 : index
    %28 = vector.load %arg14[%c1_18, %c0_19, %c0_20] : memref<2x1x192xf32, #tpu.memory_space<vmem>>, vector<1x1x192xf32>
    %29 = vector.shape_cast %28 : vector<1x1x192xf32> to vector<1x192xf32>
    %30 = vector.broadcast %29 : vector<1x192xf32> to vector<128x192xf32>
    %31 = arith.addf %27, %30 : vector<128x192xf32>
    %32 = vector.shape_cast %31 : vector<128x192xf32> to vector<2x64x192xf32>
    %33 = arith.truncf %32 : vector<2x64x192xf32> to vector<2x64x192xbf16>
    %c0_21 = arith.constant 0 : index
    %c0_22 = arith.constant 0 : index
    %34 = vector.load %arg10[%c0_21, %c0_22] : memref<3x96xf32, #tpu.memory_space<vmem>>, vector<3x96xf32>
    %c0_23 = arith.constant 0 : index
    %c0_24 = arith.constant 0 : index
    %35 = vector.load %arg2[%c0_23, %c0_24] : memref<2x4xf32, #tpu.memory_space<vmem>>, vector<2x4xf32>
    %c0_25 = arith.constant 0 : index
    %c0_26 = arith.constant 0 : index
    %36 = vector.load %arg8[%c0_25, %c0_26] : memref<4x96xf32, #tpu.memory_space<vmem>>, vector<4x96xf32>
    %cst_27 = arith.constant dense<0.000000e+00> : vector<2x96xf32>
    %37 = tpu.matmul %35, %36, %cst_27 {dimension_numbers = #tpu.dot_dimension_numbers<[1], [0], [0], [1], [0, 0, 1, 1], [], []>} : vector<2x4xf32>, vector<4x96xf32>, vector<2x96xf32> -> vector<2x96xf32>
    %38 = vector.extract_strided_slice %34 {offsets = [0, 0], sizes = [1, 96], strides = [1, 1]} : vector<3x96xf32> to vector<1x96xf32>
    %39 = vector.broadcast %38 : vector<1x96xf32> to vector<2x96xf32>
    %40 = arith.addf %37, %39 : vector<2x96xf32>
    %cst_28 = arith.constant 0.000000e+00 : f32
    %41 = vector.broadcast %cst_28 : f32 to vector<2x96xf32>
    %42 = arith.maximumf %40, %41 : vector<2x96xf32>
    %c0_29 = arith.constant 0 : index
    %c0_30 = arith.constant 0 : index
    %c0_31 = arith.constant 0 : index
    %43 = vector.load %arg9[%c0_29, %c0_30, %c0_31] : memref<2x96x96xf32, #tpu.memory_space<vmem>>, vector<1x96x96xf32>
    %44 = vector.shape_cast %43 : vector<1x96x96xf32> to vector<96x96xf32>
    %cst_32 = arith.constant dense<0.000000e+00> : vector<2x96xf32>
    %45 = tpu.matmul %42, %44, %cst_32 {dimension_numbers = #tpu.dot_dimension_numbers<[1], [0], [0], [1], [0, 0, 1, 1], [], []>} : vector<2x96xf32>, vector<96x96xf32>, vector<2x96xf32> -> vector<2x96xf32>
    %46 = vector.extract_strided_slice %34 {offsets = [1, 0], sizes = [1, 96], strides = [1, 1]} : vector<3x96xf32> to vector<1x96xf32>
    %47 = vector.broadcast %46 : vector<1x96xf32> to vector<2x96xf32>
    %48 = arith.addf %45, %47 : vector<2x96xf32>
    %cst_33 = arith.constant 0.000000e+00 : f32
    %49 = vector.broadcast %cst_33 : f32 to vector<2x96xf32>
    %50 = arith.maximumf %48, %49 : vector<2x96xf32>
    %c1_34 = arith.constant 1 : index
    %c0_35 = arith.constant 0 : index
    %c0_36 = arith.constant 0 : index
    %51 = vector.load %arg9[%c1_34, %c0_35, %c0_36] : memref<2x96x96xf32, #tpu.memory_space<vmem>>, vector<1x96x96xf32>
    %52 = vector.shape_cast %51 : vector<1x96x96xf32> to vector<96x96xf32>
    %cst_37 = arith.constant dense<0.000000e+00> : vector<2x96xf32>
    %53 = tpu.matmul %50, %52, %cst_37 {dimension_numbers = #tpu.dot_dimension_numbers<[1], [0], [0], [1], [0, 0, 1, 1], [], []>} : vector<2x96xf32>, vector<96x96xf32>, vector<2x96xf32> -> vector<2x96xf32>
    %54 = vector.extract_strided_slice %34 {offsets = [2, 0], sizes = [1, 96], strides = [1, 1]} : vector<3x96xf32> to vector<1x96xf32>
    %55 = vector.broadcast %54 : vector<1x96xf32> to vector<2x96xf32>
    %56 = arith.addf %53, %55 : vector<2x96xf32>
    %c0_38 = arith.constant 0 : index
    %c0_39 = arith.constant 0 : index
    %57 = vector.load %arg11[%c0_38, %c0_39] : memref<2x32xf32, #tpu.memory_space<vmem>>, vector<2x32xf32>
    %c0_40 = arith.constant 0 : index
    %c0_41 = arith.constant 0 : index
    %58 = memref.load %arg3[%c0_40, %c0_41] : memref<1x1xf32, #tpu.memory_space<smem>>
    %59 = vector.extract_strided_slice %57 {offsets = [0, 0], sizes = [1, 32], strides = [1, 1]} : vector<2x32xf32> to vector<1x32xf32>
    %60 = vector.broadcast %58 : f32 to vector<1x32xf32>
    %61 = arith.mulf %60, %59 : vector<1x32xf32>
    %62 = vector.extract_strided_slice %57 {offsets = [1, 0], sizes = [1, 32], strides = [1, 1]} : vector<2x32xf32> to vector<1x32xf32>
    %63 = arith.addf %61, %62 : vector<1x32xf32>
    %cst_42 = arith.constant 0.000000e+00 : f32
    %64 = vector.broadcast %cst_42 : f32 to vector<2x8x32xf32>
    %c0_43 = arith.constant 0 : index
    %c0_44 = arith.constant 0 : index
    %c0_45 = arith.constant 0 : index
    %65 = vector.load %arg25[%c0_43, %c0_44, %c0_45] : memref<2x8x32xf32, #tpu.memory_space<vmem>>, vector<2x8x32xf32>
    tpu.vector_store %arg25[%c0_43, %c0_44, %c0_45], %64 {strides = array<i32>} : memref<2x8x32xf32, #tpu.memory_space<vmem>>, vector<2x8x32xf32>,
    %66 = vector.extract_strided_slice %56 {offsets = [0, 0], sizes = [2, 32], strides = [1, 1]} : vector<2x96xf32> to vector<2x32xf32>
    %67 = vector.shape_cast %66 : vector<2x32xf32> to vector<2x1x32xf32>
    %c0_46 = arith.constant 0 : index
    %c4 = arith.constant 4 : index
    %c0_47 = arith.constant 0 : index
    %68 = vector.load %arg25[%c0_46, %c4, %c0_47] : memref<2x8x32xf32, #tpu.memory_space<vmem>>, vector<2x1x32xf32>
    tpu.vector_store %arg25[%c0_46, %c4, %c0_47], %67 {strides = array<i32>} : memref<2x8x32xf32, #tpu.memory_space<vmem>>, vector<2x1x32xf32>,
    %69 = vector.extract_strided_slice %56 {offsets = [0, 32], sizes = [2, 32], strides = [1, 1]} : vector<2x96xf32> to vector<2x32xf32>
    %70 = vector.shape_cast %69 : vector<2x32xf32> to vector<2x1x32xf32>
    %c0_48 = arith.constant 0 : index
    %c5 = arith.constant 5 : index
    %c0_49 = arith.constant 0 : index
    %71 = vector.load %arg25[%c0_48, %c5, %c0_49] : memref<2x8x32xf32, #tpu.memory_space<vmem>>, vector<2x1x32xf32>
    tpu.vector_store %arg25[%c0_48, %c5, %c0_49], %70 {strides = array<i32>} : memref<2x8x32xf32, #tpu.memory_space<vmem>>, vector<2x1x32xf32>,
    %72 = vector.extract_strided_slice %56 {offsets = [0, 64], sizes = [2, 32], strides = [1, 1]} : vector<2x96xf32> to vector<2x32xf32>
    %73 = vector.shape_cast %72 : vector<2x32xf32> to vector<2x1x32xf32>
    %c0_50 = arith.constant 0 : index
    %c6 = arith.constant 6 : index
    %c0_51 = arith.constant 0 : index
    %74 = vector.load %arg25[%c0_50, %c6, %c0_51] : memref<2x8x32xf32, #tpu.memory_space<vmem>>, vector<2x1x32xf32>
    tpu.vector_store %arg25[%c0_50, %c6, %c0_51], %73 {strides = array<i32>} : memref<2x8x32xf32, #tpu.memory_space<vmem>>, vector<2x1x32xf32>,
    %75 = vector.shape_cast %63 : vector<1x32xf32> to vector<1x1x32xf32>
    %76 = vector.shape_cast %75 : vector<1x1x32xf32> to vector<1x1x32xf32>
    %77 = vector.broadcast %76 : vector<1x1x32xf32> to vector<2x1x32xf32>
    %c0_52 = arith.constant 0 : index
    %c7 = arith.constant 7 : index
    %c0_53 = arith.constant 0 : index
    %78 = vector.load %arg25[%c0_52, %c7, %c0_53] : memref<2x8x32xf32, #tpu.memory_space<vmem>>, vector<2x1x32xf32>
    tpu.vector_store %arg25[%c0_52, %c7, %c0_53], %77 {strides = array<i32>} : memref<2x8x32xf32, #tpu.memory_space<vmem>>, vector<2x1x32xf32>,
    %c0_54 = arith.constant 0 : index
    %c0_55 = arith.constant 0 : index
    %c0_56 = arith.constant 0 : index
    %79 = vector.load %arg25[%c0_54, %c0_55, %c0_56] : memref<2x8x32xf32, #tpu.memory_space<vmem>>, vector<2x8x32xf32>
    %80 = vector.shape_cast %79 : vector<2x8x32xf32> to vector<16x32xf32>
    %c0_57 = arith.constant 0 : index
    %c0_58 = arith.constant 0 : index
    %81 = vector.load %arg4[%c0_57, %c0_58] : memref<16x32xf32, #tpu.memory_space<vmem>>, vector<16x32xf32>
    %c0_59 = arith.constant 0 : index
    %c0_60 = arith.constant 0 : index
    %82 = vector.load %arg5[%c0_59, %c0_60] : memref<16x1xf32, #tpu.memory_space<vmem>>, vector<16x1xf32>
    %cst_61 = arith.constant 1.000000e+00 : f32
    %83 = vector.broadcast %cst_61 : f32 to vector<16x1xf32>
    %84 = arith.subf %83, %82 : vector<16x1xf32>
    %c0_62 = arith.constant 0 : index
    %c0_63 = arith.constant 0 : index
    %85 = vector.load %arg18[%c0_62, %c0_63] : memref<2x32xf32, #tpu.memory_space<vmem>>, vector<2x32xf32>
    %cst_64 = arith.constant 0.000000e+00 : f32
    %86 = vector.broadcast %cst_64 : f32 to vector<16x122xf32>
    %c0_65 = arith.constant 0 : index
    %c0_66 = arith.constant 0 : index
    %c0_67 = arith.constant 0 : index
    %87 = vector.load %arg12[%c0_65, %c0_66, %c0_67] : memref<6x32x64xbf16, #tpu.memory_space<vmem>>, vector<1x32x64xbf16>
    %88 = vector.shape_cast %87 : vector<1x32x64xbf16> to vector<32x64xbf16>
    %c0_68 = arith.constant 0 : index
    %c0_69 = arith.constant 0 : index
    %c0_70 = arith.constant 0 : index
    %89 = vector.load %arg17[%c0_68, %c0_69, %c0_70] : memref<6x8x128xf32, #tpu.memory_space<vmem>>, vector<1x8x128xf32>
    %90 = vector.shape_cast %89 : vector<1x8x128xf32> to vector<8x128xf32>
    %91 = vector.extract_strided_slice %90 {offsets = [0, 0], sizes = [1, 32], strides = [1, 1]} : vector<8x128xf32> to vector<1x32xf32>
    %92 = vector.extract_strided_slice %90 {offsets = [1, 0], sizes = [1, 32], strides = [1, 1]} : vector<8x128xf32> to vector<1x32xf32>
    %93 = vector.extract_strided_slice %90 {offsets = [2, 0], sizes = [1, 32], strides = [1, 1]} : vector<8x128xf32> to vector<1x32xf32>
    %94 = vector.extract_strided_slice %90 {offsets = [3, 0], sizes = [1, 32], strides = [1, 1]} : vector<8x128xf32> to vector<1x32xf32>
    %95 = vector.extract_strided_slice %90 {offsets = [4, 0], sizes = [1, 32], strides = [1, 1]} : vector<8x128xf32> to vector<1x32xf32>
    %96 = vector.extract_strided_slice %90 {offsets = [5, 0], sizes = [1, 32], strides = [1, 1]} : vector<8x128xf32> to vector<1x32xf32>
    %97 = vector.extract_strided_slice %90 {offsets = [6, 0], sizes = [1, 32], strides = [1, 1]} : vector<8x128xf32> to vector<1x32xf32>
    %98 = vector.extract_strided_slice %90 {offsets = [7, 0], sizes = [1, 128], strides = [1, 1]} : vector<8x128xf32> to vector<1x128xf32>
    %99 = vector.extract_strided_slice %23 {offsets = [0, 0, 0], sizes = [2, 64, 32], strides = [1, 1, 1]} : vector<2x64x192xbf16> to vector<2x64x32xbf16>
    %100 = vector.extract_strided_slice %33 {offsets = [0, 0, 0], sizes = [2, 64, 32], strides = [1, 1, 1]} : vector<2x64x192xbf16> to vector<2x64x32xbf16>
    %101 = arith.addf %80, %81 : vector<16x32xf32>
    %102 = vector.extract_strided_slice %88 {offsets = [0, 0], sizes = [32, 32], strides = [1, 1]} : vector<32x64xbf16> to vector<32x32xbf16>
    %103 = arith.truncf %101 : vector<16x32xf32> to vector<16x32xbf16>
    %cst_71 = arith.constant dense<0.000000e+00> : vector<16x32xf32>
    %104 = tpu.matmul %103, %102, %cst_71 {dimension_numbers = #tpu.dot_dimension_numbers<[1], [0], [0], [1], [0, 0, 1, 1], [], []>} : vector<16x32xbf16>, vector<32x32xbf16>, vector<16x32xf32> -> vector<16x32xf32>
    %105 = vector.broadcast %91 : vector<1x32xf32> to vector<16x32xf32>
    %106 = arith.addf %104, %105 : vector<16x32xf32>
    %107 = vector.shape_cast %106 : vector<16x32xf32> to vector<2x8x32xf32>
    %108 = arith.truncf %107 : vector<2x8x32xf32> to vector<2x8x32xbf16>
    "tpu.trace_start"() <{level = 10 : i32, message = "bqh,bsh->bqs"}> : () -> ()
    %cst_72 = arith.constant dense<0.000000e+00> : vector<2x8x64xf32>
    %109 = tpu.matmul %108, %99, %cst_72 {dimension_numbers = #tpu.dot_dimension_numbers<[2], [2], [1], [1], [0, 0, 0, 1, 1, 1], [0], [0]>} : vector<2x8x32xbf16>, vector<2x64x32xbf16>, vector<2x8x64xf32> -> vector<2x8x64xf32>
    "tpu.trace_stop"() : () -> ()
    %cst_73 = arith.constant 0.176776692 : f32
    %110 = vector.broadcast %cst_73 : f32 to vector<2x8x64xf32>
    %111 = arith.mulf %109, %110 : vector<2x8x64xf32>
    %cst_74 = arith.constant dense<0xFF800000> : vector<2x8xf32>
    %112 = vector.multi_reduction <maximumf>, %111, %cst_74 [2] : vector<2x8x64xf32> to vector<2x8xf32>
    %113 = vector.shape_cast %112 : vector<2x8xf32> to vector<2x8x1xf32>
    %114 = vector.broadcast %113 : vector<2x8x1xf32> to vector<2x8x64xf32>
    %115 = arith.subf %111, %114 : vector<2x8x64xf32>
    %116 = math.exp %115 : vector<2x8x64xf32>
    %cst_75 = arith.constant dense<0.000000e+00> : vector<2x8xf32>
    %117 = vector.multi_reduction <add>, %116, %cst_75 [2] : vector<2x8x64xf32> to vector<2x8xf32>
    %118 = vector.shape_cast %117 : vector<2x8xf32> to vector<2x8x1xf32>
    %119 = tpu.reciprocal %118 {approx = true} : vector<2x8x1xf32> -> vector<2x8x1xf32>
    %120 = vector.broadcast %119 : vector<2x8x1xf32> to vector<2x8x64xf32>
    %121 = arith.mulf %116, %120 : vector<2x8x64xf32>
    %122 = arith.truncf %121 : vector<2x8x64xf32> to vector<2x8x64xbf16>
    "tpu.trace_start"() <{level = 10 : i32, message = "bqs,bsh->bqh"}> : () -> ()
    %cst_76 = arith.constant dense<0.000000e+00> : vector<2x8x32xf32>
    %123 = tpu.matmul %122, %100, %cst_76 {dimension_numbers = #tpu.dot_dimension_numbers<[2], [1], [1], [2], [0, 0, 0, 1, 1, 2], [0], [0]>} : vector<2x8x64xbf16>, vector<2x64x32xbf16>, vector<2x8x32xf32> -> vector<2x8x32xf32>
    "tpu.trace_stop"() : () -> ()
    %124 = vector.shape_cast %123 : vector<2x8x32xf32> to vector<16x32xf32>
    %125 = vector.extract_strided_slice %88 {offsets = [0, 32], sizes = [32, 32], strides = [1, 1]} : vector<32x64xbf16> to vector<32x32xbf16>
    %126 = arith.truncf %124 : vector<16x32xf32> to vector<16x32xbf16>
    %cst_77 = arith.constant dense<0.000000e+00> : vector<16x32xf32>
    %127 = tpu.matmul %126, %125, %cst_77 {dimension_numbers = #tpu.dot_dimension_numbers<[1], [0], [0], [1], [0, 0, 1, 1], [], []>} : vector<16x32xbf16>, vector<32x32xbf16>, vector<16x32xf32> -> vector<16x32xf32>
    %128 = vector.broadcast %92 : vector<1x32xf32> to vector<16x32xf32>
    %129 = arith.addf %127, %128 : vector<16x32xf32>
    %130 = vector.broadcast %84 : vector<16x1xf32> to vector<16x32xf32>
    %131 = arith.mulf %129, %130 : vector<16x32xf32>
    %132 = arith.addf %80, %131 : vector<16x32xf32>
    %cst_78 = arith.constant dense<0.000000e+00> : vector<16xf32>
    %133 = vector.multi_reduction <add>, %132, %cst_78 [1] : vector<16x32xf32> to vector<16xf32>
    %134 = vector.shape_cast %133 : vector<16xf32> to vector<16x1xf32>
    %cst_79 = arith.constant 3.200000e+01 : f32
    %135 = vector.broadcast %cst_79 : f32 to vector<16x1xf32>
    %136 = arith.divf %134, %135 : vector<16x1xf32>
    %137 = vector.broadcast %136 : vector<16x1xf32> to vector<16x32xf32>
    %138 = arith.subf %132, %137 : vector<16x32xf32>
    %139 = arith.mulf %138, %138 : vector<16x32xf32>
    %cst_80 = arith.constant dense<0.000000e+00> : vector<16xf32>
    %140 = vector.multi_reduction <add>, %139, %cst_80 [1] : vector<16x32xf32> to vector<16xf32>
    %141 = vector.shape_cast %140 : vector<16xf32> to vector<16x1xf32>
    %cst_81 = arith.constant 3.200000e+01 : f32
    %142 = vector.broadcast %cst_81 : f32 to vector<16x1xf32>
    %143 = arith.divf %141, %142 : vector<16x1xf32>
    %144 = vector.broadcast %136 : vector<16x1xf32> to vector<16x32xf32>
    %145 = arith.subf %132, %144 : vector<16x32xf32>
    %cst_82 = arith.constant 9.99999974E-6 : f32
    %146 = vector.broadcast %cst_82 : f32 to vector<16x1xf32>
    %147 = arith.addf %143, %146 : vector<16x1xf32>
    %148 = math.rsqrt %147 : vector<16x1xf32>
    %149 = vector.broadcast %148 : vector<16x1xf32> to vector<16x32xf32>
    %150 = arith.mulf %145, %149 : vector<16x32xf32>
    %151 = vector.broadcast %94 : vector<1x32xf32> to vector<16x32xf32>
    %152 = arith.mulf %150, %151 : vector<16x32xf32>
    %153 = vector.broadcast %95 : vector<1x32xf32> to vector<16x32xf32>
    %154 = arith.addf %152, %153 : vector<16x32xf32>
    %c0_83 = arith.constant 0 : index
    %c0_84 = arith.constant 0 : index
    %c0_85 = arith.constant 0 : index
    %155 = vector.load %arg15[%c0_83, %c0_84, %c0_85] : memref<6x32x128xbf16, #tpu.memory_space<vmem>>, vector<1x32x128xbf16>
    %156 = vector.shape_cast %155 : vector<1x32x128xbf16> to vector<32x128xbf16>
    %157 = arith.truncf %154 : vector<16x32xf32> to vector<16x32xbf16>
    %cst_86 = arith.constant dense<0.000000e+00> : vector<16x128xf32>
    %158 = tpu.matmul %157, %156, %cst_86 {dimension_numbers = #tpu.dot_dimension_numbers<[1], [0], [0], [1], [0, 0, 1, 1], [], []>} : vector<16x32xbf16>, vector<32x128xbf16>, vector<16x128xf32> -> vector<16x128xf32>
    %159 = vector.broadcast %98 : vector<1x128xf32> to vector<16x128xf32>
    %160 = arith.addf %158, %159 : vector<16x128xf32>
    %cst_87 = arith.constant 0.000000e+00 : f32
    %161 = vector.broadcast %cst_87 : f32 to vector<16x128xf32>
    %162 = arith.maximumf %160, %161 : vector<16x128xf32>
    %c0_88 = arith.constant 0 : index
    %c0_89 = arith.constant 0 : index
    %c0_90 = arith.constant 0 : index
    %163 = vector.load %arg16[%c0_88, %c0_89, %c0_90] : memref<6x128x32xbf16, #tpu.memory_space<vmem>>, vector<1x128x32xbf16>
    %164 = vector.shape_cast %163 : vector<1x128x32xbf16> to vector<128x32xbf16>
    %165 = arith.truncf %162 : vector<16x128xf32> to vector<16x128xbf16>
    %cst_91 = arith.constant dense<0.000000e+00> : vector<16x32xf32>
    %166 = tpu.matmul %165, %164, %cst_91 {dimension_numbers = #tpu.dot_dimension_numbers<[1], [0], [0], [1], [0, 0, 1, 1], [], []>} : vector<16x128xbf16>, vector<128x32xbf16>, vector<16x32xf32> -> vector<16x32xf32>
    %167 = vector.broadcast %93 : vector<1x32xf32> to vector<16x32xf32>
    %168 = arith.addf %166, %167 : vector<16x32xf32>
    %169 = vector.broadcast %84 : vector<16x1xf32> to vector<16x32xf32>
    %170 = arith.mulf %168, %169 : vector<16x32xf32>
    %171 = arith.addf %154, %170 : vector<16x32xf32>
    %cst_92 = arith.constant dense<0.000000e+00> : vector<16xf32>
    %172 = vector.multi_reduction <add>, %171, %cst_92 [1] : vector<16x32xf32> to vector<16xf32>
    %173 = vector.shape_cast %172 : vector<16xf32> to vector<16x1xf32>
    %cst_93 = arith.constant 3.200000e+01 : f32
    %174 = vector.broadcast %cst_93 : f32 to vector<16x1xf32>
    %175 = arith.divf %173, %174 : vector<16x1xf32>
    %176 = vector.broadcast %175 : vector<16x1xf32> to vector<16x32xf32>
    %177 = arith.subf %171, %176 : vector<16x32xf32>
    %178 = arith.mulf %177, %177 : vector<16x32xf32>
    %cst_94 = arith.constant dense<0.000000e+00> : vector<16xf32>
    %179 = vector.multi_reduction <add>, %178, %cst_94 [1] : vector<16x32xf32> to vector<16xf32>
    %180 = vector.shape_cast %179 : vector<16xf32> to vector<16x1xf32>
    %cst_95 = arith.constant 3.200000e+01 : f32
    %181 = vector.broadcast %cst_95 : f32 to vector<16x1xf32>
    %182 = arith.divf %180, %181 : vector<16x1xf32>
    %183 = vector.broadcast %175 : vector<16x1xf32> to vector<16x32xf32>
    %184 = arith.subf %171, %183 : vector<16x32xf32>
    %cst_96 = arith.constant 9.99999974E-6 : f32
    %185 = vector.broadcast %cst_96 : f32 to vector<16x1xf32>
    %186 = arith.addf %182, %185 : vector<16x1xf32>
    %187 = math.rsqrt %186 : vector<16x1xf32>
    %188 = vector.broadcast %187 : vector<16x1xf32> to vector<16x32xf32>
    %189 = arith.mulf %184, %188 : vector<16x32xf32>
    %190 = vector.broadcast %96 : vector<1x32xf32> to vector<16x32xf32>
    %191 = arith.mulf %189, %190 : vector<16x32xf32>
    %192 = vector.broadcast %97 : vector<1x32xf32> to vector<16x32xf32>
    %193 = arith.addf %191, %192 : vector<16x32xf32>
    %194 = vector.extract_strided_slice %85 {offsets = [0, 0], sizes = [1, 32], strides = [1, 1]} : vector<2x32xf32> to vector<1x32xf32>
    %195 = vector.extract_strided_slice %85 {offsets = [1, 0], sizes = [1, 32], strides = [1, 1]} : vector<2x32xf32> to vector<1x32xf32>
    %cst_97 = arith.constant dense<0.000000e+00> : vector<16xf32>
    %196 = vector.multi_reduction <add>, %193, %cst_97 [1] : vector<16x32xf32> to vector<16xf32>
    %197 = vector.shape_cast %196 : vector<16xf32> to vector<16x1xf32>
    %cst_98 = arith.constant 3.200000e+01 : f32
    %198 = vector.broadcast %cst_98 : f32 to vector<16x1xf32>
    %199 = arith.divf %197, %198 : vector<16x1xf32>
    %200 = vector.broadcast %199 : vector<16x1xf32> to vector<16x32xf32>
    %201 = arith.subf %193, %200 : vector<16x32xf32>
    %202 = arith.mulf %201, %201 : vector<16x32xf32>
    %cst_99 = arith.constant dense<0.000000e+00> : vector<16xf32>
    %203 = vector.multi_reduction <add>, %202, %cst_99 [1] : vector<16x32xf32> to vector<16xf32>
    %204 = vector.shape_cast %203 : vector<16xf32> to vector<16x1xf32>
    %cst_100 = arith.constant 3.200000e+01 : f32
    %205 = vector.broadcast %cst_100 : f32 to vector<16x1xf32>
    %206 = arith.divf %204, %205 : vector<16x1xf32>
    %207 = vector.broadcast %199 : vector<16x1xf32> to vector<16x32xf32>
    %208 = arith.subf %193, %207 : vector<16x32xf32>
    %cst_101 = arith.constant 9.99999974E-6 : f32
    %209 = vector.broadcast %cst_101 : f32 to vector<16x1xf32>
    %210 = arith.addf %206, %209 : vector<16x1xf32>
    %211 = math.rsqrt %210 : vector<16x1xf32>
    %212 = vector.broadcast %211 : vector<16x1xf32> to vector<16x32xf32>
    %213 = arith.mulf %208, %212 : vector<16x32xf32>
    %214 = vector.broadcast %194 : vector<1x32xf32> to vector<16x32xf32>
    %215 = arith.mulf %213, %214 : vector<16x32xf32>
    %216 = vector.broadcast %195 : vector<1x32xf32> to vector<16x32xf32>
    %217 = arith.addf %215, %216 : vector<16x32xf32>
    %c0_102 = arith.constant 0 : index
    %c0_103 = arith.constant 0 : index
    %c0_104 = arith.constant 0 : index
    %218 = vector.load %arg19[%c0_102, %c0_103, %c0_104] : memref<6x32x66xbf16, #tpu.memory_space<vmem>>, vector<1x32x66xbf16>
    %219 = vector.shape_cast %218 : vector<1x32x66xbf16> to vector<32x66xbf16>
    %c0_105 = arith.constant 0 : index
    %c0_106 = arith.constant 0 : index
    %c0_107 = arith.constant 0 : index
    %220 = vector.load %arg20[%c0_105, %c0_106, %c0_107] : memref<6x64x68xbf16, #tpu.memory_space<vmem>>, vector<1x64x68xbf16>
    %221 = vector.shape_cast %220 : vector<1x64x68xbf16> to vector<64x68xbf16>
    %c0_108 = arith.constant 0 : index
    %c0_109 = arith.constant 0 : index
    %c0_110 = arith.constant 0 : index
    %222 = vector.load %arg21[%c0_108, %c0_109, %c0_110] : memref<6x3x66xf32, #tpu.memory_space<vmem>>, vector<1x3x66xf32>
    %223 = vector.shape_cast %222 : vector<1x3x66xf32> to vector<3x66xf32>
    %224 = vector.extract_strided_slice %223 {offsets = [0, 0], sizes = [1, 66], strides = [1, 1]} : vector<3x66xf32> to vector<1x66xf32>
    %225 = arith.truncf %217 : vector<16x32xf32> to vector<16x32xbf16>
    %cst_111 = arith.constant dense<0.000000e+00> : vector<16x66xf32>
    %226 = tpu.matmul %225, %219, %cst_111 {dimension_numbers = #tpu.dot_dimension_numbers<[1], [0], [0], [1], [0, 0, 1, 1], [], []>} : vector<16x32xbf16>, vector<32x66xbf16>, vector<16x66xf32> -> vector<16x66xf32>
    %227 = vector.broadcast %224 : vector<1x66xf32> to vector<16x66xf32>
    %228 = arith.addf %226, %227 : vector<16x66xf32>
    %229 = vector.extract_strided_slice %228 {offsets = [0, 0], sizes = [16, 64], strides = [1, 1]} : vector<16x66xf32> to vector<16x64xf32>
    %cst_112 = arith.constant 0.000000e+00 : f32
    %230 = vector.broadcast %cst_112 : f32 to vector<16x64xf32>
    %231 = arith.maximumf %229, %230 : vector<16x64xf32>
    %232 = vector.extract_strided_slice %228 {offsets = [0, 64], sizes = [16, 2], strides = [1, 1]} : vector<16x66xf32> to vector<16x2xf32>
    %233 = vector.extract_strided_slice %221 {offsets = [0, 0], sizes = [64, 64], strides = [1, 1]} : vector<64x68xbf16> to vector<64x64xbf16>
    %234 = vector.extract_strided_slice %223 {offsets = [1, 0], sizes = [1, 64], strides = [1, 1]} : vector<3x66xf32> to vector<1x64xf32>
    %235 = arith.truncf %231 : vector<16x64xf32> to vector<16x64xbf16>
    %cst_113 = arith.constant dense<0.000000e+00> : vector<16x64xf32>
    %236 = tpu.matmul %235, %233, %cst_113 {dimension_numbers = #tpu.dot_dimension_numbers<[1], [0], [0], [1], [0, 0, 1, 1], [], []>} : vector<16x64xbf16>, vector<64x64xbf16>, vector<16x64xf32> -> vector<16x64xf32>
    %237 = vector.broadcast %234 : vector<1x64xf32> to vector<16x64xf32>
    %238 = arith.addf %236, %237 : vector<16x64xf32>
    %cst_114 = arith.constant 0.000000e+00 : f32
    %239 = vector.broadcast %cst_114 : f32 to vector<16x64xf32>
    %240 = arith.maximumf %238, %239 : vector<16x64xf32>
    %241 = vector.extract_strided_slice %221 {offsets = [0, 64], sizes = [64, 4], strides = [1, 1]} : vector<64x68xbf16> to vector<64x4xbf16>
    %242 = vector.extract_strided_slice %223 {offsets = [2, 0], sizes = [1, 4], strides = [1, 1]} : vector<3x66xf32> to vector<1x4xf32>
    %243 = arith.truncf %240 : vector<16x64xf32> to vector<16x64xbf16>
    %cst_115 = arith.constant dense<0.000000e+00> : vector<16x4xf32>
    %244 = tpu.matmul %243, %241, %cst_115 {dimension_numbers = #tpu.dot_dimension_numbers<[1], [0], [0], [1], [0, 0, 1, 1], [], []>} : vector<16x64xbf16>, vector<64x4xbf16>, vector<16x4xf32> -> vector<16x4xf32>
    %245 = vector.broadcast %242 : vector<1x4xf32> to vector<16x4xf32>
    %246 = arith.addf %244, %245 : vector<16x4xf32>
    %247 = tpu.concatenate %232, %246 in 1 : vector<16x2xf32>, vector<16x4xf32> -> vector<16x6xf32>
    %248 = tpu.iota {dimensions = array<i32: 1>} : vector<16x6xi32>
    %c2_i32 = arith.constant 2 : i32
    %249 = vector.broadcast %c2_i32 : i32 to vector<16x6xi32>
    %250 = arith.cmpi slt, %248, %249 : vector<16x6xi32>
    %c5_i32 = arith.constant 5 : i32
    %251 = vector.broadcast %c5_i32 : i32 to vector<16x6xi32>
    %252 = arith.cmpi slt, %248, %251 : vector<16x6xi32>
    %253 = math.tanh %247 : vector<16x6xf32>
    %254 = arith.negf %247 : vector<16x6xf32>
    %255 = math.exp %254 : vector<16x6xf32>
    %cst_116 = arith.constant 1.000000e+00 : f32
    %256 = vector.broadcast %cst_116 : f32 to vector<16x6xf32>
    %257 = arith.addf %256, %255 : vector<16x6xf32>
    %258 = arith.divf %256, %257 : vector<16x6xf32>
    %259 = arith.select %252, %253, %258 : vector<16x6xi1>, vector<16x6xf32>
    %260 = arith.select %250, %247, %259 : vector<16x6xi1>, vector<16x6xf32>
    %261 = tpu.concatenate %260, %86 in 1 : vector<16x6xf32>, vector<16x122xf32> -> vector<16x128xf32>
    %c0_117 = arith.constant 0 : index
    %c0_118 = arith.constant 0 : index
    %c0_119 = arith.constant 0 : index
    %262 = vector.load %arg22[%c0_117, %c0_118, %c0_119] : memref<6x16x128xf32, #tpu.memory_space<vmem>>, vector<1x16x128xf32>
    %263 = vector.shape_cast %262 : vector<1x16x128xf32> to vector<16x128xf32>
    %264 = vector.shape_cast %261 : vector<16x128xf32> to vector<1x16x128xf32>
    tpu.vector_store %arg22[%c0_117, %c0_118, %c0_119], %264 {strides = array<i32>} : memref<6x16x128xf32, #tpu.memory_space<vmem>>, vector<1x16x128xf32>,
    %c1_120 = arith.constant 1 : index
    %c0_121 = arith.constant 0 : index
    %c0_122 = arith.constant 0 : index
    %265 = vector.load %arg12[%c1_120, %c0_121, %c0_122] : memref<6x32x64xbf16, #tpu.memory_space<vmem>>, vector<1x32x64xbf16>
    %266 = vector.shape_cast %265 : vector<1x32x64xbf16> to vector<32x64xbf16>
    %c1_123 = arith.constant 1 : index
    %c0_124 = arith.constant 0 : index
    %c0_125 = arith.constant 0 : index
    %267 = vector.load %arg17[%c1_123, %c0_124, %c0_125] : memref<6x8x128xf32, #tpu.memory_space<vmem>>, vector<1x8x128xf32>
    %268 = vector.shape_cast %267 : vector<1x8x128xf32> to vector<8x128xf32>
    %269 = vector.extract_strided_slice %268 {offsets = [0, 0], sizes = [1, 32], strides = [1, 1]} : vector<8x128xf32> to vector<1x32xf32>
    %270 = vector.extract_strided_slice %268 {offsets = [1, 0], sizes = [1, 32], strides = [1, 1]} : vector<8x128xf32> to vector<1x32xf32>
    %271 = vector.extract_strided_slice %268 {offsets = [2, 0], sizes = [1, 32], strides = [1, 1]} : vector<8x128xf32> to vector<1x32xf32>
    %272 = vector.extract_strided_slice %268 {offsets = [3, 0], sizes = [1, 32], strides = [1, 1]} : vector<8x128xf32> to vector<1x32xf32>
    %273 = vector.extract_strided_slice %268 {offsets = [4, 0], sizes = [1, 32], strides = [1, 1]} : vector<8x128xf32> to vector<1x32xf32>
    %274 = vector.extract_strided_slice %268 {offsets = [5, 0], sizes = [1, 32], strides = [1, 1]} : vector<8x128xf32> to vector<1x32xf32>
    %275 = vector.extract_strided_slice %268 {offsets = [6, 0], sizes = [1, 32], strides = [1, 1]} : vector<8x128xf32> to vector<1x32xf32>
    %276 = vector.extract_strided_slice %268 {offsets = [7, 0], sizes = [1, 128], strides = [1, 1]} : vector<8x128xf32> to vector<1x128xf32>
    %277 = vector.extract_strided_slice %23 {offsets = [0, 0, 32], sizes = [2, 64, 32], strides = [1, 1, 1]} : vector<2x64x192xbf16> to vector<2x64x32xbf16>
    %278 = vector.extract_strided_slice %33 {offsets = [0, 0, 32], sizes = [2, 64, 32], strides = [1, 1, 1]} : vector<2x64x192xbf16> to vector<2x64x32xbf16>
    %279 = arith.addf %193, %81 : vector<16x32xf32>
    %280 = vector.extract_strided_slice %266 {offsets = [0, 0], sizes = [32, 32], strides = [1, 1]} : vector<32x64xbf16> to vector<32x32xbf16>
    %281 = arith.truncf %279 : vector<16x32xf32> to vector<16x32xbf16>
    %cst_126 = arith.constant dense<0.000000e+00> : vector<16x32xf32>
    %282 = tpu.matmul %281, %280, %cst_126 {dimension_numbers = #tpu.dot_dimension_numbers<[1], [0], [0], [1], [0, 0, 1, 1], [], []>} : vector<16x32xbf16>, vector<32x32xbf16>, vector<16x32xf32> -> vector<16x32xf32>
    %283 = vector.broadcast %269 : vector<1x32xf32> to vector<16x32xf32>
    %284 = arith.addf %282, %283 : vector<16x32xf32>
    %285 = vector.shape_cast %284 : vector<16x32xf32> to vector<2x8x32xf32>
    %286 = arith.truncf %285 : vector<2x8x32xf32> to vector<2x8x32xbf16>
    "tpu.trace_start"() <{level = 10 : i32, message = "bqh,bsh->bqs"}> : () -> ()
    %cst_127 = arith.constant dense<0.000000e+00> : vector<2x8x64xf32>
    %287 = tpu.matmul %286, %277, %cst_127 {dimension_numbers = #tpu.dot_dimension_numbers<[2], [2], [1], [1], [0, 0, 0, 1, 1, 1], [0], [0]>} : vector<2x8x32xbf16>, vector<2x64x32xbf16>, vector<2x8x64xf32> -> vector<2x8x64xf32>
    "tpu.trace_stop"() : () -> ()
    %cst_128 = arith.constant 0.176776692 : f32
    %288 = vector.broadcast %cst_128 : f32 to vector<2x8x64xf32>
    %289 = arith.mulf %287, %288 : vector<2x8x64xf32>
    %cst_129 = arith.constant dense<0xFF800000> : vector<2x8xf32>
    %290 = vector.multi_reduction <maximumf>, %289, %cst_129 [2] : vector<2x8x64xf32> to vector<2x8xf32>
    %291 = vector.shape_cast %290 : vector<2x8xf32> to vector<2x8x1xf32>
    %292 = vector.broadcast %291 : vector<2x8x1xf32> to vector<2x8x64xf32>
    %293 = arith.subf %289, %292 : vector<2x8x64xf32>
    %294 = math.exp %293 : vector<2x8x64xf32>
    %cst_130 = arith.constant dense<0.000000e+00> : vector<2x8xf32>
    %295 = vector.multi_reduction <add>, %294, %cst_130 [2] : vector<2x8x64xf32> to vector<2x8xf32>
    %296 = vector.shape_cast %295 : vector<2x8xf32> to vector<2x8x1xf32>
    %297 = tpu.reciprocal %296 {approx = true} : vector<2x8x1xf32> -> vector<2x8x1xf32>
    %298 = vector.broadcast %297 : vector<2x8x1xf32> to vector<2x8x64xf32>
    %299 = arith.mulf %294, %298 : vector<2x8x64xf32>
    %300 = arith.truncf %299 : vector<2x8x64xf32> to vector<2x8x64xbf16>
    "tpu.trace_start"() <{level = 10 : i32, message = "bqs,bsh->bqh"}> : () -> ()
    %cst_131 = arith.constant dense<0.000000e+00> : vector<2x8x32xf32>
    %301 = tpu.matmul %300, %278, %cst_131 {dimension_numbers = #tpu.dot_dimension_numbers<[2], [1], [1], [2], [0, 0, 0, 1, 1, 2], [0], [0]>} : vector<2x8x64xbf16>, vector<2x64x32xbf16>, vector<2x8x32xf32> -> vector<2x8x32xf32>
    "tpu.trace_stop"() : () -> ()
    %302 = vector.shape_cast %301 : vector<2x8x32xf32> to vector<16x32xf32>
    %303 = vector.extract_strided_slice %266 {offsets = [0, 32], sizes = [32, 32], strides = [1, 1]} : vector<32x64xbf16> to vector<32x32xbf16>
    %304 = arith.truncf %302 : vector<16x32xf32> to vector<16x32xbf16>
    %cst_132 = arith.constant dense<0.000000e+00> : vector<16x32xf32>
    %305 = tpu.matmul %304, %303, %cst_132 {dimension_numbers = #tpu.dot_dimension_numbers<[1], [0], [0], [1], [0, 0, 1, 1], [], []>} : vector<16x32xbf16>, vector<32x32xbf16>, vector<16x32xf32> -> vector<16x32xf32>
    %306 = vector.broadcast %270 : vector<1x32xf32> to vector<16x32xf32>
    %307 = arith.addf %305, %306 : vector<16x32xf32>
    %308 = vector.broadcast %84 : vector<16x1xf32> to vector<16x32xf32>
    %309 = arith.mulf %307, %308 : vector<16x32xf32>
    %310 = arith.addf %193, %309 : vector<16x32xf32>
    %cst_133 = arith.constant dense<0.000000e+00> : vector<16xf32>
    %311 = vector.multi_reduction <add>, %310, %cst_133 [1] : vector<16x32xf32> to vector<16xf32>
    %312 = vector.shape_cast %311 : vector<16xf32> to vector<16x1xf32>
    %cst_134 = arith.constant 3.200000e+01 : f32
    %313 = vector.broadcast %cst_134 : f32 to vector<16x1xf32>
    %314 = arith.divf %312, %313 : vector<16x1xf32>
    %315 = vector.broadcast %314 : vector<16x1xf32> to vector<16x32xf32>
    %316 = arith.subf %310, %315 : vector<16x32xf32>
    %317 = arith.mulf %316, %316 : vector<16x32xf32>
    %cst_135 = arith.constant dense<0.000000e+00> : vector<16xf32>
    %318 = vector.multi_reduction <add>, %317, %cst_135 [1] : vector<16x32xf32> to vector<16xf32>
    %319 = vector.shape_cast %318 : vector<16xf32> to vector<16x1xf32>
    %cst_136 = arith.constant 3.200000e+01 : f32
    %320 = vector.broadcast %cst_136 : f32 to vector<16x1xf32>
    %321 = arith.divf %319, %320 : vector<16x1xf32>
    %322 = vector.broadcast %314 : vector<16x1xf32> to vector<16x32xf32>
    %323 = arith.subf %310, %322 : vector<16x32xf32>
    %cst_137 = arith.constant 9.99999974E-6 : f32
    %324 = vector.broadcast %cst_137 : f32 to vector<16x1xf32>
    %325 = arith.addf %321, %324 : vector<16x1xf32>
    %326 = math.rsqrt %325 : vector<16x1xf32>
    %327 = vector.broadcast %326 : vector<16x1xf32> to vector<16x32xf32>
    %328 = arith.mulf %323, %327 : vector<16x32xf32>
    %329 = vector.broadcast %272 : vector<1x32xf32> to vector<16x32xf32>
    %330 = arith.mulf %328, %329 : vector<16x32xf32>
    %331 = vector.broadcast %273 : vector<1x32xf32> to vector<16x32xf32>
    %332 = arith.addf %330, %331 : vector<16x32xf32>
    %c1_138 = arith.constant 1 : index
    %c0_139 = arith.constant 0 : index
    %c0_140 = arith.constant 0 : index
    %333 = vector.load %arg15[%c1_138, %c0_139, %c0_140] : memref<6x32x128xbf16, #tpu.memory_space<vmem>>, vector<1x32x128xbf16>
    %334 = vector.shape_cast %333 : vector<1x32x128xbf16> to vector<32x128xbf16>
    %335 = arith.truncf %332 : vector<16x32xf32> to vector<16x32xbf16>
    %cst_141 = arith.constant dense<0.000000e+00> : vector<16x128xf32>
    %336 = tpu.matmul %335, %334, %cst_141 {dimension_numbers = #tpu.dot_dimension_numbers<[1], [0], [0], [1], [0, 0, 1, 1], [], []>} : vector<16x32xbf16>, vector<32x128xbf16>, vector<16x128xf32> -> vector<16x128xf32>
    %337 = vector.broadcast %276 : vector<1x128xf32> to vector<16x128xf32>
    %338 = arith.addf %336, %337 : vector<16x128xf32>
    %cst_142 = arith.constant 0.000000e+00 : f32
    %339 = vector.broadcast %cst_142 : f32 to vector<16x128xf32>
    %340 = arith.maximumf %338, %339 : vector<16x128xf32>
    %c1_143 = arith.constant 1 : index
    %c0_144 = arith.constant 0 : index
    %c0_145 = arith.constant 0 : index
    %341 = vector.load %arg16[%c1_143, %c0_144, %c0_145] : memref<6x128x32xbf16, #tpu.memory_space<vmem>>, vector<1x128x32xbf16>
    %342 = vector.shape_cast %341 : vector<1x128x32xbf16> to vector<128x32xbf16>
    %343 = arith.truncf %340 : vector<16x128xf32> to vector<16x128xbf16>
    %cst_146 = arith.constant dense<0.000000e+00> : vector<16x32xf32>
    %344 = tpu.matmul %343, %342, %cst_146 {dimension_numbers = #tpu.dot_dimension_numbers<[1], [0], [0], [1], [0, 0, 1, 1], [], []>} : vector<16x128xbf16>, vector<128x32xbf16>, vector<16x32xf32> -> vector<16x32xf32>
    %345 = vector.broadcast %271 : vector<1x32xf32> to vector<16x32xf32>
    %346 = arith.addf %344, %345 : vector<16x32xf32>
    %347 = vector.broadcast %84 : vector<16x1xf32> to vector<16x32xf32>
    %348 = arith.mulf %346, %347 : vector<16x32xf32>
    %349 = arith.addf %332, %348 : vector<16x32xf32>
    %cst_147 = arith.constant dense<0.000000e+00> : vector<16xf32>
    %350 = vector.multi_reduction <add>, %349, %cst_147 [1] : vector<16x32xf32> to vector<16xf32>
    %351 = vector.shape_cast %350 : vector<16xf32> to vector<16x1xf32>
    %cst_148 = arith.constant 3.200000e+01 : f32
    %352 = vector.broadcast %cst_148 : f32 to vector<16x1xf32>
    %353 = arith.divf %351, %352 : vector<16x1xf32>
    %354 = vector.broadcast %353 : vector<16x1xf32> to vector<16x32xf32>
    %355 = arith.subf %349, %354 : vector<16x32xf32>
    %356 = arith.mulf %355, %355 : vector<16x32xf32>
    %cst_149 = arith.constant dense<0.000000e+00> : vector<16xf32>
    %357 = vector.multi_reduction <add>, %356, %cst_149 [1] : vector<16x32xf32> to vector<16xf32>
    %358 = vector.shape_cast %357 : vector<16xf32> to vector<16x1xf32>
    %cst_150 = arith.constant 3.200000e+01 : f32
    %359 = vector.broadcast %cst_150 : f32 to vector<16x1xf32>
    %360 = arith.divf %358, %359 : vector<16x1xf32>
    %361 = vector.broadcast %353 : vector<16x1xf32> to vector<16x32xf32>
    %362 = arith.subf %349, %361 : vector<16x32xf32>
    %cst_151 = arith.constant 9.99999974E-6 : f32
    %363 = vector.broadcast %cst_151 : f32 to vector<16x1xf32>
    %364 = arith.addf %360, %363 : vector<16x1xf32>
    %365 = math.rsqrt %364 : vector<16x1xf32>
    %366 = vector.broadcast %365 : vector<16x1xf32> to vector<16x32xf32>
    %367 = arith.mulf %362, %366 : vector<16x32xf32>
    %368 = vector.broadcast %274 : vector<1x32xf32> to vector<16x32xf32>
    %369 = arith.mulf %367, %368 : vector<16x32xf32>
    %370 = vector.broadcast %275 : vector<1x32xf32> to vector<16x32xf32>
    %371 = arith.addf %369, %370 : vector<16x32xf32>
    %372 = vector.extract_strided_slice %85 {offsets = [0, 0], sizes = [1, 32], strides = [1, 1]} : vector<2x32xf32> to vector<1x32xf32>
    %373 = vector.extract_strided_slice %85 {offsets = [1, 0], sizes = [1, 32], strides = [1, 1]} : vector<2x32xf32> to vector<1x32xf32>
    %cst_152 = arith.constant dense<0.000000e+00> : vector<16xf32>
    %374 = vector.multi_reduction <add>, %371, %cst_152 [1] : vector<16x32xf32> to vector<16xf32>
    %375 = vector.shape_cast %374 : vector<16xf32> to vector<16x1xf32>
    %cst_153 = arith.constant 3.200000e+01 : f32
    %376 = vector.broadcast %cst_153 : f32 to vector<16x1xf32>
    %377 = arith.divf %375, %376 : vector<16x1xf32>
    %378 = vector.broadcast %377 : vector<16x1xf32> to vector<16x32xf32>
    %379 = arith.subf %371, %378 : vector<16x32xf32>
    %380 = arith.mulf %379, %379 : vector<16x32xf32>
    %cst_154 = arith.constant dense<0.000000e+00> : vector<16xf32>
    %381 = vector.multi_reduction <add>, %380, %cst_154 [1] : vector<16x32xf32> to vector<16xf32>
    %382 = vector.shape_cast %381 : vector<16xf32> to vector<16x1xf32>
    %cst_155 = arith.constant 3.200000e+01 : f32
    %383 = vector.broadcast %cst_155 : f32 to vector<16x1xf32>
    %384 = arith.divf %382, %383 : vector<16x1xf32>
    %385 = vector.broadcast %377 : vector<16x1xf32> to vector<16x32xf32>
    %386 = arith.subf %371, %385 : vector<16x32xf32>
    %cst_156 = arith.constant 9.99999974E-6 : f32
    %387 = vector.broadcast %cst_156 : f32 to vector<16x1xf32>
    %388 = arith.addf %384, %387 : vector<16x1xf32>
    %389 = math.rsqrt %388 : vector<16x1xf32>
    %390 = vector.broadcast %389 : vector<16x1xf32> to vector<16x32xf32>
    %391 = arith.mulf %386, %390 : vector<16x32xf32>
    %392 = vector.broadcast %372 : vector<1x32xf32> to vector<16x32xf32>
    %393 = arith.mulf %391, %392 : vector<16x32xf32>
    %394 = vector.broadcast %373 : vector<1x32xf32> to vector<16x32xf32>
    %395 = arith.addf %393, %394 : vector<16x32xf32>
    %c1_157 = arith.constant 1 : index
    %c0_158 = arith.constant 0 : index
    %c0_159 = arith.constant 0 : index
    %396 = vector.load %arg19[%c1_157, %c0_158, %c0_159] : memref<6x32x66xbf16, #tpu.memory_space<vmem>>, vector<1x32x66xbf16>
    %397 = vector.shape_cast %396 : vector<1x32x66xbf16> to vector<32x66xbf16>
    %c1_160 = arith.constant 1 : index
    %c0_161 = arith.constant 0 : index
    %c0_162 = arith.constant 0 : index
    %398 = vector.load %arg20[%c1_160, %c0_161, %c0_162] : memref<6x64x68xbf16, #tpu.memory_space<vmem>>, vector<1x64x68xbf16>
    %399 = vector.shape_cast %398 : vector<1x64x68xbf16> to vector<64x68xbf16>
    %c1_163 = arith.constant 1 : index
    %c0_164 = arith.constant 0 : index
    %c0_165 = arith.constant 0 : index
    %400 = vector.load %arg21[%c1_163, %c0_164, %c0_165] : memref<6x3x66xf32, #tpu.memory_space<vmem>>, vector<1x3x66xf32>
    %401 = vector.shape_cast %400 : vector<1x3x66xf32> to vector<3x66xf32>
    %402 = vector.extract_strided_slice %401 {offsets = [0, 0], sizes = [1, 66], strides = [1, 1]} : vector<3x66xf32> to vector<1x66xf32>
    %403 = arith.truncf %395 : vector<16x32xf32> to vector<16x32xbf16>
    %cst_166 = arith.constant dense<0.000000e+00> : vector<16x66xf32>
    %404 = tpu.matmul %403, %397, %cst_166 {dimension_numbers = #tpu.dot_dimension_numbers<[1], [0], [0], [1], [0, 0, 1, 1], [], []>} : vector<16x32xbf16>, vector<32x66xbf16>, vector<16x66xf32> -> vector<16x66xf32>
    %405 = vector.broadcast %402 : vector<1x66xf32> to vector<16x66xf32>
    %406 = arith.addf %404, %405 : vector<16x66xf32>
    %407 = vector.extract_strided_slice %406 {offsets = [0, 0], sizes = [16, 64], strides = [1, 1]} : vector<16x66xf32> to vector<16x64xf32>
    %cst_167 = arith.constant 0.000000e+00 : f32
    %408 = vector.broadcast %cst_167 : f32 to vector<16x64xf32>
    %409 = arith.maximumf %407, %408 : vector<16x64xf32>
    %410 = vector.extract_strided_slice %406 {offsets = [0, 64], sizes = [16, 2], strides = [1, 1]} : vector<16x66xf32> to vector<16x2xf32>
    %411 = vector.extract_strided_slice %399 {offsets = [0, 0], sizes = [64, 64], strides = [1, 1]} : vector<64x68xbf16> to vector<64x64xbf16>
    %412 = vector.extract_strided_slice %401 {offsets = [1, 0], sizes = [1, 64], strides = [1, 1]} : vector<3x66xf32> to vector<1x64xf32>
    %413 = arith.truncf %409 : vector<16x64xf32> to vector<16x64xbf16>
    %cst_168 = arith.constant dense<0.000000e+00> : vector<16x64xf32>
    %414 = tpu.matmul %413, %411, %cst_168 {dimension_numbers = #tpu.dot_dimension_numbers<[1], [0], [0], [1], [0, 0, 1, 1], [], []>} : vector<16x64xbf16>, vector<64x64xbf16>, vector<16x64xf32> -> vector<16x64xf32>
    %415 = vector.broadcast %412 : vector<1x64xf32> to vector<16x64xf32>
    %416 = arith.addf %414, %415 : vector<16x64xf32>
    %cst_169 = arith.constant 0.000000e+00 : f32
    %417 = vector.broadcast %cst_169 : f32 to vector<16x64xf32>
    %418 = arith.maximumf %416, %417 : vector<16x64xf32>
    %419 = vector.extract_strided_slice %399 {offsets = [0, 64], sizes = [64, 4], strides = [1, 1]} : vector<64x68xbf16> to vector<64x4xbf16>
    %420 = vector.extract_strided_slice %401 {offsets = [2, 0], sizes = [1, 4], strides = [1, 1]} : vector<3x66xf32> to vector<1x4xf32>
    %421 = arith.truncf %418 : vector<16x64xf32> to vector<16x64xbf16>
    %cst_170 = arith.constant dense<0.000000e+00> : vector<16x4xf32>
    %422 = tpu.matmul %421, %419, %cst_170 {dimension_numbers = #tpu.dot_dimension_numbers<[1], [0], [0], [1], [0, 0, 1, 1], [], []>} : vector<16x64xbf16>, vector<64x4xbf16>, vector<16x4xf32> -> vector<16x4xf32>
    %423 = vector.broadcast %420 : vector<1x4xf32> to vector<16x4xf32>
    %424 = arith.addf %422, %423 : vector<16x4xf32>
    %425 = tpu.concatenate %410, %424 in 1 : vector<16x2xf32>, vector<16x4xf32> -> vector<16x6xf32>
    %426 = tpu.iota {dimensions = array<i32: 1>} : vector<16x6xi32>
    %c2_i32_171 = arith.constant 2 : i32
    %427 = vector.broadcast %c2_i32_171 : i32 to vector<16x6xi32>
    %428 = arith.cmpi slt, %426, %427 : vector<16x6xi32>
    %c5_i32_172 = arith.constant 5 : i32
    %429 = vector.broadcast %c5_i32_172 : i32 to vector<16x6xi32>
    %430 = arith.cmpi slt, %426, %429 : vector<16x6xi32>
    %431 = math.tanh %425 : vector<16x6xf32>
    %432 = arith.negf %425 : vector<16x6xf32>
    %433 = math.exp %432 : vector<16x6xf32>
    %cst_173 = arith.constant 1.000000e+00 : f32
    %434 = vector.broadcast %cst_173 : f32 to vector<16x6xf32>
    %435 = arith.addf %434, %433 : vector<16x6xf32>
    %436 = arith.divf %434, %435 : vector<16x6xf32>
    %437 = arith.select %430, %431, %436 : vector<16x6xi1>, vector<16x6xf32>
    %438 = arith.select %428, %425, %437 : vector<16x6xi1>, vector<16x6xf32>
    %439 = tpu.concatenate %438, %86 in 1 : vector<16x6xf32>, vector<16x122xf32> -> vector<16x128xf32>
    %c1_174 = arith.constant 1 : index
    %c0_175 = arith.constant 0 : index
    %c0_176 = arith.constant 0 : index
    %440 = vector.load %arg22[%c1_174, %c0_175, %c0_176] : memref<6x16x128xf32, #tpu.memory_space<vmem>>, vector<1x16x128xf32>
    %441 = vector.shape_cast %440 : vector<1x16x128xf32> to vector<16x128xf32>
    %442 = vector.shape_cast %439 : vector<16x128xf32> to vector<1x16x128xf32>
    tpu.vector_store %arg22[%c1_174, %c0_175, %c0_176], %442 {strides = array<i32>} : memref<6x16x128xf32, #tpu.memory_space<vmem>>, vector<1x16x128xf32>,
    %c2 = arith.constant 2 : index
    %c0_177 = arith.constant 0 : index
    %c0_178 = arith.constant 0 : index
    %443 = vector.load %arg12[%c2, %c0_177, %c0_178] : memref<6x32x64xbf16, #tpu.memory_space<vmem>>, vector<1x32x64xbf16>
    %444 = vector.shape_cast %443 : vector<1x32x64xbf16> to vector<32x64xbf16>
    %c2_179 = arith.constant 2 : index
    %c0_180 = arith.constant 0 : index
    %c0_181 = arith.constant 0 : index
    %445 = vector.load %arg17[%c2_179, %c0_180, %c0_181] : memref<6x8x128xf32, #tpu.memory_space<vmem>>, vector<1x8x128xf32>
    %446 = vector.shape_cast %445 : vector<1x8x128xf32> to vector<8x128xf32>
    %447 = vector.extract_strided_slice %446 {offsets = [0, 0], sizes = [1, 32], strides = [1, 1]} : vector<8x128xf32> to vector<1x32xf32>
    %448 = vector.extract_strided_slice %446 {offsets = [1, 0], sizes = [1, 32], strides = [1, 1]} : vector<8x128xf32> to vector<1x32xf32>
    %449 = vector.extract_strided_slice %446 {offsets = [2, 0], sizes = [1, 32], strides = [1, 1]} : vector<8x128xf32> to vector<1x32xf32>
    %450 = vector.extract_strided_slice %446 {offsets = [3, 0], sizes = [1, 32], strides = [1, 1]} : vector<8x128xf32> to vector<1x32xf32>
    %451 = vector.extract_strided_slice %446 {offsets = [4, 0], sizes = [1, 32], strides = [1, 1]} : vector<8x128xf32> to vector<1x32xf32>
    %452 = vector.extract_strided_slice %446 {offsets = [5, 0], sizes = [1, 32], strides = [1, 1]} : vector<8x128xf32> to vector<1x32xf32>
    %453 = vector.extract_strided_slice %446 {offsets = [6, 0], sizes = [1, 32], strides = [1, 1]} : vector<8x128xf32> to vector<1x32xf32>
    %454 = vector.extract_strided_slice %446 {offsets = [7, 0], sizes = [1, 128], strides = [1, 1]} : vector<8x128xf32> to vector<1x128xf32>
    %455 = vector.extract_strided_slice %23 {offsets = [0, 0, 64], sizes = [2, 64, 32], strides = [1, 1, 1]} : vector<2x64x192xbf16> to vector<2x64x32xbf16>
    %456 = vector.extract_strided_slice %33 {offsets = [0, 0, 64], sizes = [2, 64, 32], strides = [1, 1, 1]} : vector<2x64x192xbf16> to vector<2x64x32xbf16>
    %457 = arith.addf %371, %81 : vector<16x32xf32>
    %458 = vector.extract_strided_slice %444 {offsets = [0, 0], sizes = [32, 32], strides = [1, 1]} : vector<32x64xbf16> to vector<32x32xbf16>
    %459 = arith.truncf %457 : vector<16x32xf32> to vector<16x32xbf16>
    %cst_182 = arith.constant dense<0.000000e+00> : vector<16x32xf32>
    %460 = tpu.matmul %459, %458, %cst_182 {dimension_numbers = #tpu.dot_dimension_numbers<[1], [0], [0], [1], [0, 0, 1, 1], [], []>} : vector<16x32xbf16>, vector<32x32xbf16>, vector<16x32xf32> -> vector<16x32xf32>
    %461 = vector.broadcast %447 : vector<1x32xf32> to vector<16x32xf32>
    %462 = arith.addf %460, %461 : vector<16x32xf32>
    %463 = vector.shape_cast %462 : vector<16x32xf32> to vector<2x8x32xf32>
    %464 = arith.truncf %463 : vector<2x8x32xf32> to vector<2x8x32xbf16>
    "tpu.trace_start"() <{level = 10 : i32, message = "bqh,bsh->bqs"}> : () -> ()
    %cst_183 = arith.constant dense<0.000000e+00> : vector<2x8x64xf32>
    %465 = tpu.matmul %464, %455, %cst_183 {dimension_numbers = #tpu.dot_dimension_numbers<[2], [2], [1], [1], [0, 0, 0, 1, 1, 1], [0], [0]>} : vector<2x8x32xbf16>, vector<2x64x32xbf16>, vector<2x8x64xf32> -> vector<2x8x64xf32>
    "tpu.trace_stop"() : () -> ()
    %cst_184 = arith.constant 0.176776692 : f32
    %466 = vector.broadcast %cst_184 : f32 to vector<2x8x64xf32>
    %467 = arith.mulf %465, %466 : vector<2x8x64xf32>
    %cst_185 = arith.constant dense<0xFF800000> : vector<2x8xf32>
    %468 = vector.multi_reduction <maximumf>, %467, %cst_185 [2] : vector<2x8x64xf32> to vector<2x8xf32>
    %469 = vector.shape_cast %468 : vector<2x8xf32> to vector<2x8x1xf32>
    %470 = vector.broadcast %469 : vector<2x8x1xf32> to vector<2x8x64xf32>
    %471 = arith.subf %467, %470 : vector<2x8x64xf32>
    %472 = math.exp %471 : vector<2x8x64xf32>
    %cst_186 = arith.constant dense<0.000000e+00> : vector<2x8xf32>
    %473 = vector.multi_reduction <add>, %472, %cst_186 [2] : vector<2x8x64xf32> to vector<2x8xf32>
    %474 = vector.shape_cast %473 : vector<2x8xf32> to vector<2x8x1xf32>
    %475 = tpu.reciprocal %474 {approx = true} : vector<2x8x1xf32> -> vector<2x8x1xf32>
    %476 = vector.broadcast %475 : vector<2x8x1xf32> to vector<2x8x64xf32>
    %477 = arith.mulf %472, %476 : vector<2x8x64xf32>
    %478 = arith.truncf %477 : vector<2x8x64xf32> to vector<2x8x64xbf16>
    "tpu.trace_start"() <{level = 10 : i32, message = "bqs,bsh->bqh"}> : () -> ()
    %cst_187 = arith.constant dense<0.000000e+00> : vector<2x8x32xf32>
    %479 = tpu.matmul %478, %456, %cst_187 {dimension_numbers = #tpu.dot_dimension_numbers<[2], [1], [1], [2], [0, 0, 0, 1, 1, 2], [0], [0]>} : vector<2x8x64xbf16>, vector<2x64x32xbf16>, vector<2x8x32xf32> -> vector<2x8x32xf32>
    "tpu.trace_stop"() : () -> ()
    %480 = vector.shape_cast %479 : vector<2x8x32xf32> to vector<16x32xf32>
    %481 = vector.extract_strided_slice %444 {offsets = [0, 32], sizes = [32, 32], strides = [1, 1]} : vector<32x64xbf16> to vector<32x32xbf16>
    %482 = arith.truncf %480 : vector<16x32xf32> to vector<16x32xbf16>
    %cst_188 = arith.constant dense<0.000000e+00> : vector<16x32xf32>
    %483 = tpu.matmul %482, %481, %cst_188 {dimension_numbers = #tpu.dot_dimension_numbers<[1], [0], [0], [1], [0, 0, 1, 1], [], []>} : vector<16x32xbf16>, vector<32x32xbf16>, vector<16x32xf32> -> vector<16x32xf32>
    %484 = vector.broadcast %448 : vector<1x32xf32> to vector<16x32xf32>
    %485 = arith.addf %483, %484 : vector<16x32xf32>
    %486 = vector.broadcast %84 : vector<16x1xf32> to vector<16x32xf32>
    %487 = arith.mulf %485, %486 : vector<16x32xf32>
    %488 = arith.addf %371, %487 : vector<16x32xf32>
    %cst_189 = arith.constant dense<0.000000e+00> : vector<16xf32>
    %489 = vector.multi_reduction <add>, %488, %cst_189 [1] : vector<16x32xf32> to vector<16xf32>
    %490 = vector.shape_cast %489 : vector<16xf32> to vector<16x1xf32>
    %cst_190 = arith.constant 3.200000e+01 : f32
    %491 = vector.broadcast %cst_190 : f32 to vector<16x1xf32>
    %492 = arith.divf %490, %491 : vector<16x1xf32>
    %493 = vector.broadcast %492 : vector<16x1xf32> to vector<16x32xf32>
    %494 = arith.subf %488, %493 : vector<16x32xf32>
    %495 = arith.mulf %494, %494 : vector<16x32xf32>
    %cst_191 = arith.constant dense<0.000000e+00> : vector<16xf32>
    %496 = vector.multi_reduction <add>, %495, %cst_191 [1] : vector<16x32xf32> to vector<16xf32>
    %497 = vector.shape_cast %496 : vector<16xf32> to vector<16x1xf32>
    %cst_192 = arith.constant 3.200000e+01 : f32
    %498 = vector.broadcast %cst_192 : f32 to vector<16x1xf32>
    %499 = arith.divf %497, %498 : vector<16x1xf32>
    %500 = vector.broadcast %492 : vector<16x1xf32> to vector<16x32xf32>
    %501 = arith.subf %488, %500 : vector<16x32xf32>
    %cst_193 = arith.constant 9.99999974E-6 : f32
    %502 = vector.broadcast %cst_193 : f32 to vector<16x1xf32>
    %503 = arith.addf %499, %502 : vector<16x1xf32>
    %504 = math.rsqrt %503 : vector<16x1xf32>
    %505 = vector.broadcast %504 : vector<16x1xf32> to vector<16x32xf32>
    %506 = arith.mulf %501, %505 : vector<16x32xf32>
    %507 = vector.broadcast %450 : vector<1x32xf32> to vector<16x32xf32>
    %508 = arith.mulf %506, %507 : vector<16x32xf32>
    %509 = vector.broadcast %451 : vector<1x32xf32> to vector<16x32xf32>
    %510 = arith.addf %508, %509 : vector<16x32xf32>
    %c2_194 = arith.constant 2 : index
    %c0_195 = arith.constant 0 : index
    %c0_196 = arith.constant 0 : index
    %511 = vector.load %arg15[%c2_194, %c0_195, %c0_196] : memref<6x32x128xbf16, #tpu.memory_space<vmem>>, vector<1x32x128xbf16>
    %512 = vector.shape_cast %511 : vector<1x32x128xbf16> to vector<32x128xbf16>
    %513 = arith.truncf %510 : vector<16x32xf32> to vector<16x32xbf16>
    %cst_197 = arith.constant dense<0.000000e+00> : vector<16x128xf32>
    %514 = tpu.matmul %513, %512, %cst_197 {dimension_numbers = #tpu.dot_dimension_numbers<[1], [0], [0], [1], [0, 0, 1, 1], [], []>} : vector<16x32xbf16>, vector<32x128xbf16>, vector<16x128xf32> -> vector<16x128xf32>
    %515 = vector.broadcast %454 : vector<1x128xf32> to vector<16x128xf32>
    %516 = arith.addf %514, %515 : vector<16x128xf32>
    %cst_198 = arith.constant 0.000000e+00 : f32
    %517 = vector.broadcast %cst_198 : f32 to vector<16x128xf32>
    %518 = arith.maximumf %516, %517 : vector<16x128xf32>
    %c2_199 = arith.constant 2 : index
    %c0_200 = arith.constant 0 : index
    %c0_201 = arith.constant 0 : index
    %519 = vector.load %arg16[%c2_199, %c0_200, %c0_201] : memref<6x128x32xbf16, #tpu.memory_space<vmem>>, vector<1x128x32xbf16>
    %520 = vector.shape_cast %519 : vector<1x128x32xbf16> to vector<128x32xbf16>
    %521 = arith.truncf %518 : vector<16x128xf32> to vector<16x128xbf16>
    %cst_202 = arith.constant dense<0.000000e+00> : vector<16x32xf32>
    %522 = tpu.matmul %521, %520, %cst_202 {dimension_numbers = #tpu.dot_dimension_numbers<[1], [0], [0], [1], [0, 0, 1, 1], [], []>} : vector<16x128xbf16>, vector<128x32xbf16>, vector<16x32xf32> -> vector<16x32xf32>
    %523 = vector.broadcast %449 : vector<1x32xf32> to vector<16x32xf32>
    %524 = arith.addf %522, %523 : vector<16x32xf32>
    %525 = vector.broadcast %84 : vector<16x1xf32> to vector<16x32xf32>
    %526 = arith.mulf %524, %525 : vector<16x32xf32>
    %527 = arith.addf %510, %526 : vector<16x32xf32>
    %cst_203 = arith.constant dense<0.000000e+00> : vector<16xf32>
    %528 = vector.multi_reduction <add>, %527, %cst_203 [1] : vector<16x32xf32> to vector<16xf32>
    %529 = vector.shape_cast %528 : vector<16xf32> to vector<16x1xf32>
    %cst_204 = arith.constant 3.200000e+01 : f32
    %530 = vector.broadcast %cst_204 : f32 to vector<16x1xf32>
    %531 = arith.divf %529, %530 : vector<16x1xf32>
    %532 = vector.broadcast %531 : vector<16x1xf32> to vector<16x32xf32>
    %533 = arith.subf %527, %532 : vector<16x32xf32>
    %534 = arith.mulf %533, %533 : vector<16x32xf32>
    %cst_205 = arith.constant dense<0.000000e+00> : vector<16xf32>
    %535 = vector.multi_reduction <add>, %534, %cst_205 [1] : vector<16x32xf32> to vector<16xf32>
    %536 = vector.shape_cast %535 : vector<16xf32> to vector<16x1xf32>
    %cst_206 = arith.constant 3.200000e+01 : f32
    %537 = vector.broadcast %cst_206 : f32 to vector<16x1xf32>
    %538 = arith.divf %536, %537 : vector<16x1xf32>
    %539 = vector.broadcast %531 : vector<16x1xf32> to vector<16x32xf32>
    %540 = arith.subf %527, %539 : vector<16x32xf32>
    %cst_207 = arith.constant 9.99999974E-6 : f32
    %541 = vector.broadcast %cst_207 : f32 to vector<16x1xf32>
    %542 = arith.addf %538, %541 : vector<16x1xf32>
    %543 = math.rsqrt %542 : vector<16x1xf32>
    %544 = vector.broadcast %543 : vector<16x1xf32> to vector<16x32xf32>
    %545 = arith.mulf %540, %544 : vector<16x32xf32>
    %546 = vector.broadcast %452 : vector<1x32xf32> to vector<16x32xf32>
    %547 = arith.mulf %545, %546 : vector<16x32xf32>
    %548 = vector.broadcast %453 : vector<1x32xf32> to vector<16x32xf32>
    %549 = arith.addf %547, %548 : vector<16x32xf32>
    %550 = vector.extract_strided_slice %85 {offsets = [0, 0], sizes = [1, 32], strides = [1, 1]} : vector<2x32xf32> to vector<1x32xf32>
    %551 = vector.extract_strided_slice %85 {offsets = [1, 0], sizes = [1, 32], strides = [1, 1]} : vector<2x32xf32> to vector<1x32xf32>
    %cst_208 = arith.constant dense<0.000000e+00> : vector<16xf32>
    %552 = vector.multi_reduction <add>, %549, %cst_208 [1] : vector<16x32xf32> to vector<16xf32>
    %553 = vector.shape_cast %552 : vector<16xf32> to vector<16x1xf32>
    %cst_209 = arith.constant 3.200000e+01 : f32
    %554 = vector.broadcast %cst_209 : f32 to vector<16x1xf32>
    %555 = arith.divf %553, %554 : vector<16x1xf32>
    %556 = vector.broadcast %555 : vector<16x1xf32> to vector<16x32xf32>
    %557 = arith.subf %549, %556 : vector<16x32xf32>
    %558 = arith.mulf %557, %557 : vector<16x32xf32>
    %cst_210 = arith.constant dense<0.000000e+00> : vector<16xf32>
    %559 = vector.multi_reduction <add>, %558, %cst_210 [1] : vector<16x32xf32> to vector<16xf32>
    %560 = vector.shape_cast %559 : vector<16xf32> to vector<16x1xf32>
    %cst_211 = arith.constant 3.200000e+01 : f32
    %561 = vector.broadcast %cst_211 : f32 to vector<16x1xf32>
    %562 = arith.divf %560, %561 : vector<16x1xf32>
    %563 = vector.broadcast %555 : vector<16x1xf32> to vector<16x32xf32>
    %564 = arith.subf %549, %563 : vector<16x32xf32>
    %cst_212 = arith.constant 9.99999974E-6 : f32
    %565 = vector.broadcast %cst_212 : f32 to vector<16x1xf32>
    %566 = arith.addf %562, %565 : vector<16x1xf32>
    %567 = math.rsqrt %566 : vector<16x1xf32>
    %568 = vector.broadcast %567 : vector<16x1xf32> to vector<16x32xf32>
    %569 = arith.mulf %564, %568 : vector<16x32xf32>
    %570 = vector.broadcast %550 : vector<1x32xf32> to vector<16x32xf32>
    %571 = arith.mulf %569, %570 : vector<16x32xf32>
    %572 = vector.broadcast %551 : vector<1x32xf32> to vector<16x32xf32>
    %573 = arith.addf %571, %572 : vector<16x32xf32>
    %c2_213 = arith.constant 2 : index
    %c0_214 = arith.constant 0 : index
    %c0_215 = arith.constant 0 : index
    %574 = vector.load %arg19[%c2_213, %c0_214, %c0_215] : memref<6x32x66xbf16, #tpu.memory_space<vmem>>, vector<1x32x66xbf16>
    %575 = vector.shape_cast %574 : vector<1x32x66xbf16> to vector<32x66xbf16>
    %c2_216 = arith.constant 2 : index
    %c0_217 = arith.constant 0 : index
    %c0_218 = arith.constant 0 : index
    %576 = vector.load %arg20[%c2_216, %c0_217, %c0_218] : memref<6x64x68xbf16, #tpu.memory_space<vmem>>, vector<1x64x68xbf16>
    %577 = vector.shape_cast %576 : vector<1x64x68xbf16> to vector<64x68xbf16>
    %c2_219 = arith.constant 2 : index
    %c0_220 = arith.constant 0 : index
    %c0_221 = arith.constant 0 : index
    %578 = vector.load %arg21[%c2_219, %c0_220, %c0_221] : memref<6x3x66xf32, #tpu.memory_space<vmem>>, vector<1x3x66xf32>
    %579 = vector.shape_cast %578 : vector<1x3x66xf32> to vector<3x66xf32>
    %580 = vector.extract_strided_slice %579 {offsets = [0, 0], sizes = [1, 66], strides = [1, 1]} : vector<3x66xf32> to vector<1x66xf32>
    %581 = arith.truncf %573 : vector<16x32xf32> to vector<16x32xbf16>
    %cst_222 = arith.constant dense<0.000000e+00> : vector<16x66xf32>
    %582 = tpu.matmul %581, %575, %cst_222 {dimension_numbers = #tpu.dot_dimension_numbers<[1], [0], [0], [1], [0, 0, 1, 1], [], []>} : vector<16x32xbf16>, vector<32x66xbf16>, vector<16x66xf32> -> vector<16x66xf32>
    %583 = vector.broadcast %580 : vector<1x66xf32> to vector<16x66xf32>
    %584 = arith.addf %582, %583 : vector<16x66xf32>
    %585 = vector.extract_strided_slice %584 {offsets = [0, 0], sizes = [16, 64], strides = [1, 1]} : vector<16x66xf32> to vector<16x64xf32>
    %cst_223 = arith.constant 0.000000e+00 : f32
    %586 = vector.broadcast %cst_223 : f32 to vector<16x64xf32>
    %587 = arith.maximumf %585, %586 : vector<16x64xf32>
    %588 = vector.extract_strided_slice %584 {offsets = [0, 64], sizes = [16, 2], strides = [1, 1]} : vector<16x66xf32> to vector<16x2xf32>
    %589 = vector.extract_strided_slice %577 {offsets = [0, 0], sizes = [64, 64], strides = [1, 1]} : vector<64x68xbf16> to vector<64x64xbf16>
    %590 = vector.extract_strided_slice %579 {offsets = [1, 0], sizes = [1, 64], strides = [1, 1]} : vector<3x66xf32> to vector<1x64xf32>
    %591 = arith.truncf %587 : vector<16x64xf32> to vector<16x64xbf16>
    %cst_224 = arith.constant dense<0.000000e+00> : vector<16x64xf32>
    %592 = tpu.matmul %591, %589, %cst_224 {dimension_numbers = #tpu.dot_dimension_numbers<[1], [0], [0], [1], [0, 0, 1, 1], [], []>} : vector<16x64xbf16>, vector<64x64xbf16>, vector<16x64xf32> -> vector<16x64xf32>
    %593 = vector.broadcast %590 : vector<1x64xf32> to vector<16x64xf32>
    %594 = arith.addf %592, %593 : vector<16x64xf32>
    %cst_225 = arith.constant 0.000000e+00 : f32
    %595 = vector.broadcast %cst_225 : f32 to vector<16x64xf32>
    %596 = arith.maximumf %594, %595 : vector<16x64xf32>
    %597 = vector.extract_strided_slice %577 {offsets = [0, 64], sizes = [64, 4], strides = [1, 1]} : vector<64x68xbf16> to vector<64x4xbf16>
    %598 = vector.extract_strided_slice %579 {offsets = [2, 0], sizes = [1, 4], strides = [1, 1]} : vector<3x66xf32> to vector<1x4xf32>
    %599 = arith.truncf %596 : vector<16x64xf32> to vector<16x64xbf16>
    %cst_226 = arith.constant dense<0.000000e+00> : vector<16x4xf32>
    %600 = tpu.matmul %599, %597, %cst_226 {dimension_numbers = #tpu.dot_dimension_numbers<[1], [0], [0], [1], [0, 0, 1, 1], [], []>} : vector<16x64xbf16>, vector<64x4xbf16>, vector<16x4xf32> -> vector<16x4xf32>
    %601 = vector.broadcast %598 : vector<1x4xf32> to vector<16x4xf32>
    %602 = arith.addf %600, %601 : vector<16x4xf32>
    %603 = tpu.concatenate %588, %602 in 1 : vector<16x2xf32>, vector<16x4xf32> -> vector<16x6xf32>
    %604 = tpu.iota {dimensions = array<i32: 1>} : vector<16x6xi32>
    %c2_i32_227 = arith.constant 2 : i32
    %605 = vector.broadcast %c2_i32_227 : i32 to vector<16x6xi32>
    %606 = arith.cmpi slt, %604, %605 : vector<16x6xi32>
    %c5_i32_228 = arith.constant 5 : i32
    %607 = vector.broadcast %c5_i32_228 : i32 to vector<16x6xi32>
    %608 = arith.cmpi slt, %604, %607 : vector<16x6xi32>
    %609 = math.tanh %603 : vector<16x6xf32>
    %610 = arith.negf %603 : vector<16x6xf32>
    %611 = math.exp %610 : vector<16x6xf32>
    %cst_229 = arith.constant 1.000000e+00 : f32
    %612 = vector.broadcast %cst_229 : f32 to vector<16x6xf32>
    %613 = arith.addf %612, %611 : vector<16x6xf32>
    %614 = arith.divf %612, %613 : vector<16x6xf32>
    %615 = arith.select %608, %609, %614 : vector<16x6xi1>, vector<16x6xf32>
    %616 = arith.select %606, %603, %615 : vector<16x6xi1>, vector<16x6xf32>
    %617 = tpu.concatenate %616, %86 in 1 : vector<16x6xf32>, vector<16x122xf32> -> vector<16x128xf32>
    %c2_230 = arith.constant 2 : index
    %c0_231 = arith.constant 0 : index
    %c0_232 = arith.constant 0 : index
    %618 = vector.load %arg22[%c2_230, %c0_231, %c0_232] : memref<6x16x128xf32, #tpu.memory_space<vmem>>, vector<1x16x128xf32>
    %619 = vector.shape_cast %618 : vector<1x16x128xf32> to vector<16x128xf32>
    %620 = vector.shape_cast %617 : vector<16x128xf32> to vector<1x16x128xf32>
    tpu.vector_store %arg22[%c2_230, %c0_231, %c0_232], %620 {strides = array<i32>} : memref<6x16x128xf32, #tpu.memory_space<vmem>>, vector<1x16x128xf32>,
    %c3 = arith.constant 3 : index
    %c0_233 = arith.constant 0 : index
    %c0_234 = arith.constant 0 : index
    %621 = vector.load %arg12[%c3, %c0_233, %c0_234] : memref<6x32x64xbf16, #tpu.memory_space<vmem>>, vector<1x32x64xbf16>
    %622 = vector.shape_cast %621 : vector<1x32x64xbf16> to vector<32x64xbf16>
    %c3_235 = arith.constant 3 : index
    %c0_236 = arith.constant 0 : index
    %c0_237 = arith.constant 0 : index
    %623 = vector.load %arg17[%c3_235, %c0_236, %c0_237] : memref<6x8x128xf32, #tpu.memory_space<vmem>>, vector<1x8x128xf32>
    %624 = vector.shape_cast %623 : vector<1x8x128xf32> to vector<8x128xf32>
    %625 = vector.extract_strided_slice %624 {offsets = [0, 0], sizes = [1, 32], strides = [1, 1]} : vector<8x128xf32> to vector<1x32xf32>
    %626 = vector.extract_strided_slice %624 {offsets = [1, 0], sizes = [1, 32], strides = [1, 1]} : vector<8x128xf32> to vector<1x32xf32>
    %627 = vector.extract_strided_slice %624 {offsets = [2, 0], sizes = [1, 32], strides = [1, 1]} : vector<8x128xf32> to vector<1x32xf32>
    %628 = vector.extract_strided_slice %624 {offsets = [3, 0], sizes = [1, 32], strides = [1, 1]} : vector<8x128xf32> to vector<1x32xf32>
    %629 = vector.extract_strided_slice %624 {offsets = [4, 0], sizes = [1, 32], strides = [1, 1]} : vector<8x128xf32> to vector<1x32xf32>
    %630 = vector.extract_strided_slice %624 {offsets = [5, 0], sizes = [1, 32], strides = [1, 1]} : vector<8x128xf32> to vector<1x32xf32>
    %631 = vector.extract_strided_slice %624 {offsets = [6, 0], sizes = [1, 32], strides = [1, 1]} : vector<8x128xf32> to vector<1x32xf32>
    %632 = vector.extract_strided_slice %624 {offsets = [7, 0], sizes = [1, 128], strides = [1, 1]} : vector<8x128xf32> to vector<1x128xf32>
    %633 = vector.extract_strided_slice %23 {offsets = [0, 0, 96], sizes = [2, 64, 32], strides = [1, 1, 1]} : vector<2x64x192xbf16> to vector<2x64x32xbf16>
    %634 = vector.extract_strided_slice %33 {offsets = [0, 0, 96], sizes = [2, 64, 32], strides = [1, 1, 1]} : vector<2x64x192xbf16> to vector<2x64x32xbf16>
    %635 = arith.addf %549, %81 : vector<16x32xf32>
    %636 = vector.extract_strided_slice %622 {offsets = [0, 0], sizes = [32, 32], strides = [1, 1]} : vector<32x64xbf16> to vector<32x32xbf16>
    %637 = arith.truncf %635 : vector<16x32xf32> to vector<16x32xbf16>
    %cst_238 = arith.constant dense<0.000000e+00> : vector<16x32xf32>
    %638 = tpu.matmul %637, %636, %cst_238 {dimension_numbers = #tpu.dot_dimension_numbers<[1], [0], [0], [1], [0, 0, 1, 1], [], []>} : vector<16x32xbf16>, vector<32x32xbf16>, vector<16x32xf32> -> vector<16x32xf32>
    %639 = vector.broadcast %625 : vector<1x32xf32> to vector<16x32xf32>
    %640 = arith.addf %638, %639 : vector<16x32xf32>
    %641 = vector.shape_cast %640 : vector<16x32xf32> to vector<2x8x32xf32>
    %642 = arith.truncf %641 : vector<2x8x32xf32> to vector<2x8x32xbf16>
    "tpu.trace_start"() <{level = 10 : i32, message = "bqh,bsh->bqs"}> : () -> ()
    %cst_239 = arith.constant dense<0.000000e+00> : vector<2x8x64xf32>
    %643 = tpu.matmul %642, %633, %cst_239 {dimension_numbers = #tpu.dot_dimension_numbers<[2], [2], [1], [1], [0, 0, 0, 1, 1, 1], [0], [0]>} : vector<2x8x32xbf16>, vector<2x64x32xbf16>, vector<2x8x64xf32> -> vector<2x8x64xf32>
    "tpu.trace_stop"() : () -> ()
    %cst_240 = arith.constant 0.176776692 : f32
    %644 = vector.broadcast %cst_240 : f32 to vector<2x8x64xf32>
    %645 = arith.mulf %643, %644 : vector<2x8x64xf32>
    %cst_241 = arith.constant dense<0xFF800000> : vector<2x8xf32>
    %646 = vector.multi_reduction <maximumf>, %645, %cst_241 [2] : vector<2x8x64xf32> to vector<2x8xf32>
    %647 = vector.shape_cast %646 : vector<2x8xf32> to vector<2x8x1xf32>
    %648 = vector.broadcast %647 : vector<2x8x1xf32> to vector<2x8x64xf32>
    %649 = arith.subf %645, %648 : vector<2x8x64xf32>
    %650 = math.exp %649 : vector<2x8x64xf32>
    %cst_242 = arith.constant dense<0.000000e+00> : vector<2x8xf32>
    %651 = vector.multi_reduction <add>, %650, %cst_242 [2] : vector<2x8x64xf32> to vector<2x8xf32>
    %652 = vector.shape_cast %651 : vector<2x8xf32> to vector<2x8x1xf32>
    %653 = tpu.reciprocal %652 {approx = true} : vector<2x8x1xf32> -> vector<2x8x1xf32>
    %654 = vector.broadcast %653 : vector<2x8x1xf32> to vector<2x8x64xf32>
    %655 = arith.mulf %650, %654 : vector<2x8x64xf32>
    %656 = arith.truncf %655 : vector<2x8x64xf32> to vector<2x8x64xbf16>
    "tpu.trace_start"() <{level = 10 : i32, message = "bqs,bsh->bqh"}> : () -> ()
    %cst_243 = arith.constant dense<0.000000e+00> : vector<2x8x32xf32>
    %657 = tpu.matmul %656, %634, %cst_243 {dimension_numbers = #tpu.dot_dimension_numbers<[2], [1], [1], [2], [0, 0, 0, 1, 1, 2], [0], [0]>} : vector<2x8x64xbf16>, vector<2x64x32xbf16>, vector<2x8x32xf32> -> vector<2x8x32xf32>
    "tpu.trace_stop"() : () -> ()
    %658 = vector.shape_cast %657 : vector<2x8x32xf32> to vector<16x32xf32>
    %659 = vector.extract_strided_slice %622 {offsets = [0, 32], sizes = [32, 32], strides = [1, 1]} : vector<32x64xbf16> to vector<32x32xbf16>
    %660 = arith.truncf %658 : vector<16x32xf32> to vector<16x32xbf16>
    %cst_244 = arith.constant dense<0.000000e+00> : vector<16x32xf32>
    %661 = tpu.matmul %660, %659, %cst_244 {dimension_numbers = #tpu.dot_dimension_numbers<[1], [0], [0], [1], [0, 0, 1, 1], [], []>} : vector<16x32xbf16>, vector<32x32xbf16>, vector<16x32xf32> -> vector<16x32xf32>
    %662 = vector.broadcast %626 : vector<1x32xf32> to vector<16x32xf32>
    %663 = arith.addf %661, %662 : vector<16x32xf32>
    %664 = vector.broadcast %84 : vector<16x1xf32> to vector<16x32xf32>
    %665 = arith.mulf %663, %664 : vector<16x32xf32>
    %666 = arith.addf %549, %665 : vector<16x32xf32>
    %cst_245 = arith.constant dense<0.000000e+00> : vector<16xf32>
    %667 = vector.multi_reduction <add>, %666, %cst_245 [1] : vector<16x32xf32> to vector<16xf32>
    %668 = vector.shape_cast %667 : vector<16xf32> to vector<16x1xf32>
    %cst_246 = arith.constant 3.200000e+01 : f32
    %669 = vector.broadcast %cst_246 : f32 to vector<16x1xf32>
    %670 = arith.divf %668, %669 : vector<16x1xf32>
    %671 = vector.broadcast %670 : vector<16x1xf32> to vector<16x32xf32>
    %672 = arith.subf %666, %671 : vector<16x32xf32>
    %673 = arith.mulf %672, %672 : vector<16x32xf32>
    %cst_247 = arith.constant dense<0.000000e+00> : vector<16xf32>
    %674 = vector.multi_reduction <add>, %673, %cst_247 [1] : vector<16x32xf32> to vector<16xf32>
    %675 = vector.shape_cast %674 : vector<16xf32> to vector<16x1xf32>
    %cst_248 = arith.constant 3.200000e+01 : f32
    %676 = vector.broadcast %cst_248 : f32 to vector<16x1xf32>
    %677 = arith.divf %675, %676 : vector<16x1xf32>
    %678 = vector.broadcast %670 : vector<16x1xf32> to vector<16x32xf32>
    %679 = arith.subf %666, %678 : vector<16x32xf32>
    %cst_249 = arith.constant 9.99999974E-6 : f32
    %680 = vector.broadcast %cst_249 : f32 to vector<16x1xf32>
    %681 = arith.addf %677, %680 : vector<16x1xf32>
    %682 = math.rsqrt %681 : vector<16x1xf32>
    %683 = vector.broadcast %682 : vector<16x1xf32> to vector<16x32xf32>
    %684 = arith.mulf %679, %683 : vector<16x32xf32>
    %685 = vector.broadcast %628 : vector<1x32xf32> to vector<16x32xf32>
    %686 = arith.mulf %684, %685 : vector<16x32xf32>
    %687 = vector.broadcast %629 : vector<1x32xf32> to vector<16x32xf32>
    %688 = arith.addf %686, %687 : vector<16x32xf32>
    %c3_250 = arith.constant 3 : index
    %c0_251 = arith.constant 0 : index
    %c0_252 = arith.constant 0 : index
    %689 = vector.load %arg15[%c3_250, %c0_251, %c0_252] : memref<6x32x128xbf16, #tpu.memory_space<vmem>>, vector<1x32x128xbf16>
    %690 = vector.shape_cast %689 : vector<1x32x128xbf16> to vector<32x128xbf16>
    %691 = arith.truncf %688 : vector<16x32xf32> to vector<16x32xbf16>
    %cst_253 = arith.constant dense<0.000000e+00> : vector<16x128xf32>
    %692 = tpu.matmul %691, %690, %cst_253 {dimension_numbers = #tpu.dot_dimension_numbers<[1], [0], [0], [1], [0, 0, 1, 1], [], []>} : vector<16x32xbf16>, vector<32x128xbf16>, vector<16x128xf32> -> vector<16x128xf32>
    %693 = vector.broadcast %632 : vector<1x128xf32> to vector<16x128xf32>
    %694 = arith.addf %692, %693 : vector<16x128xf32>
    %cst_254 = arith.constant 0.000000e+00 : f32
    %695 = vector.broadcast %cst_254 : f32 to vector<16x128xf32>
    %696 = arith.maximumf %694, %695 : vector<16x128xf32>
    %c3_255 = arith.constant 3 : index
    %c0_256 = arith.constant 0 : index
    %c0_257 = arith.constant 0 : index
    %697 = vector.load %arg16[%c3_255, %c0_256, %c0_257] : memref<6x128x32xbf16, #tpu.memory_space<vmem>>, vector<1x128x32xbf16>
    %698 = vector.shape_cast %697 : vector<1x128x32xbf16> to vector<128x32xbf16>
    %699 = arith.truncf %696 : vector<16x128xf32> to vector<16x128xbf16>
    %cst_258 = arith.constant dense<0.000000e+00> : vector<16x32xf32>
    %700 = tpu.matmul %699, %698, %cst_258 {dimension_numbers = #tpu.dot_dimension_numbers<[1], [0], [0], [1], [0, 0, 1, 1], [], []>} : vector<16x128xbf16>, vector<128x32xbf16>, vector<16x32xf32> -> vector<16x32xf32>
    %701 = vector.broadcast %627 : vector<1x32xf32> to vector<16x32xf32>
    %702 = arith.addf %700, %701 : vector<16x32xf32>
    %703 = vector.broadcast %84 : vector<16x1xf32> to vector<16x32xf32>
    %704 = arith.mulf %702, %703 : vector<16x32xf32>
    %705 = arith.addf %688, %704 : vector<16x32xf32>
    %cst_259 = arith.constant dense<0.000000e+00> : vector<16xf32>
    %706 = vector.multi_reduction <add>, %705, %cst_259 [1] : vector<16x32xf32> to vector<16xf32>
    %707 = vector.shape_cast %706 : vector<16xf32> to vector<16x1xf32>
    %cst_260 = arith.constant 3.200000e+01 : f32
    %708 = vector.broadcast %cst_260 : f32 to vector<16x1xf32>
    %709 = arith.divf %707, %708 : vector<16x1xf32>
    %710 = vector.broadcast %709 : vector<16x1xf32> to vector<16x32xf32>
    %711 = arith.subf %705, %710 : vector<16x32xf32>
    %712 = arith.mulf %711, %711 : vector<16x32xf32>
    %cst_261 = arith.constant dense<0.000000e+00> : vector<16xf32>
    %713 = vector.multi_reduction <add>, %712, %cst_261 [1] : vector<16x32xf32> to vector<16xf32>
    %714 = vector.shape_cast %713 : vector<16xf32> to vector<16x1xf32>
    %cst_262 = arith.constant 3.200000e+01 : f32
    %715 = vector.broadcast %cst_262 : f32 to vector<16x1xf32>
    %716 = arith.divf %714, %715 : vector<16x1xf32>
    %717 = vector.broadcast %709 : vector<16x1xf32> to vector<16x32xf32>
    %718 = arith.subf %705, %717 : vector<16x32xf32>
    %cst_263 = arith.constant 9.99999974E-6 : f32
    %719 = vector.broadcast %cst_263 : f32 to vector<16x1xf32>
    %720 = arith.addf %716, %719 : vector<16x1xf32>
    %721 = math.rsqrt %720 : vector<16x1xf32>
    %722 = vector.broadcast %721 : vector<16x1xf32> to vector<16x32xf32>
    %723 = arith.mulf %718, %722 : vector<16x32xf32>
    %724 = vector.broadcast %630 : vector<1x32xf32> to vector<16x32xf32>
    %725 = arith.mulf %723, %724 : vector<16x32xf32>
    %726 = vector.broadcast %631 : vector<1x32xf32> to vector<16x32xf32>
    %727 = arith.addf %725, %726 : vector<16x32xf32>
    %728 = vector.extract_strided_slice %85 {offsets = [0, 0], sizes = [1, 32], strides = [1, 1]} : vector<2x32xf32> to vector<1x32xf32>
    %729 = vector.extract_strided_slice %85 {offsets = [1, 0], sizes = [1, 32], strides = [1, 1]} : vector<2x32xf32> to vector<1x32xf32>
    %cst_264 = arith.constant dense<0.000000e+00> : vector<16xf32>
    %730 = vector.multi_reduction <add>, %727, %cst_264 [1] : vector<16x32xf32> to vector<16xf32>
    %731 = vector.shape_cast %730 : vector<16xf32> to vector<16x1xf32>
    %cst_265 = arith.constant 3.200000e+01 : f32
    %732 = vector.broadcast %cst_265 : f32 to vector<16x1xf32>
    %733 = arith.divf %731, %732 : vector<16x1xf32>
    %734 = vector.broadcast %733 : vector<16x1xf32> to vector<16x32xf32>
    %735 = arith.subf %727, %734 : vector<16x32xf32>
    %736 = arith.mulf %735, %735 : vector<16x32xf32>
    %cst_266 = arith.constant dense<0.000000e+00> : vector<16xf32>
    %737 = vector.multi_reduction <add>, %736, %cst_266 [1] : vector<16x32xf32> to vector<16xf32>
    %738 = vector.shape_cast %737 : vector<16xf32> to vector<16x1xf32>
    %cst_267 = arith.constant 3.200000e+01 : f32
    %739 = vector.broadcast %cst_267 : f32 to vector<16x1xf32>
    %740 = arith.divf %738, %739 : vector<16x1xf32>
    %741 = vector.broadcast %733 : vector<16x1xf32> to vector<16x32xf32>
    %742 = arith.subf %727, %741 : vector<16x32xf32>
    %cst_268 = arith.constant 9.99999974E-6 : f32
    %743 = vector.broadcast %cst_268 : f32 to vector<16x1xf32>
    %744 = arith.addf %740, %743 : vector<16x1xf32>
    %745 = math.rsqrt %744 : vector<16x1xf32>
    %746 = vector.broadcast %745 : vector<16x1xf32> to vector<16x32xf32>
    %747 = arith.mulf %742, %746 : vector<16x32xf32>
    %748 = vector.broadcast %728 : vector<1x32xf32> to vector<16x32xf32>
    %749 = arith.mulf %747, %748 : vector<16x32xf32>
    %750 = vector.broadcast %729 : vector<1x32xf32> to vector<16x32xf32>
    %751 = arith.addf %749, %750 : vector<16x32xf32>
    %c3_269 = arith.constant 3 : index
    %c0_270 = arith.constant 0 : index
    %c0_271 = arith.constant 0 : index
    %752 = vector.load %arg19[%c3_269, %c0_270, %c0_271] : memref<6x32x66xbf16, #tpu.memory_space<vmem>>, vector<1x32x66xbf16>
    %753 = vector.shape_cast %752 : vector<1x32x66xbf16> to vector<32x66xbf16>
    %c3_272 = arith.constant 3 : index
    %c0_273 = arith.constant 0 : index
    %c0_274 = arith.constant 0 : index
    %754 = vector.load %arg20[%c3_272, %c0_273, %c0_274] : memref<6x64x68xbf16, #tpu.memory_space<vmem>>, vector<1x64x68xbf16>
    %755 = vector.shape_cast %754 : vector<1x64x68xbf16> to vector<64x68xbf16>
    %c3_275 = arith.constant 3 : index
    %c0_276 = arith.constant 0 : index
    %c0_277 = arith.constant 0 : index
    %756 = vector.load %arg21[%c3_275, %c0_276, %c0_277] : memref<6x3x66xf32, #tpu.memory_space<vmem>>, vector<1x3x66xf32>
    %757 = vector.shape_cast %756 : vector<1x3x66xf32> to vector<3x66xf32>
    %758 = vector.extract_strided_slice %757 {offsets = [0, 0], sizes = [1, 66], strides = [1, 1]} : vector<3x66xf32> to vector<1x66xf32>
    %759 = arith.truncf %751 : vector<16x32xf32> to vector<16x32xbf16>
    %cst_278 = arith.constant dense<0.000000e+00> : vector<16x66xf32>
    %760 = tpu.matmul %759, %753, %cst_278 {dimension_numbers = #tpu.dot_dimension_numbers<[1], [0], [0], [1], [0, 0, 1, 1], [], []>} : vector<16x32xbf16>, vector<32x66xbf16>, vector<16x66xf32> -> vector<16x66xf32>
    %761 = vector.broadcast %758 : vector<1x66xf32> to vector<16x66xf32>
    %762 = arith.addf %760, %761 : vector<16x66xf32>
    %763 = vector.extract_strided_slice %762 {offsets = [0, 0], sizes = [16, 64], strides = [1, 1]} : vector<16x66xf32> to vector<16x64xf32>
    %cst_279 = arith.constant 0.000000e+00 : f32
    %764 = vector.broadcast %cst_279 : f32 to vector<16x64xf32>
    %765 = arith.maximumf %763, %764 : vector<16x64xf32>
    %766 = vector.extract_strided_slice %762 {offsets = [0, 64], sizes = [16, 2], strides = [1, 1]} : vector<16x66xf32> to vector<16x2xf32>
    %767 = vector.extract_strided_slice %755 {offsets = [0, 0], sizes = [64, 64], strides = [1, 1]} : vector<64x68xbf16> to vector<64x64xbf16>
    %768 = vector.extract_strided_slice %757 {offsets = [1, 0], sizes = [1, 64], strides = [1, 1]} : vector<3x66xf32> to vector<1x64xf32>
    %769 = arith.truncf %765 : vector<16x64xf32> to vector<16x64xbf16>
    %cst_280 = arith.constant dense<0.000000e+00> : vector<16x64xf32>
    %770 = tpu.matmul %769, %767, %cst_280 {dimension_numbers = #tpu.dot_dimension_numbers<[1], [0], [0], [1], [0, 0, 1, 1], [], []>} : vector<16x64xbf16>, vector<64x64xbf16>, vector<16x64xf32> -> vector<16x64xf32>
    %771 = vector.broadcast %768 : vector<1x64xf32> to vector<16x64xf32>
    %772 = arith.addf %770, %771 : vector<16x64xf32>
    %cst_281 = arith.constant 0.000000e+00 : f32
    %773 = vector.broadcast %cst_281 : f32 to vector<16x64xf32>
    %774 = arith.maximumf %772, %773 : vector<16x64xf32>
    %775 = vector.extract_strided_slice %755 {offsets = [0, 64], sizes = [64, 4], strides = [1, 1]} : vector<64x68xbf16> to vector<64x4xbf16>
    %776 = vector.extract_strided_slice %757 {offsets = [2, 0], sizes = [1, 4], strides = [1, 1]} : vector<3x66xf32> to vector<1x4xf32>
    %777 = arith.truncf %774 : vector<16x64xf32> to vector<16x64xbf16>
    %cst_282 = arith.constant dense<0.000000e+00> : vector<16x4xf32>
    %778 = tpu.matmul %777, %775, %cst_282 {dimension_numbers = #tpu.dot_dimension_numbers<[1], [0], [0], [1], [0, 0, 1, 1], [], []>} : vector<16x64xbf16>, vector<64x4xbf16>, vector<16x4xf32> -> vector<16x4xf32>
    %779 = vector.broadcast %776 : vector<1x4xf32> to vector<16x4xf32>
    %780 = arith.addf %778, %779 : vector<16x4xf32>
    %781 = tpu.concatenate %766, %780 in 1 : vector<16x2xf32>, vector<16x4xf32> -> vector<16x6xf32>
    %782 = tpu.iota {dimensions = array<i32: 1>} : vector<16x6xi32>
    %c2_i32_283 = arith.constant 2 : i32
    %783 = vector.broadcast %c2_i32_283 : i32 to vector<16x6xi32>
    %784 = arith.cmpi slt, %782, %783 : vector<16x6xi32>
    %c5_i32_284 = arith.constant 5 : i32
    %785 = vector.broadcast %c5_i32_284 : i32 to vector<16x6xi32>
    %786 = arith.cmpi slt, %782, %785 : vector<16x6xi32>
    %787 = math.tanh %781 : vector<16x6xf32>
    %788 = arith.negf %781 : vector<16x6xf32>
    %789 = math.exp %788 : vector<16x6xf32>
    %cst_285 = arith.constant 1.000000e+00 : f32
    %790 = vector.broadcast %cst_285 : f32 to vector<16x6xf32>
    %791 = arith.addf %790, %789 : vector<16x6xf32>
    %792 = arith.divf %790, %791 : vector<16x6xf32>
    %793 = arith.select %786, %787, %792 : vector<16x6xi1>, vector<16x6xf32>
    %794 = arith.select %784, %781, %793 : vector<16x6xi1>, vector<16x6xf32>
    %795 = tpu.concatenate %794, %86 in 1 : vector<16x6xf32>, vector<16x122xf32> -> vector<16x128xf32>
    %c3_286 = arith.constant 3 : index
    %c0_287 = arith.constant 0 : index
    %c0_288 = arith.constant 0 : index
    %796 = vector.load %arg22[%c3_286, %c0_287, %c0_288] : memref<6x16x128xf32, #tpu.memory_space<vmem>>, vector<1x16x128xf32>
    %797 = vector.shape_cast %796 : vector<1x16x128xf32> to vector<16x128xf32>
    %798 = vector.shape_cast %795 : vector<16x128xf32> to vector<1x16x128xf32>
    tpu.vector_store %arg22[%c3_286, %c0_287, %c0_288], %798 {strides = array<i32>} : memref<6x16x128xf32, #tpu.memory_space<vmem>>, vector<1x16x128xf32>,
    %c4_289 = arith.constant 4 : index
    %c0_290 = arith.constant 0 : index
    %c0_291 = arith.constant 0 : index
    %799 = vector.load %arg12[%c4_289, %c0_290, %c0_291] : memref<6x32x64xbf16, #tpu.memory_space<vmem>>, vector<1x32x64xbf16>
    %800 = vector.shape_cast %799 : vector<1x32x64xbf16> to vector<32x64xbf16>
    %c4_292 = arith.constant 4 : index
    %c0_293 = arith.constant 0 : index
    %c0_294 = arith.constant 0 : index
    %801 = vector.load %arg17[%c4_292, %c0_293, %c0_294] : memref<6x8x128xf32, #tpu.memory_space<vmem>>, vector<1x8x128xf32>
    %802 = vector.shape_cast %801 : vector<1x8x128xf32> to vector<8x128xf32>
    %803 = vector.extract_strided_slice %802 {offsets = [0, 0], sizes = [1, 32], strides = [1, 1]} : vector<8x128xf32> to vector<1x32xf32>
    %804 = vector.extract_strided_slice %802 {offsets = [1, 0], sizes = [1, 32], strides = [1, 1]} : vector<8x128xf32> to vector<1x32xf32>
    %805 = vector.extract_strided_slice %802 {offsets = [2, 0], sizes = [1, 32], strides = [1, 1]} : vector<8x128xf32> to vector<1x32xf32>
    %806 = vector.extract_strided_slice %802 {offsets = [3, 0], sizes = [1, 32], strides = [1, 1]} : vector<8x128xf32> to vector<1x32xf32>
    %807 = vector.extract_strided_slice %802 {offsets = [4, 0], sizes = [1, 32], strides = [1, 1]} : vector<8x128xf32> to vector<1x32xf32>
    %808 = vector.extract_strided_slice %802 {offsets = [5, 0], sizes = [1, 32], strides = [1, 1]} : vector<8x128xf32> to vector<1x32xf32>
    %809 = vector.extract_strided_slice %802 {offsets = [6, 0], sizes = [1, 32], strides = [1, 1]} : vector<8x128xf32> to vector<1x32xf32>
    %810 = vector.extract_strided_slice %802 {offsets = [7, 0], sizes = [1, 128], strides = [1, 1]} : vector<8x128xf32> to vector<1x128xf32>
    %811 = vector.extract_strided_slice %23 {offsets = [0, 0, 128], sizes = [2, 64, 32], strides = [1, 1, 1]} : vector<2x64x192xbf16> to vector<2x64x32xbf16>
    %812 = vector.extract_strided_slice %33 {offsets = [0, 0, 128], sizes = [2, 64, 32], strides = [1, 1, 1]} : vector<2x64x192xbf16> to vector<2x64x32xbf16>
    %813 = arith.addf %727, %81 : vector<16x32xf32>
    %814 = vector.extract_strided_slice %800 {offsets = [0, 0], sizes = [32, 32], strides = [1, 1]} : vector<32x64xbf16> to vector<32x32xbf16>
    %815 = arith.truncf %813 : vector<16x32xf32> to vector<16x32xbf16>
    %cst_295 = arith.constant dense<0.000000e+00> : vector<16x32xf32>
    %816 = tpu.matmul %815, %814, %cst_295 {dimension_numbers = #tpu.dot_dimension_numbers<[1], [0], [0], [1], [0, 0, 1, 1], [], []>} : vector<16x32xbf16>, vector<32x32xbf16>, vector<16x32xf32> -> vector<16x32xf32>
    %817 = vector.broadcast %803 : vector<1x32xf32> to vector<16x32xf32>
    %818 = arith.addf %816, %817 : vector<16x32xf32>
    %819 = vector.shape_cast %818 : vector<16x32xf32> to vector<2x8x32xf32>
    %820 = arith.truncf %819 : vector<2x8x32xf32> to vector<2x8x32xbf16>
    "tpu.trace_start"() <{level = 10 : i32, message = "bqh,bsh->bqs"}> : () -> ()
    %cst_296 = arith.constant dense<0.000000e+00> : vector<2x8x64xf32>
    %821 = tpu.matmul %820, %811, %cst_296 {dimension_numbers = #tpu.dot_dimension_numbers<[2], [2], [1], [1], [0, 0, 0, 1, 1, 1], [0], [0]>} : vector<2x8x32xbf16>, vector<2x64x32xbf16>, vector<2x8x64xf32> -> vector<2x8x64xf32>
    "tpu.trace_stop"() : () -> ()
    %cst_297 = arith.constant 0.176776692 : f32
    %822 = vector.broadcast %cst_297 : f32 to vector<2x8x64xf32>
    %823 = arith.mulf %821, %822 : vector<2x8x64xf32>
    %cst_298 = arith.constant dense<0xFF800000> : vector<2x8xf32>
    %824 = vector.multi_reduction <maximumf>, %823, %cst_298 [2] : vector<2x8x64xf32> to vector<2x8xf32>
    %825 = vector.shape_cast %824 : vector<2x8xf32> to vector<2x8x1xf32>
    %826 = vector.broadcast %825 : vector<2x8x1xf32> to vector<2x8x64xf32>
    %827 = arith.subf %823, %826 : vector<2x8x64xf32>
    %828 = math.exp %827 : vector<2x8x64xf32>
    %cst_299 = arith.constant dense<0.000000e+00> : vector<2x8xf32>
    %829 = vector.multi_reduction <add>, %828, %cst_299 [2] : vector<2x8x64xf32> to vector<2x8xf32>
    %830 = vector.shape_cast %829 : vector<2x8xf32> to vector<2x8x1xf32>
    %831 = tpu.reciprocal %830 {approx = true} : vector<2x8x1xf32> -> vector<2x8x1xf32>
    %832 = vector.broadcast %831 : vector<2x8x1xf32> to vector<2x8x64xf32>
    %833 = arith.mulf %828, %832 : vector<2x8x64xf32>
    %834 = arith.truncf %833 : vector<2x8x64xf32> to vector<2x8x64xbf16>
    "tpu.trace_start"() <{level = 10 : i32, message = "bqs,bsh->bqh"}> : () -> ()
    %cst_300 = arith.constant dense<0.000000e+00> : vector<2x8x32xf32>
    %835 = tpu.matmul %834, %812, %cst_300 {dimension_numbers = #tpu.dot_dimension_numbers<[2], [1], [1], [2], [0, 0, 0, 1, 1, 2], [0], [0]>} : vector<2x8x64xbf16>, vector<2x64x32xbf16>, vector<2x8x32xf32> -> vector<2x8x32xf32>
    "tpu.trace_stop"() : () -> ()
    %836 = vector.shape_cast %835 : vector<2x8x32xf32> to vector<16x32xf32>
    %837 = vector.extract_strided_slice %800 {offsets = [0, 32], sizes = [32, 32], strides = [1, 1]} : vector<32x64xbf16> to vector<32x32xbf16>
    %838 = arith.truncf %836 : vector<16x32xf32> to vector<16x32xbf16>
    %cst_301 = arith.constant dense<0.000000e+00> : vector<16x32xf32>
    %839 = tpu.matmul %838, %837, %cst_301 {dimension_numbers = #tpu.dot_dimension_numbers<[1], [0], [0], [1], [0, 0, 1, 1], [], []>} : vector<16x32xbf16>, vector<32x32xbf16>, vector<16x32xf32> -> vector<16x32xf32>
    %840 = vector.broadcast %804 : vector<1x32xf32> to vector<16x32xf32>
    %841 = arith.addf %839, %840 : vector<16x32xf32>
    %842 = vector.broadcast %84 : vector<16x1xf32> to vector<16x32xf32>
    %843 = arith.mulf %841, %842 : vector<16x32xf32>
    %844 = arith.addf %727, %843 : vector<16x32xf32>
    %cst_302 = arith.constant dense<0.000000e+00> : vector<16xf32>
    %845 = vector.multi_reduction <add>, %844, %cst_302 [1] : vector<16x32xf32> to vector<16xf32>
    %846 = vector.shape_cast %845 : vector<16xf32> to vector<16x1xf32>
    %cst_303 = arith.constant 3.200000e+01 : f32
    %847 = vector.broadcast %cst_303 : f32 to vector<16x1xf32>
    %848 = arith.divf %846, %847 : vector<16x1xf32>
    %849 = vector.broadcast %848 : vector<16x1xf32> to vector<16x32xf32>
    %850 = arith.subf %844, %849 : vector<16x32xf32>
    %851 = arith.mulf %850, %850 : vector<16x32xf32>
    %cst_304 = arith.constant dense<0.000000e+00> : vector<16xf32>
    %852 = vector.multi_reduction <add>, %851, %cst_304 [1] : vector<16x32xf32> to vector<16xf32>
    %853 = vector.shape_cast %852 : vector<16xf32> to vector<16x1xf32>
    %cst_305 = arith.constant 3.200000e+01 : f32
    %854 = vector.broadcast %cst_305 : f32 to vector<16x1xf32>
    %855 = arith.divf %853, %854 : vector<16x1xf32>
    %856 = vector.broadcast %848 : vector<16x1xf32> to vector<16x32xf32>
    %857 = arith.subf %844, %856 : vector<16x32xf32>
    %cst_306 = arith.constant 9.99999974E-6 : f32
    %858 = vector.broadcast %cst_306 : f32 to vector<16x1xf32>
    %859 = arith.addf %855, %858 : vector<16x1xf32>
    %860 = math.rsqrt %859 : vector<16x1xf32>
    %861 = vector.broadcast %860 : vector<16x1xf32> to vector<16x32xf32>
    %862 = arith.mulf %857, %861 : vector<16x32xf32>
    %863 = vector.broadcast %806 : vector<1x32xf32> to vector<16x32xf32>
    %864 = arith.mulf %862, %863 : vector<16x32xf32>
    %865 = vector.broadcast %807 : vector<1x32xf32> to vector<16x32xf32>
    %866 = arith.addf %864, %865 : vector<16x32xf32>
    %c4_307 = arith.constant 4 : index
    %c0_308 = arith.constant 0 : index
    %c0_309 = arith.constant 0 : index
    %867 = vector.load %arg15[%c4_307, %c0_308, %c0_309] : memref<6x32x128xbf16, #tpu.memory_space<vmem>>, vector<1x32x128xbf16>
    %868 = vector.shape_cast %867 : vector<1x32x128xbf16> to vector<32x128xbf16>
    %869 = arith.truncf %866 : vector<16x32xf32> to vector<16x32xbf16>
    %cst_310 = arith.constant dense<0.000000e+00> : vector<16x128xf32>
    %870 = tpu.matmul %869, %868, %cst_310 {dimension_numbers = #tpu.dot_dimension_numbers<[1], [0], [0], [1], [0, 0, 1, 1], [], []>} : vector<16x32xbf16>, vector<32x128xbf16>, vector<16x128xf32> -> vector<16x128xf32>
    %871 = vector.broadcast %810 : vector<1x128xf32> to vector<16x128xf32>
    %872 = arith.addf %870, %871 : vector<16x128xf32>
    %cst_311 = arith.constant 0.000000e+00 : f32
    %873 = vector.broadcast %cst_311 : f32 to vector<16x128xf32>
    %874 = arith.maximumf %872, %873 : vector<16x128xf32>
    %c4_312 = arith.constant 4 : index
    %c0_313 = arith.constant 0 : index
    %c0_314 = arith.constant 0 : index
    %875 = vector.load %arg16[%c4_312, %c0_313, %c0_314] : memref<6x128x32xbf16, #tpu.memory_space<vmem>>, vector<1x128x32xbf16>
    %876 = vector.shape_cast %875 : vector<1x128x32xbf16> to vector<128x32xbf16>
    %877 = arith.truncf %874 : vector<16x128xf32> to vector<16x128xbf16>
    %cst_315 = arith.constant dense<0.000000e+00> : vector<16x32xf32>
    %878 = tpu.matmul %877, %876, %cst_315 {dimension_numbers = #tpu.dot_dimension_numbers<[1], [0], [0], [1], [0, 0, 1, 1], [], []>} : vector<16x128xbf16>, vector<128x32xbf16>, vector<16x32xf32> -> vector<16x32xf32>
    %879 = vector.broadcast %805 : vector<1x32xf32> to vector<16x32xf32>
    %880 = arith.addf %878, %879 : vector<16x32xf32>
    %881 = vector.broadcast %84 : vector<16x1xf32> to vector<16x32xf32>
    %882 = arith.mulf %880, %881 : vector<16x32xf32>
    %883 = arith.addf %866, %882 : vector<16x32xf32>
    %cst_316 = arith.constant dense<0.000000e+00> : vector<16xf32>
    %884 = vector.multi_reduction <add>, %883, %cst_316 [1] : vector<16x32xf32> to vector<16xf32>
    %885 = vector.shape_cast %884 : vector<16xf32> to vector<16x1xf32>
    %cst_317 = arith.constant 3.200000e+01 : f32
    %886 = vector.broadcast %cst_317 : f32 to vector<16x1xf32>
    %887 = arith.divf %885, %886 : vector<16x1xf32>
    %888 = vector.broadcast %887 : vector<16x1xf32> to vector<16x32xf32>
    %889 = arith.subf %883, %888 : vector<16x32xf32>
    %890 = arith.mulf %889, %889 : vector<16x32xf32>
    %cst_318 = arith.constant dense<0.000000e+00> : vector<16xf32>
    %891 = vector.multi_reduction <add>, %890, %cst_318 [1] : vector<16x32xf32> to vector<16xf32>
    %892 = vector.shape_cast %891 : vector<16xf32> to vector<16x1xf32>
    %cst_319 = arith.constant 3.200000e+01 : f32
    %893 = vector.broadcast %cst_319 : f32 to vector<16x1xf32>
    %894 = arith.divf %892, %893 : vector<16x1xf32>
    %895 = vector.broadcast %887 : vector<16x1xf32> to vector<16x32xf32>
    %896 = arith.subf %883, %895 : vector<16x32xf32>
    %cst_320 = arith.constant 9.99999974E-6 : f32
    %897 = vector.broadcast %cst_320 : f32 to vector<16x1xf32>
    %898 = arith.addf %894, %897 : vector<16x1xf32>
    %899 = math.rsqrt %898 : vector<16x1xf32>
    %900 = vector.broadcast %899 : vector<16x1xf32> to vector<16x32xf32>
    %901 = arith.mulf %896, %900 : vector<16x32xf32>
    %902 = vector.broadcast %808 : vector<1x32xf32> to vector<16x32xf32>
    %903 = arith.mulf %901, %902 : vector<16x32xf32>
    %904 = vector.broadcast %809 : vector<1x32xf32> to vector<16x32xf32>
    %905 = arith.addf %903, %904 : vector<16x32xf32>
    %906 = vector.extract_strided_slice %85 {offsets = [0, 0], sizes = [1, 32], strides = [1, 1]} : vector<2x32xf32> to vector<1x32xf32>
    %907 = vector.extract_strided_slice %85 {offsets = [1, 0], sizes = [1, 32], strides = [1, 1]} : vector<2x32xf32> to vector<1x32xf32>
    %cst_321 = arith.constant dense<0.000000e+00> : vector<16xf32>
    %908 = vector.multi_reduction <add>, %905, %cst_321 [1] : vector<16x32xf32> to vector<16xf32>
    %909 = vector.shape_cast %908 : vector<16xf32> to vector<16x1xf32>
    %cst_322 = arith.constant 3.200000e+01 : f32
    %910 = vector.broadcast %cst_322 : f32 to vector<16x1xf32>
    %911 = arith.divf %909, %910 : vector<16x1xf32>
    %912 = vector.broadcast %911 : vector<16x1xf32> to vector<16x32xf32>
    %913 = arith.subf %905, %912 : vector<16x32xf32>
    %914 = arith.mulf %913, %913 : vector<16x32xf32>
    %cst_323 = arith.constant dense<0.000000e+00> : vector<16xf32>
    %915 = vector.multi_reduction <add>, %914, %cst_323 [1] : vector<16x32xf32> to vector<16xf32>
    %916 = vector.shape_cast %915 : vector<16xf32> to vector<16x1xf32>
    %cst_324 = arith.constant 3.200000e+01 : f32
    %917 = vector.broadcast %cst_324 : f32 to vector<16x1xf32>
    %918 = arith.divf %916, %917 : vector<16x1xf32>
    %919 = vector.broadcast %911 : vector<16x1xf32> to vector<16x32xf32>
    %920 = arith.subf %905, %919 : vector<16x32xf32>
    %cst_325 = arith.constant 9.99999974E-6 : f32
    %921 = vector.broadcast %cst_325 : f32 to vector<16x1xf32>
    %922 = arith.addf %918, %921 : vector<16x1xf32>
    %923 = math.rsqrt %922 : vector<16x1xf32>
    %924 = vector.broadcast %923 : vector<16x1xf32> to vector<16x32xf32>
    %925 = arith.mulf %920, %924 : vector<16x32xf32>
    %926 = vector.broadcast %906 : vector<1x32xf32> to vector<16x32xf32>
    %927 = arith.mulf %925, %926 : vector<16x32xf32>
    %928 = vector.broadcast %907 : vector<1x32xf32> to vector<16x32xf32>
    %929 = arith.addf %927, %928 : vector<16x32xf32>
    %c4_326 = arith.constant 4 : index
    %c0_327 = arith.constant 0 : index
    %c0_328 = arith.constant 0 : index
    %930 = vector.load %arg19[%c4_326, %c0_327, %c0_328] : memref<6x32x66xbf16, #tpu.memory_space<vmem>>, vector<1x32x66xbf16>
    %931 = vector.shape_cast %930 : vector<1x32x66xbf16> to vector<32x66xbf16>
    %c4_329 = arith.constant 4 : index
    %c0_330 = arith.constant 0 : index
    %c0_331 = arith.constant 0 : index
    %932 = vector.load %arg20[%c4_329, %c0_330, %c0_331] : memref<6x64x68xbf16, #tpu.memory_space<vmem>>, vector<1x64x68xbf16>
    %933 = vector.shape_cast %932 : vector<1x64x68xbf16> to vector<64x68xbf16>
    %c4_332 = arith.constant 4 : index
    %c0_333 = arith.constant 0 : index
    %c0_334 = arith.constant 0 : index
    %934 = vector.load %arg21[%c4_332, %c0_333, %c0_334] : memref<6x3x66xf32, #tpu.memory_space<vmem>>, vector<1x3x66xf32>
    %935 = vector.shape_cast %934 : vector<1x3x66xf32> to vector<3x66xf32>
    %936 = vector.extract_strided_slice %935 {offsets = [0, 0], sizes = [1, 66], strides = [1, 1]} : vector<3x66xf32> to vector<1x66xf32>
    %937 = arith.truncf %929 : vector<16x32xf32> to vector<16x32xbf16>
    %cst_335 = arith.constant dense<0.000000e+00> : vector<16x66xf32>
    %938 = tpu.matmul %937, %931, %cst_335 {dimension_numbers = #tpu.dot_dimension_numbers<[1], [0], [0], [1], [0, 0, 1, 1], [], []>} : vector<16x32xbf16>, vector<32x66xbf16>, vector<16x66xf32> -> vector<16x66xf32>
    %939 = vector.broadcast %936 : vector<1x66xf32> to vector<16x66xf32>
    %940 = arith.addf %938, %939 : vector<16x66xf32>
    %941 = vector.extract_strided_slice %940 {offsets = [0, 0], sizes = [16, 64], strides = [1, 1]} : vector<16x66xf32> to vector<16x64xf32>
    %cst_336 = arith.constant 0.000000e+00 : f32
    %942 = vector.broadcast %cst_336 : f32 to vector<16x64xf32>
    %943 = arith.maximumf %941, %942 : vector<16x64xf32>
    %944 = vector.extract_strided_slice %940 {offsets = [0, 64], sizes = [16, 2], strides = [1, 1]} : vector<16x66xf32> to vector<16x2xf32>
    %945 = vector.extract_strided_slice %933 {offsets = [0, 0], sizes = [64, 64], strides = [1, 1]} : vector<64x68xbf16> to vector<64x64xbf16>
    %946 = vector.extract_strided_slice %935 {offsets = [1, 0], sizes = [1, 64], strides = [1, 1]} : vector<3x66xf32> to vector<1x64xf32>
    %947 = arith.truncf %943 : vector<16x64xf32> to vector<16x64xbf16>
    %cst_337 = arith.constant dense<0.000000e+00> : vector<16x64xf32>
    %948 = tpu.matmul %947, %945, %cst_337 {dimension_numbers = #tpu.dot_dimension_numbers<[1], [0], [0], [1], [0, 0, 1, 1], [], []>} : vector<16x64xbf16>, vector<64x64xbf16>, vector<16x64xf32> -> vector<16x64xf32>
    %949 = vector.broadcast %946 : vector<1x64xf32> to vector<16x64xf32>
    %950 = arith.addf %948, %949 : vector<16x64xf32>
    %cst_338 = arith.constant 0.000000e+00 : f32
    %951 = vector.broadcast %cst_338 : f32 to vector<16x64xf32>
    %952 = arith.maximumf %950, %951 : vector<16x64xf32>
    %953 = vector.extract_strided_slice %933 {offsets = [0, 64], sizes = [64, 4], strides = [1, 1]} : vector<64x68xbf16> to vector<64x4xbf16>
    %954 = vector.extract_strided_slice %935 {offsets = [2, 0], sizes = [1, 4], strides = [1, 1]} : vector<3x66xf32> to vector<1x4xf32>
    %955 = arith.truncf %952 : vector<16x64xf32> to vector<16x64xbf16>
    %cst_339 = arith.constant dense<0.000000e+00> : vector<16x4xf32>
    %956 = tpu.matmul %955, %953, %cst_339 {dimension_numbers = #tpu.dot_dimension_numbers<[1], [0], [0], [1], [0, 0, 1, 1], [], []>} : vector<16x64xbf16>, vector<64x4xbf16>, vector<16x4xf32> -> vector<16x4xf32>
    %957 = vector.broadcast %954 : vector<1x4xf32> to vector<16x4xf32>
    %958 = arith.addf %956, %957 : vector<16x4xf32>
    %959 = tpu.concatenate %944, %958 in 1 : vector<16x2xf32>, vector<16x4xf32> -> vector<16x6xf32>
    %960 = tpu.iota {dimensions = array<i32: 1>} : vector<16x6xi32>
    %c2_i32_340 = arith.constant 2 : i32
    %961 = vector.broadcast %c2_i32_340 : i32 to vector<16x6xi32>
    %962 = arith.cmpi slt, %960, %961 : vector<16x6xi32>
    %c5_i32_341 = arith.constant 5 : i32
    %963 = vector.broadcast %c5_i32_341 : i32 to vector<16x6xi32>
    %964 = arith.cmpi slt, %960, %963 : vector<16x6xi32>
    %965 = math.tanh %959 : vector<16x6xf32>
    %966 = arith.negf %959 : vector<16x6xf32>
    %967 = math.exp %966 : vector<16x6xf32>
    %cst_342 = arith.constant 1.000000e+00 : f32
    %968 = vector.broadcast %cst_342 : f32 to vector<16x6xf32>
    %969 = arith.addf %968, %967 : vector<16x6xf32>
    %970 = arith.divf %968, %969 : vector<16x6xf32>
    %971 = arith.select %964, %965, %970 : vector<16x6xi1>, vector<16x6xf32>
    %972 = arith.select %962, %959, %971 : vector<16x6xi1>, vector<16x6xf32>
    %973 = tpu.concatenate %972, %86 in 1 : vector<16x6xf32>, vector<16x122xf32> -> vector<16x128xf32>
    %c4_343 = arith.constant 4 : index
    %c0_344 = arith.constant 0 : index
    %c0_345 = arith.constant 0 : index
    %974 = vector.load %arg22[%c4_343, %c0_344, %c0_345] : memref<6x16x128xf32, #tpu.memory_space<vmem>>, vector<1x16x128xf32>
    %975 = vector.shape_cast %974 : vector<1x16x128xf32> to vector<16x128xf32>
    %976 = vector.shape_cast %973 : vector<16x128xf32> to vector<1x16x128xf32>
    tpu.vector_store %arg22[%c4_343, %c0_344, %c0_345], %976 {strides = array<i32>} : memref<6x16x128xf32, #tpu.memory_space<vmem>>, vector<1x16x128xf32>,
    %c5_346 = arith.constant 5 : index
    %c0_347 = arith.constant 0 : index
    %c0_348 = arith.constant 0 : index
    %977 = vector.load %arg12[%c5_346, %c0_347, %c0_348] : memref<6x32x64xbf16, #tpu.memory_space<vmem>>, vector<1x32x64xbf16>
    %978 = vector.shape_cast %977 : vector<1x32x64xbf16> to vector<32x64xbf16>
    %c5_349 = arith.constant 5 : index
    %c0_350 = arith.constant 0 : index
    %c0_351 = arith.constant 0 : index
    %979 = vector.load %arg17[%c5_349, %c0_350, %c0_351] : memref<6x8x128xf32, #tpu.memory_space<vmem>>, vector<1x8x128xf32>
    %980 = vector.shape_cast %979 : vector<1x8x128xf32> to vector<8x128xf32>
    %981 = vector.extract_strided_slice %980 {offsets = [0, 0], sizes = [1, 32], strides = [1, 1]} : vector<8x128xf32> to vector<1x32xf32>
    %982 = vector.extract_strided_slice %980 {offsets = [1, 0], sizes = [1, 32], strides = [1, 1]} : vector<8x128xf32> to vector<1x32xf32>
    %983 = vector.extract_strided_slice %980 {offsets = [2, 0], sizes = [1, 32], strides = [1, 1]} : vector<8x128xf32> to vector<1x32xf32>
    %984 = vector.extract_strided_slice %980 {offsets = [3, 0], sizes = [1, 32], strides = [1, 1]} : vector<8x128xf32> to vector<1x32xf32>
    %985 = vector.extract_strided_slice %980 {offsets = [4, 0], sizes = [1, 32], strides = [1, 1]} : vector<8x128xf32> to vector<1x32xf32>
    %986 = vector.extract_strided_slice %980 {offsets = [5, 0], sizes = [1, 32], strides = [1, 1]} : vector<8x128xf32> to vector<1x32xf32>
    %987 = vector.extract_strided_slice %980 {offsets = [6, 0], sizes = [1, 32], strides = [1, 1]} : vector<8x128xf32> to vector<1x32xf32>
    %988 = vector.extract_strided_slice %980 {offsets = [7, 0], sizes = [1, 128], strides = [1, 1]} : vector<8x128xf32> to vector<1x128xf32>
    %989 = vector.extract_strided_slice %23 {offsets = [0, 0, 160], sizes = [2, 64, 32], strides = [1, 1, 1]} : vector<2x64x192xbf16> to vector<2x64x32xbf16>
    %990 = vector.extract_strided_slice %33 {offsets = [0, 0, 160], sizes = [2, 64, 32], strides = [1, 1, 1]} : vector<2x64x192xbf16> to vector<2x64x32xbf16>
    %991 = arith.addf %905, %81 : vector<16x32xf32>
    %992 = vector.extract_strided_slice %978 {offsets = [0, 0], sizes = [32, 32], strides = [1, 1]} : vector<32x64xbf16> to vector<32x32xbf16>
    %993 = arith.truncf %991 : vector<16x32xf32> to vector<16x32xbf16>
    %cst_352 = arith.constant dense<0.000000e+00> : vector<16x32xf32>
    %994 = tpu.matmul %993, %992, %cst_352 {dimension_numbers = #tpu.dot_dimension_numbers<[1], [0], [0], [1], [0, 0, 1, 1], [], []>} : vector<16x32xbf16>, vector<32x32xbf16>, vector<16x32xf32> -> vector<16x32xf32>
    %995 = vector.broadcast %981 : vector<1x32xf32> to vector<16x32xf32>
    %996 = arith.addf %994, %995 : vector<16x32xf32>
    %997 = vector.shape_cast %996 : vector<16x32xf32> to vector<2x8x32xf32>
    %998 = arith.truncf %997 : vector<2x8x32xf32> to vector<2x8x32xbf16>
    "tpu.trace_start"() <{level = 10 : i32, message = "bqh,bsh->bqs"}> : () -> ()
    %cst_353 = arith.constant dense<0.000000e+00> : vector<2x8x64xf32>
    %999 = tpu.matmul %998, %989, %cst_353 {dimension_numbers = #tpu.dot_dimension_numbers<[2], [2], [1], [1], [0, 0, 0, 1, 1, 1], [0], [0]>} : vector<2x8x32xbf16>, vector<2x64x32xbf16>, vector<2x8x64xf32> -> vector<2x8x64xf32>
    "tpu.trace_stop"() : () -> ()
    %cst_354 = arith.constant 0.176776692 : f32
    %1000 = vector.broadcast %cst_354 : f32 to vector<2x8x64xf32>
    %1001 = arith.mulf %999, %1000 : vector<2x8x64xf32>
    %cst_355 = arith.constant dense<0xFF800000> : vector<2x8xf32>
    %1002 = vector.multi_reduction <maximumf>, %1001, %cst_355 [2] : vector<2x8x64xf32> to vector<2x8xf32>
    %1003 = vector.shape_cast %1002 : vector<2x8xf32> to vector<2x8x1xf32>
    %1004 = vector.broadcast %1003 : vector<2x8x1xf32> to vector<2x8x64xf32>
    %1005 = arith.subf %1001, %1004 : vector<2x8x64xf32>
    %1006 = math.exp %1005 : vector<2x8x64xf32>
    %cst_356 = arith.constant dense<0.000000e+00> : vector<2x8xf32>
    %1007 = vector.multi_reduction <add>, %1006, %cst_356 [2] : vector<2x8x64xf32> to vector<2x8xf32>
    %1008 = vector.shape_cast %1007 : vector<2x8xf32> to vector<2x8x1xf32>
    %1009 = tpu.reciprocal %1008 {approx = true} : vector<2x8x1xf32> -> vector<2x8x1xf32>
    %1010 = vector.broadcast %1009 : vector<2x8x1xf32> to vector<2x8x64xf32>
    %1011 = arith.mulf %1006, %1010 : vector<2x8x64xf32>
    %1012 = arith.truncf %1011 : vector<2x8x64xf32> to vector<2x8x64xbf16>
    "tpu.trace_start"() <{level = 10 : i32, message = "bqs,bsh->bqh"}> : () -> ()
    %cst_357 = arith.constant dense<0.000000e+00> : vector<2x8x32xf32>
    %1013 = tpu.matmul %1012, %990, %cst_357 {dimension_numbers = #tpu.dot_dimension_numbers<[2], [1], [1], [2], [0, 0, 0, 1, 1, 2], [0], [0]>} : vector<2x8x64xbf16>, vector<2x64x32xbf16>, vector<2x8x32xf32> -> vector<2x8x32xf32>
    "tpu.trace_stop"() : () -> ()
    %1014 = vector.shape_cast %1013 : vector<2x8x32xf32> to vector<16x32xf32>
    %1015 = vector.extract_strided_slice %978 {offsets = [0, 32], sizes = [32, 32], strides = [1, 1]} : vector<32x64xbf16> to vector<32x32xbf16>
    %1016 = arith.truncf %1014 : vector<16x32xf32> to vector<16x32xbf16>
    %cst_358 = arith.constant dense<0.000000e+00> : vector<16x32xf32>
    %1017 = tpu.matmul %1016, %1015, %cst_358 {dimension_numbers = #tpu.dot_dimension_numbers<[1], [0], [0], [1], [0, 0, 1, 1], [], []>} : vector<16x32xbf16>, vector<32x32xbf16>, vector<16x32xf32> -> vector<16x32xf32>
    %1018 = vector.broadcast %982 : vector<1x32xf32> to vector<16x32xf32>
    %1019 = arith.addf %1017, %1018 : vector<16x32xf32>
    %1020 = vector.broadcast %84 : vector<16x1xf32> to vector<16x32xf32>
    %1021 = arith.mulf %1019, %1020 : vector<16x32xf32>
    %1022 = arith.addf %905, %1021 : vector<16x32xf32>
    %cst_359 = arith.constant dense<0.000000e+00> : vector<16xf32>
    %1023 = vector.multi_reduction <add>, %1022, %cst_359 [1] : vector<16x32xf32> to vector<16xf32>
    %1024 = vector.shape_cast %1023 : vector<16xf32> to vector<16x1xf32>
    %cst_360 = arith.constant 3.200000e+01 : f32
    %1025 = vector.broadcast %cst_360 : f32 to vector<16x1xf32>
    %1026 = arith.divf %1024, %1025 : vector<16x1xf32>
    %1027 = vector.broadcast %1026 : vector<16x1xf32> to vector<16x32xf32>
    %1028 = arith.subf %1022, %1027 : vector<16x32xf32>
    %1029 = arith.mulf %1028, %1028 : vector<16x32xf32>
    %cst_361 = arith.constant dense<0.000000e+00> : vector<16xf32>
    %1030 = vector.multi_reduction <add>, %1029, %cst_361 [1] : vector<16x32xf32> to vector<16xf32>
    %1031 = vector.shape_cast %1030 : vector<16xf32> to vector<16x1xf32>
    %cst_362 = arith.constant 3.200000e+01 : f32
    %1032 = vector.broadcast %cst_362 : f32 to vector<16x1xf32>
    %1033 = arith.divf %1031, %1032 : vector<16x1xf32>
    %1034 = vector.broadcast %1026 : vector<16x1xf32> to vector<16x32xf32>
    %1035 = arith.subf %1022, %1034 : vector<16x32xf32>
    %cst_363 = arith.constant 9.99999974E-6 : f32
    %1036 = vector.broadcast %cst_363 : f32 to vector<16x1xf32>
    %1037 = arith.addf %1033, %1036 : vector<16x1xf32>
    %1038 = math.rsqrt %1037 : vector<16x1xf32>
    %1039 = vector.broadcast %1038 : vector<16x1xf32> to vector<16x32xf32>
    %1040 = arith.mulf %1035, %1039 : vector<16x32xf32>
    %1041 = vector.broadcast %984 : vector<1x32xf32> to vector<16x32xf32>
    %1042 = arith.mulf %1040, %1041 : vector<16x32xf32>
    %1043 = vector.broadcast %985 : vector<1x32xf32> to vector<16x32xf32>
    %1044 = arith.addf %1042, %1043 : vector<16x32xf32>
    %c5_364 = arith.constant 5 : index
    %c0_365 = arith.constant 0 : index
    %c0_366 = arith.constant 0 : index
    %1045 = vector.load %arg15[%c5_364, %c0_365, %c0_366] : memref<6x32x128xbf16, #tpu.memory_space<vmem>>, vector<1x32x128xbf16>
    %1046 = vector.shape_cast %1045 : vector<1x32x128xbf16> to vector<32x128xbf16>
    %1047 = arith.truncf %1044 : vector<16x32xf32> to vector<16x32xbf16>
    %cst_367 = arith.constant dense<0.000000e+00> : vector<16x128xf32>
    %1048 = tpu.matmul %1047, %1046, %cst_367 {dimension_numbers = #tpu.dot_dimension_numbers<[1], [0], [0], [1], [0, 0, 1, 1], [], []>} : vector<16x32xbf16>, vector<32x128xbf16>, vector<16x128xf32> -> vector<16x128xf32>
    %1049 = vector.broadcast %988 : vector<1x128xf32> to vector<16x128xf32>
    %1050 = arith.addf %1048, %1049 : vector<16x128xf32>
    %cst_368 = arith.constant 0.000000e+00 : f32
    %1051 = vector.broadcast %cst_368 : f32 to vector<16x128xf32>
    %1052 = arith.maximumf %1050, %1051 : vector<16x128xf32>
    %c5_369 = arith.constant 5 : index
    %c0_370 = arith.constant 0 : index
    %c0_371 = arith.constant 0 : index
    %1053 = vector.load %arg16[%c5_369, %c0_370, %c0_371] : memref<6x128x32xbf16, #tpu.memory_space<vmem>>, vector<1x128x32xbf16>
    %1054 = vector.shape_cast %1053 : vector<1x128x32xbf16> to vector<128x32xbf16>
    %1055 = arith.truncf %1052 : vector<16x128xf32> to vector<16x128xbf16>
    %cst_372 = arith.constant dense<0.000000e+00> : vector<16x32xf32>
    %1056 = tpu.matmul %1055, %1054, %cst_372 {dimension_numbers = #tpu.dot_dimension_numbers<[1], [0], [0], [1], [0, 0, 1, 1], [], []>} : vector<16x128xbf16>, vector<128x32xbf16>, vector<16x32xf32> -> vector<16x32xf32>
    %1057 = vector.broadcast %983 : vector<1x32xf32> to vector<16x32xf32>
    %1058 = arith.addf %1056, %1057 : vector<16x32xf32>
    %1059 = vector.broadcast %84 : vector<16x1xf32> to vector<16x32xf32>
    %1060 = arith.mulf %1058, %1059 : vector<16x32xf32>
    %1061 = arith.addf %1044, %1060 : vector<16x32xf32>
    %cst_373 = arith.constant dense<0.000000e+00> : vector<16xf32>
    %1062 = vector.multi_reduction <add>, %1061, %cst_373 [1] : vector<16x32xf32> to vector<16xf32>
    %1063 = vector.shape_cast %1062 : vector<16xf32> to vector<16x1xf32>
    %cst_374 = arith.constant 3.200000e+01 : f32
    %1064 = vector.broadcast %cst_374 : f32 to vector<16x1xf32>
    %1065 = arith.divf %1063, %1064 : vector<16x1xf32>
    %1066 = vector.broadcast %1065 : vector<16x1xf32> to vector<16x32xf32>
    %1067 = arith.subf %1061, %1066 : vector<16x32xf32>
    %1068 = arith.mulf %1067, %1067 : vector<16x32xf32>
    %cst_375 = arith.constant dense<0.000000e+00> : vector<16xf32>
    %1069 = vector.multi_reduction <add>, %1068, %cst_375 [1] : vector<16x32xf32> to vector<16xf32>
    %1070 = vector.shape_cast %1069 : vector<16xf32> to vector<16x1xf32>
    %cst_376 = arith.constant 3.200000e+01 : f32
    %1071 = vector.broadcast %cst_376 : f32 to vector<16x1xf32>
    %1072 = arith.divf %1070, %1071 : vector<16x1xf32>
    %1073 = vector.broadcast %1065 : vector<16x1xf32> to vector<16x32xf32>
    %1074 = arith.subf %1061, %1073 : vector<16x32xf32>
    %cst_377 = arith.constant 9.99999974E-6 : f32
    %1075 = vector.broadcast %cst_377 : f32 to vector<16x1xf32>
    %1076 = arith.addf %1072, %1075 : vector<16x1xf32>
    %1077 = math.rsqrt %1076 : vector<16x1xf32>
    %1078 = vector.broadcast %1077 : vector<16x1xf32> to vector<16x32xf32>
    %1079 = arith.mulf %1074, %1078 : vector<16x32xf32>
    %1080 = vector.broadcast %986 : vector<1x32xf32> to vector<16x32xf32>
    %1081 = arith.mulf %1079, %1080 : vector<16x32xf32>
    %1082 = vector.broadcast %987 : vector<1x32xf32> to vector<16x32xf32>
    %1083 = arith.addf %1081, %1082 : vector<16x32xf32>
    %1084 = vector.extract_strided_slice %85 {offsets = [0, 0], sizes = [1, 32], strides = [1, 1]} : vector<2x32xf32> to vector<1x32xf32>
    %1085 = vector.extract_strided_slice %85 {offsets = [1, 0], sizes = [1, 32], strides = [1, 1]} : vector<2x32xf32> to vector<1x32xf32>
    %cst_378 = arith.constant dense<0.000000e+00> : vector<16xf32>
    %1086 = vector.multi_reduction <add>, %1083, %cst_378 [1] : vector<16x32xf32> to vector<16xf32>
    %1087 = vector.shape_cast %1086 : vector<16xf32> to vector<16x1xf32>
    %cst_379 = arith.constant 3.200000e+01 : f32
    %1088 = vector.broadcast %cst_379 : f32 to vector<16x1xf32>
    %1089 = arith.divf %1087, %1088 : vector<16x1xf32>
    %1090 = vector.broadcast %1089 : vector<16x1xf32> to vector<16x32xf32>
    %1091 = arith.subf %1083, %1090 : vector<16x32xf32>
    %1092 = arith.mulf %1091, %1091 : vector<16x32xf32>
    %cst_380 = arith.constant dense<0.000000e+00> : vector<16xf32>
    %1093 = vector.multi_reduction <add>, %1092, %cst_380 [1] : vector<16x32xf32> to vector<16xf32>
    %1094 = vector.shape_cast %1093 : vector<16xf32> to vector<16x1xf32>
    %cst_381 = arith.constant 3.200000e+01 : f32
    %1095 = vector.broadcast %cst_381 : f32 to vector<16x1xf32>
    %1096 = arith.divf %1094, %1095 : vector<16x1xf32>
    %1097 = vector.broadcast %1089 : vector<16x1xf32> to vector<16x32xf32>
    %1098 = arith.subf %1083, %1097 : vector<16x32xf32>
    %cst_382 = arith.constant 9.99999974E-6 : f32
    %1099 = vector.broadcast %cst_382 : f32 to vector<16x1xf32>
    %1100 = arith.addf %1096, %1099 : vector<16x1xf32>
    %1101 = math.rsqrt %1100 : vector<16x1xf32>
    %1102 = vector.broadcast %1101 : vector<16x1xf32> to vector<16x32xf32>
    %1103 = arith.mulf %1098, %1102 : vector<16x32xf32>
    %1104 = vector.broadcast %1084 : vector<1x32xf32> to vector<16x32xf32>
    %1105 = arith.mulf %1103, %1104 : vector<16x32xf32>
    %1106 = vector.broadcast %1085 : vector<1x32xf32> to vector<16x32xf32>
    %1107 = arith.addf %1105, %1106 : vector<16x32xf32>
    %c5_383 = arith.constant 5 : index
    %c0_384 = arith.constant 0 : index
    %c0_385 = arith.constant 0 : index
    %1108 = vector.load %arg19[%c5_383, %c0_384, %c0_385] : memref<6x32x66xbf16, #tpu.memory_space<vmem>>, vector<1x32x66xbf16>
    %1109 = vector.shape_cast %1108 : vector<1x32x66xbf16> to vector<32x66xbf16>
    %c5_386 = arith.constant 5 : index
    %c0_387 = arith.constant 0 : index
    %c0_388 = arith.constant 0 : index
    %1110 = vector.load %arg20[%c5_386, %c0_387, %c0_388] : memref<6x64x68xbf16, #tpu.memory_space<vmem>>, vector<1x64x68xbf16>
    %1111 = vector.shape_cast %1110 : vector<1x64x68xbf16> to vector<64x68xbf16>
    %c5_389 = arith.constant 5 : index
    %c0_390 = arith.constant 0 : index
    %c0_391 = arith.constant 0 : index
    %1112 = vector.load %arg21[%c5_389, %c0_390, %c0_391] : memref<6x3x66xf32, #tpu.memory_space<vmem>>, vector<1x3x66xf32>
    %1113 = vector.shape_cast %1112 : vector<1x3x66xf32> to vector<3x66xf32>
    %1114 = vector.extract_strided_slice %1113 {offsets = [0, 0], sizes = [1, 66], strides = [1, 1]} : vector<3x66xf32> to vector<1x66xf32>
    %1115 = arith.truncf %1107 : vector<16x32xf32> to vector<16x32xbf16>
    %cst_392 = arith.constant dense<0.000000e+00> : vector<16x66xf32>
    %1116 = tpu.matmul %1115, %1109, %cst_392 {dimension_numbers = #tpu.dot_dimension_numbers<[1], [0], [0], [1], [0, 0, 1, 1], [], []>} : vector<16x32xbf16>, vector<32x66xbf16>, vector<16x66xf32> -> vector<16x66xf32>
    %1117 = vector.broadcast %1114 : vector<1x66xf32> to vector<16x66xf32>
    %1118 = arith.addf %1116, %1117 : vector<16x66xf32>
    %1119 = vector.extract_strided_slice %1118 {offsets = [0, 0], sizes = [16, 64], strides = [1, 1]} : vector<16x66xf32> to vector<16x64xf32>
    %cst_393 = arith.constant 0.000000e+00 : f32
    %1120 = vector.broadcast %cst_393 : f32 to vector<16x64xf32>
    %1121 = arith.maximumf %1119, %1120 : vector<16x64xf32>
    %1122 = vector.extract_strided_slice %1118 {offsets = [0, 64], sizes = [16, 2], strides = [1, 1]} : vector<16x66xf32> to vector<16x2xf32>
    %1123 = vector.extract_strided_slice %1111 {offsets = [0, 0], sizes = [64, 64], strides = [1, 1]} : vector<64x68xbf16> to vector<64x64xbf16>
    %1124 = vector.extract_strided_slice %1113 {offsets = [1, 0], sizes = [1, 64], strides = [1, 1]} : vector<3x66xf32> to vector<1x64xf32>
    %1125 = arith.truncf %1121 : vector<16x64xf32> to vector<16x64xbf16>
    %cst_394 = arith.constant dense<0.000000e+00> : vector<16x64xf32>
    %1126 = tpu.matmul %1125, %1123, %cst_394 {dimension_numbers = #tpu.dot_dimension_numbers<[1], [0], [0], [1], [0, 0, 1, 1], [], []>} : vector<16x64xbf16>, vector<64x64xbf16>, vector<16x64xf32> -> vector<16x64xf32>
    %1127 = vector.broadcast %1124 : vector<1x64xf32> to vector<16x64xf32>
    %1128 = arith.addf %1126, %1127 : vector<16x64xf32>
    %cst_395 = arith.constant 0.000000e+00 : f32
    %1129 = vector.broadcast %cst_395 : f32 to vector<16x64xf32>
    %1130 = arith.maximumf %1128, %1129 : vector<16x64xf32>
    %1131 = vector.extract_strided_slice %1111 {offsets = [0, 64], sizes = [64, 4], strides = [1, 1]} : vector<64x68xbf16> to vector<64x4xbf16>
    %1132 = vector.extract_strided_slice %1113 {offsets = [2, 0], sizes = [1, 4], strides = [1, 1]} : vector<3x66xf32> to vector<1x4xf32>
    %1133 = arith.truncf %1130 : vector<16x64xf32> to vector<16x64xbf16>
    %cst_396 = arith.constant dense<0.000000e+00> : vector<16x4xf32>
    %1134 = tpu.matmul %1133, %1131, %cst_396 {dimension_numbers = #tpu.dot_dimension_numbers<[1], [0], [0], [1], [0, 0, 1, 1], [], []>} : vector<16x64xbf16>, vector<64x4xbf16>, vector<16x4xf32> -> vector<16x4xf32>
    %1135 = vector.broadcast %1132 : vector<1x4xf32> to vector<16x4xf32>
    %1136 = arith.addf %1134, %1135 : vector<16x4xf32>
    %1137 = tpu.concatenate %1122, %1136 in 1 : vector<16x2xf32>, vector<16x4xf32> -> vector<16x6xf32>
    %1138 = tpu.iota {dimensions = array<i32: 1>} : vector<16x6xi32>
    %c2_i32_397 = arith.constant 2 : i32
    %1139 = vector.broadcast %c2_i32_397 : i32 to vector<16x6xi32>
    %1140 = arith.cmpi slt, %1138, %1139 : vector<16x6xi32>
    %c5_i32_398 = arith.constant 5 : i32
    %1141 = vector.broadcast %c5_i32_398 : i32 to vector<16x6xi32>
    %1142 = arith.cmpi slt, %1138, %1141 : vector<16x6xi32>
    %1143 = math.tanh %1137 : vector<16x6xf32>
    %1144 = arith.negf %1137 : vector<16x6xf32>
    %1145 = math.exp %1144 : vector<16x6xf32>
    %cst_399 = arith.constant 1.000000e+00 : f32
    %1146 = vector.broadcast %cst_399 : f32 to vector<16x6xf32>
    %1147 = arith.addf %1146, %1145 : vector<16x6xf32>
    %1148 = arith.divf %1146, %1147 : vector<16x6xf32>
    %1149 = arith.select %1142, %1143, %1148 : vector<16x6xi1>, vector<16x6xf32>
    %1150 = arith.select %1140, %1137, %1149 : vector<16x6xi1>, vector<16x6xf32>
    %1151 = tpu.concatenate %1150, %86 in 1 : vector<16x6xf32>, vector<16x122xf32> -> vector<16x128xf32>
    %c5_400 = arith.constant 5 : index
    %c0_401 = arith.constant 0 : index
    %c0_402 = arith.constant 0 : index
    %1152 = vector.load %arg22[%c5_400, %c0_401, %c0_402] : memref<6x16x128xf32, #tpu.memory_space<vmem>>, vector<1x16x128xf32>
    %1153 = vector.shape_cast %1152 : vector<1x16x128xf32> to vector<16x128xf32>
    %1154 = vector.shape_cast %1151 : vector<16x128xf32> to vector<1x16x128xf32>
    tpu.vector_store %arg22[%c5_400, %c0_401, %c0_402], %1154 {strides = array<i32>} : memref<6x16x128xf32, #tpu.memory_space<vmem>>, vector<1x16x128xf32>,
    %1155 = vector.shape_cast %1083 : vector<16x32xf32> to vector<2x8x32xf32>
    %c0_403 = arith.constant 0 : index
    %c0_404 = arith.constant 0 : index
    %c0_405 = arith.constant 0 : index
    %1156 = vector.load %arg23[%c0_403, %c0_404, %c0_405] : memref<2x8x32xf32, #tpu.memory_space<vmem>>, vector<2x8x32xf32>
    tpu.vector_store %arg23[%c0_403, %c0_404, %c0_405], %1155 {strides = array<i32>} : memref<2x8x32xf32, #tpu.memory_space<vmem>>, vector<2x8x32xf32>,
    return
  }
  func.func @transform_0(%arg0: i32) -> (i32, i32) {
    %c0_i32 = arith.constant 0 : i32
    %c0_i32_0 = arith.constant 0 : i32
    %c0_i32_1 = arith.constant 0 : i32
    return %c0_i32, %c0_i32_0 : i32, i32
  }
  func.func @transform_1(%arg0: i32) -> (i32, i32) {
    %c0_i32 = arith.constant 0 : i32
    %c0_i32_0 = arith.constant 0 : i32
    %c0_i32_1 = arith.constant 0 : i32
    return %c0_i32, %c0_i32_0 : i32, i32
  }
  func.func @transform_2(%arg0: i32) -> (i32, i32) {
    %c0_i32 = arith.constant 0 : i32
    %c0_i32_0 = arith.constant 0 : i32
    %c0_i32_1 = arith.constant 0 : i32
    return %c0_i32, %c0_i32_0 : i32, i32
  }
  func.func @transform_3(%arg0: i32) -> (i32, i32) {
    %c0_i32 = arith.constant 0 : i32
    %c0_i32_0 = arith.constant 0 : i32
    %c0_i32_1 = arith.constant 0 : i32
    return %c0_i32, %c0_i32_0 : i32, i32
  }
  func.func @transform_4(%arg0: i32) -> (i32, i32) {
    %c0_i32 = arith.constant 0 : i32
    %c0_i32_0 = arith.constant 0 : i32
    %c0_i32_1 = arith.constant 0 : i32
    return %c0_i32, %c0_i32_0 : i32, i32
  }
  func.func @transform_5(%arg0: i32) -> (i32, i32) {
    %c0_i32 = arith.constant 0 : i32
    %c0_i32_0 = arith.constant 0 : i32
    %c0_i32_1 = arith.constant 0 : i32
    return %c0_i32, %c0_i32_0 : i32, i32
  }
  func.func @transform_6(%arg0: i32) -> (i32, i32) {
    %c0_i32 = arith.constant 0 : i32
    %c0_i32_0 = arith.constant 0 : i32
    %c0_i32_1 = arith.constant 0 : i32
    return %c0_i32, %c0_i32_0 : i32, i32
  }
  func.func @transform_7(%arg0: i32) -> (i32, i32) {
    %c0_i32 = arith.constant 0 : i32
    %c0_i32_0 = arith.constant 0 : i32
    %c0_i32_1 = arith.constant 0 : i32
    return %c0_i32, %c0_i32_0 : i32, i32
  }
  func.func @transform_8(%arg0: i32) -> (i32, i32, i32) {
    %c0_i32 = arith.constant 0 : i32
    %c0_i32_0 = arith.constant 0 : i32
    %c0_i32_1 = arith.constant 0 : i32
    %c0_i32_2 = arith.constant 0 : i32
    return %c0_i32, %c0_i32_0, %c0_i32_1 : i32, i32, i32
  }
  func.func @transform_9(%arg0: i32) -> (i32, i32) {
    %c0_i32 = arith.constant 0 : i32
    %c0_i32_0 = arith.constant 0 : i32
    %c0_i32_1 = arith.constant 0 : i32
    return %c0_i32, %c0_i32_0 : i32, i32
  }
  func.func @transform_10(%arg0: i32) -> (i32, i32) {
    %c0_i32 = arith.constant 0 : i32
    %c0_i32_0 = arith.constant 0 : i32
    %c0_i32_1 = arith.constant 0 : i32
    return %c0_i32, %c0_i32_0 : i32, i32
  }
  func.func @transform_11(%arg0: i32) -> (i32, i32, i32) {
    %c0_i32 = arith.constant 0 : i32
    %c0_i32_0 = arith.constant 0 : i32
    %c0_i32_1 = arith.constant 0 : i32
    %c0_i32_2 = arith.constant 0 : i32
    return %c0_i32, %c0_i32_0, %c0_i32_1 : i32, i32, i32
  }
  func.func @transform_12(%arg0: i32) -> (i32, i32, i32) {
    %c0_i32 = arith.constant 0 : i32
    %c0_i32_0 = arith.constant 0 : i32
    %c0_i32_1 = arith.constant 0 : i32
    %c0_i32_2 = arith.constant 0 : i32
    return %c0_i32, %c0_i32_0, %c0_i32_1 : i32, i32, i32
  }
  func.func @transform_13(%arg0: i32) -> (i32, i32, i32) {
    %c0_i32 = arith.constant 0 : i32
    %c0_i32_0 = arith.constant 0 : i32
    %c0_i32_1 = arith.constant 0 : i32
    %c0_i32_2 = arith.constant 0 : i32
    return %c0_i32, %c0_i32_0, %c0_i32_1 : i32, i32, i32
  }
  func.func @transform_14(%arg0: i32) -> (i32, i32, i32) {
    %c0_i32 = arith.constant 0 : i32
    %c0_i32_0 = arith.constant 0 : i32
    %c0_i32_1 = arith.constant 0 : i32
    %c0_i32_2 = arith.constant 0 : i32
    return %c0_i32, %c0_i32_0, %c0_i32_1 : i32, i32, i32
  }
  func.func @transform_15(%arg0: i32) -> (i32, i32, i32) {
    %c0_i32 = arith.constant 0 : i32
    %c0_i32_0 = arith.constant 0 : i32
    %c0_i32_1 = arith.constant 0 : i32
    %c0_i32_2 = arith.constant 0 : i32
    return %c0_i32, %c0_i32_0, %c0_i32_1 : i32, i32, i32
  }
  func.func @transform_16(%arg0: i32) -> (i32, i32, i32) {
    %c0_i32 = arith.constant 0 : i32
    %c0_i32_0 = arith.constant 0 : i32
    %c0_i32_1 = arith.constant 0 : i32
    %c0_i32_2 = arith.constant 0 : i32
    return %c0_i32, %c0_i32_0, %c0_i32_1 : i32, i32, i32
  }
  func.func @transform_17(%arg0: i32) -> (i32, i32) {
    %c0_i32 = arith.constant 0 : i32
    %c0_i32_0 = arith.constant 0 : i32
    %c0_i32_1 = arith.constant 0 : i32
    return %c0_i32, %c0_i32_0 : i32, i32
  }
  func.func @transform_18(%arg0: i32) -> (i32, i32, i32) {
    %c0_i32 = arith.constant 0 : i32
    %c0_i32_0 = arith.constant 0 : i32
    %c0_i32_1 = arith.constant 0 : i32
    %c0_i32_2 = arith.constant 0 : i32
    return %c0_i32, %c0_i32_0, %c0_i32_1 : i32, i32, i32
  }
  func.func @transform_19(%arg0: i32) -> (i32, i32, i32) {
    %c0_i32 = arith.constant 0 : i32
    %c0_i32_0 = arith.constant 0 : i32
    %c0_i32_1 = arith.constant 0 : i32
    %c0_i32_2 = arith.constant 0 : i32
    return %c0_i32, %c0_i32_0, %c0_i32_1 : i32, i32, i32
  }
  func.func @transform_20(%arg0: i32) -> (i32, i32, i32) {
    %c0_i32 = arith.constant 0 : i32
    %c0_i32_0 = arith.constant 0 : i32
    %c0_i32_1 = arith.constant 0 : i32
    %c0_i32_2 = arith.constant 0 : i32
    return %c0_i32, %c0_i32_0, %c0_i32_1 : i32, i32, i32
  }
  func.func @transform_21(%arg0: i32) -> (i32, i32, i32) {
    %c0_i32 = arith.constant 0 : i32
    %c0_i32_0 = arith.constant 0 : i32
    %c0_i32_1 = arith.constant 0 : i32
    %c0_i32_2 = arith.constant 0 : i32
    return %c0_i32, %c0_i32_0, %c0_i32_1 : i32, i32, i32
  }
  func.func @transform_22(%arg0: i32) -> (i32, i32, i32) {
    %c0_i32 = arith.constant 0 : i32
    %c0_i32_0 = arith.constant 0 : i32
    %c0_i32_1 = arith.constant 0 : i32
    %c0_i32_2 = arith.constant 0 : i32
    return %c0_i32, %c0_i32_0, %c0_i32_1 : i32, i32, i32
  }
  func.func @transform_23(%arg0: i32) -> (i32, i32, i32) {
    %c0_i32 = arith.constant 0 : i32
    %c0_i32_0 = arith.constant 0 : i32
    %c0_i32_1 = arith.constant 0 : i32
    %c0_i32_2 = arith.constant 0 : i32
    return %c0_i32, %c0_i32_0, %c0_i32_1 : i32, i32, i32
  }
}

</mosaic_0001>

<bundles_post_ra>
// kernel: tpu_custom_call.1
= control target key start
LH: loop header
LB: loop body
LE: loop exit
PB: predicated region body
PF: predicated region fallthrough
CT: control target
= control target key end

     0   :  { %s11702_s0 = inlined_call_operand.vmem [shape: f32[128,16], index: 0, kind: input, shape index: {}]   ;;  %s11703_s1 = inlined_call_operand.hbm [shape: f32[2,4], index: 1, kind: input, shape index: {}]   ;;  %s11704_s2 = inlined_call_operand.<no memory space> [shape: f32[1,1], index: 2, kind: input, shape index: {}]   ;;  %s11705_s3 = inlined_call_operand.hbm [shape: f32[16,32], index: 3, kind: input, shape index: {}]   ;;  %s11706_s4 = inlined_call_operand.vmem [shape: f32[16,1], index: 4, kind: input, shape index: {}]   ;;  %s11707_s5 = inlined_call_operand.hbm [shape: f32[17,32], index: 5, kind: input, shape index: {}]   ;;  %s11708_s6 = inlined_call_operand.vmem [shape: f32[64,32], index: 6, kind: input, shape index: {}]   ;;  %s11709_s7 = inlined_call_operand.hbm [shape: f32[4,96], index: 7, kind: input, shape index: {}]   ;;  %s11710_s8 = inlined_call_operand.vmem [shape: f32[2,96,96], index: 8, kind: input, shape index: {}]   ;;  %s11711_s9 = inlined_call_operand.hbm [shape: f32[3,96], index: 9, kind: input, shape index: {}]   ;;  %s11712_s10 = inlined_call_operand.hbm [shape: f32[2,32], index: 10, kind: input, shape index: {}]   ;;  %s11713_s11 = inlined_call_operand.vmem [shape: bf16[6,32,64], index: 11, kind: input, shape index: {}]   ;;  %s11714_s12 = inlined_call_operand.hbm [shape: bf16[2,32,192], index: 12, kind: input, shape index: {}]   ;;  %s11715_s13 = inlined_call_operand.hbm [shape: f32[2,1,192], index: 13, kind: input, shape index: {}]   ;;  %s11716_s14 = inlined_call_operand.vmem [shape: bf16[6,32,128], index: 14, kind: input, shape index: {}]   ;;  %s11717_s15 = inlined_call_operand.vmem [shape: bf16[6,128,32], index: 15, kind: input, shape index: {}]   ;;  %s11718_s16 = inlined_call_operand.hbm [shape: f32[6,8,128], index: 16, kind: input, shape index: {}]   ;;  %s11719_s17 = inlined_call_operand.hbm [shape: f32[2,32], index: 17, kind: input, shape index: {}]   ;;  %s11720_s18 = inlined_call_operand.vmem [shape: bf16[6,32,66], index: 18, kind: input, shape index: {}]   ;;  %s11721_s19 = inlined_call_operand.vmem [shape: bf16[6,64,68], index: 19, kind: input, shape index: {}]   ;;  %s11722_s20 = inlined_call_operand.vmem [shape: f32[6,3,66], index: 20, kind: input, shape index: {}]   ;;  %s11723_s21 = inlined_call_operand.hbm [shape: f32[6,16,128], index: 21, kind: output, shape index: {0}]   ;;  %s11724_s22 = inlined_call_operand.hbm [shape: f32[2,8,32], index: 22, kind: output, shape index: {1}]   ;;  %s11725_s23 = inlined_call_operand.vmem [shape: f32[2,64,32], index: 23, kind: output, shape index: {2}]  }
   0x1   :  { %11752 = sst [smem:[#allocation47_spill]] %s11702_s0 }
   0x2   :  { %11753 = sst [smem:[#allocation48_spill]] %s11703_s1 }
   0x3   :  { %11754 = sst [smem:[#allocation49_spill]] %s11704_s2 }
   0x4   :  { %11755 = sst [smem:[#allocation50_spill]] %s11705_s3 }
   0x5   :  { %11756 = sst [smem:[#allocation51_spill]] %s11706_s4 }
   0x6   :  { %11757 = sst [smem:[#allocation52_spill]] %s11707_s5 }
   0x7   :  { %11758 = sst [smem:[#allocation53_spill]] %s11708_s6 }
   0x8   :  { %11759 = sst [smem:[#allocation54_spill]] %s11709_s7 }
   0x9   :  { %11760 = sst [smem:[#allocation55_spill]] %s11722_s20 }
   0xa   :  { %11761 = sst [smem:[#allocation56_spill]] %s11723_s21 }
   0xb   :  { %11762 = sst [smem:[#allocation57_spill]] %s11724_s22 }
   0xc   :  { %30 = vsyncpa [#allocation5], 0 }
   0xd   :  { %31 = vsyncpa [#allocation8], 0 }
   0xe   :  { %32 = vsyncpa [#allocation11], 0 }
   0xf   :  { %33 = vsyncpa [#allocation14], 0 }
  0x10   :  { %34 = vsyncpa [#allocation17], 0 }
  0x11   :  { %35 = vsyncpa [#allocation20], 0 }
  0x12   :  { %36 = vsyncpa [#allocation6], 0 }
  0x13   :  { %37 = vsyncpa [#allocation23], 0  ;;  %s9106_s4 = smov [#allocation7]   ;;  %s11763_s5 = sld [smem:[#allocation50_spill]] }
  0x14   :  { %s57_s30 = sshll.u32 %s9106_s4, 4  ;;  %s58_s30 = int_to_ptr.vmem [resolvable:$true] %s57_s30 }
  0x19   :  { %s8826_s1 = scalar_lea.hbm %s11763_s5, 256 }
  0x1a   :  { %p8827_p0 = scmp.ne.s32.totalorder %s11763_s5, %s8826_s1  ;;  %p8830_p1 = scmp.lt.u32.totalorder %s8826_s1, %s11763_s5 }
  0x1c   :  { %p8832_p2 = pnand %p8830_p1, %p8827_p0 }
  0x1e   :  { %8835 = shalt.err (!%p8832_p2)
}
  0x1f   :  { %s8836_s7 = scalar_lea.vmem %s58_s30, 256  ;;  %p8841_p4 = scmp.lt.s32.totalorder %s58_s30, %s58_s30 }
  0x20   :  { %p8837_p3 = scmp.ne.s32.totalorder %s58_s30, %s8836_s7  ;;  %p8842_p5 = scmp.lt.s32.totalorder %s8836_s7, %s8836_s7 }
  0x22   :  { %p8843_p6 = por %p8842_p5, %p8841_p4 }
  0x24   :  { %p8844_p7 = pnand %p8843_p6, %p8837_p3 }
  0x26   :  { %8847 = shalt.err (!%p8844_p7)
}
  0x27   :  { %s9107_s28 = smov 128   ;;  %s9108_s29 = smov 8  }
  0x28   :  { %63 = dma.hbm_to_vmem [thread:$0]  %s11763_s5, 256, %s58_s30, [#allocation8], %s9107_s28, %s9107_s28, %s9108_s29  }
  0x29   :  { %s9109_s4 = smov [#allocation10]   ;;  %s9110_s25 = smov [#allocation13]  }
  0x2a   :  { %s86_s24 = sshll.u32 %s9109_s4, 4  ;;  %s108_s1 = sshll.u32 %s9110_s25, 4  ;;  %s87_s24 = int_to_ptr.vmem [resolvable:$true] %s86_s24  ;;  %s109_s1 = int_to_ptr.vmem [resolvable:$true] %s108_s1 }
  0x2b   :  { %s11764_s6 = sld [smem:[#allocation54_spill]] }
  0x31   :  { %s8848_s27 = scalar_lea.hbm %s11764_s6, 64 }
  0x32   :  { %p8849_p8 = scmp.ne.s32.totalorder %s11764_s6, %s8848_s27  ;;  %p8852_p9 = scmp.lt.u32.totalorder %s8848_s27, %s11764_s6 }
  0x34   :  { %p8854_p10 = pnand %p8852_p9, %p8849_p8 }
  0x36   :  { %8857 = shalt.err (!%p8854_p10)
}
  0x37   :  { %s8858_s30 = scalar_lea.vmem %s87_s24, 64  ;;  %p8863_p12 = scmp.lt.s32.totalorder %s87_s24, %s87_s24 }
  0x38   :  { %p8859_p11 = scmp.ne.s32.totalorder %s87_s24, %s8858_s30  ;;  %p8864_p13 = scmp.lt.s32.totalorder %s8858_s30, %s8858_s30 }
  0x3a   :  { %p8865_p0 = por %p8864_p13, %p8863_p12 }
  0x3c   :  { %p8866_p1 = pnand %p8865_p0, %p8859_p11 }
  0x3e   :  { %8869 = shalt.err (!%p8866_p1)
}
  0x3f   :  { %89 = dma.hbm_to_vmem [thread:$0]  %s11764_s6, 64, %s87_s24, [#allocation11]  }
  0x40   :  { %s8870_s4 = scalar_lea.hbm %s11712_s10, 32 }
  0x41   :  { %p8871_p2 = scmp.ne.s32.totalorder %s11712_s10, %s8870_s4  ;;  %p8874_p3 = scmp.lt.u32.totalorder %s8870_s4, %s11712_s10 }
  0x43   :  { %p8876_p4 = pnand %p8874_p3, %p8871_p2 }
  0x45   :  { %8879 = shalt.err (!%p8876_p4)
}
  0x46   :  { %s8880_s2 = scalar_lea.vmem %s109_s1, 32  ;;  %p8885_p6 = scmp.lt.s32.totalorder %s109_s1, %s109_s1 }
  0x47   :  { %p8881_p5 = scmp.ne.s32.totalorder %s109_s1, %s8880_s2  ;;  %p8886_p7 = scmp.lt.s32.totalorder %s8880_s2, %s8880_s2 }
  0x49   :  { %p8887_p8 = por %p8886_p7, %p8885_p6 }
  0x4b   :  { %p8888_p9 = pnand %p8887_p8, %p8881_p5 }
  0x4d   :  { %8891 = shalt.err (!%p8888_p9)
}
  0x4e   :  { %111 = dma.hbm_to_vmem [thread:$0]  %s11712_s10, 32, %s109_s1, [#allocation14]  }
  0x4f   :  { %s9111_s27 = smov [#allocation16]   ;;  %s8892_s3 = scalar_lea.hbm %s11715_s13, 64 }
  0x50   :  { %s131_s7 = sshll.u32 %s9111_s27, 4  ;;  %p8893_p10 = scmp.ne.s32.totalorder %s11715_s13, %s8892_s3  ;;  %s132_s7 = int_to_ptr.vmem [resolvable:$true] %s131_s7 }
  0x51   :  { %p8896_p11 = scmp.lt.u32.totalorder %s8892_s3, %s11715_s13 }
  0x53   :  { %p8898_p12 = pnand %p8896_p11, %p8893_p10 }
  0x55   :  { %8901 = shalt.err (!%p8898_p12)
}
  0x56   :  { %s8902_s22 = scalar_lea.vmem %s132_s7, 64  ;;  %p8907_p0 = scmp.lt.s32.totalorder %s132_s7, %s132_s7 }
  0x57   :  { %p8903_p13 = scmp.ne.s32.totalorder %s132_s7, %s8902_s22  ;;  %p8908_p1 = scmp.lt.s32.totalorder %s8902_s22, %s8902_s22 }
  0x59   :  { %p8909_p2 = por %p8908_p1, %p8907_p0 }
  0x5b   :  { %p8910_p3 = pnand %p8909_p2, %p8903_p13 }
  0x5d   :  { %8913 = shalt.err (!%p8910_p3)
}
  0x5e   :  { %s9112_s10 = smov 32   ;;  %s9113_s1 = smov 2  }
  0x5f   :  { %137 = dma.hbm_to_vmem [thread:$0]  %s11715_s13, 64, %s132_s7, [#allocation17], %s9112_s10, %s9112_s10, %s9113_s1  }
  0x60   :  { %s9114_s2 = smov [#allocation4]   ;;  %s9115_s6 = smov [#allocation9]  }
  0x61   :  { %s46_s24 = sshll.u32 %s9114_s2, 4  ;;  %s71_s27 = sshll.u32 %s9115_s6, 4  ;;  %s47_s24 = int_to_ptr.vmem [resolvable:$true] %s46_s24  ;;  %s9303_s27 = int_to_ptr.vmem [resolvable:$true] %s71_s27 }
  0x62   :  { %s11765_s3 = sld [smem:[#allocation48_spill]] }
  0x68   :  { %s8914_s21 = scalar_lea.hbm %s11765_s3, 32 }
  0x69   :  { %p8915_p4 = scmp.ne.s32.totalorder %s11765_s3, %s8914_s21  ;;  %p8918_p5 = scmp.lt.u32.totalorder %s8914_s21, %s11765_s3 }
  0x6b   :  { %p8920_p6 = pnand %p8918_p5, %p8915_p4 }
  0x6d   :  { %8923 = shalt.err (!%p8920_p6)
}
  0x6e   :  { %s8924_s13 = scalar_lea.vmem %s47_s24, 32  ;;  %p8929_p8 = scmp.lt.s32.totalorder %s47_s24, %s47_s24 }
  0x6f   :  { %p8925_p7 = scmp.ne.s32.totalorder %s47_s24, %s8924_s13  ;;  %p8930_p9 = scmp.lt.s32.totalorder %s8924_s13, %s8924_s13 }
  0x71   :  { %p8931_p10 = por %p8930_p9, %p8929_p8 }
  0x73   :  { %p8932_p11 = pnand %p8931_p10, %p8925_p7 }
  0x75   :  { %8935 = shalt.err (!%p8932_p11)
}
  0x76   :  { %49 = dma.hbm_to_vmem [thread:$0]  %s11765_s3, 32, %s47_s24, [#allocation5]  }
  0x77   :  { %s11766_s6 = sld [smem:[#allocation52_spill]] }
  0x7d   :  { %s8936_s30 = scalar_lea.hbm %s11766_s6, 384 }
  0x7e   :  { %p8937_p12 = scmp.ne.s32.totalorder %s11766_s6, %s8936_s30  ;;  %p8940_p13 = scmp.lt.u32.totalorder %s8936_s30, %s11766_s6 }
  0x80   :  { %p8942_p0 = pnand %p8940_p13, %p8937_p12 }
  0x82   :  { %8945 = shalt.err (!%p8942_p0)
}
  0x83   :  { %s8946_s20 = scalar_lea.vmem %s9303_s27, 384  ;;  %p8951_p2 = scmp.lt.s32.totalorder %s9303_s27, %s9303_s27 }
  0x84   :  { %p8947_p1 = scmp.ne.s32.totalorder %s9303_s27, %s8946_s20  ;;  %p8952_p3 = scmp.lt.s32.totalorder %s8946_s20, %s8946_s20 }
  0x86   :  { %p8953_p4 = por %p8952_p3, %p8951_p2 }
  0x88   :  { %p8954_p5 = pnand %p8953_p4, %p8947_p1 }
  0x8a   :  { %8957 = shalt.err (!%p8954_p5)
}
  0x8b   :  { %77 = dma.hbm_to_vmem [thread:$0]  %s11766_s6, 384, %s9303_s27, [#allocation8], %s9107_s28, %s9107_s28, %s9108_s29  }
  0x8c   :  { %s9116_s22 = smov [#allocation12]   ;;  %s9117_s7 = smov [#allocation15]  }
  0x8d   :  { %s98_s13 = sshll.u32 %s9116_s22, 4  ;;  %s119_s25 = sshll.u32 %s9117_s7, 4  ;;  %s99_s13 = int_to_ptr.vmem [resolvable:$true] %s98_s13  ;;  %s9337_s25 = int_to_ptr.vmem [resolvable:$true] %s119_s25 }
  0x8e   :  { %s8958_s30 = scalar_lea.hbm %s11711_s9, 64 }
  0x8f   :  { %p8959_p6 = scmp.ne.s32.totalorder %s11711_s9, %s8958_s30  ;;  %p8962_p7 = scmp.lt.u32.totalorder %s8958_s30, %s11711_s9 }
  0x91   :  { %p8964_p8 = pnand %p8962_p7, %p8959_p6 }
  0x93   :  { %8967 = shalt.err (!%p8964_p8)
}
  0x94   :  { %s8968_s27 = scalar_lea.vmem %s99_s13, 64  ;;  %p8973_p10 = scmp.lt.s32.totalorder %s99_s13, %s99_s13 }
  0x95   :  { %p8969_p9 = scmp.ne.s32.totalorder %s99_s13, %s8968_s27  ;;  %p8974_p11 = scmp.lt.s32.totalorder %s8968_s27, %s8968_s27 }
  0x97   :  { %p8975_p12 = por %p8974_p11, %p8973_p10 }
  0x99   :  { %p8976_p13 = pnand %p8975_p12, %p8969_p9 }
  0x9b   :  { %8979 = shalt.err (!%p8976_p13)
}
  0x9c   :  { %101 = dma.hbm_to_vmem [thread:$0]  %s11711_s9, 64, %s99_s13, [#allocation11]  }
  0x9d   :  { %s8980_s22 = scalar_lea.hbm %s11714_s12, 1024 }
  0x9e   :  { %p8981_p0 = scmp.ne.s32.totalorder %s11714_s12, %s8980_s22  ;;  %p8984_p1 = scmp.lt.u32.totalorder %s8980_s22, %s11714_s12 }
  0xa0   :  { %p8986_p2 = pnand %p8984_p1, %p8981_p0 }
  0xa2   :  { %8989 = shalt.err (!%p8986_p2)
}
  0xa3   :  { %s8990_s5 = scalar_lea.vmem %s9337_s25, 1024  ;;  %p8995_p4 = scmp.lt.s32.totalorder %s9337_s25, %s9337_s25 }
  0xa4   :  { %p8991_p3 = scmp.ne.s32.totalorder %s9337_s25, %s8990_s5  ;;  %p8996_p5 = scmp.lt.s32.totalorder %s8990_s5, %s8990_s5 }
  0xa6   :  { %p8997_p6 = por %p8996_p5, %p8995_p4 }
  0xa8   :  { %p8998_p7 = pnand %p8997_p6, %p8991_p3 }
  0xaa   :  { %9001 = shalt.err (!%p8998_p7)
}
  0xab   :  { %125 = dma.hbm_to_vmem [thread:$0]  %s11714_s12, 1024, %s9337_s25, [#allocation14], %s9107_s28, %s9107_s28, %s9108_s29  }
  0xac   :  { %s9118_s0 = smov [#allocation18]   ;;  %s9119_s4 = smov [#allocation19]  }
  0xad   :  { %s147_s21 = sshll.u32 %s9118_s0, 4  ;;  %s160_s27 = sshll.u32 %s9119_s4, 4  ;;  %s148_s21 = int_to_ptr.vmem [resolvable:$true] %s147_s21  ;;  %s161_s27 = int_to_ptr.vmem [resolvable:$true] %s160_s27 }
  0xae   :  { %s9002_s24 = scalar_lea.hbm %s11718_s16, 768 }
  0xaf   :  { %p9003_p8 = scmp.ne.s32.totalorder %s11718_s16, %s9002_s24  ;;  %p9006_p9 = scmp.lt.u32.totalorder %s9002_s24, %s11718_s16 }
  0xb1   :  { %p9008_p10 = pnand %p9006_p9, %p9003_p8 }
  0xb3   :  { %9011 = shalt.err (!%p9008_p10)
}
  0xb4   :  { %s9012_s12 = scalar_lea.vmem %s148_s21, 768  ;;  %p9017_p12 = scmp.lt.s32.totalorder %s148_s21, %s148_s21 }
  0xb5   :  { %p9013_p11 = scmp.ne.s32.totalorder %s148_s21, %s9012_s12  ;;  %p9018_p13 = scmp.lt.s32.totalorder %s9012_s12, %s9012_s12 }
  0xb7   :  { %p9019_p0 = por %p9018_p13, %p9017_p12 }
  0xb9   :  { %p9020_p1 = pnand %p9019_p0, %p9013_p11 }
  0xbb   :  { %9023 = shalt.err (!%p9020_p1)
}
  0xbc   :  { %153 = dma.hbm_to_vmem [thread:$0]  %s11718_s16, 768, %s148_s21, [#allocation17], %s9107_s28, %s9107_s28, %s9108_s29  }
  0xbd   :  { %s9024_s9 = scalar_lea.hbm %s11719_s17, 32 }
  0xbe   :  { %p9025_p2 = scmp.ne.s32.totalorder %s11719_s17, %s9024_s9  ;;  %p9028_p3 = scmp.lt.u32.totalorder %s9024_s9, %s11719_s17 }
  0xc0   :  { %p9030_p4 = pnand %p9028_p3, %p9025_p2 }
  0xc2   :  { %9033 = shalt.err (!%p9030_p4)
}
  0xc3   :  { %s9034_s20 = scalar_lea.vmem %s161_s27, 32  ;;  %p9039_p6 = scmp.lt.s32.totalorder %s161_s27, %s161_s27 }
  0xc4   :  { %p9035_p5 = scmp.ne.s32.totalorder %s161_s27, %s9034_s20  ;;  %p9040_p7 = scmp.lt.s32.totalorder %s9034_s20, %s9034_s20 }
  0xc6   :  { %p9041_p8 = por %p9040_p7, %p9039_p6 }
  0xc8   :  { %p9042_p9 = pnand %p9041_p8, %p9035_p5 }
  0xca   :  { %9045 = shalt.err (!%p9042_p9)
}
  0xcb   :  { %163 = dma.hbm_to_vmem [thread:$0]  %s11719_s17, 32, %s161_s27, [#allocation20]  }
  0xcc   :  { %9090 = dma.done.wait [#allocation5], 32  }
  0xcd   :  { %9091 = vsyncadd [#allocation5], 4294967264 }
  0xce   :  { %9092 = dma.done.wait [#allocation8], 640  }
  0xcf   :  { %9093 = vsyncadd [#allocation8], 4294966656 }
  0xd0   :  { %9094 = dma.done.wait [#allocation11], 128  }
  0xd1   :  { %9095 = vsyncadd [#allocation11], 4294967168 }
  0xd2   :  { %9096 = dma.done.wait [#allocation14], 1056  }
  0xd3   :  { %9097 = vsyncadd [#allocation14], 4294966240 }
  0xd4   :  { %9098 = dma.done.wait [#allocation17], 832  }
  0xd5   :  { %9099 = vsyncadd [#allocation17], 4294966464 }
  0xd6   :  { %9100 = dma.done.wait [#allocation20], 32  }
  0xd7   :  { %9101 = vsyncadd [#allocation20], 4294967264  ;;  %vm224_vm0 = vcmask 130048   ;;  %v201_v0 = vld [vmem:[#allocation9] sm:$0xff]  ;;  %v202_v1 = vld [vmem:[#allocation9 + $0x8] sm:$0xff]  ;;  %s11767_s22 = sld [smem:[#allocation47_spill]] }
  0xd8   :  { %v8442_v3 = vpack.c.bf16 %v202_v1, %v201_v0  ;;  %v8507_v6 = vld [vmem:[#allocation15 + $0x20] ss:$8 sps:$4 sm:$0xff]   ;;  %v8509_v9 = vld [vmem:[#allocation15 + $0x24] ss:$8 sps:$4 sm:$0xff]   ;;  %v8514_v25 = vld [vmem:[#allocation15 + $0x34] ss:$8 sps:$4 sm:$0xff]  }
  0xd9   :  { %v8510_v10 = vld [vmem:[#allocation15 + $0x4] ss:$8 sps:$4 sm:$0xff]   ;;  %v8512_v26 = vld [vmem:[#allocation15 + $0x30] ss:$8 sps:$4 sm:$0xff]   ;;  %v8515_v27 = vld [vmem:[#allocation15 + $0x14] ss:$8 sps:$4 sm:$0xff]  }
  0xda   :  { %8443 = vmatprep.subr.bf16.mxu0 %v8442_v3  ;;  %527 = vmatprep.subr.bf16.mxu1 %v8510_v10  ;;  %v459_v22 = vld [vmem:[#allocation15] sm:$0xff]  ;;  %v460_v23 = vld [vmem:[#allocation15 + $0x8] sm:$0xff]  ;;  %v8517_v28 = vld [vmem:[#allocation15 + $0x10] ss:$8 sps:$4 sm:$0xff]   ;;  %v9120_v29 = vmov 0   ;;  %vm418_vm1 = vcmask 261120  }
  0xdb   :  { %8445 = vmatpush3.bf16.msra.mxu0 %v8442_v3  ;;  %v6854_v24 = vcombine.low %v459_v22, %v460_v23  ;;  %559 = vmatprep.mubr.bf16.mxu1 %v9120_v29  ;;  %v11737_v30 = vmov 0.0   ;;  %v9471_v31 = vld [vmem:[#allocation9 + $0x10] ss:$0 sm:$0xff]  ;;  %s11768_s4 = sld [smem:[#allocation53_spill]]  ;;  %v857_v48 = vld [vmem:[#allocation10] sm:$0xf] }
  0xdc   :  { %726 = vmatprep.subr.bf16.mxu0 %v8509_v9  ;;  %8505 = vset.pattern.permute.xlu1 %v9120_v29  ;;  %1130 = vst.msk [vmem:[#allocation2] sm:$0xff] %vm418_vm1, %v11737_v30  ;;  %1131 = vst.msk [vmem:[#allocation2 + $0x8] sm:$0xff] %vm418_vm1, %v11737_v30  ;;  %vm866_vm2 = vcmask 1043456   ;;  %vm9122_vm3 = vmmov 0   ;;  %vm862_vm4 = vcmask 31744   ;;  %vm957_vm5 = vcmask 785408  }
  0xdd   :  { %v204_v2 = vld [vmem:[%s11767_s22] sm:$0xff]  ;;  %v205_v4 = vld [vmem:[%s11767_s22 + $0x8] sm:$0xff]  ;;  %v206_v5 = vld [vmem:[%s11767_s22 + $0x10] sm:$0xff]  ;;  %528 = vmatpush1.bf16.msra.mxu1 %v6854_v24  ;;  %8506 = vset.pattern.permute.xlu0 %v9120_v29  ;;  %s11780_s2 = sld [smem:[#allocation49_spill]]  ;;  %vm1157_vm6 = vcmask 253952   ;;  %s9126_s0 = smov 96  }
  0xde   :  { %7615 = vmatprep.mubr.msk.f32.mxu0 %vm224_vm0, %v204_v2  ;;  %v207_v7 = vld [vmem:[%s11767_s22 + $0x18] sm:$0xff]  ;;  %v208_v8 = vld [vmem:[%s11767_s22 + $0x20] sm:$0xff]  ;;  %v209_v11 = vld [vmem:[%s11767_s22 + $0x28] sm:$0xff]  ;;  %529 = vmatprep.subr.bf16.mxu1 %v8515_v27  ;;  %vm1377_vm7 = vcmask 523264   ;;  %s11781_s16 = sld [smem:[#allocation51_spill]]  ;;  %s11783_s21 = sld [smem:[#allocation55_spill]] }
  0xdf   :  { %7616 = vmatmul.mubr.msk.f32.vlgmr.msra.gmra.mrb[0].mxu0 %vm224_vm0, %v205_v4  ;;  %v210_v12 = vld [vmem:[%s11767_s22 + $0x30] sm:$0xff]  ;;  %v211_v13 = vld [vmem:[%s11767_s22 + $0x38] sm:$0xff]  ;;  %v212_v14 = vld [vmem:[%s11767_s22 + $0x40] sm:$0xff]  ;;  %vm2081_vm8 = vcmask 15360   ;;  %vm2106_vm11 = vcmask 48128  }
  0xe0   :  { %7618 = vmatprep.mubr.msk.f32.mxu0 %vm224_vm0, %v206_v5  ;;  %727 = vmatpush1.bf16.msra.mxu0 %v8507_v6  ;;  %v213_v15 = vld [vmem:[%s11767_s22 + $0x48] sm:$0xff]  ;;  %v214_v16 = vld [vmem:[%s11767_s22 + $0x50] sm:$0xff]  ;;  %v215_v17 = vld [vmem:[%s11767_s22 + $0x58] sm:$0xff] }
  0xe1   :  { %v216_v18 = vld [vmem:[%s11767_s22 + $0x60] sm:$0xff]  ;;  %v217_v19 = vld [vmem:[%s11767_s22 + $0x68] sm:$0xff]  ;;  %v218_v20 = vld [vmem:[%s11767_s22 + $0x70] sm:$0xff]  ;;  %728 = vmatprep.subr.bf16.mxu0 %v8514_v25  ;;  %530 = vmatpush1.bf16.msra.mxu1 %v8517_v28 }
  0xe2   :  { %v219_v21 = vld [vmem:[%s11767_s22 + $0x78] sm:$0xff]  ;;  %7639 = vmatprep.subr.mxu1 %v11737_v30  ;;  %v9476_v33 = vld [vmem:[%s11768_s4 + $0x8] sm:$0xff]  ;;  %v435_v36 = vld [vmem:[%s11768_s4] sm:$0xff]  ;;  %s9125_s22 = smov 64  }
  0xe3   :  { %7619 = vmatmul.mubr.msk.f32.gmra.mrb[2].mxu0 %vm224_vm0, %v207_v7  ;;  %v9495_v42 = vld [vmem:[%s11768_s4 + $0x18] sm:$0xff]  ;;  %v9501_v45 = vld [vmem:[%s11768_s4 + $0x10] sm:$0xff]  ;;  %v440_v53 = vld [vmem:[%s11768_s4 + $0x28] sm:$0xff] }
  0xe4   :  { %7621 = vmatprep.mubr.msk.f32.mxu0 %vm224_vm0, %v208_v8  ;;  %729 = vmatpush1.bf16.msra.mxu0 %v8512_v26  ;;  %v439_v56 = vld [vmem:[%s11768_s4 + $0x20] sm:$0xff]  ;;  %v442_v63 = vld [vmem:[%s11768_s4 + $0x38] sm:$0xff]  ;;  %v441_v2 = vld [vmem:[%s11768_s4 + $0x30] sm:$0xff] }
  0xe7   :  { %7622 = vmatmul.mubr.msk.f32.gmra.mrb[4].mxu0 %vm224_vm0, %v209_v11 }
  0xe8   :  { %7624 = vmatprep.mubr.msk.f32.mxu0 %vm224_vm0, %v210_v12 }
  0xeb   :  { %7625 = vmatmul.mubr.msk.f32.gmra.mrb[6].mxu0 %vm224_vm0, %v211_v13 }
  0xec   :  { %7627 = vmatprep.mubr.msk.f32.mxu0 %vm224_vm0, %v212_v14 }
  0xef   :  { %7628 = vmatmul.mubr.msk.f32.gmra.mrb[8].mxu0 %vm224_vm0, %v213_v15 }
  0xf0   :  { %7630 = vmatprep.mubr.msk.f32.mxu0 %vm224_vm0, %v214_v16 }
  0xf3   :  { %7631 = vmatmul.mubr.msk.f32.gmra.mrb[10].mxu0 %vm224_vm0, %v215_v17 }
  0xf4   :  { %7633 = vmatprep.mubr.msk.f32.mxu0 %vm224_vm0, %v216_v18 }
  0xf7   :  { %7634 = vmatmul.mubr.msk.f32.gmra.mrb[12].mxu0 %vm224_vm0, %v217_v19 }
  0xf8   :  { %7636 = vmatprep.mubr.msk.f32.mxu0 %vm224_vm0, %v218_v20 }
  0xfb   :  { %7637 = vmatmul.mubr.msk.f32.gmra.mrb[14].mxu0 %vm224_vm0, %v219_v21 }
  0xfc   :  { %758 = vmatprep.mubr.bf16.mxu0 %v9120_v29 }
 0x1b2   :  { %v7617_v32 = vpop.f32.mrb[0].mxu0 }
 0x1b3   :  { %v345_v34 = vadd.f32 %v7617_v32, %v9471_v31  ;;  %v339_v35 = vpop.f32.mrb[1].mxu0 }
 0x1b4   :  { %v340_v37 = vadd.f32 %v9471_v31, %v339_v35 }
 0x1b5   :  { %420 = vst.msk [vmem:[%s11725_s23 + $0x8] sm:$0xff] %vm418_vm1, %v345_v34  ;;  %v444_v38 = vadd.f32 %v9476_v33, %v345_v34 }
 0x1b6   :  { %419 = vst.msk [vmem:[%s11725_s23] sm:$0xff] %vm418_vm1, %v340_v37  ;;  %v443_v39 = vadd.f32 %v435_v36, %v340_v37  ;;  %v661_v40 = vpack.c.bf16 %v345_v34, %v340_v37  ;;  %v7620_v41 = vpop.f32.mrb[2].mxu0 }
 0x1b7   :  { %v355_v43 = vadd.f32 %v7620_v41, %v9471_v31  ;;  %v349_v44 = vpop.f32.mrb[3].mxu0 }
 0x1b8   :  { %v463_v46 = vpack.c.bf16 %v444_v38, %v443_v39  ;;  %6870 = vmatmul.mubr.msk.bf16.vlgmr.msra.gmra.mrb[16].mxu0 %vm418_vm1, %v661_v40  ;;  %v350_v47 = vadd.f32 %v9471_v31, %v349_v44  ;;  %v942_v44 = vld [vmem:[%s11710_s8 + $0x8] sm:$0xff] }
 0x1b9   :  { %422 = vst.msk [vmem:[%s11725_s23 + $0x18] sm:$0xff] %vm418_vm1, %v355_v43  ;;  %v446_v49 = vadd.f32 %v9495_v42, %v355_v43  ;;  %768 = vmatprep.mubr.bf16.mxu0 %v9120_v29 }
 0x1ba   :  { %421 = vst.msk [vmem:[%s11725_s23 + $0x10] sm:$0xff] %vm418_vm1, %v350_v47  ;;  %v445_v50 = vadd.f32 %v9501_v45, %v350_v47  ;;  %v662_v51 = vpack.c.bf16 %v355_v43, %v350_v47  ;;  %6858 = vmatmul.mubr.msk.bf16.vlgmr.msra.gmra.mrb[0].mxu1 %vm418_vm1, %v463_v46  ;;  %v7623_v52 = vpop.f32.mrb[4].mxu0  ;;  %v856_v43 = vld [vmem:[#allocation4] sm:$0x3]  ;;  %v9123_v46 = vmov 0.0|0.0  }
 0x1bb   :  { %7640 = vmatpush3.msk.msra.mxu1 %vm866_vm2, %v857_v48  ;;  %v365_v54 = vadd.f32 %v7623_v52, %v9471_v31  ;;  %569 = vmatprep.mubr.bf16.mxu1 %v9120_v29  ;;  %v359_v55 = vpop.f32.mrb[5].mxu0  ;;  %v943_v47 = vld [vmem:[%s11710_s8 + $0x10] sm:$0xff]  ;;  %v944_v48 = vld [vmem:[%s11710_s8 + $0x18] sm:$0xff] }
 0x1bc   :  { %v464_v57 = vpack.c.bf16 %v446_v49, %v445_v50  ;;  %v360_v58 = vadd.f32 %v9471_v31, %v359_v55  ;;  %8446 = vmatprep.subr.bf16.mxu1 %v9123_v46  ;;  %8464 = vmatprep.subr.bf16.mxu0 %v9123_v46  ;;  %v8450_v49 = vpack.c.bf16 %v944_v48, %v943_v47  ;;  %v945_v50 = vld [vmem:[%s11710_s8 + $0x20] sm:$0xff] }
 0x1bd   :  { %424 = vst.msk [vmem:[%s11725_s23 + $0x28] sm:$0xff] %vm418_vm1, %v365_v54  ;;  %v448_v59 = vadd.f32 %v440_v53, %v365_v54 }
 0x1be   :  { %423 = vst.msk [vmem:[%s11725_s23 + $0x20] sm:$0xff] %vm418_vm1, %v360_v58  ;;  %v447_v60 = vadd.f32 %v439_v56, %v360_v58  ;;  %v663_v61 = vpack.c.bf16 %v365_v54, %v360_v58  ;;  %v7626_v62 = vpop.f32.mrb[6].mxu0  ;;  %v948_v54 = vld [vmem:[%s11710_s8 + $0x38] sm:$0xff] }
 0x1bf   :  { %v375_v0 = vadd.f32 %v7626_v62, %v9471_v31  ;;  %v369_v1 = vpop.f32.mrb[7].mxu0  ;;  %v6881_v62 = vld [vmem:[%s11710_s8 + $0x60] sm:$0xff] }
 0x1c0   :  { %6871 = vmatmul.mubr.msk.bf16.gmra.mrb[20].mxu0 %vm418_vm1, %v662_v51  ;;  %v465_v3 = vpack.c.bf16 %v448_v59, %v447_v60  ;;  %v370_v4 = vadd.f32 %v9471_v31, %v369_v1  ;;  %v946_v51 = vld [vmem:[%s11710_s8 + $0x28] sm:$0xff]  ;;  %v951_v59 = vld [vmem:[%s11710_s8 + $0x50] sm:$0xff]  ;;  %v952_v60 = vld [vmem:[%s11710_s8 + $0x58] sm:$0xff] }
 0x1c1   :  { %778 = vmatprep.mubr.bf16.mxu0 %v9120_v29  ;;  %426 = vst.msk [vmem:[%s11725_s23 + $0x38] sm:$0xff] %vm418_vm1, %v375_v0  ;;  %v450_v5 = vadd.f32 %v442_v63, %v375_v0  ;;  %v8453_v52 = vpack.c.bf16 %v946_v51, %v945_v50 }
 0x1c2   :  { %6859 = vmatmul.mubr.msk.bf16.gmra.mrb[4].mxu1 %vm418_vm1, %v464_v57  ;;  %425 = vst.msk [vmem:[%s11725_s23 + $0x30] sm:$0xff] %vm418_vm1, %v370_v4  ;;  %v449_v6 = vadd.f32 %v441_v2, %v370_v4  ;;  %v664_v7 = vpack.c.bf16 %v375_v0, %v370_v4  ;;  %v7629_v8 = vpop.f32.mrb[8].mxu0  ;;  %v950_v57 = vld [vmem:[%s11710_s8 + $0x48] sm:$0xff]  ;;  %v6883_v0 = vld [vmem:[%s11710_s8 + $0x70] sm:$0xff]  ;;  %v6885_v4 = vld [vmem:[%s11710_s8 + $0x80] sm:$0xff] }
 0x1c3   :  { %579 = vmatprep.mubr.bf16.mxu1 %v9120_v29  ;;  %v385_v9 = vadd.f32 %v7629_v8, %v9471_v31  ;;  %v379_v10 = vpop.f32.mrb[9].mxu0  ;;  %v6888_v8 = vld [vmem:[%s11710_s8 + $0x98] sm:$0xff] }
 0x1c4   :  { %v466_v11 = vpack.c.bf16 %v450_v5, %v449_v6  ;;  %v380_v12 = vadd.f32 %v9471_v31, %v379_v10  ;;  %v6886_v5 = vld [vmem:[%s11710_s8 + $0x88] sm:$0xff]  ;;  %v6889_v10 = vld [vmem:[%s11710_s8 + $0xa0] sm:$0xff] }
 0x1c5   :  { %428 = vst.msk [vmem:[%s11725_s23 + $0x48] sm:$0xff] %vm418_vm1, %v385_v9  ;;  %v452_v13 = vadd.f32 %v9476_v33, %v385_v9  ;;  %v8471_v6 = vpack.c.bf16 %v6886_v5, %v6885_v4 }
 0x1c6   :  { %427 = vst.msk [vmem:[%s11725_s23 + $0x40] sm:$0xff] %vm418_vm1, %v380_v12  ;;  %v451_v14 = vadd.f32 %v435_v36, %v380_v12  ;;  %v665_v15 = vpack.c.bf16 %v385_v9, %v380_v12  ;;  %v7632_v16 = vpop.f32.mrb[10].mxu0 }
 0x1c7   :  { %v395_v17 = vadd.f32 %v7632_v16, %v9471_v31  ;;  %v389_v18 = vpop.f32.mrb[11].mxu0 }
 0x1c8   :  { %6872 = vmatmul.mubr.msk.bf16.gmra.mrb[24].mxu0 %vm418_vm1, %v663_v61  ;;  %v467_v19 = vpack.c.bf16 %v452_v13, %v451_v14  ;;  %v390_v20 = vadd.f32 %v9471_v31, %v389_v18  ;;  %v8462_v61 = vpack.c.bf16 %v952_v60, %v951_v59  ;;  %v6891_v13 = vld [vmem:[%s11710_s8 + $0xb0] sm:$0xff]  ;;  %v6892_v14 = vld [vmem:[%s11710_s8 + $0xb8] sm:$0xff] }
 0x1c9   :  { %788 = vmatprep.mubr.bf16.mxu0 %v9120_v29  ;;  %430 = vst.msk [vmem:[%s11725_s23 + $0x58] sm:$0xff] %vm418_vm1, %v395_v17  ;;  %v454_v21 = vadd.f32 %v9495_v42, %v395_v17  ;;  %v8480_v16 = vpack.c.bf16 %v6892_v14, %v6891_v13 }
 0x1ca   :  { %6860 = vmatmul.mubr.msk.bf16.gmra.mrb[8].mxu1 %vm418_vm1, %v465_v3  ;;  %429 = vst.msk [vmem:[%s11725_s23 + $0x50] sm:$0xff] %vm418_vm1, %v390_v20  ;;  %v453_v22 = vadd.f32 %v9501_v45, %v390_v20  ;;  %v666_v23 = vpack.c.bf16 %v395_v17, %v390_v20  ;;  %v7635_v24 = vpop.f32.mrb[12].mxu0 }
 0x1cb   :  { %589 = vmatprep.mubr.bf16.mxu1 %v9120_v29  ;;  %v405_v25 = vadd.f32 %v7635_v24, %v9471_v31  ;;  %v399_v26 = vpop.f32.mrb[13].mxu0 }
 0x1cc   :  { %v468_v27 = vpack.c.bf16 %v454_v21, %v453_v22  ;;  %v400_v28 = vadd.f32 %v9471_v31, %v399_v26  ;;  %v471_v21 = vld [vmem:[#allocation16] sm:$0x3] }
 0x1cd   :  { %432 = vst.msk [vmem:[%s11725_s23 + $0x68] sm:$0xff] %vm418_vm1, %v405_v25  ;;  %v456_v32 = vadd.f32 %v440_v53, %v405_v25  ;;  %v947_v53 = vld [vmem:[%s11710_s8 + $0x30] sm:$0xff] }
 0x1ce   :  { %431 = vst.msk [vmem:[%s11725_s23 + $0x60] sm:$0xff] %vm418_vm1, %v400_v28  ;;  %v455_v33 = vadd.f32 %v439_v56, %v400_v28  ;;  %v667_v34 = vpack.c.bf16 %v405_v25, %v400_v28  ;;  %v7638_v35 = vpop.f32.mrb[14].mxu0  ;;  %v8456_v55 = vpack.c.bf16 %v948_v54, %v947_v53  ;;  %v949_v56 = vld [vmem:[%s11710_s8 + $0x40] sm:$0xff] }
 0x1cf   :  { %v415_v36 = vadd.f32 %v7638_v35, %v9471_v31  ;;  %v409_v37 = vpop.f32.mrb[15].mxu0  ;;  %v8459_v58 = vpack.c.bf16 %v950_v57, %v949_v56 }
 0x1d0   :  { %6873 = vmatmul.mubr.msk.bf16.gmra.mrb[28].mxu0 %vm418_vm1, %v664_v7  ;;  %v469_v38 = vpack.c.bf16 %v456_v32, %v455_v33  ;;  %v410_v39 = vadd.f32 %v9471_v31, %v409_v37  ;;  %v6887_v7 = vld [vmem:[%s11710_s8 + $0x90] sm:$0xff] }
 0x1d1   :  { %798 = vmatprep.mubr.bf16.mxu0 %v9120_v29  ;;  %434 = vst.msk [vmem:[%s11725_s23 + $0x78] sm:$0xff] %vm418_vm1, %v415_v36  ;;  %v458_v40 = vadd.f32 %v442_v63, %v415_v36  ;;  %v6882_v63 = vld [vmem:[%s11710_s8 + $0x68] sm:$0xff]  ;;  %v8474_v9 = vpack.c.bf16 %v6888_v8, %v6887_v7 }
 0x1d2   :  { %6861 = vmatmul.mubr.msk.bf16.gmra.mrb[12].mxu1 %vm418_vm1, %v466_v11  ;;  %433 = vst.msk [vmem:[%s11725_s23 + $0x70] sm:$0xff] %vm418_vm1, %v410_v39  ;;  %v457_v41 = vadd.f32 %v441_v2, %v410_v39  ;;  %v668_v42 = vpack.c.bf16 %v415_v36, %v410_v39  ;;  %v8465_v1 = vpack.c.bf16 %v6882_v63, %v6881_v62  ;;  %v6884_v2 = vld [vmem:[%s11710_s8 + $0x78] sm:$0xff]  ;;  %v6890_v11 = vld [vmem:[%s11710_s8 + $0xa8] sm:$0xff] }
 0x1d3   :  { %599 = vmatprep.mubr.bf16.mxu1 %v9120_v29  ;;  %v8468_v3 = vpack.c.bf16 %v6884_v2, %v6883_v0  ;;  %v8477_v12 = vpack.c.bf16 %v6890_v11, %v6889_v10 }
 0x1d4   :  { %v470_v31 = vpack.c.bf16 %v458_v40, %v457_v41  ;;  %8466 = vmatpush3.bf16.msra.mxu0 %v8465_v1 }
 0x1d5   :  { %8467 = vmatprep.subr.bf16.mxu0 %v9123_v46 }
 0x1d8   :  { %6874 = vmatmul.mubr.msk.bf16.gmra.mrb[32].mxu0 %vm418_vm1, %v665_v15  ;;  %v11736_v15 = vlaneseq }
 0x1d9   :  { %808 = vmatprep.mubr.bf16.mxu0 %v9120_v29  ;;  %8469 = vmatpush3.bf16.msra.mxu0 %v8468_v3 }
 0x1da   :  { %6862 = vmatmul.mubr.msk.bf16.gmra.mrb[16].mxu1 %vm418_vm1, %v467_v19  ;;  %8470 = vmatprep.subr.bf16.mxu0 %v9123_v46  ;;  %v9699_v17 = vshrl.u32 %v11736_v15, 7  ;;  %v670_v19 = vld [vmem:[#allocation16 + $0x2] sm:$0x3] }
 0x1db   :  { %609 = vmatprep.mubr.bf16.mxu1 %v9120_v29 }
 0x1dc   :  { %v9703_v18 = vsub.s32 0, %v9699_v17  ;;  %v9706_v20 = vsub.s32 1, %v9699_v17 }
 0x1dd   :  { %8472 = vmatpush3.bf16.msra.mxu0 %v8471_v6 }
 0x1de   :  { %8473 = vmatprep.subr.bf16.mxu0 %v9123_v46  ;;  %v9709_v22 = vrot.slane %v670_v19, %v9703_v18  ;;  %v9715_v25 = vrot.slane %v670_v19, %v9706_v20  ;;  %v9718_v26 = vrot.slane %v471_v21, %v9706_v20 }
 0x1e0   :  { %6875 = vmatmul.mubr.msk.bf16.gmra.mrb[36].mxu0 %vm418_vm1, %v666_v23  ;;  %v9712_v23 = vrot.slane %v471_v21, %v9703_v18 }
 0x1e1   :  { %818 = vmatprep.mubr.bf16.mxu0 %v9120_v29  ;;  %8475 = vmatpush3.bf16.msra.mxu0 %v8474_v9 }
 0x1e2   :  { %6863 = vmatmul.mubr.msk.bf16.gmra.mrb[20].mxu1 %vm418_vm1, %v468_v27  ;;  %8476 = vmatprep.subr.bf16.mxu0 %v9123_v46 }
 0x1e3   :  { %619 = vmatprep.mubr.bf16.mxu1 %v9120_v29 }
 0x1e5   :  { %8478 = vmatpush3.bf16.msra.mxu0 %v8477_v12 }
 0x1e6   :  { %8479 = vmatprep.subr.bf16.mxu0 %v9123_v46 }
 0x1e8   :  { %6876 = vmatmul.mubr.msk.bf16.gmra.mrb[40].mxu0 %vm418_vm1, %v667_v34 }
 0x1e9   :  { %828 = vmatprep.mubr.bf16.mxu0 %v9120_v29  ;;  %8481 = vmatpush3.bf16.msra.mxu0 %v8480_v16 }
 0x1ea   :  { %6864 = vmatmul.mubr.msk.bf16.gmra.mrb[24].mxu1 %vm418_vm1, %v469_v38  ;;  %7698 = vmatprep.subr.bf16.mxu0 %v11737_v30 }
 0x1eb   :  { %629 = vmatprep.mubr.bf16.mxu1 %v9120_v29  ;;  %v941_v29 = vld [vmem:[%s11710_s8] sm:$0xff] }
 0x1ec   :  { %v8447_v45 = vpack.c.bf16 %v942_v44, %v941_v29 }
 0x1f0   :  { %6877 = vmatmul.mubr.msk.bf16.gmra.mrb[44].mxu0 %vm418_vm1, %v668_v42 }
 0x1f1   :  { %7695 = vmatprep.mubr.msk.f32.mxu0 %vm9122_vm3, %v11737_v30 }
 0x1f2   :  { %6865 = vmatmul.mubr.msk.bf16.gmra.mrb[28].mxu1 %vm418_vm1, %v470_v31 }
 0x1f3   :  { %7641 = vmatprep.mubr.msk.f32.mxu1 %vm9122_vm3, %v11737_v30 }
 0x1fa   :  { %7642 = vmatmul.mubr.msk.f32.vlgmr.msra.gmra.mrb[32].mxu1 %vm862_vm4, %v856_v43 }
 0x1fb   :  { %7668 = vmatprep.mubr.msk.f32.mxu1 %vm9122_vm3, %v11737_v30  ;;  %8448 = vmatpush3.bf16.msra.mxu1 %v8447_v45 }
 0x1fc   :  { %8449 = vmatprep.subr.bf16.mxu1 %v9123_v46 }
 0x1ff   :  { %8451 = vmatpush3.bf16.msra.mxu1 %v8450_v49 }
 0x200   :  { %8452 = vmatprep.subr.bf16.mxu1 %v9123_v46 }
 0x203   :  { %8454 = vmatpush3.bf16.msra.mxu1 %v8453_v52 }
 0x204   :  { %8455 = vmatprep.subr.bf16.mxu1 %v9123_v46 }
 0x207   :  { %8457 = vmatpush3.bf16.msra.mxu1 %v8456_v55 }
 0x208   :  { %8458 = vmatprep.subr.bf16.mxu1 %v9123_v46 }
 0x20b   :  { %8460 = vmatpush3.bf16.msra.mxu1 %v8459_v58 }
 0x20c   :  { %8461 = vmatprep.subr.bf16.mxu1 %v9123_v46 }
 0x20f   :  { %8463 = vmatpush3.bf16.msra.mxu1 %v8462_v61 }
 0x210   :  { %7718 = vmatprep.subr.bf16.mxu1 %v11737_v30 }
 0x28b   :  { %v760_v24 = vpop.f32.mrb[16].mxu0 }
 0x28c   :  { %v762_v27 = vpop.f32.mrb[17].mxu0  ;;  %v761_v33 = vadd.f32 %v760_v24, %v9709_v22 }
 0x28d   :  { %v561_v28 = vpop.f32.mrb[0].mxu1  ;;  %v764_v32 = vpop.f32.mrb[18].mxu0  ;;  %v763_v38 = vadd.f32 %v762_v27, %v9715_v25 }
 0x28e   :  { %v562_v34 = vadd.f32 %v561_v28, %v9712_v23  ;;  %v765_v35 = vadd.f32 %v764_v32, %v9709_v22  ;;  %v563_v36 = vpop.f32.mrb[1].mxu1  ;;  %v766_v37 = vpop.f32.mrb[19].mxu0 }
 0x28f   :  { %v564_v39 = vadd.f32 %v563_v36, %v9718_v26  ;;  %v767_v40 = vadd.f32 %v766_v37, %v9715_v25  ;;  %v565_v41 = vpop.f32.mrb[2].mxu1 }
 0x290   :  { %v9726_v42 = vpack.c.bf16 %v765_v35, %v761_v33  ;;  %v566_v31 = vadd.f32 %v565_v41, %v9712_v23  ;;  %v567_v43 = vpop.f32.mrb[3].mxu1 }
 0x291   :  { %v9729_v29 = vpack.c.bf16 %v767_v40, %v763_v38  ;;  %v568_v44 = vadd.f32 %v567_v43, %v9718_v26 }
 0x292   :  { %v9732_v45 = vpack.c.bf16 %v566_v31, %v562_v34 }
 0x293   :  { %v9734_v46 = vpack.c.bf16 %v568_v44, %v564_v39  ;;  %v770_v47 = vpop.f32.mrb[20].mxu0 }
 0x294   :  { %v772_v48 = vpop.f32.mrb[21].mxu0  ;;  %v771_v51 = vadd.f32 %v770_v47, %v9709_v22 }
 0x295   :  { %v571_v49 = vpop.f32.mrb[4].mxu1  ;;  %v774_v50 = vpop.f32.mrb[22].mxu0  ;;  %v773_v56 = vadd.f32 %v772_v48, %v9715_v25 }
 0x296   :  { %v572_v52 = vadd.f32 %v571_v49, %v9712_v23  ;;  %v775_v53 = vadd.f32 %v774_v50, %v9709_v22  ;;  %v573_v54 = vpop.f32.mrb[5].mxu1  ;;  %v776_v55 = vpop.f32.mrb[23].mxu0 }
 0x297   :  { %v574_v57 = vadd.f32 %v573_v54, %v9718_v26  ;;  %v777_v58 = vadd.f32 %v776_v55, %v9715_v25  ;;  %v575_v59 = vpop.f32.mrb[6].mxu1 }
 0x298   :  { %v9742_v60 = vpack.c.bf16 %v775_v53, %v771_v51  ;;  %v576_v61 = vadd.f32 %v575_v59, %v9712_v23  ;;  %v577_v62 = vpop.f32.mrb[7].mxu1 }
 0x299   :  { %v9745_v63 = vpack.c.bf16 %v777_v58, %v773_v56  ;;  %v578_v0 = vadd.f32 %v577_v62, %v9718_v26 }
 0x29a   :  { %v9748_v1 = vpack.c.bf16 %v576_v61, %v572_v52 }
 0x29b   :  { %11769 = vst [vmem:[#allocation32_spill] sm:$0xff] %v9745_v63  ;;  %v9750_v2 = vpack.c.bf16 %v578_v0, %v574_v57  ;;  %v780_v3 = vpop.f32.mrb[24].mxu0 }
 0x29c   :  { %v782_v4 = vpop.f32.mrb[25].mxu0  ;;  %v781_v7 = vadd.f32 %v780_v3, %v9709_v22 }
 0x29d   :  { %v581_v5 = vpop.f32.mrb[8].mxu1  ;;  %v784_v6 = vpop.f32.mrb[26].mxu0  ;;  %v783_v12 = vadd.f32 %v782_v4, %v9715_v25 }
 0x29e   :  { %v582_v8 = vadd.f32 %v581_v5, %v9712_v23  ;;  %v785_v9 = vadd.f32 %v784_v6, %v9709_v22  ;;  %v583_v10 = vpop.f32.mrb[9].mxu1  ;;  %v786_v11 = vpop.f32.mrb[27].mxu0 }
 0x29f   :  { %v584_v13 = vadd.f32 %v583_v10, %v9718_v26  ;;  %v787_v14 = vadd.f32 %v786_v11, %v9715_v25  ;;  %v585_v16 = vpop.f32.mrb[10].mxu1 }
 0x2a0   :  { %v9758_v19 = vpack.c.bf16 %v785_v9, %v781_v7  ;;  %v586_v21 = vadd.f32 %v585_v16, %v9712_v23  ;;  %v587_v24 = vpop.f32.mrb[11].mxu1 }
 0x2a1   :  { %v9761_v27 = vpack.c.bf16 %v787_v14, %v783_v12  ;;  %v588_v28 = vadd.f32 %v587_v24, %v9718_v26 }
 0x2a2   :  { %v9764_v32 = vpack.c.bf16 %v586_v21, %v582_v8 }
 0x2a3   :  { %11770 = vst [vmem:[#allocation33_spill] sm:$0xff] %v9761_v27  ;;  %v9766_v33 = vpack.c.bf16 %v588_v28, %v584_v13  ;;  %v790_v34 = vpop.f32.mrb[28].mxu0 }
 0x2a4   :  { %v792_v35 = vpop.f32.mrb[29].mxu0  ;;  %v791_v38 = vadd.f32 %v790_v34, %v9709_v22 }
 0x2a5   :  { %v591_v36 = vpop.f32.mrb[12].mxu1  ;;  %v794_v37 = vpop.f32.mrb[30].mxu0  ;;  %v793_v43 = vadd.f32 %v792_v35, %v9715_v25 }
 0x2a6   :  { %v592_v39 = vadd.f32 %v591_v36, %v9712_v23  ;;  %v795_v40 = vadd.f32 %v794_v37, %v9709_v22  ;;  %v593_v41 = vpop.f32.mrb[13].mxu1  ;;  %v796_v31 = vpop.f32.mrb[31].mxu0 }
 0x2a7   :  { %v594_v44 = vadd.f32 %v593_v41, %v9718_v26  ;;  %v797_v47 = vadd.f32 %v796_v31, %v9715_v25  ;;  %v595_v48 = vpop.f32.mrb[14].mxu1 }
 0x2a8   :  { %v9774_v49 = vpack.c.bf16 %v795_v40, %v791_v38  ;;  %v596_v50 = vadd.f32 %v595_v48, %v9712_v23  ;;  %v597_v51 = vpop.f32.mrb[15].mxu1 }
 0x2a9   :  { %v9777_v52 = vpack.c.bf16 %v797_v47, %v793_v43  ;;  %v598_v53 = vadd.f32 %v597_v51, %v9718_v26 }
 0x2aa   :  { %v9780_v54 = vpack.c.bf16 %v596_v50, %v592_v39 }
 0x2ab   :  { %11771 = vst [vmem:[#allocation34_spill] sm:$0xff] %v9777_v52  ;;  %v9782_v55 = vpack.c.bf16 %v598_v53, %v594_v44  ;;  %v800_v56 = vpop.f32.mrb[32].mxu0 }
 0x2ac   :  { %v802_v57 = vpop.f32.mrb[33].mxu0  ;;  %v801_v62 = vadd.f32 %v800_v56, %v9709_v22 }
 0x2ad   :  { %v803_v58 = vadd.f32 %v802_v57, %v9715_v25  ;;  %v601_v59 = vpop.f32.mrb[16].mxu1  ;;  %v804_v61 = vpop.f32.mrb[34].mxu0 }
 0x2ae   :  { %v805_v0 = vadd.f32 %v804_v61, %v9709_v22  ;;  %v603_v3 = vpop.f32.mrb[17].mxu1  ;;  %v806_v4 = vpop.f32.mrb[35].mxu0  ;;  %v602_v8 = vadd.f32 %v601_v59, %v9712_v23 }
 0x2af   :  { %v604_v5 = vadd.f32 %v603_v3, %v9718_v26  ;;  %v807_v6 = vadd.f32 %v806_v4, %v9715_v25  ;;  %v605_v7 = vpop.f32.mrb[18].mxu1 }
 0x2b0   :  { %v9790_v9 = vpack.c.bf16 %v805_v0, %v801_v62  ;;  %v606_v10 = vadd.f32 %v605_v7, %v9712_v23  ;;  %v607_v11 = vpop.f32.mrb[19].mxu1 }
 0x2b1   :  { %v9793_v12 = vpack.c.bf16 %v807_v6, %v803_v58  ;;  %v608_v13 = vadd.f32 %v607_v11, %v9718_v26 }
 0x2b2   :  { %v9796_v14 = vpack.c.bf16 %v606_v10, %v602_v8 }
 0x2b3   :  { %11772 = vst [vmem:[#allocation35_spill] sm:$0xff] %v9793_v12  ;;  %v9798_v16 = vpack.c.bf16 %v608_v13, %v604_v5  ;;  %v810_v21 = vpop.f32.mrb[36].mxu0 }
 0x2b4   :  { %v812_v24 = vpop.f32.mrb[37].mxu0  ;;  %v811_v36 = vadd.f32 %v810_v21, %v9709_v22 }
 0x2b5   :  { %11773 = vst [vmem:[#allocation36_spill] sm:$0xff] %v9798_v16  ;;  %v813_v28 = vadd.f32 %v812_v24, %v9715_v25  ;;  %v611_v34 = vpop.f32.mrb[20].mxu1  ;;  %v814_v35 = vpop.f32.mrb[38].mxu0 }
 0x2b6   :  { %v815_v37 = vadd.f32 %v814_v35, %v9709_v22  ;;  %v613_v38 = vpop.f32.mrb[21].mxu1  ;;  %v816_v39 = vpop.f32.mrb[39].mxu0  ;;  %v612_v43 = vadd.f32 %v611_v34, %v9712_v23 }
 0x2b7   :  { %v614_v40 = vadd.f32 %v613_v38, %v9718_v26  ;;  %v817_v41 = vadd.f32 %v816_v39, %v9715_v25  ;;  %v615_v31 = vpop.f32.mrb[22].mxu1 }
 0x2b8   :  { %v9806_v44 = vpack.c.bf16 %v815_v37, %v811_v36  ;;  %v616_v47 = vadd.f32 %v615_v31, %v9712_v23  ;;  %v617_v48 = vpop.f32.mrb[23].mxu1 }
 0x2b9   :  { %v9809_v50 = vpack.c.bf16 %v817_v41, %v813_v28  ;;  %v618_v51 = vadd.f32 %v617_v48, %v9718_v26 }
 0x2ba   :  { %v9812_v53 = vpack.c.bf16 %v616_v47, %v612_v43 }
 0x2bb   :  { %11774 = vst [vmem:[#allocation37_spill] sm:$0xff] %v9809_v50  ;;  %v9814_v56 = vpack.c.bf16 %v618_v51, %v614_v40  ;;  %v820_v57 = vpop.f32.mrb[40].mxu0 }
 0x2bc   :  { %v822_v58 = vpop.f32.mrb[41].mxu0  ;;  %v821_v0 = vadd.f32 %v820_v57, %v9709_v22 }
 0x2bd   :  { %11775 = vst [vmem:[#allocation38_spill] sm:$0xff] %v9814_v56  ;;  %v823_v59 = vadd.f32 %v822_v58, %v9715_v25  ;;  %v621_v61 = vpop.f32.mrb[24].mxu1  ;;  %v824_v62 = vpop.f32.mrb[42].mxu0  ;;  %v855_v58 = vld [vmem:[#allocation12] sm:$0x7] }
 0x2be   :  { %v825_v3 = vadd.f32 %v824_v62, %v9709_v22  ;;  %v623_v4 = vpop.f32.mrb[25].mxu1  ;;  %v826_v5 = vpop.f32.mrb[43].mxu0  ;;  %v622_v10 = vadd.f32 %v621_v61, %v9712_v23 }
 0x2bf   :  { %v624_v6 = vadd.f32 %v623_v4, %v9718_v26  ;;  %v827_v7 = vadd.f32 %v826_v5, %v9715_v25  ;;  %v625_v8 = vpop.f32.mrb[26].mxu1  ;;  %v861_v5 = vrot.slane %v855_v58, %v9703_v18 }
 0x2c0   :  { %v9822_v11 = vpack.c.bf16 %v825_v3, %v821_v0  ;;  %v626_v13 = vadd.f32 %v625_v8, %v9712_v23  ;;  %v627_v21 = vpop.f32.mrb[27].mxu1 }
 0x2c1   :  { %v9825_v24 = vpack.c.bf16 %v827_v7, %v823_v59  ;;  %v628_v28 = vadd.f32 %v627_v21, %v9718_v26 }
 0x2c2   :  { %v9828_v34 = vpack.c.bf16 %v626_v13, %v622_v10 }
 0x2c3   :  { %11776 = vst [vmem:[#allocation39_spill] sm:$0xff] %v9825_v24  ;;  %v9830_v35 = vpack.c.bf16 %v628_v28, %v624_v6  ;;  %v830_v36 = vpop.f32.mrb[44].mxu0  ;;  %v956_v28 = vrot.slane %v855_v58, %v9706_v20 }
 0x2c4   :  { %v832_v37 = vpop.f32.mrb[45].mxu0  ;;  %v831_v41 = vadd.f32 %v830_v36, %v9709_v22  ;;  %v1330_v13 = vsel %vm418_vm1, %v9828_v34, 0 }
 0x2c5   :  { %11777 = vst [vmem:[#allocation40_spill] sm:$0xff] %v9830_v35  ;;  %v833_v38 = vadd.f32 %v832_v37, %v9715_v25  ;;  %v631_v39 = vpop.f32.mrb[28].mxu1  ;;  %v834_v40 = vpop.f32.mrb[46].mxu0 }
 0x2c6   :  { %v835_v31 = vadd.f32 %v834_v40, %v9709_v22  ;;  %v633_v43 = vpop.f32.mrb[29].mxu1  ;;  %v836_v47 = vpop.f32.mrb[47].mxu0  ;;  %v632_v59 = vadd.f32 %v631_v39, %v9712_v23  ;;  %v1122_v40 = vld [vmem:[#allocation13] sm:$0x3] }
 0x2c7   :  { %v634_v48 = vadd.f32 %v633_v43, %v9718_v26  ;;  %v837_v51 = vadd.f32 %v836_v47, %v9715_v25  ;;  %v635_v57 = vpop.f32.mrb[30].mxu1  ;;  %v1127_v43 = vrot.slane %v1122_v40, 1 }
 0x2c8   :  { %v9838_v61 = vpack.c.bf16 %v835_v31, %v831_v41  ;;  %v636_v62 = vadd.f32 %v635_v57, %v9712_v23  ;;  %v637_v0 = vpop.f32.mrb[31].mxu1  ;;  %v1324_v23 = vsel %vm418_vm1, %v9796_v14, 0  ;;  %v1124_v41 = vstv %s11780_s2 }
 0x2c9   :  { %v9841_v3 = vpack.c.bf16 %v837_v51, %v833_v38  ;;  %v638_v4 = vadd.f32 %v637_v0, %v9718_v26  ;;  %v1327_v26 = vsel %vm418_vm1, %v9812_v53, 0  ;;  %v1125_v31 = vmul.f32 %v1124_v41, %v1122_v40  ;;  %v9906_v40 = vld [vmem:[#allocation7] sm:$0xff]  ;;  %v9908_v41 = vld [vmem:[#allocation7 + $0x8] sm:$0xff] }
 0x2ca   :  { %v9844_v22 = vpack.c.bf16 %v636_v62, %v632_v59  ;;  %v9874_v57 = vsub.s32 2, %v9699_v17  ;;  %v9879_v62 = vld [vmem:[%s11713_s11] sm:$0xff]  }
 0x2cb   :  { %11778 = vst [vmem:[#allocation41_spill] sm:$0xff] %v9841_v3  ;;  %v9847_v6 = vpack.c.bf16 %v638_v4, %v634_v48  ;;  %v1129_v47 = vadd.f32 %v1127_v43, %v1125_v31  ;;  %v9124_v48 = vmov 1966171168  }
 0x2cc   :  { %v1333_v21 = vsel %vm418_vm1, %v9844_v22, 0  ;;  %v1134_v51 = vunpack.c.l.s4 %v9124_v48  ;;  %v1048_v0 = vrot.slane %v855_v58, %v9874_v57 }
 0x2cd   :  { %11779 = vst [vmem:[#allocation42_spill] sm:$0xff] %v9847_v6  ;;  %v936_v25 = vpop.f32.mrb[32].mxu1  ;;  %1184 = vst.msk [vmem:[#allocation2 + $0x7] sm:$0x1] %vm1157_vm6, %v1129_v47  ;;  %v1194_v6 = vld [vmem:[#allocation19] sm:$0x3] }
 0x2ce   :  { %v937_v7 = vadd.f32 %v936_v25, %v861_v5  ;;  %v7643_v8 = vpop.f32.mrb[33].mxu1  ;;  %1185 = vst.msk [vmem:[#allocation2 + $0xf] sm:$0x1] %vm1157_vm6, %v1129_v47  ;;  %v1135_v59 = vunpack.c.0.s8 %v1134_v51  ;;  %v9888_v25 = vld [vmem:[%s11713_s11 + $0x8] sm:$0xff]   ;;  %v1269_v51 = vsel %vm418_vm1, %v9732_v45, 0 }
 0x2d0   :  { %v940_v10 = vmax.f32 %v937_v7, 0.0  ;;  %v1138_v4 = vsub.s32 %v1135_v59, %v9699_v17  ;;  %v1272_v59 = vsel %vm418_vm1, %v9748_v1, 0 }
 0x2d2   :  { %7669 = vmatmul.mubr.msk.f32.vlgmr.msra.gmra.mrb[34].mxu1 %vm957_vm5, %v940_v10 }
 0x2d3   :  { %7719 = vmatpush3.bf16.xpose.msra.mxu1 %v1324_v23  ;;  %7726 = vmatprep.mubr.msk.bf16.mxu1 %vm9122_vm3, %v11737_v30 }
 0x2d4   :  { %7720 = vmatprep.subr.bf16.mxu1 %v11737_v30 }
 0x2db   :  { %7721 = vmatpush3.bf16.xpose.msra.mxu1 %v1327_v26 }
 0x2dc   :  { %7722 = vmatprep.subr.bf16.mxu1 %v11737_v30 }
 0x2e3   :  { %7723 = vmatpush3.bf16.xpose.msra.mxu1 %v1330_v13 }
 0x2e4   :  { %7724 = vmatprep.subr.bf16.mxu1 %v11737_v30 }
 0x2eb   :  { %7725 = vmatpush3.bf16.xpose.msra.mxu1 %v1333_v21 }
 0x2ec   :  { %7742 = vmatprep.subr.bf16.mxu1 %v11737_v30 }
 0x3a5   :  { %v1027_v36 = vpop.f32.mrb[34].mxu1 }
 0x3a6   :  { %v1028_v37 = vadd.f32 %v1027_v36, %v956_v28  ;;  %v7670_v38 = vpop.f32.mrb[35].mxu1 }
 0x3a8   :  { %v1031_v39 = vmax.f32 %v1028_v37, 0.0 }
 0x3aa   :  { %7696 = vmatmul.mubr.msk.f32.vlgmr.msra.gmra.mrb[48].mxu0 %vm957_vm5, %v1031_v39 }
 0x3ab   :  { %7702 = vmatprep.mubr.msk.bf16.mxu0 %vm9122_vm3, %v11737_v30  ;;  %7699 = vmatpush3.bf16.msra.mxu0 %v9879_v62 }
 0x3ac   :  { %7700 = vmatprep.subr.bf16.mxu0 %v11737_v30 }
 0x3af   :  { %7701 = vmatpush3.bf16.msra.mxu0 %v9888_v25 }
 0x3b0   :  { %7706 = vmatprep.subr.bf16.mxu0 %v11737_v30 }
 0x47d   :  { %v1118_v5 = vpop.f32.mrb[48].mxu0 }
 0x47e   :  { %v1119_v7 = vadd.f32 %v1118_v5, %v1048_v0  ;;  %v7697_v8 = vpop.f32.mrb[49].mxu0  ;;  %v1275_v0 = vsel %vm418_vm1, %v9764_v32, 0  ;;  %v9931_v5 = vld [vmem:[#allocation18] sm:$0xff] }
 0x480   :  { %v1139_v10 = vrot.slane %v1119_v7, %v1138_v4  ;;  %v1206_v7 = vrot.slane %v9931_v5, %v9703_v18 }
 0x482   :  { %v1140_v58 = vcombine.high %v1139_v10, %v1139_v10  ;;  %v1147_v23 = vrot.slane %v1139_v10, %v1138_v4 }
 0x484   :  { %v1163_v26 = vrot.slane %v1147_v23, %v9703_v18  ;;  %v1154_v13 = vrot.slane %v1140_v58, %v1138_v4  ;;  %1158 = vst.msk [vmem:[#allocation2 + $0x4] sm:$0x1] %vm1157_vm6, %v1147_v23  ;;  %v1278_v4 = vsel %vm418_vm1, %v9780_v54, 0 }
 0x486   :  { %1176 = vrot.lane.b32.xlu1 %v1163_v26, %s9125_s22  ;;  %1168 = vrot.lane.b32.xlu0 %v1163_v26, %s9126_s0  ;;  %1159 = vst.msk [vmem:[#allocation2 + $0xc] sm:$0x1] %vm1157_vm6, %v1154_v13  ;;  %v1167_v21 = vrot.slane %v1154_v13, %v9703_v18 }
 0x48a   :  { %1178 = vrot.lane.b32.xlu1 %v1167_v21, %s9125_s22  ;;  %1170 = vrot.lane.b32.xlu0 %v1167_v21, %s9126_s0 }
 0x4f8   :  { %v1177_v28 = vpop.permute.xlu1 %1176  ;;  %v1169_v36 = vpop.permute.xlu0 %1168 }
 0x4f9   :  { %1182 = vst.msk [vmem:[#allocation2 + $0x6] sm:$0x1] %vm1157_vm6, %v1177_v28  ;;  %1174 = vst.msk [vmem:[#allocation2 + $0x5] sm:$0x1] %vm1157_vm6, %v1169_v36 }
 0x4fc   :  { %v1179_v37 = vpop.permute.xlu1 %1178  ;;  %v1171_v38 = vpop.permute.xlu0 %1170 }
 0x4fd   :  { %1183 = vst.msk [vmem:[#allocation2 + $0xe] sm:$0x1] %vm1157_vm6, %v1179_v37  ;;  %1175 = vst.msk [vmem:[#allocation2 + $0xd] sm:$0x1] %vm1157_vm6, %v1171_v38 }
 0x500   :  { %v9904_v39 = vld [vmem:[#allocation2] sm:$0xff] }
 0x501   :  { %v1200_v43 = vadd.f32 %v9906_v40, %v9904_v39 }
 0x504   :  { %v9910_v31 = vld [vmem:[#allocation2 + $0x8] sm:$0xff] }
 0x505   :  { %v1201_v47 = vadd.f32 %v9908_v41, %v9910_v31 }
 0x507   :  { %v1202_v48 = vpack.c.bf16 %v1201_v47, %v1200_v43 }
 0x509   :  { %7703 = vmatmul.mubr.msk.bf16.vlgmr.msra.gmra.mrb[52].mxu0 %vm418_vm1, %v1202_v48 }
 0x50a   :  { %7707 = vmatpush3.bf16.xpose.msra.mxu0 %v1269_v51  ;;  %7714 = vmatprep.mubr.msk.bf16.mxu0 %vm9122_vm3, %v11737_v30 }
 0x50b   :  { %7708 = vmatprep.subr.bf16.mxu0 %v11737_v30 }
 0x512   :  { %7709 = vmatpush3.bf16.xpose.msra.mxu0 %v1272_v59 }
 0x513   :  { %7710 = vmatprep.subr.bf16.mxu0 %v11737_v30 }
 0x51a   :  { %7711 = vmatpush3.bf16.xpose.msra.mxu0 %v1275_v0 }
 0x51b   :  { %7712 = vmatprep.subr.bf16.mxu0 %v11737_v30 }
 0x522   :  { %7713 = vmatpush3.bf16.xpose.msra.mxu0 %v1278_v4 }
 0x523   :  { %7730 = vmatprep.subr.bf16.mxu0 %v11737_v30 }
 0x5dc   :  { %v1256_v8 = vpop.f32.mrb[52].mxu0 }
 0x5dd   :  { %v1257_v10 = vadd.f32 %v1256_v8, %v1206_v7  ;;  %v7704_v58 = vpop.f32.mrb[53].mxu0 }
 0x5de   :  { %v1259_v23 = vpop.f32.mrb[54].mxu0 }
 0x5df   :  { %v1263_v26 = vpack.c.bf16 %v1257_v10, %v1257_v10  ;;  %v1260_v13 = vadd.f32 %v1259_v23, %v1206_v7  ;;  %v7705_v21 = vpop.f32.mrb[55].mxu0 }
 0x5e1   :  { %v1264_v28 = vpack.c.bf16 %v1260_v13, %v1260_v13  ;;  %7715 = vmatmul.mubr.msk.bf16.vlgmr.msra.gmra.mrb[56].mxu0 %vm418_vm1, %v1263_v26 }
 0x5e2   :  { %7731 = vmatpush3.bf16.msra.mxu0 %v9726_v42  ;;  %7738 = vmatprep.mubr.msk.bf16.mxu0 %vm9122_vm3, %v11737_v30 }
 0x5e3   :  { %7727 = vmatmul.mubr.msk.bf16.vlgmr.msra.gmra.mrb[36].mxu1 %vm418_vm1, %v1264_v28  ;;  %7732 = vmatprep.subr.bf16.mxu0 %v11737_v30 }
 0x5e4   :  { %7743 = vmatpush3.bf16.msra.mxu1 %v9790_v9  ;;  %7750 = vmatprep.mubr.msk.bf16.mxu1 %vm9122_vm3, %v11737_v30 }
 0x5e5   :  { %7744 = vmatprep.subr.bf16.mxu1 %v11737_v30 }
 0x5e6   :  { %7733 = vmatpush3.bf16.msra.mxu0 %v9742_v60 }
 0x5e7   :  { %7734 = vmatprep.subr.bf16.mxu0 %v11737_v30 }
 0x5e8   :  { %7745 = vmatpush3.bf16.msra.mxu1 %v9806_v44 }
 0x5e9   :  { %7746 = vmatprep.subr.bf16.mxu1 %v11737_v30 }
 0x5ea   :  { %7735 = vmatpush3.bf16.msra.mxu0 %v9758_v19 }
 0x5eb   :  { %7736 = vmatprep.subr.bf16.mxu0 %v11737_v30 }
 0x5ec   :  { %7747 = vmatpush3.bf16.msra.mxu1 %v9822_v11 }
 0x5ed   :  { %7748 = vmatprep.subr.bf16.mxu1 %v11737_v30 }
 0x5ee   :  { %7737 = vmatpush3.bf16.msra.mxu0 %v9774_v49 }
 0x5ef   :  { %7754 = vmatprep.subr.bf16.mxu0 %v11737_v30 }
 0x5f0   :  { %7749 = vmatpush3.bf16.msra.mxu1 %v9838_v61 }
 0x5f1   :  { %7762 = vmatprep.subr.bf16.mxu1 %v11737_v30 }
 0x6b4   :  { %v1314_v36 = vpop.f32.mrb[56].mxu0 }
 0x6b5   :  { %v1375_v37 = vmul.f32 0.17677669, %v1314_v36  ;;  %v7716_v38 = vpop.f32.mrb[57].mxu0 }
 0x6b6   :  { %v1317_v43 = vpop.f32.mrb[58].mxu0  ;;  %v1369_v47 = vpop.f32.mrb[36].mxu1 }
 0x6b7   :  { %v1376_v48 = vmul.f32 0.17677669, %v1369_v47  ;;  %v7717_v51 = vpop.f32.mrb[59].mxu0  ;;  %v7728_v59 = vpop.f32.mrb[37].mxu1  ;;  %v1378_v0 = vsel %vm1377_vm7, %v1375_v37, -inf }
 0x6b8   :  { %v1372_v4 = vpop.f32.mrb[38].mxu1  ;;  %1379 = vmax.xlane.f32.xlu0 %v1378_v0 }
 0x6b9   :  { %v7729_v7 = vpop.f32.mrb[39].mxu1  ;;  %v1381_v8 = vsel %vm1377_vm7, %v1376_v48, -inf }
 0x6ba   :  { %1382 = vmax.xlane.f32.xlu1 %v1381_v8  ;;  %v1190_v8 = vld [vmem:[%s11781_s16] sm:$0xff] }
 0x6cb   :  { %1493 = vrot.lane.b32.xlu1 %v9879_v62, %s9126_s0 }
 0x745   :  { %v1380_v10 = vpop.xlane.xlu0 %1379 }
 0x746   :  { %v1384_v58 = vsub.f32 %v1375_v37, %v1380_v10  ;;  %v1191_v10 = vld [vmem:[%s11781_s16 + $0x8] sm:$0xff] }
 0x747   :  { %v1383_v23 = vpop.xlane.xlu1 %1382 }
 0x748   :  { %v1386_v26 = vmul.f32 1.442695, %v1384_v58  ;;  %v1385_v13 = vsub.f32 %v1376_v48, %v1383_v23  ;;  %v1192_v58 = vsub.f32 1.0, %v1190_v8  ;;  %v1193_v23 = vsub.f32 1.0, %v1191_v10 }
 0x74a   :  { %8626 = vpow2.f32 %v1386_v26  ;;  %v1388_v21 = vmul.f32 1.442695, %v1385_v13  ;;  %1545 = vperm.xlu1 %8505, %v1192_v58  }
 0x74b   :  { %v1494_v59 = vpop.permute.xlu1 %1493 }
 0x74c   :  { %8628 = vpow2.f32 %v1388_v21 }
 0x74e   :  { %1550 = vperm.xlu1 %8505, %v1193_v23  }
 0x754   :  { %v8627_v28 = vpop.eup %8626 }
 0x755   :  { %v1390_v36 = vsel %vm1377_vm7, %v8627_v28, 0.0 }
 0x756   :  { %v8629_v38 = vpop.eup %8628  ;;  %1391 = vadd.xlane.f32.xlu0 %v1390_v36 }
 0x757   :  { %v1393_v43 = vsel %vm1377_vm7, %v8629_v38, 0.0 }
 0x75a   :  { %1394 = vadd.xlane.f32.xlu0 %v1393_v43 }
 0x770   :  { %1495 = vrot.lane.b32.xlu0 %v9888_v25, %s9126_s0 }
 0x7e3   :  { %v1392_v62 = vpop.xlane.xlu0 %1391 }
 0x7e4   :  { %8630 = vrcp.f32 %v1392_v62 }
 0x7e7   :  { %v1395_v37 = vpop.xlane.xlu0 %1394 }
 0x7e8   :  { %8632 = vrcp.f32 %v1395_v37 }
 0x7eb   :  { %v1496_v25 = vpop.permute.xlu0 %1495 }
 0x7ee   :  { %v8631_v47 = vpop.eup %8630 }
 0x7ef   :  { %v1398_v48 = vmul.f32 %v8631_v47, %v8627_v28  ;;  %v1492_v47 = vrot.slane %v9931_v5, %v9706_v20 }
 0x7f1   :  { %v1400_v51 = vpack.c.bf16 %v1398_v48, %v1398_v48  ;;  %v9984_v48 = vpop.permute.xlu1 %1545 }
 0x7f2   :  { %v8633_v0 = vpop.eup %8632 }
 0x7f3   :  { %7739 = vmatmul.mubr.msk.bf16.vlgmr.msra.gmra.mrb[60].mxu0 %vm1377_vm7, %v1400_v51  ;;  %v1399_v4 = vmul.f32 %v8633_v0, %v8629_v38 }
 0x7f4   :  { %7755 = vmatpush3.bf16.msra.mxu0 %v1494_v59  ;;  %7758 = vmatprep.mubr.msk.bf16.mxu0 %vm9122_vm3, %v11737_v30 }
 0x7f5   :  { %v1401_v7 = vpack.c.bf16 %v1399_v4, %v1399_v4  ;;  %7756 = vmatprep.subr.bf16.mxu0 %v11737_v30  ;;  %v9987_v10 = vpop.permute.xlu1 %1550 }
 0x7f7   :  { %7751 = vmatmul.mubr.msk.bf16.vlgmr.msra.gmra.mrb[40].mxu1 %vm1377_vm7, %v1401_v7 }
 0x7f8   :  { %7766 = vmatprep.mubr.msk.bf16.mxu1 %vm9122_vm3, %v11737_v30  ;;  %7757 = vmatpush3.bf16.msra.mxu0 %v1496_v25 }
 0x7f9   :  { %7770 = vmatprep.subr.bf16.mxu0 %v11737_v30 }
 0x8c6   :  { %v1439_v26 = vpop.f32.mrb[60].mxu0 }
 0x8c7   :  { %v7740_v13 = vpop.f32.mrb[61].mxu0 }
 0x8c8   :  { %v1442_v21 = vpop.f32.mrb[62].mxu0 }
 0x8c9   :  { %v7741_v28 = vpop.f32.mrb[63].mxu0 }
 0x8ca   :  { %v1482_v36 = vpop.f32.mrb[40].mxu1 }
 0x8cb   :  { %v1488_v38 = vpack.c.bf16 %v1482_v36, %v1439_v26  ;;  %v7752_v43 = vpop.f32.mrb[41].mxu1 }
 0x8cc   :  { %v1485_v62 = vpop.f32.mrb[42].mxu1 }
 0x8cd   :  { %v7753_v37 = vpop.f32.mrb[43].mxu1  ;;  %7759 = vmatmul.mubr.msk.bf16.vlgmr.msra.gmra.mrb[64].mxu0 %vm418_vm1, %v1488_v38 }
 0x8ce   :  { %7786 = vmatprep.mubr.msk.bf16.mxu0 %vm9122_vm3, %v11737_v30 }
 0x9a0   :  { %v1536_v51 = vpop.f32.mrb[64].mxu0 }
 0x9a1   :  { %v1537_v59 = vadd.f32 %v1536_v51, %v1492_v47  ;;  %v7760_v0 = vpop.f32.mrb[65].mxu0 }
 0x9a2   :  { %v1539_v4 = vpop.f32.mrb[66].mxu0  ;;  %v8521_v0 = vld [vmem:[%s11716_s14 + $0x8] sm:$0xff]  }
 0x9a3   :  { %v1553_v7 = vmul.f32 %v9984_v48, %v1537_v59  ;;  %v1540_v25 = vadd.f32 %v1539_v4, %v1492_v47  ;;  %v7761_v8 = vpop.f32.mrb[67].mxu0  ;;  %v8522_v4 = vld [vmem:[%s11717_s15] sm:$0xff]  }
 0x9a4   :  { %7771 = vmatpush3.bf16.msra.mxu0 %v8522_v4  ;;  %v8525_v8 = vld [vmem:[%s11717_s15 + $0x18] sm:$0xff]  }
 0x9a5   :  { %v1554_v58 = vmul.f32 %v9987_v10, %v1540_v25  ;;  %v1555_v23 = vadd.f32 %v1553_v7, %v9904_v39  ;;  %v8523_v7 = vld [vmem:[%s11717_s15 + $0x8] sm:$0xff]   ;;  %7772 = vmatprep.subr.bf16.mxu0 %v11737_v30  ;;  %v8524_v25 = vld [vmem:[%s11717_s15 + $0x10] sm:$0xff]  }
 0x9a7   :  { %v1557_v26 = vsel %vm418_vm1, %v1555_v23, 0.0  ;;  %v1556_v13 = vadd.f32 %v1554_v58, %v9910_v31  ;;  %v8520_v31 = vld [vmem:[%s11716_s14] sm:$0xff]  }
 0x9a8   :  { %1558 = vadd.xlane.f32.xlu0 %v1557_v26  ;;  %7763 = vmatpush3.bf16.msra.mxu1 %v8520_v31  ;;  %v8526_v58 = vld [vmem:[%s11717_s15 + $0x20] sm:$0xff]  }
 0x9a9   :  { %v1560_v21 = vsel %vm418_vm1, %v1556_v13, 0.0  ;;  %7764 = vmatprep.subr.bf16.mxu1 %v11737_v30  ;;  %7773 = vmatpush3.bf16.msra.mxu0 %v8523_v7 }
 0x9aa   :  { %1561 = vadd.xlane.f32.xlu1 %v1560_v21  ;;  %7774 = vmatprep.subr.bf16.mxu0 %v11737_v30 }
 0x9ac   :  { %7765 = vmatpush3.bf16.msra.mxu1 %v8521_v0 }
 0x9ad   :  { %7790 = vmatprep.subr.bf16.mxu1 %v11737_v30  ;;  %7775 = vmatpush3.bf16.msra.mxu0 %v8524_v25 }
 0x9ae   :  { %7776 = vmatprep.subr.bf16.mxu0 %v11737_v30 }
 0x9b1   :  { %7777 = vmatpush3.bf16.msra.mxu0 %v8525_v8 }
 0x9b2   :  { %7778 = vmatprep.subr.bf16.mxu0 %v11737_v30 }
 0x9b5   :  { %7779 = vmatpush3.bf16.msra.mxu0 %v8526_v58 }
 0x9b6   :  { %7780 = vmatprep.subr.bf16.mxu0 %v11737_v30 }
 0xa35   :  { %v1559_v28 = vpop.xlane.xlu0 %1558 }
 0xa36   :  { %v1564_v36 = vmul.f32 0.03125, %v1559_v28 }
 0xa37   :  { %v1562_v38 = vpop.xlane.xlu1 %1561 }
 0xa38   :  { %v1566_v43 = vsub.f32 %v1555_v23, %v1564_v36  ;;  %v1565_v62 = vmul.f32 0.03125, %v1562_v38  ;;  %v8527_v23 = vld [vmem:[%s11717_s15 + $0x28] sm:$0xff]  }
 0xa39   :  { %7781 = vmatpush3.bf16.msra.mxu0 %v8527_v23 }
 0xa3a   :  { %v1567_v37 = vsub.f32 %v1556_v13, %v1565_v62  ;;  %v1568_v47 = vmul.f32 %v1566_v43, %v1566_v43  ;;  %7782 = vmatprep.subr.bf16.mxu0 %v11737_v30  ;;  %v10029_v62 = vsub.s32 3, %v9699_v17 }
 0xa3c   :  { %v1570_v51 = vsel %vm418_vm1, %v1568_v47, 0.0  ;;  %v1569_v59 = vmul.f32 %v1567_v37, %v1567_v37 }
 0xa3d   :  { %1571 = vadd.xlane.f32.xlu0 %v1570_v51  ;;  %v1587_v51 = vrot.slane %v9931_v5, %v10029_v62 }
 0xa3e   :  { %v1573_v39 = vsel %vm418_vm1, %v1569_v59, 0.0 }
 0xa41   :  { %1574 = vadd.xlane.f32.xlu0 %v1573_v39  ;;  %v10034_v39 = vsub.s32 4, %v9699_v17 }
 0xa43   :  { %v1593_v7 = vrot.slane %v9931_v5, %v10034_v39 }
 0xaca   :  { %v1572_v26 = vpop.xlane.xlu0 %1571 }
 0xacb   :  { %v1576_v13 = vmul.f32 0.03125, %v1572_v26  ;;  %v10050_v26 = vsub.s32 7, %v9699_v17 }
 0xacd   :  { %v1578_v21 = vadd.f32 1e-05, %v1576_v13  ;;  %v1604_v13 = vrot.slane %v9931_v5, %v10050_v26 }
 0xace   :  { %v1575_v28 = vpop.xlane.xlu0 %1574 }
 0xacf   :  { %8634 = vrsqrt.f32 %v1578_v21  ;;  %v1577_v36 = vmul.f32 0.03125, %v1575_v28 }
 0xad1   :  { %v1579_v38 = vadd.f32 1e-05, %v1577_v36 }
 0xad3   :  { %8636 = vrsqrt.f32 %v1579_v38 }
 0xad9   :  { %v8635_v47 = vpop.eup %8634 }
 0xada   :  { %v1582_v59 = vmul.f32 %v8635_v47, %v1566_v43  ;;  %v8528_v43 = vld [vmem:[%s11717_s15 + $0x30] sm:$0xff]  }
 0xadb   :  { %7783 = vmatpush3.bf16.msra.mxu0 %v8528_v43 }
 0xadc   :  { %v1588_v0 = vmul.f32 %v1587_v51, %v1582_v59  ;;  %7784 = vmatprep.subr.bf16.mxu0 %v11737_v30 }
 0xadd   :  { %v8637_v31 = vpop.eup %8636 }
 0xade   :  { %v1583_v4 = vmul.f32 %v8637_v31, %v1567_v37  ;;  %v1594_v8 = vadd.f32 %v1593_v7, %v1588_v0  ;;  %v8529_v37 = vld [vmem:[%s11717_s15 + $0x38] sm:$0xff]  }
 0xadf   :  { %7785 = vmatpush3.bf16.msra.mxu0 %v8529_v37 }
 0xae0   :  { %v1589_v25 = vmul.f32 %v1587_v51, %v1583_v4  ;;  %7822 = vmatprep.subr.bf16.mxu0 %v11737_v30  ;;  %v1683_v4 = vrot.slane %v9931_v5, %v9874_v57 }
 0xae2   :  { %v1595_v58 = vadd.f32 %v1593_v7, %v1589_v25 }
 0xae4   :  { %v1600_v23 = vpack.c.bf16 %v1595_v58, %v1594_v8 }
 0xae6   :  { %7767 = vmatmul.mubr.msk.bf16.vlgmr.msra.gmra.mrb[44].mxu1 %vm418_vm1, %v1600_v23 }
 0xae7   :  { %7794 = vmatprep.mubr.msk.bf16.mxu1 %vm9122_vm3, %v11737_v30 }
 0xbb9   :  { %v1654_v21 = vpop.f32.mrb[44].mxu1 }
 0xbba   :  { %v1655_v28 = vadd.f32 %v1654_v21, %v1604_v13  ;;  %v7768_v36 = vpop.f32.mrb[45].mxu1 }
 0xbbb   :  { %v1657_v38 = vpop.f32.mrb[46].mxu1 }
 0xbbc   :  { %v1658_v47 = vadd.f32 %v1657_v38, %v1604_v13  ;;  %v7769_v51 = vpop.f32.mrb[47].mxu1  ;;  %v1661_v59 = vmax.f32 %v1655_v28, 0.0 }
 0xbbe   :  { %v1662_v31 = vmax.f32 %v1658_v47, 0.0 }
 0xbc0   :  { %v1679_v0 = vpack.c.bf16 %v1662_v31, %v1661_v59 }
 0xbc2   :  { %7787 = vmatmul.mubr.bf16.vlgmr.msra.gmra.mrb[68].mxu0 %v1679_v0 }
 0xbc3   :  { %7826 = vmatprep.mubr.msk.bf16.mxu0 %vm9122_vm3, %v11737_v30 }
 0xc95   :  { %v1766_v7 = vpop.f32.mrb[68].mxu0 }
 0xc96   :  { %v1767_v25 = vadd.f32 %v1766_v7, %v1683_v4  ;;  %v7788_v23 = vpop.f32.mrb[69].mxu0 }
 0xc97   :  { %v1769_v43 = vpop.f32.mrb[70].mxu0 }
 0xc98   :  { %v1773_v37 = vmul.f32 %v1767_v25, %v9984_v48  ;;  %v1770_v21 = vadd.f32 %v1769_v43, %v1683_v4  ;;  %v7789_v36 = vpop.f32.mrb[71].mxu0  ;;  %v11782_v43 = vmov 0.0  }
 0xc9a   :  { %v1774_v13 = vmul.f32 %v1770_v21, %v9987_v10  ;;  %v1775_v28 = vadd.f32 %v1773_v37, %v1594_v8  ;;  %v10074_v37 = vld [vmem:[%s11713_s11 + $0x18] sm:$0xff]  }
 0xc9c   :  { %v1777_v38 = vsel %vm418_vm1, %v1775_v28, 0.0  ;;  %v1776_v47 = vadd.f32 %v1774_v13, %v1595_v58  ;;  %v10067_v58 = vld [vmem:[%s11713_s11 + $0x10] sm:$0xff]  }
 0xc9d   :  { %1778 = vadd.xlane.f32.xlu1 %v1777_v38  ;;  %7823 = vmatpush3.bf16.msra.mxu0 %v10067_v58 }
 0xc9e   :  { %v1780_v51 = vsel %vm418_vm1, %v1776_v47, 0.0  ;;  %7824 = vmatprep.subr.bf16.mxu0 %v11782_v43 }
 0xc9f   :  { %1781 = vadd.xlane.f32.xlu0 %v1780_v51  ;;  %v10082_v51 = vsub.s32 6, %v9699_v17 }
 0xca1   :  { %7825 = vmatpush3.bf16.msra.mxu0 %v10074_v37 }
 0xca2   :  { %7830 = vmatprep.subr.bf16.mxu0 %v11782_v43 }
 0xd2a   :  { %v1779_v59 = vpop.xlane.xlu1 %1778 }
 0xd2b   :  { %v1783_v31 = vmul.f32 0.03125, %v1779_v59 }
 0xd2c   :  { %v1782_v0 = vpop.xlane.xlu0 %1781 }
 0xd2d   :  { %v1785_v7 = vsub.f32 %v1775_v28, %v1783_v31  ;;  %v1784_v23 = vmul.f32 0.03125, %v1782_v0 }
 0xd2f   :  { %v1786_v15 = vsub.f32 %v1776_v47, %v1784_v23  ;;  %v1787_v30 = vmul.f32 %v1785_v7, %v1785_v7  ;;  %v10079_v47 = vsub.s32 5, %v9699_v17  ;;  %v1812_v23 = vrot.slane %v9931_v5, %v10082_v51 }
 0xd31   :  { %v1789_v4 = vsel %vm418_vm1, %v1787_v30, 0.0  ;;  %v1788_v25 = vmul.f32 %v1786_v15, %v1786_v15  ;;  %v1806_v59 = vrot.slane %v9931_v5, %v10079_v47 }
 0xd32   :  { %1790 = vadd.xlane.f32.xlu1 %v1789_v4 }
 0xd33   :  { %v1792_v8 = vsel %vm418_vm1, %v1788_v25, 0.0 }
 0xd34   :  { %1793 = vadd.xlane.f32.xlu0 %v1792_v8 }
 0xdbf   :  { %v1791_v30 = vpop.xlane.xlu1 %1790 }
 0xdc0   :  { %v1795_v21 = vmul.f32 0.03125, %v1791_v30 }
 0xdc1   :  { %v1794_v36 = vpop.xlane.xlu0 %1793 }
 0xdc2   :  { %v1797_v13 = vadd.f32 1e-05, %v1795_v21  ;;  %v1796_v28 = vmul.f32 0.03125, %v1794_v36 }
 0xdc4   :  { %8638 = vrsqrt.f32 %v1797_v13  ;;  %v1798_v38 = vadd.f32 1e-05, %v1796_v28 }
 0xdc6   :  { %8640 = vrsqrt.f32 %v1798_v38 }
 0xdce   :  { %v8639_v31 = vpop.eup %8638 }
 0xdcf   :  { %v1801_v0 = vmul.f32 %v8639_v31, %v1785_v7 }
 0xdd0   :  { %v8641_v4 = vpop.eup %8640 }
 0xdd1   :  { %v1807_v25 = vmul.f32 %v1806_v59, %v1801_v0  ;;  %v1802_v8 = vmul.f32 %v8641_v4, %v1786_v15 }
 0xdd3   :  { %v10088_v30 = vadd.f32 %v1812_v23, %v1807_v25  ;;  %v1808_v21 = vmul.f32 %v1806_v59, %v1802_v8  ;;  %v8532_v8 = vld [vmem:[%s11721_s19] sm:$0xff]  }
 0xdd5   :  { %v1815_v36 = vsel %vm418_vm1, %v10088_v30, 0.0  ;;  %v10092_v13 = vadd.f32 %v1812_v23, %v1808_v21  ;;  %v2118_v7 = vadd.f32 %v10088_v30, %v9906_v40  ;;  %v10114_v21 = vld [vmem:[%s11721_s19 + $0x10] sm:$0xff]  }
 0xdd6   :  { %1816 = vadd.xlane.f32.xlu1 %v1815_v36  ;;  %v8534_v36 = vld [vmem:[%s11721_s19 + $0x8] sm:$0xff]  }
 0xdd7   :  { %v1818_v17 = vsel %vm418_vm1, %v10092_v13, 0.0  ;;  %v2119_v5 = vadd.f32 %v10092_v13, %v9908_v41 }
 0xdd8   :  { %1819 = vadd.xlane.f32.xlu0 %v1818_v17  ;;  %v10124_v17 = vld [vmem:[%s11721_s19 + $0x18] sm:$0xff]  }
 0xdd9   :  { %v2120_v15 = vpack.c.bf16 %v2119_v5, %v2118_v7  ;;  %v8536_v7 = vld [vmem:[%s11720_s18] sm:$0xff]   ;;  %v8537_v5 = vld [vmem:[%s11720_s18 + $0x8] sm:$0xff]  }
 0xdda   :  { %7791 = vmatpush3.bf16.msra.mxu1 %v8536_v7 }
 0xddb   :  { %7827 = vmatmul.mubr.msk.bf16.vlgmr.msra.gmra.mrb[72].mxu0 %vm418_vm1, %v2120_v15  ;;  %7792 = vmatprep.subr.bf16.mxu1 %v11782_v43  ;;  %v10153_v15 = vld [vmem:[#allocation18 + $0x8] sm:$0xff] }
 0xddc   :  { %7838 = vmatprep.mubr.msk.bf16.mxu0 %vm9122_vm3, %v11782_v43 }
 0xdde   :  { %7793 = vmatpush3.bf16.msra.mxu1 %v8537_v5 }
 0xddf   :  { %7798 = vmatprep.subr.bf16.mxu1 %v11782_v43 }
 0xe63   :  { %v1817_v28 = vpop.xlane.xlu1 %1816 }
 0xe64   :  { %v1821_v38 = vmul.f32 0.03125, %v1817_v28 }
 0xe65   :  { %v1820_v59 = vpop.xlane.xlu0 %1819 }
 0xe66   :  { %v1823_v31 = vsub.f32 %v10088_v30, %v1821_v38  ;;  %v1822_v0 = vmul.f32 0.03125, %v1820_v59  ;;  %v2124_v38 = vrot.slane %v10153_v15, %v9703_v18 }
 0xe68   :  { %v1824_v23 = vsub.f32 %v10092_v13, %v1822_v0  ;;  %v1825_v4 = vmul.f32 %v1823_v31, %v1823_v31 }
 0xe6a   :  { %v1827_v40 = vsel %vm418_vm1, %v1825_v4, 0.0  ;;  %v1826_v25 = vmul.f32 %v1824_v23, %v1824_v23 }
 0xe6b   :  { %1828 = vadd.xlane.f32.xlu1 %v1827_v40 }
 0xe6c   :  { %v1830_v41 = vsel %vm418_vm1, %v1826_v25, 0.0 }
 0xe6d   :  { %1831 = vadd.xlane.f32.xlu0 %v1830_v41 }
 0xe7c   :  { %2009 = vrot.lane.b32.xlu1 %v8532_v8, %s9125_s22 }
 0xe80   :  { %2013 = vrot.lane.b32.xlu1 %v10114_v21, %s9125_s22 }
 0xe83   :  { %2011 = vrot.lane.b32.xlu0 %v8534_v36, %s9125_s22 }
 0xe84   :  { %2015 = vrot.lane.b32.xlu1 %v10124_v17, %s9125_s22 }
 0xe87   :  { %2187 = vrot.lane.b32.xlu0 %v9732_v45, %s9126_s0 }
 0xe88   :  { %2254 = vrot.lane.b32.xlu1 %v9796_v14, %s9126_s0 }
 0xe8b   :  { %2189 = vrot.lane.b32.xlu0 %v9748_v1, %s9126_s0 }
 0xe8c   :  { %2256 = vrot.lane.b32.xlu1 %v9812_v53, %s9126_s0 }
 0xe8f   :  { %2191 = vrot.lane.b32.xlu0 %v9764_v32, %s9126_s0 }
 0xe90   :  { %2258 = vrot.lane.b32.xlu1 %v9828_v34, %s9126_s0 }
 0xe93   :  { %2193 = vrot.lane.b32.xlu0 %v9780_v54, %s9126_s0 }
 0xe94   :  { %2260 = vrot.lane.b32.xlu1 %v9844_v22, %s9126_s0 }
 0xeae   :  { %v2174_v28 = vpop.f32.mrb[72].mxu0 }
 0xeaf   :  { %v7828_v59 = vpop.f32.mrb[73].mxu0 }
 0xeb0   :  { %v2177_v0 = vpop.f32.mrb[74].mxu0  ;;  %v10162_v59 = vrot.slane %v1194_v6, %v9703_v18 }
 0xeb1   :  { %v10157_v4 = vadd.f32 %v2177_v0, %v2124_v38  ;;  %v7829_v40 = vpop.f32.mrb[75].mxu0 }
 0xef8   :  { %v1829_v25 = vpop.xlane.xlu1 %1828 }
 0xef9   :  { %v1833_v41 = vmul.f32 0.03125, %v1829_v25 }
 0xefa   :  { %v1832_v7 = vpop.xlane.xlu0 %1831 }
 0xefb   :  { %v1835_v5 = vadd.f32 1e-05, %v1833_v41  ;;  %v1834_v3 = vmul.f32 0.03125, %v1832_v7 }
 0xefd   :  { %8642 = vrsqrt.f32 %v1835_v5  ;;  %v1836_v24 = vadd.f32 1e-05, %v1834_v3  ;;  %v10166_v3 = vrot.slane %v1194_v6, %v9706_v20 }
 0xefe   :  { %v2012_v50 = vpop.permute.xlu0 %2011 }
 0xeff   :  { %8644 = vrsqrt.f32 %v1836_v24 }
 0xf02   :  { %v2188_v12 = vpop.permute.xlu0 %2187 }
 0xf03   :  { %v2199_v35 = vsel %vm418_vm1, %v2188_v12, 0 }
 0xf04   :  { %7831 = vmatpush3.bf16.xpose.msra.mxu0 %v2199_v35 }
 0xf05   :  { %7832 = vmatprep.subr.bf16.mxu0 %v11782_v43 }
 0xf06   :  { %v2190_v25 = vpop.permute.xlu0 %2189 }
 0xf07   :  { %v8643_v0 = vpop.eup %8642  ;;  %v2202_v24 = vsel %vm418_vm1, %v2190_v25, 0 }
 0xf08   :  { %v1839_v40 = vmul.f32 %v8643_v0, %v1823_v31 }
 0xf09   :  { %v8645_v56 = vpop.eup %8644 }
 0xf0a   :  { %v1845_v41 = vmul.f32 %v10162_v59, %v1839_v40  ;;  %v1840_v7 = vmul.f32 %v8645_v56, %v1824_v23  ;;  %v2192_v31 = vpop.permute.xlu0 %2191 }
 0xf0b   :  { %v2205_v56 = vsel %vm418_vm1, %v2192_v31, 0 }
 0xf0c   :  { %v1846_v12 = vmul.f32 %v10162_v59, %v1840_v7  ;;  %7833 = vmatpush3.bf16.xpose.msra.mxu0 %v2202_v24  ;;  %v1851_v35 = vadd.f32 %v10166_v3, %v1845_v41 }
 0xf0d   :  { %7834 = vmatprep.subr.bf16.mxu0 %v11782_v43 }
 0xf0e   :  { %v1852_v5 = vadd.f32 %v10166_v3, %v1846_v12  ;;  %v2194_v6 = vpop.permute.xlu0 %2193 }
 0xf0f   :  { %v2208_v23 = vsel %vm418_vm1, %v2194_v6, 0 }
 0xf10   :  { %v1866_v0 = vpack.c.bf16 %v1852_v5, %v1851_v35  ;;  %v2010_v5 = vpop.permute.xlu1 %2009 }
 0xf12   :  { %7795 = vmatmul.mubr.msk.bf16.vlgmr.msra.gmra.mrb[48].mxu1 %vm418_vm1, %v1866_v0 }
 0xf13   :  { %7799 = vmatpush3.bf16.msra.mxu1 %v8532_v8  ;;  %7806 = vmatprep.mubr.msk.bf16.mxu1 %vm9122_vm3, %v11782_v43  ;;  %v2175_v8 = vadd.f32 %v2174_v28, %v2124_v38 }
 0xf14   :  { %7835 = vmatpush3.bf16.xpose.msra.mxu0 %v2205_v56  ;;  %7800 = vmatprep.subr.bf16.mxu1 %v11782_v43  ;;  %v2014_v31 = vpop.permute.xlu1 %2013 }
 0xf15   :  { %7836 = vmatprep.subr.bf16.mxu0 %v11782_v43  ;;  %v2181_v40 = vpack.c.bf16 %v2175_v8, %v2175_v8 }
 0xf17   :  { %7801 = vmatpush3.bf16.msra.mxu1 %v8534_v36 }
 0xf18   :  { %7802 = vmatprep.subr.bf16.mxu1 %v11782_v43 }
 0xf1b   :  { %7803 = vmatpush3.bf16.msra.mxu1 %v10114_v21  ;;  %v1865_v21 = vld [vmem:[%s11783_s21] sm:$0x7] }
 0xf1c   :  { %7837 = vmatpush3.bf16.xpose.msra.mxu0 %v2208_v23  ;;  %7804 = vmatprep.subr.bf16.mxu1 %v11782_v43  ;;  %v1870_v36 = vrot.slane %v1865_v21, %v9703_v18 }
 0xf1d   :  { %7854 = vmatprep.subr.bf16.mxu0 %v11782_v43 }
 0xf1f   :  { %7805 = vmatpush3.bf16.msra.mxu1 %v10124_v17 }
 0xf20   :  { %7810 = vmatprep.subr.bf16.mxu1 %v11782_v43 }
 0xf23   :  { %7839 = vmatmul.mubr.msk.bf16.vlgmr.msra.gmra.mrb[76].mxu0 %vm418_vm1, %v2181_v40 }
 0xf24   :  { %7862 = vmatprep.mubr.msk.bf16.mxu0 %vm9122_vm3, %v11782_v43 }
 0xfe5   :  { %v1920_v25 = vpop.f32.mrb[48].mxu1 }
 0xfe6   :  { %v10193_v28 = vadd.f32 %v1920_v25, %v1870_v36  ;;  %v7796_v38 = vpop.f32.mrb[49].mxu1 }
 0xfe7   :  { %v1923_v41 = vpop.f32.mrb[50].mxu1 }
 0xfe8   :  { %11784 = vst [vmem:[#allocation43_spill] sm:$0xff] %v10193_v28  ;;  %v10195_v17 = vadd.f32 %v1923_v41, %v1870_v36  ;;  %v7797_v7 = vpop.f32.mrb[51].mxu1  ;;  %v1927_v24 = vmax.f32 %v10193_v28, 0.0  ;;  %v2016_v36 = vpop.permute.xlu1 %2015 }
 0xfea   :  { %11785 = vst [vmem:[#allocation44_spill] sm:$0xff] %v10195_v17  ;;  %v1928_v12 = vmax.f32 %v10195_v17, 0.0 }
 0xfec   :  { %v1929_v35 = vpack.c.bf16 %v1928_v12, %v1927_v24  ;;  %v1933_v24 = vrot.slane %v1865_v21, %v9706_v20 }
 0xfee   :  { %7807 = vmatmul.mubr.msk.bf16.vlgmr.msra.gmra.mrb[52].mxu1 %vm1377_vm7, %v1929_v35 }
 0xfef   :  { %7811 = vmatpush3.bf16.msra.mxu1 %v2010_v5  ;;  %7818 = vmatprep.mubr.msk.bf16.mxu1 %vm9122_vm3, %v11782_v43 }
 0xff0   :  { %7812 = vmatprep.subr.bf16.mxu1 %v11782_v43 }
 0xff3   :  { %7813 = vmatpush3.bf16.msra.mxu1 %v2012_v50 }
 0xff4   :  { %7814 = vmatprep.subr.bf16.mxu1 %v11782_v43 }
 0xff6   :  { %v2244_v0 = vpop.f32.mrb[76].mxu0 }
 0xff7   :  { %v2317_v56 = vmul.f32 0.17677669, %v2244_v0  ;;  %v7840_v6 = vpop.f32.mrb[77].mxu0  ;;  %7815 = vmatpush3.bf16.msra.mxu1 %v2014_v31 }
 0xff8   :  { %v2247_v23 = vpop.f32.mrb[78].mxu0  ;;  %7816 = vmatprep.subr.bf16.mxu1 %v11782_v43 }
 0xff9   :  { %v7841_v8 = vpop.f32.mrb[79].mxu0  ;;  %v2319_v40 = vsel %vm1377_vm7, %v2317_v56, -inf }
 0xffa   :  { %2320 = vmax.xlane.f32.xlu0 %v2319_v40  ;;  %v2255_v8 = vpop.permute.xlu1 %2254 }
 0xffb   :  { %7817 = vmatpush3.bf16.msra.mxu1 %v2016_v36  ;;  %v2266_v36 = vsel %vm418_vm1, %v2255_v8, 0 }
 0xffc   :  { %7842 = vmatprep.subr.bf16.mxu1 %v11782_v43 }
 0xffe   :  { %v2257_v21 = vpop.permute.xlu1 %2256 }
0x1087   :  { %v2321_v25 = vpop.xlane.xlu0 %2320 }
0x1088   :  { %v2325_v50 = vsub.f32 %v2317_v56, %v2321_v25  ;;  %v2269_v25 = vsel %vm418_vm1, %v2257_v21, 0 }
0x108a   :  { %v2327_v38 = vmul.f32 1.442695, %v2325_v50  ;;  %v2259_v50 = vpop.permute.xlu1 %2258 }
0x108c   :  { %8646 = vpow2.f32 %v2327_v38  ;;  %v2272_v38 = vsel %vm418_vm1, %v2259_v50, 0 }
0x1096   :  { %v10207_v41 = vpop.eup %8646 }
0x1097   :  { %v2331_v7 = vsel %vm1377_vm7, %v10207_v41, 0.0 }
0x1098   :  { %2332 = vadd.xlane.f32.xlu0 %v2331_v7  ;;  %v2261_v7 = vpop.permute.xlu1 %2260 }
0x10ae   :  { %2406 = vrot.lane.b32.xlu0 %v9790_v9, %s9126_s0 }
0x10b2   :  { %2351 = vrot.lane.b32.xlu0 %v9758_v19, %s9126_s0 }
0x10c1   :  { %v1995_v12 = vpop.f32.mrb[52].mxu1 }
0x10c2   :  { %v1996_v35 = vadd.f32 %v1995_v12, %v1933_v24  ;;  %v7808_v5 = vpop.f32.mrb[53].mxu1  ;;  %v2182_v12 = vpack.c.bf16 %v10157_v4, %v10157_v4 }
0x10c3   :  { %v1998_v31 = vpop.f32.mrb[54].mxu1 }
0x10c4   :  { %v1999_v0 = vadd.f32 %v1998_v31, %v1933_v24  ;;  %v7809_v56 = vpop.f32.mrb[55].mxu1  ;;  %v2002_v6 = vmax.f32 %v1996_v35, 0.0  ;;  %v2275_v24 = vsel %vm418_vm1, %v2261_v7, 0 }
0x10c6   :  { %v2003_v23 = vmax.f32 %v1999_v0, 0.0 }
0x10c8   :  { %v2004_v40 = vpack.c.bf16 %v2003_v23, %v2002_v6 }
0x10ca   :  { %7819 = vmatmul.mubr.msk.bf16.vlgmr.msra.gmra.mrb[56].mxu1 %vm1377_vm7, %v2004_v40 }
0x10cb   :  { %7843 = vmatpush3.bf16.xpose.msra.mxu1 %v2266_v36  ;;  %7850 = vmatprep.mubr.msk.bf16.mxu1 %vm9122_vm3, %v11782_v43 }
0x10cc   :  { %7844 = vmatprep.subr.bf16.mxu1 %v11782_v43 }
0x10d3   :  { %7845 = vmatpush3.bf16.xpose.msra.mxu1 %v2269_v25 }
0x10d4   :  { %7846 = vmatprep.subr.bf16.mxu1 %v11782_v43 }
0x10db   :  { %7847 = vmatpush3.bf16.xpose.msra.mxu1 %v2272_v38 }
0x10dc   :  { %7848 = vmatprep.subr.bf16.mxu1 %v11782_v43 }
0x10e3   :  { %7849 = vmatpush3.bf16.xpose.msra.mxu1 %v2275_v24 }
0x10e4   :  { %7866 = vmatprep.subr.bf16.mxu1 %v11782_v43 }
0x10ea   :  { %7851 = vmatmul.mubr.msk.bf16.vlgmr.msra.gmra.mrb[60].mxu1 %vm418_vm1, %v2182_v12 }
0x10eb   :  { %7874 = vmatprep.mubr.msk.bf16.mxu1 %vm9122_vm3, %v11782_v43 }
0x1125   :  { %v2333_v35 = vpop.xlane.xlu0 %2332 }
0x1129   :  { %v2407_v5 = vpop.permute.xlu0 %2406 }
0x112a   :  { %7867 = vmatpush3.bf16.msra.mxu1 %v2407_v5 }
0x112b   :  { %7868 = vmatprep.subr.bf16.mxu1 %v11782_v43 }
0x112d   :  { %v2352_v12 = vpop.permute.xlu0 %2351 }
0x119d   :  { %v10233_v31 = vpop.f32.mrb[56].mxu1 }
0x119e   :  { %11786 = vst [vmem:[#allocation45_spill] sm:$0xff] %v10233_v31  ;;  %v7820_v0 = vpop.f32.mrb[57].mxu1 }
0x119f   :  { %v10235_v56 = vpop.f32.mrb[58].mxu1 }
0x11a0   :  { %11787 = vst [vmem:[#allocation46_spill] sm:$0xff] %v10235_v56  ;;  %v7821_v6 = vpop.f32.mrb[59].mxu1 }
0x11bd   :  { %v2311_v23 = vpop.f32.mrb[60].mxu1 }
0x11be   :  { %v2318_v8 = vmul.f32 0.17677669, %v2311_v23  ;;  %v7852_v40 = vpop.f32.mrb[61].mxu1 }
0x11bf   :  { %v2314_v4 = vpop.f32.mrb[62].mxu1 }
0x11c0   :  { %v7853_v36 = vpop.f32.mrb[63].mxu1  ;;  %v2322_v21 = vsel %vm1377_vm7, %v2318_v8, -inf }
0x11c1   :  { %2323 = vmax.xlane.f32.xlu1 %v2322_v21 }
0x11d2   :  { %2347 = vrot.lane.b32.xlu1 %v9726_v42, %s9126_s0 }
0x11d6   :  { %2349 = vrot.lane.b32.xlu1 %v9742_v60, %s9126_s0 }
0x11da   :  { %2408 = vrot.lane.b32.xlu1 %v9806_v44, %s9126_s0 }
0x11de   :  { %2410 = vrot.lane.b32.xlu1 %v9822_v11, %s9126_s0 }
0x11e2   :  { %2412 = vrot.lane.b32.xlu1 %v9838_v61, %s9126_s0 }
0x11e6   :  { %2468 = vrot.lane.b32.xlu1 %v10074_v37, %s9126_s0 }
0x124e   :  { %v2324_v25 = vpop.xlane.xlu1 %2323 }
0x124f   :  { %v2326_v50 = vsub.f32 %v2318_v8, %v2324_v25 }
0x1251   :  { %v2329_v38 = vmul.f32 1.442695, %v2326_v50 }
0x1252   :  { %v2348_v7 = vpop.permute.xlu1 %2347 }
0x1253   :  { %8648 = vpow2.f32 %v2329_v38  ;;  %7855 = vmatpush3.bf16.msra.mxu0 %v2348_v7 }
0x1254   :  { %7856 = vmatprep.subr.bf16.mxu0 %v11782_v43  ;;  %8650 = vrcp.f32 %v2333_v35 }
0x1256   :  { %v2350_v24 = vpop.permute.xlu1 %2349 }
0x1257   :  { %7857 = vmatpush3.bf16.msra.mxu0 %v2350_v24 }
0x1258   :  { %7858 = vmatprep.subr.bf16.mxu0 %v11782_v43 }
0x125a   :  { %v2409_v5 = vpop.permute.xlu1 %2408 }
0x125b   :  { %7859 = vmatpush3.bf16.msra.mxu0 %v2352_v12  ;;  %7869 = vmatpush3.bf16.msra.mxu1 %v2409_v5 }
0x125c   :  { %7870 = vmatprep.subr.bf16.mxu1 %v11782_v43  ;;  %7860 = vmatprep.subr.bf16.mxu0 %v11782_v43 }
0x125d   :  { %v8649_v37 = vpop.eup %8648 }
0x125e   :  { %v2411_v0 = vpop.permute.xlu1 %2410  ;;  %v2334_v6 = vsel %vm1377_vm7, %v8649_v37, 0.0  ;;  %v8651_v8 = vpop.eup %8650 }
0x125f   :  { %2335 = vadd.xlane.f32.xlu0 %v2334_v6  ;;  %7871 = vmatpush3.bf16.msra.mxu1 %v2411_v0  ;;  %v2339_v4 = vmul.f32 %v8651_v8, %v10207_v41  ;;  %v2465_v8 = vrot.slane %v10153_v15, %v9706_v20 }
0x1260   :  { %7872 = vmatprep.subr.bf16.mxu1 %v11782_v43 }
0x1261   :  { %v2341_v21 = vpack.c.bf16 %v2339_v4, %v2339_v4 }
0x1262   :  { %v2413_v23 = vpop.permute.xlu1 %2412 }
0x1263   :  { %7873 = vmatpush3.bf16.msra.mxu1 %v2413_v23 }
0x1264   :  { %7886 = vmatprep.subr.bf16.mxu1 %v11782_v43 }
0x1266   :  { %v2469_v41 = vpop.permute.xlu1 %2468 }
0x1275   :  { %2353 = vrot.lane.b32.xlu0 %v9774_v49, %s9126_s0 }
0x1279   :  { %2466 = vrot.lane.b32.xlu0 %v10067_v58, %s9126_s0 }
0x12ec   :  { %v2336_v40 = vpop.xlane.xlu0 %2335 }
0x12ed   :  { %8652 = vrcp.f32 %v2336_v40 }
0x12f0   :  { %v2354_v36 = vpop.permute.xlu0 %2353 }
0x12f1   :  { %7861 = vmatpush3.bf16.msra.mxu0 %v2354_v36 }
0x12f2   :  { %7878 = vmatprep.subr.bf16.mxu0 %v11782_v43 }
0x12f4   :  { %7863 = vmatmul.mubr.msk.bf16.vlgmr.msra.gmra.mrb[80].mxu0 %vm1377_vm7, %v2341_v21  ;;  %v2467_v58 = vpop.permute.xlu0 %2466 }
0x12f5   :  { %7882 = vmatprep.mubr.msk.bf16.mxu0 %vm9122_vm3, %v11782_v43  ;;  %7879 = vmatpush3.bf16.msra.mxu0 %v2467_v58 }
0x12f6   :  { %7880 = vmatprep.subr.bf16.mxu0 %v11782_v43 }
0x12f7   :  { %v8653_v25 = vpop.eup %8652 }
0x12f8   :  { %v2340_v50 = vmul.f32 %v8653_v25, %v8649_v37 }
0x12f9   :  { %7881 = vmatpush3.bf16.msra.mxu0 %v2469_v41 }
0x12fa   :  { %v2342_v38 = vpack.c.bf16 %v2340_v50, %v2340_v50  ;;  %7894 = vmatprep.subr.bf16.mxu0 %v11782_v43 }
0x12fc   :  { %7875 = vmatmul.mubr.msk.bf16.vlgmr.msra.gmra.mrb[64].mxu1 %vm1377_vm7, %v2342_v38 }
0x12fd   :  { %7890 = vmatprep.mubr.msk.bf16.mxu1 %vm9122_vm3, %v11782_v43 }
0x13c7   :  { %v2396_v35 = vpop.f32.mrb[80].mxu0 }
0x13c8   :  { %v7864_v7 = vpop.f32.mrb[81].mxu0 }
0x13c9   :  { %v2399_v24 = vpop.f32.mrb[82].mxu0 }
0x13ca   :  { %v7865_v12 = vpop.f32.mrb[83].mxu0 }
0x13cf   :  { %v2455_v5 = vpop.f32.mrb[64].mxu1 }
0x13d0   :  { %v2461_v37 = vpack.c.bf16 %v2455_v5, %v2396_v35  ;;  %v7876_v0 = vpop.f32.mrb[65].mxu1 }
0x13d1   :  { %v2458_v6 = vpop.f32.mrb[66].mxu1 }
0x13d2   :  { %v7877_v23 = vpop.f32.mrb[67].mxu1  ;;  %7883 = vmatmul.mubr.msk.bf16.vlgmr.msra.gmra.mrb[84].mxu0 %vm418_vm1, %v2461_v37 }
0x13d3   :  { %7910 = vmatprep.mubr.msk.bf16.mxu0 %vm9122_vm3, %v11782_v43 }
0x14a5   :  { %v2509_v40 = vpop.f32.mrb[84].mxu0 }
0x14a6   :  { %v2510_v4 = vadd.f32 %v2509_v40, %v2465_v8  ;;  %v7884_v36 = vpop.f32.mrb[85].mxu0 }
0x14a7   :  { %v2512_v21 = vpop.f32.mrb[86].mxu0  ;;  %v8539_v36 = vld [vmem:[%s11716_s14 + $0x18] sm:$0xff]  }
0x14a8   :  { %v2516_v25 = vmul.f32 %v2510_v4, %v9984_v48  ;;  %v2513_v50 = vadd.f32 %v2512_v21, %v2465_v8  ;;  %v7885_v38 = vpop.f32.mrb[87].mxu0  ;;  %v8540_v21 = vld [vmem:[%s11717_s15 + $0x40] sm:$0xff]  }
0x14a9   :  { %7895 = vmatpush3.bf16.msra.mxu0 %v8540_v21  ;;  %v8543_v38 = vld [vmem:[%s11717_s15 + $0x58] sm:$0xff]  }
0x14aa   :  { %v2517_v58 = vmul.f32 %v2513_v50, %v9987_v10  ;;  %v2518_v41 = vadd.f32 %v2516_v25, %v10088_v30  ;;  %v8541_v25 = vld [vmem:[%s11717_s15 + $0x48] sm:$0xff]   ;;  %7896 = vmatprep.subr.bf16.mxu0 %v11782_v43  ;;  %v8542_v50 = vld [vmem:[%s11717_s15 + $0x50] sm:$0xff]  }
0x14ac   :  { %v2520_v35 = vsel %vm418_vm1, %v2518_v41, 0.0  ;;  %v2519_v7 = vadd.f32 %v2517_v58, %v10092_v13  ;;  %v8538_v13 = vld [vmem:[%s11716_s14 + $0x10] sm:$0xff]   ;;  %v8544_v58 = vld [vmem:[%s11717_s15 + $0x60] sm:$0xff]  }
0x14ad   :  { %2521 = vadd.xlane.f32.xlu0 %v2520_v35  ;;  %7887 = vmatpush3.bf16.msra.mxu1 %v8538_v13 }
0x14ae   :  { %v2523_v24 = vsel %vm418_vm1, %v2519_v7, 0.0  ;;  %7888 = vmatprep.subr.bf16.mxu1 %v11782_v43  ;;  %7897 = vmatpush3.bf16.msra.mxu0 %v8541_v25 }
0x14af   :  { %2524 = vadd.xlane.f32.xlu1 %v2523_v24  ;;  %7898 = vmatprep.subr.bf16.mxu0 %v11782_v43 }
0x14b1   :  { %7889 = vmatpush3.bf16.msra.mxu1 %v8539_v36  ;;  %v2555_v36 = vrot.slane %v10153_v15, %v10034_v39 }
0x14b2   :  { %7914 = vmatprep.subr.bf16.mxu1 %v11782_v43  ;;  %7899 = vmatpush3.bf16.msra.mxu0 %v8542_v50 }
0x14b3   :  { %7900 = vmatprep.subr.bf16.mxu0 %v11782_v43 }
0x14b6   :  { %7901 = vmatpush3.bf16.msra.mxu0 %v8543_v38 }
0x14b7   :  { %7902 = vmatprep.subr.bf16.mxu0 %v11782_v43 }
0x14ba   :  { %7903 = vmatpush3.bf16.msra.mxu0 %v8544_v58  ;;  %v8546_v58 = vld [vmem:[%s11717_s15 + $0x70] sm:$0xff]  }
0x14bb   :  { %7904 = vmatprep.subr.bf16.mxu0 %v11782_v43 }
0x153a   :  { %v2522_v12 = vpop.xlane.xlu0 %2521 }
0x153b   :  { %v2526_v5 = vmul.f32 0.03125, %v2522_v12 }
0x153c   :  { %v2525_v37 = vpop.xlane.xlu1 %2524 }
0x153d   :  { %v2528_v0 = vsub.f32 %v2518_v41, %v2526_v5  ;;  %v2527_v6 = vmul.f32 0.03125, %v2525_v37  ;;  %v8545_v41 = vld [vmem:[%s11717_s15 + $0x68] sm:$0xff]  }
0x153e   :  { %7905 = vmatpush3.bf16.msra.mxu0 %v8545_v41 }
0x153f   :  { %v2529_v23 = vsub.f32 %v2519_v7, %v2527_v6  ;;  %v2530_v8 = vmul.f32 %v2528_v0, %v2528_v0  ;;  %7906 = vmatprep.subr.bf16.mxu0 %v11782_v43 }
0x1541   :  { %v2532_v40 = vsel %vm418_vm1, %v2530_v8, 0.0  ;;  %v2531_v4 = vmul.f32 %v2529_v23, %v2529_v23  ;;  %v2549_v8 = vrot.slane %v10153_v15, %v10029_v62 }
0x1542   :  { %2533 = vadd.xlane.f32.xlu0 %v2532_v40  ;;  %7907 = vmatpush3.bf16.msra.mxu0 %v8546_v58 }
0x1543   :  { %v2535_v30 = vsel %vm418_vm1, %v2531_v4, 0.0  ;;  %7908 = vmatprep.subr.bf16.mxu0 %v11782_v43 }
0x1546   :  { %2536 = vadd.xlane.f32.xlu0 %v2535_v30 }
0x15cf   :  { %v2534_v35 = vpop.xlane.xlu0 %2533 }
0x15d0   :  { %v2538_v7 = vmul.f32 0.03125, %v2534_v35 }
0x15d2   :  { %v2540_v24 = vadd.f32 1e-05, %v2538_v7 }
0x15d3   :  { %v2537_v12 = vpop.xlane.xlu0 %2536 }
0x15d4   :  { %8654 = vrsqrt.f32 %v2540_v24  ;;  %v2539_v5 = vmul.f32 0.03125, %v2537_v12 }
0x15d6   :  { %v2541_v37 = vadd.f32 1e-05, %v2539_v5 }
0x15d8   :  { %8656 = vrsqrt.f32 %v2541_v37 }
0x15de   :  { %v8655_v6 = vpop.eup %8654 }
0x15df   :  { %v2544_v40 = vmul.f32 %v8655_v6, %v2528_v0  ;;  %v8547_v0 = vld [vmem:[%s11717_s15 + $0x78] sm:$0xff]  }
0x15e0   :  { %7909 = vmatpush3.bf16.msra.mxu0 %v8547_v0 }
0x15e1   :  { %v2550_v30 = vmul.f32 %v2549_v8, %v2544_v40  ;;  %7946 = vmatprep.subr.bf16.mxu0 %v11782_v43  ;;  %v2647_v40 = vrot.slane %v10153_v15, %v9874_v57 }
0x15e2   :  { %v8657_v4 = vpop.eup %8656 }
0x15e3   :  { %v2545_v13 = vmul.f32 %v8657_v4, %v2529_v23  ;;  %v2556_v25 = vadd.f32 %v2555_v36, %v2550_v30  ;;  %v2567_v23 = vrot.slane %v10153_v15, %v10050_v26 }
0x15e5   :  { %v2551_v21 = vmul.f32 %v2549_v8, %v2545_v13 }
0x15e7   :  { %v2557_v50 = vadd.f32 %v2555_v36, %v2551_v21 }
0x15e9   :  { %v2563_v38 = vpack.c.bf16 %v2557_v50, %v2556_v25 }
0x15eb   :  { %7891 = vmatmul.mubr.msk.bf16.vlgmr.msra.gmra.mrb[68].mxu1 %vm418_vm1, %v2563_v38 }
0x15ec   :  { %7918 = vmatprep.mubr.msk.bf16.mxu1 %vm9122_vm3, %v11782_v43 }
0x16be   :  { %v2617_v41 = vpop.f32.mrb[68].mxu1 }
0x16bf   :  { %v2618_v35 = vadd.f32 %v2617_v41, %v2567_v23  ;;  %v7892_v7 = vpop.f32.mrb[69].mxu1 }
0x16c0   :  { %v2620_v24 = vpop.f32.mrb[70].mxu1 }
0x16c1   :  { %v2621_v12 = vadd.f32 %v2620_v24, %v2567_v23  ;;  %v7893_v5 = vpop.f32.mrb[71].mxu1  ;;  %v2624_v37 = vmax.f32 %v2618_v35, 0.0 }
0x16c3   :  { %v2625_v6 = vmax.f32 %v2621_v12, 0.0 }
0x16c5   :  { %v2643_v8 = vpack.c.bf16 %v2625_v6, %v2624_v37 }
0x16c7   :  { %7911 = vmatmul.mubr.bf16.vlgmr.msra.gmra.mrb[88].mxu0 %v2643_v8 }
0x16c8   :  { %7950 = vmatprep.mubr.msk.bf16.mxu0 %vm9122_vm3, %v11782_v43 }
0x179a   :  { %v2730_v4 = vpop.f32.mrb[88].mxu0 }
0x179b   :  { %v2731_v30 = vadd.f32 %v2730_v4, %v2647_v40  ;;  %v7912_v13 = vpop.f32.mrb[89].mxu0 }
0x179c   :  { %v2733_v36 = vpop.f32.mrb[90].mxu0  ;;  %v10353_v13 = vld [vmem:[%s11713_s11 + $0x28] sm:$0xff]  }
0x179d   :  { %v2737_v21 = vmul.f32 %v2731_v30, %v9984_v48  ;;  %v2734_v38 = vadd.f32 %v2733_v36, %v2647_v40  ;;  %v7913_v58 = vpop.f32.mrb[91].mxu0 }
0x179f   :  { %v2738_v0 = vmul.f32 %v2734_v38, %v9987_v10  ;;  %v2739_v23 = vadd.f32 %v2737_v21, %v2556_v25 }
0x17a1   :  { %v2741_v41 = vsel %vm418_vm1, %v2739_v23, 0.0  ;;  %v2740_v35 = vadd.f32 %v2738_v0, %v2557_v50  ;;  %v10346_v50 = vld [vmem:[%s11713_s11 + $0x20] sm:$0xff]  }
0x17a2   :  { %2742 = vadd.xlane.f32.xlu1 %v2741_v41  ;;  %7947 = vmatpush3.bf16.msra.mxu0 %v10346_v50  ;;  %v2770_v41 = vrot.slane %v10153_v15, %v10079_v47 }
0x17a3   :  { %v2744_v7 = vsel %vm418_vm1, %v2740_v35, 0.0  ;;  %7948 = vmatprep.subr.bf16.mxu0 %v11782_v43 }
0x17a4   :  { %2745 = vadd.xlane.f32.xlu0 %v2744_v7 }
0x17a6   :  { %7949 = vmatpush3.bf16.msra.mxu0 %v10353_v13 }
0x17a7   :  { %7954 = vmatprep.subr.bf16.mxu0 %v11782_v43 }
0x182f   :  { %v2743_v24 = vpop.xlane.xlu1 %2742 }
0x1830   :  { %v2747_v12 = vmul.f32 0.03125, %v2743_v24  ;;  %v2776_v24 = vrot.slane %v10153_v15, %v10082_v51 }
0x1831   :  { %v2746_v5 = vpop.xlane.xlu0 %2745 }
0x1832   :  { %v2749_v37 = vsub.f32 %v2739_v23, %v2747_v12  ;;  %v2748_v6 = vmul.f32 0.03125, %v2746_v5 }
0x1834   :  { %v2750_v8 = vsub.f32 %v2740_v35, %v2748_v6  ;;  %v2751_v4 = vmul.f32 %v2749_v37, %v2749_v37 }
0x1836   :  { %v2753_v40 = vsel %vm418_vm1, %v2751_v4, 0.0  ;;  %v2752_v30 = vmul.f32 %v2750_v8, %v2750_v8 }
0x1837   :  { %2754 = vadd.xlane.f32.xlu1 %v2753_v40 }
0x1838   :  { %v2756_v25 = vsel %vm418_vm1, %v2752_v30, 0.0 }
0x1839   :  { %2757 = vadd.xlane.f32.xlu0 %v2756_v25 }
0x18c4   :  { %v2755_v36 = vpop.xlane.xlu1 %2754 }
0x18c5   :  { %v2759_v21 = vmul.f32 0.03125, %v2755_v36 }
0x18c6   :  { %v2758_v38 = vpop.xlane.xlu0 %2757 }
0x18c7   :  { %v2761_v58 = vadd.f32 1e-05, %v2759_v21  ;;  %v2760_v0 = vmul.f32 0.03125, %v2758_v38  ;;  %v10369_v21 = vld [vmem:[#allocation7] sm:$0xff] }
0x18c9   :  { %8658 = vrsqrt.f32 %v2761_v58  ;;  %v2762_v23 = vadd.f32 1e-05, %v2760_v0 }
0x18cb   :  { %8660 = vrsqrt.f32 %v2762_v23 }
0x18d3   :  { %v8659_v35 = vpop.eup %8658 }
0x18d4   :  { %v2765_v7 = vmul.f32 %v8659_v35, %v2749_v37  ;;  %v10373_v37 = vld [vmem:[#allocation7 + $0x8] sm:$0xff] }
0x18d5   :  { %v8661_v12 = vpop.eup %8660 }
0x18d6   :  { %v2771_v5 = vmul.f32 %v2770_v41, %v2765_v7  ;;  %v2766_v6 = vmul.f32 %v8661_v12, %v2750_v8 }
0x18d8   :  { %v10361_v4 = vadd.f32 %v2776_v24, %v2771_v5  ;;  %v2772_v40 = vmul.f32 %v2770_v41, %v2766_v6 }
0x18da   :  { %v2779_v30 = vsel %vm418_vm1, %v10361_v4, 0.0  ;;  %v10365_v25 = vadd.f32 %v2776_v24, %v2772_v40  ;;  %v3072_v15 = vadd.f32 %v10369_v21, %v10361_v4  ;;  %v8550_v40 = vld [vmem:[%s11721_s19 + $0x20] sm:$0xff]  }
0x18db   :  { %2780 = vadd.xlane.f32.xlu1 %v2779_v30  ;;  %v10391_v30 = vld [vmem:[%s11721_s19 + $0x30] sm:$0xff]  }
0x18dc   :  { %v2782_v36 = vsel %vm418_vm1, %v10365_v25, 0.0  ;;  %v3073_v8 = vadd.f32 %v10373_v37, %v10365_v25 }
0x18dd   :  { %2783 = vadd.xlane.f32.xlu0 %v2782_v36  ;;  %v8552_v36 = vld [vmem:[%s11721_s19 + $0x28] sm:$0xff]  }
0x18de   :  { %v3074_v38 = vpack.c.bf16 %v3073_v8, %v3072_v15  ;;  %v10401_v15 = vld [vmem:[%s11721_s19 + $0x38] sm:$0xff]   ;;  %v8554_v8 = vld [vmem:[%s11720_s18 + $0x10] sm:$0xff]  }
0x18df   :  { %7915 = vmatpush3.bf16.msra.mxu1 %v8554_v8 }
0x18e0   :  { %7951 = vmatmul.mubr.msk.bf16.vlgmr.msra.gmra.mrb[92].mxu0 %vm418_vm1, %v3074_v38  ;;  %7916 = vmatprep.subr.bf16.mxu1 %v11782_v43  ;;  %v8555_v38 = vld [vmem:[%s11720_s18 + $0x18] sm:$0xff]  }
0x18e1   :  { %7962 = vmatprep.mubr.msk.bf16.mxu0 %vm9122_vm3, %v11782_v43 }
0x18e3   :  { %7917 = vmatpush3.bf16.msra.mxu1 %v8555_v38 }
0x18e4   :  { %7922 = vmatprep.subr.bf16.mxu1 %v11782_v43 }
0x1968   :  { %v2781_v58 = vpop.xlane.xlu1 %2780 }
0x1969   :  { %v2785_v0 = vmul.f32 0.03125, %v2781_v58  ;;  %v10430_v58 = vld [vmem:[#allocation18 + $0x10] sm:$0xff] }
0x196a   :  { %v2784_v23 = vpop.xlane.xlu0 %2783 }
0x196b   :  { %v2787_v41 = vsub.f32 %v10361_v4, %v2785_v0  ;;  %v2786_v35 = vmul.f32 0.03125, %v2784_v23  ;;  %v3078_v23 = vrot.slane %v10430_v58, %v9703_v18 }
0x196d   :  { %v2788_v7 = vsub.f32 %v10365_v25, %v2786_v35  ;;  %v2789_v24 = vmul.f32 %v2787_v41, %v2787_v41 }
0x196f   :  { %v2791_v12 = vsel %vm418_vm1, %v2789_v24, 0.0  ;;  %v2790_v5 = vmul.f32 %v2788_v7, %v2788_v7 }
0x1970   :  { %2792 = vadd.xlane.f32.xlu1 %v2791_v12 }
0x1971   :  { %v2794_v6 = vsel %vm418_vm1, %v2790_v5, 0.0 }
0x1972   :  { %2795 = vadd.xlane.f32.xlu0 %v2794_v6 }
0x1981   :  { %2968 = vrot.lane.b32.xlu1 %v8550_v40, %s9125_s22 }
0x1985   :  { %2972 = vrot.lane.b32.xlu1 %v10391_v30, %s9125_s22 }
0x1988   :  { %2970 = vrot.lane.b32.xlu0 %v8552_v36, %s9125_s22 }
0x1989   :  { %2974 = vrot.lane.b32.xlu1 %v10401_v15, %s9125_s22 }
0x198c   :  { %3137 = vrot.lane.b32.xlu0 %v9732_v45, %s9125_s22 }
0x198d   :  { %3200 = vrot.lane.b32.xlu1 %v9796_v14, %s9125_s22 }
0x1990   :  { %3139 = vrot.lane.b32.xlu0 %v9748_v1, %s9125_s22 }
0x1991   :  { %3202 = vrot.lane.b32.xlu1 %v9812_v53, %s9125_s22 }
0x1994   :  { %3141 = vrot.lane.b32.xlu0 %v9764_v32, %s9125_s22 }
0x1995   :  { %3204 = vrot.lane.b32.xlu1 %v9828_v34, %s9125_s22 }
0x1998   :  { %3143 = vrot.lane.b32.xlu0 %v9780_v54, %s9125_s22 }
0x1999   :  { %3206 = vrot.lane.b32.xlu1 %v9844_v22, %s9125_s22 }
0x19b3   :  { %v3128_v0 = vpop.f32.mrb[92].mxu0 }
0x19b4   :  { %v7952_v35 = vpop.f32.mrb[93].mxu0 }
0x19b5   :  { %v3131_v24 = vpop.f32.mrb[94].mxu0 }
0x19b6   :  { %v10434_v12 = vadd.f32 %v3131_v24, %v3078_v23  ;;  %v7953_v5 = vpop.f32.mrb[95].mxu0 }
0x19fd   :  { %v2793_v6 = vpop.xlane.xlu1 %2792 }
0x19fe   :  { %v2797_v8 = vmul.f32 0.03125, %v2793_v6 }
0x19ff   :  { %v2796_v38 = vpop.xlane.xlu0 %2795 }
0x1a00   :  { %v2799_v56 = vadd.f32 1e-05, %v2797_v8  ;;  %v2798_v31 = vmul.f32 0.03125, %v2796_v38 }
0x1a02   :  { %8662 = vrsqrt.f32 %v2799_v56  ;;  %v2800_v17 = vadd.f32 1e-05, %v2798_v31 }
0x1a03   :  { %v2971_v28 = vpop.permute.xlu0 %2970 }
0x1a04   :  { %8664 = vrsqrt.f32 %v2800_v17 }
0x1a07   :  { %v3138_v16 = vpop.permute.xlu0 %3137 }
0x1a08   :  { %v3149_v52 = vsel %vm418_vm1, %v3138_v16, 0 }
0x1a09   :  { %7955 = vmatpush3.bf16.xpose.msra.mxu0 %v3149_v52 }
0x1a0a   :  { %7956 = vmatprep.subr.bf16.mxu0 %v11782_v43 }
0x1a0b   :  { %v3140_v24 = vpop.permute.xlu0 %3139 }
0x1a0c   :  { %v8663_v35 = vpop.eup %8662  ;;  %v3152_v8 = vsel %vm418_vm1, %v3140_v24, 0 }
0x1a0d   :  { %v2803_v27 = vmul.f32 %v8663_v35, %v2787_v41 }
0x1a0e   :  { %v8665_v63 = vpop.eup %8664 }
0x1a0f   :  { %v2805_v5 = vmul.f32 %v2803_v27, %v10162_v59  ;;  %v2804_v6 = vmul.f32 %v8665_v63, %v2788_v7  ;;  %v3142_v16 = vpop.permute.xlu0 %3141  ;;  %v3129_v7 = vadd.f32 %v3128_v0, %v3078_v23 }
0x1a10   :  { %v3155_v41 = vsel %vm418_vm1, %v3142_v16, 0 }
0x1a11   :  { %v2806_v56 = vmul.f32 %v2804_v6, %v10162_v59  ;;  %7957 = vmatpush3.bf16.xpose.msra.mxu0 %v3152_v8  ;;  %v2807_v17 = vadd.f32 %v2805_v5, %v10166_v3 }
0x1a12   :  { %7958 = vmatprep.subr.bf16.mxu0 %v11782_v43 }
0x1a13   :  { %v2808_v52 = vadd.f32 %v2806_v56, %v10166_v3  ;;  %v3144_v63 = vpop.permute.xlu0 %3143  ;;  %v2969_v56 = vpop.permute.xlu1 %2968 }
0x1a14   :  { %v3158_v27 = vsel %vm418_vm1, %v3144_v63, 0 }
0x1a15   :  { %v2825_v31 = vpack.c.bf16 %v2808_v52, %v2807_v17 }
0x1a17   :  { %7919 = vmatmul.mubr.msk.bf16.vlgmr.msra.gmra.mrb[72].mxu1 %vm418_vm1, %v2825_v31  ;;  %v2973_v17 = vpop.permute.xlu1 %2972 }
0x1a18   :  { %7923 = vmatpush3.bf16.msra.mxu1 %v8550_v40  ;;  %7930 = vmatprep.mubr.msk.bf16.mxu1 %vm9122_vm3, %v11782_v43  ;;  %v3135_v40 = vpack.c.bf16 %v3129_v7, %v3129_v7 }
0x1a19   :  { %7959 = vmatpush3.bf16.xpose.msra.mxu0 %v3155_v41  ;;  %7924 = vmatprep.subr.bf16.mxu1 %v11782_v43 }
0x1a1a   :  { %7960 = vmatprep.subr.bf16.mxu0 %v11782_v43 }
0x1a1b   :  { %v2975_v7 = vpop.permute.xlu1 %2974 }
0x1a1c   :  { %7925 = vmatpush3.bf16.msra.mxu1 %v8552_v36 }
0x1a1d   :  { %7926 = vmatprep.subr.bf16.mxu1 %v11782_v43 }
0x1a20   :  { %7927 = vmatpush3.bf16.msra.mxu1 %v10391_v30  ;;  %v6979_v30 = vld [vmem:[%s11783_s21 + $0x4] sm:$0x7] }
0x1a21   :  { %7961 = vmatpush3.bf16.xpose.msra.mxu0 %v3158_v27  ;;  %7928 = vmatprep.subr.bf16.mxu1 %v11782_v43  ;;  %v2829_v36 = vrot.slane %v6979_v30, %v9703_v18 }
0x1a22   :  { %7978 = vmatprep.subr.bf16.mxu0 %v11782_v43 }
0x1a24   :  { %7929 = vmatpush3.bf16.msra.mxu1 %v10401_v15 }
0x1a25   :  { %7934 = vmatprep.subr.bf16.mxu1 %v11782_v43 }
0x1a28   :  { %7963 = vmatmul.mubr.msk.bf16.vlgmr.msra.gmra.mrb[96].mxu0 %vm418_vm1, %v3135_v40 }
0x1a29   :  { %7986 = vmatprep.mubr.msk.bf16.mxu0 %vm9122_vm3, %v11782_v43 }
0x1aea   :  { %v2879_v38 = vpop.f32.mrb[72].mxu1 }
0x1aeb   :  { %v10464_v0 = vadd.f32 %v2879_v38, %v2829_v36  ;;  %v7920_v23 = vpop.f32.mrb[73].mxu1 }
0x1aec   :  { %v2882_v35 = vpop.f32.mrb[74].mxu1 }
0x1aed   :  { %v10466_v15 = vadd.f32 %v2882_v35, %v2829_v36  ;;  %v7921_v24 = vpop.f32.mrb[75].mxu1  ;;  %v2886_v5 = vmax.f32 %v10464_v0, 0.0  ;;  %v2892_v35 = vrot.slane %v6979_v30, %v9706_v20 }
0x1aef   :  { %v2887_v6 = vmax.f32 %v10466_v15, 0.0 }
0x1af1   :  { %v2888_v8 = vpack.c.bf16 %v2887_v6, %v2886_v5 }
0x1af3   :  { %7931 = vmatmul.mubr.msk.bf16.vlgmr.msra.gmra.mrb[76].mxu1 %vm1377_vm7, %v2888_v8 }
0x1af4   :  { %7935 = vmatpush3.bf16.msra.mxu1 %v2969_v56  ;;  %7942 = vmatprep.mubr.msk.bf16.mxu1 %vm9122_vm3, %v11782_v43 }
0x1af5   :  { %7936 = vmatprep.subr.bf16.mxu1 %v11782_v43 }
0x1af8   :  { %7937 = vmatpush3.bf16.msra.mxu1 %v2971_v28 }
0x1af9   :  { %7938 = vmatprep.subr.bf16.mxu1 %v11782_v43 }
0x1afb   :  { %v3194_v52 = vpop.f32.mrb[96].mxu0 }
0x1afc   :  { %v3263_v16 = vmul.f32 0.17677669, %v3194_v52  ;;  %v7964_v31 = vpop.f32.mrb[97].mxu0  ;;  %7939 = vmatpush3.bf16.msra.mxu1 %v2973_v17 }
0x1afd   :  { %v3197_v41 = vpop.f32.mrb[98].mxu0  ;;  %7940 = vmatprep.subr.bf16.mxu1 %v11782_v43  ;;  %v3201_v31 = vpop.permute.xlu1 %3200 }
0x1afe   :  { %v7965_v63 = vpop.f32.mrb[99].mxu0  ;;  %v3265_v27 = vsel %vm1377_vm7, %v3263_v16, -inf }
0x1aff   :  { %3266 = vmax.xlane.f32.xlu0 %v3265_v27  ;;  %v3212_v63 = vsel %vm418_vm1, %v3201_v31, 0 }
0x1b00   :  { %7941 = vmatpush3.bf16.msra.mxu1 %v2975_v7 }
0x1b01   :  { %7966 = vmatprep.subr.bf16.mxu1 %v11782_v43  ;;  %v3203_v30 = vpop.permute.xlu1 %3202 }
0x1b02   :  { %v3215_v27 = vsel %vm418_vm1, %v3203_v30, 0 }
0x1b05   :  { %v3205_v7 = vpop.permute.xlu1 %3204 }
0x1b8c   :  { %v3267_v40 = vpop.xlane.xlu0 %3266 }
0x1b8d   :  { %v3271_v28 = vsub.f32 %v3263_v16, %v3267_v40  ;;  %v3218_v40 = vsel %vm418_vm1, %v3205_v7, 0 }
0x1b8f   :  { %v3273_v36 = vmul.f32 1.442695, %v3271_v28  ;;  %v3207_v28 = vpop.permute.xlu1 %3206 }
0x1b91   :  { %8666 = vpow2.f32 %v3273_v36  ;;  %v3221_v36 = vsel %vm418_vm1, %v3207_v28, 0 }
0x1b9b   :  { %v10478_v38 = vpop.eup %8666 }
0x1b9c   :  { %v3277_v23 = vsel %vm1377_vm7, %v10478_v38, 0.0 }
0x1b9d   :  { %3278 = vadd.xlane.f32.xlu0 %v3277_v23  ;;  %v3136_v23 = vpack.c.bf16 %v10434_v12, %v10434_v12 }
0x1bb3   :  { %3344 = vrot.lane.b32.xlu0 %v9790_v9, %s9125_s22 }
0x1bb7   :  { %3293 = vrot.lane.b32.xlu0 %v9758_v19, %s9125_s22 }
0x1bc6   :  { %v2954_v24 = vpop.f32.mrb[76].mxu1 }
0x1bc7   :  { %v2955_v5 = vadd.f32 %v2954_v24, %v2892_v35  ;;  %v7932_v6 = vpop.f32.mrb[77].mxu1 }
0x1bc8   :  { %v2957_v8 = vpop.f32.mrb[78].mxu1 }
0x1bc9   :  { %v2958_v56 = vadd.f32 %v2957_v8, %v2892_v35  ;;  %v7933_v17 = vpop.f32.mrb[79].mxu1  ;;  %v2961_v52 = vmax.f32 %v2955_v5, 0.0 }
0x1bcb   :  { %v2962_v16 = vmax.f32 %v2958_v56, 0.0 }
0x1bcd   :  { %v2963_v41 = vpack.c.bf16 %v2962_v16, %v2961_v52 }
0x1bcf   :  { %7943 = vmatmul.mubr.msk.bf16.vlgmr.msra.gmra.mrb[80].mxu1 %vm1377_vm7, %v2963_v41 }
0x1bd0   :  { %7967 = vmatpush3.bf16.xpose.msra.mxu1 %v3212_v63  ;;  %7974 = vmatprep.mubr.msk.bf16.mxu1 %vm9122_vm3, %v11782_v43 }
0x1bd1   :  { %7968 = vmatprep.subr.bf16.mxu1 %v11782_v43 }
0x1bd8   :  { %7969 = vmatpush3.bf16.xpose.msra.mxu1 %v3215_v27 }
0x1bd9   :  { %7970 = vmatprep.subr.bf16.mxu1 %v11782_v43 }
0x1be0   :  { %7971 = vmatpush3.bf16.xpose.msra.mxu1 %v3218_v40 }
0x1be1   :  { %7972 = vmatprep.subr.bf16.mxu1 %v11782_v43 }
0x1be8   :  { %7973 = vmatpush3.bf16.xpose.msra.mxu1 %v3221_v36 }
0x1be9   :  { %7990 = vmatprep.subr.bf16.mxu1 %v11782_v43 }
0x1bef   :  { %7975 = vmatmul.mubr.msk.bf16.vlgmr.msra.gmra.mrb[84].mxu1 %vm418_vm1, %v3136_v23 }
0x1bf0   :  { %7998 = vmatprep.mubr.msk.bf16.mxu1 %vm9122_vm3, %v11782_v43 }
0x1c2a   :  { %v3279_v35 = vpop.xlane.xlu0 %3278 }
0x1c2e   :  { %v3345_v24 = vpop.permute.xlu0 %3344 }
0x1c2f   :  { %7991 = vmatpush3.bf16.msra.mxu1 %v3345_v24 }
0x1c30   :  { %7992 = vmatprep.subr.bf16.mxu1 %v11782_v43 }
0x1c32   :  { %v3294_v28 = vpop.permute.xlu0 %3293 }
0x1ca2   :  { %v10504_v5 = vpop.f32.mrb[80].mxu1 }
0x1ca3   :  { %v7944_v6 = vpop.f32.mrb[81].mxu1 }
0x1ca4   :  { %v10506_v8 = vpop.f32.mrb[82].mxu1 }
0x1ca5   :  { %v7945_v56 = vpop.f32.mrb[83].mxu1 }
0x1cc2   :  { %v3257_v17 = vpop.f32.mrb[84].mxu1 }
0x1cc3   :  { %v3264_v52 = vmul.f32 0.17677669, %v3257_v17  ;;  %v7976_v16 = vpop.f32.mrb[85].mxu1 }
0x1cc4   :  { %v3260_v12 = vpop.f32.mrb[86].mxu1 }
0x1cc5   :  { %v7977_v31 = vpop.f32.mrb[87].mxu1  ;;  %v3268_v41 = vsel %vm1377_vm7, %v3264_v52, -inf }
0x1cc6   :  { %3269 = vmax.xlane.f32.xlu1 %v3268_v41 }
0x1cd7   :  { %3289 = vrot.lane.b32.xlu1 %v9726_v42, %s9125_s22 }
0x1cdb   :  { %3291 = vrot.lane.b32.xlu1 %v9742_v60, %s9125_s22 }
0x1cdf   :  { %3346 = vrot.lane.b32.xlu1 %v9806_v44, %s9125_s22 }
0x1ce3   :  { %3348 = vrot.lane.b32.xlu1 %v9822_v11, %s9125_s22 }
0x1ce7   :  { %3350 = vrot.lane.b32.xlu1 %v9838_v61, %s9125_s22 }
0x1ceb   :  { %3406 = vrot.lane.b32.xlu1 %v10353_v13, %s9126_s0 }
0x1d53   :  { %v3270_v63 = vpop.xlane.xlu1 %3269 }
0x1d54   :  { %v3272_v30 = vsub.f32 %v3264_v52, %v3270_v63 }
0x1d56   :  { %v3275_v27 = vmul.f32 1.442695, %v3272_v30 }
0x1d57   :  { %v3290_v7 = vpop.permute.xlu1 %3289 }
0x1d58   :  { %8668 = vpow2.f32 %v3275_v27  ;;  %7979 = vmatpush3.bf16.msra.mxu0 %v3290_v7 }
0x1d59   :  { %7980 = vmatprep.subr.bf16.mxu0 %v11782_v43  ;;  %8670 = vrcp.f32 %v3279_v35 }
0x1d5b   :  { %v3292_v40 = vpop.permute.xlu1 %3291 }
0x1d5c   :  { %7981 = vmatpush3.bf16.msra.mxu0 %v3292_v40 }
0x1d5d   :  { %7982 = vmatprep.subr.bf16.mxu0 %v11782_v43 }
0x1d5f   :  { %v3347_v36 = vpop.permute.xlu1 %3346 }
0x1d60   :  { %7983 = vmatpush3.bf16.msra.mxu0 %v3294_v28  ;;  %7993 = vmatpush3.bf16.msra.mxu1 %v3347_v36 }
0x1d61   :  { %7994 = vmatprep.subr.bf16.mxu1 %v11782_v43  ;;  %7984 = vmatprep.subr.bf16.mxu0 %v11782_v43 }
0x1d62   :  { %v8669_v13 = vpop.eup %8668 }
0x1d63   :  { %v3349_v23 = vpop.permute.xlu1 %3348  ;;  %v3280_v24 = vsel %vm1377_vm7, %v8669_v13, 0.0  ;;  %v8671_v56 = vpop.eup %8670 }
0x1d64   :  { %3281 = vadd.xlane.f32.xlu0 %v3280_v24  ;;  %7995 = vmatpush3.bf16.msra.mxu1 %v3349_v23  ;;  %v3285_v52 = vmul.f32 %v8671_v56, %v10478_v38  ;;  %v3403_v24 = vrot.slane %v10430_v58, %v9706_v20 }
0x1d65   :  { %7996 = vmatprep.subr.bf16.mxu1 %v11782_v43 }
0x1d66   :  { %v3287_v12 = vpack.c.bf16 %v3285_v52, %v3285_v52 }
0x1d67   :  { %v3351_v6 = vpop.permute.xlu1 %3350 }
0x1d68   :  { %7997 = vmatpush3.bf16.msra.mxu1 %v3351_v6 }
0x1d69   :  { %8010 = vmatprep.subr.bf16.mxu1 %v11782_v43 }
0x1d6b   :  { %v3407_v38 = vpop.permute.xlu1 %3406 }
0x1d7a   :  { %3295 = vrot.lane.b32.xlu0 %v9774_v49, %s9125_s22 }
0x1d7e   :  { %3404 = vrot.lane.b32.xlu0 %v10346_v50, %s9126_s0 }
0x1df1   :  { %v3282_v17 = vpop.xlane.xlu0 %3281 }
0x1df2   :  { %8672 = vrcp.f32 %v3282_v17 }
0x1df5   :  { %v3296_v16 = vpop.permute.xlu0 %3295 }
0x1df6   :  { %7985 = vmatpush3.bf16.msra.mxu0 %v3296_v16 }
0x1df7   :  { %8002 = vmatprep.subr.bf16.mxu0 %v11782_v43 }
0x1df9   :  { %7987 = vmatmul.mubr.msk.bf16.vlgmr.msra.gmra.mrb[100].mxu0 %vm1377_vm7, %v3287_v12  ;;  %v3405_v50 = vpop.permute.xlu0 %3404 }
0x1dfa   :  { %8006 = vmatprep.mubr.msk.bf16.mxu0 %vm9122_vm3, %v11782_v43  ;;  %8003 = vmatpush3.bf16.msra.mxu0 %v3405_v50 }
0x1dfb   :  { %8004 = vmatprep.subr.bf16.mxu0 %v11782_v43 }
0x1dfc   :  { %v8673_v31 = vpop.eup %8672 }
0x1dfd   :  { %v3286_v41 = vmul.f32 %v8673_v31, %v8669_v13 }
0x1dfe   :  { %8005 = vmatpush3.bf16.msra.mxu0 %v3407_v38 }
0x1dff   :  { %v3288_v63 = vpack.c.bf16 %v3286_v41, %v3286_v41  ;;  %8018 = vmatprep.subr.bf16.mxu0 %v11782_v43 }
0x1e01   :  { %7999 = vmatmul.mubr.msk.bf16.vlgmr.msra.gmra.mrb[88].mxu1 %vm1377_vm7, %v3288_v63 }
0x1e02   :  { %8014 = vmatprep.mubr.msk.bf16.mxu1 %vm9122_vm3, %v11782_v43 }
0x1ecc   :  { %v3338_v35 = vpop.f32.mrb[100].mxu0 }
0x1ecd   :  { %v7988_v30 = vpop.f32.mrb[101].mxu0 }
0x1ece   :  { %v3341_v27 = vpop.f32.mrb[102].mxu0 }
0x1ecf   :  { %v7989_v7 = vpop.f32.mrb[103].mxu0 }
0x1ed4   :  { %v3393_v40 = vpop.f32.mrb[88].mxu1 }
0x1ed5   :  { %v3399_v28 = vpack.c.bf16 %v3393_v40, %v3338_v35  ;;  %v8000_v36 = vpop.f32.mrb[89].mxu1 }
0x1ed6   :  { %v3396_v13 = vpop.f32.mrb[90].mxu1 }
0x1ed7   :  { %v8001_v23 = vpop.f32.mrb[91].mxu1  ;;  %8007 = vmatmul.mubr.msk.bf16.vlgmr.msra.gmra.mrb[104].mxu0 %vm418_vm1, %v3399_v28 }
0x1ed8   :  { %8034 = vmatprep.mubr.msk.bf16.mxu0 %vm9122_vm3, %v11782_v43 }
0x1faa   :  { %v3447_v6 = vpop.f32.mrb[104].mxu0 }
0x1fab   :  { %v3448_v56 = vadd.f32 %v3447_v6, %v3403_v24  ;;  %v8008_v17 = vpop.f32.mrb[105].mxu0  ;;  %v8557_v6 = vld [vmem:[%s11716_s14 + $0x28] sm:$0xff]  }
0x1fac   :  { %v3450_v52 = vpop.f32.mrb[106].mxu0  ;;  %v8559_v17 = vld [vmem:[%s11717_s15 + $0x88] sm:$0xff]  }
0x1fad   :  { %v3454_v16 = vmul.f32 %v3448_v56, %v9984_v48  ;;  %v3451_v12 = vadd.f32 %v3450_v52, %v3403_v24  ;;  %v8009_v31 = vpop.f32.mrb[107].mxu0  ;;  %v8558_v56 = vld [vmem:[%s11717_s15 + $0x80] sm:$0xff]   ;;  %v8560_v52 = vld [vmem:[%s11717_s15 + $0x90] sm:$0xff]  }
0x1fae   :  { %8019 = vmatpush3.bf16.msra.mxu0 %v8558_v56  ;;  %v8563_v31 = vld [vmem:[%s11717_s15 + $0xa8] sm:$0xff]  }
0x1faf   :  { %v3455_v41 = vmul.f32 %v3451_v12, %v9987_v10  ;;  %v3456_v63 = vadd.f32 %v3454_v16, %v10361_v4  ;;  %8020 = vmatprep.subr.bf16.mxu0 %v11782_v43  ;;  %v8561_v16 = vld [vmem:[%s11717_s15 + $0x98] sm:$0xff]   ;;  %v8562_v12 = vld [vmem:[%s11717_s15 + $0xa0] sm:$0xff]  }
0x1fb1   :  { %v3458_v50 = vsel %vm418_vm1, %v3456_v63, 0.0  ;;  %v3457_v38 = vadd.f32 %v3455_v41, %v10365_v25  ;;  %v8556_v25 = vld [vmem:[%s11716_s14 + $0x20] sm:$0xff]  }
0x1fb2   :  { %3459 = vadd.xlane.f32.xlu0 %v3458_v50  ;;  %8011 = vmatpush3.bf16.msra.mxu1 %v8556_v25 }
0x1fb3   :  { %v3461_v35 = vsel %vm418_vm1, %v3457_v38, 0.0  ;;  %8012 = vmatprep.subr.bf16.mxu1 %v11782_v43  ;;  %8021 = vmatpush3.bf16.msra.mxu0 %v8559_v17 }
0x1fb4   :  { %3462 = vadd.xlane.f32.xlu1 %v3461_v35  ;;  %8022 = vmatprep.subr.bf16.mxu0 %v11782_v43 }
0x1fb6   :  { %8013 = vmatpush3.bf16.msra.mxu1 %v8557_v6 }
0x1fb7   :  { %8038 = vmatprep.subr.bf16.mxu1 %v11782_v43  ;;  %8023 = vmatpush3.bf16.msra.mxu0 %v8560_v52  ;;  %v8564_v52 = vld [vmem:[%s11717_s15 + $0xb0] sm:$0xff]  }
0x1fb8   :  { %8024 = vmatprep.subr.bf16.mxu0 %v11782_v43 }
0x1fbb   :  { %8025 = vmatpush3.bf16.msra.mxu0 %v8561_v16 }
0x1fbc   :  { %8026 = vmatprep.subr.bf16.mxu0 %v11782_v43 }
0x1fbf   :  { %8027 = vmatpush3.bf16.msra.mxu0 %v8562_v12 }
0x1fc0   :  { %8028 = vmatprep.subr.bf16.mxu0 %v11782_v43 }
0x1fc3   :  { %8029 = vmatpush3.bf16.msra.mxu0 %v8563_v31 }
0x1fc4   :  { %8030 = vmatprep.subr.bf16.mxu0 %v11782_v43 }
0x1fc7   :  { %8031 = vmatpush3.bf16.msra.mxu0 %v8564_v52 }
0x1fc8   :  { %8032 = vmatprep.subr.bf16.mxu0 %v11782_v43 }
0x203f   :  { %v3460_v30 = vpop.xlane.xlu0 %3459 }
0x2040   :  { %v3464_v27 = vmul.f32 0.03125, %v3460_v30 }
0x2041   :  { %v3463_v7 = vpop.xlane.xlu1 %3462 }
0x2042   :  { %v3466_v40 = vsub.f32 %v3456_v63, %v3464_v27  ;;  %v3465_v28 = vmul.f32 0.03125, %v3463_v7  ;;  %v3487_v7 = vrot.slane %v10430_v58, %v10029_v62 }
0x2044   :  { %v3467_v36 = vsub.f32 %v3457_v38, %v3465_v28  ;;  %v3468_v13 = vmul.f32 %v3466_v40, %v3466_v40 }
0x2046   :  { %v3470_v23 = vsel %vm418_vm1, %v3468_v13, 0.0  ;;  %v3469_v24 = vmul.f32 %v3467_v36, %v3467_v36 }
0x2047   :  { %3471 = vadd.xlane.f32.xlu0 %v3470_v23 }
0x2048   :  { %v3473_v4 = vsel %vm418_vm1, %v3469_v24, 0.0 }
0x204b   :  { %3474 = vadd.xlane.f32.xlu0 %v3473_v4  ;;  %v3493_v4 = vrot.slane %v10430_v58, %v10034_v39 }
0x20d4   :  { %v3472_v41 = vpop.xlane.xlu0 %3471 }
0x20d5   :  { %v3476_v63 = vmul.f32 0.03125, %v3472_v41 }
0x20d7   :  { %v3478_v50 = vadd.f32 1e-05, %v3476_v63 }
0x20d8   :  { %v3475_v38 = vpop.xlane.xlu0 %3474 }
0x20d9   :  { %8674 = vrsqrt.f32 %v3478_v50  ;;  %v3477_v35 = vmul.f32 0.03125, %v3475_v38 }
0x20db   :  { %v3479_v30 = vadd.f32 1e-05, %v3477_v35 }
0x20dd   :  { %8676 = vrsqrt.f32 %v3479_v30 }
0x20e3   :  { %v8675_v27 = vpop.eup %8674 }
0x20e4   :  { %v3482_v28 = vmul.f32 %v8675_v27, %v3466_v40  ;;  %v8565_v40 = vld [vmem:[%s11717_s15 + $0xb8] sm:$0xff]   ;;  %v3585_v27 = vrot.slane %v10430_v58, %v9874_v57 }
0x20e5   :  { %8033 = vmatpush3.bf16.msra.mxu0 %v8565_v40 }
0x20e6   :  { %v3488_v23 = vmul.f32 %v3487_v7, %v3482_v28  ;;  %8070 = vmatprep.subr.bf16.mxu0 %v11782_v43 }
0x20e7   :  { %v8677_v13 = vpop.eup %8676 }
0x20e8   :  { %v3483_v24 = vmul.f32 %v8677_v13, %v3467_v36  ;;  %v3494_v6 = vadd.f32 %v3493_v4, %v3488_v23  ;;  %v3505_v36 = vrot.slane %v10430_v58, %v10050_v26 }
0x20ea   :  { %v3489_v25 = vmul.f32 %v3487_v7, %v3483_v24 }
0x20ec   :  { %v3495_v56 = vadd.f32 %v3493_v4, %v3489_v25 }
0x20ee   :  { %v3501_v17 = vpack.c.bf16 %v3495_v56, %v3494_v6 }
0x20f0   :  { %8015 = vmatmul.mubr.msk.bf16.vlgmr.msra.gmra.mrb[92].mxu1 %vm418_vm1, %v3501_v17 }
0x20f1   :  { %8042 = vmatprep.mubr.msk.bf16.mxu1 %vm9122_vm3, %v11782_v43 }
0x21c3   :  { %v3555_v16 = vpop.f32.mrb[92].mxu1 }
0x21c4   :  { %v3556_v12 = vadd.f32 %v3555_v16, %v3505_v36  ;;  %v8016_v31 = vpop.f32.mrb[93].mxu1 }
0x21c5   :  { %v3558_v41 = vpop.f32.mrb[94].mxu1 }
0x21c6   :  { %v3559_v63 = vadd.f32 %v3558_v41, %v3505_v36  ;;  %v8017_v50 = vpop.f32.mrb[95].mxu1  ;;  %v3562_v38 = vmax.f32 %v3556_v12, 0.0 }
0x21c8   :  { %v3563_v35 = vmax.f32 %v3559_v63, 0.0 }
0x21ca   :  { %v3581_v30 = vpack.c.bf16 %v3563_v35, %v3562_v38 }
0x21cc   :  { %8035 = vmatmul.mubr.bf16.vlgmr.msra.gmra.mrb[108].mxu0 %v3581_v30 }
0x21cd   :  { %8074 = vmatprep.mubr.msk.bf16.mxu0 %vm9122_vm3, %v11782_v43 }
0x229f   :  { %v3668_v7 = vpop.f32.mrb[108].mxu0 }
0x22a0   :  { %v3669_v28 = vadd.f32 %v3668_v7, %v3585_v27  ;;  %v8036_v13 = vpop.f32.mrb[109].mxu0  ;;  %v10624_v7 = vld [vmem:[%s11713_s11 + $0x38] sm:$0xff]  }
0x22a1   :  { %v3671_v23 = vpop.f32.mrb[110].mxu0 }
0x22a2   :  { %v3675_v24 = vmul.f32 %v3669_v28, %v9984_v48  ;;  %v3672_v4 = vadd.f32 %v3671_v23, %v3585_v27  ;;  %v8037_v25 = vpop.f32.mrb[111].mxu0 }
0x22a4   :  { %v3676_v17 = vmul.f32 %v3672_v4, %v9987_v10  ;;  %v3677_v52 = vadd.f32 %v3675_v24, %v3494_v6 }
0x22a6   :  { %v3679_v40 = vsel %vm418_vm1, %v3677_v52, 0.0  ;;  %v3678_v36 = vadd.f32 %v3676_v17, %v3495_v56  ;;  %v10617_v56 = vld [vmem:[%s11713_s11 + $0x30] sm:$0xff]   ;;  %v3708_v17 = vrot.slane %v10430_v58, %v10079_v47 }
0x22a7   :  { %3680 = vadd.xlane.f32.xlu1 %v3679_v40  ;;  %8071 = vmatpush3.bf16.msra.mxu0 %v10617_v56 }
0x22a8   :  { %v3682_v16 = vsel %vm418_vm1, %v3678_v36, 0.0  ;;  %8072 = vmatprep.subr.bf16.mxu0 %v11782_v43 }
0x22a9   :  { %3683 = vadd.xlane.f32.xlu0 %v3682_v16 }
0x22ab   :  { %8073 = vmatpush3.bf16.msra.mxu0 %v10624_v7 }
0x22ac   :  { %8078 = vmatprep.subr.bf16.mxu0 %v11782_v43 }
0x2334   :  { %v3681_v12 = vpop.xlane.xlu1 %3680 }
0x2335   :  { %v3685_v31 = vmul.f32 0.03125, %v3681_v12 }
0x2336   :  { %v3684_v41 = vpop.xlane.xlu0 %3683 }
0x2337   :  { %v3687_v63 = vsub.f32 %v3677_v52, %v3685_v31  ;;  %v3686_v50 = vmul.f32 0.03125, %v3684_v41 }
0x2339   :  { %v3688_v38 = vsub.f32 %v3678_v36, %v3686_v50  ;;  %v3689_v35 = vmul.f32 %v3687_v63, %v3687_v63  ;;  %v3714_v36 = vrot.slane %v10430_v58, %v10082_v51 }
0x233b   :  { %v3691_v30 = vsel %vm418_vm1, %v3689_v35, 0.0  ;;  %v3690_v27 = vmul.f32 %v3688_v38, %v3688_v38 }
0x233c   :  { %3692 = vadd.xlane.f32.xlu1 %v3691_v30 }
0x233d   :  { %v3694_v6 = vsel %vm418_vm1, %v3690_v27, 0.0 }
0x233e   :  { %3695 = vadd.xlane.f32.xlu0 %v3694_v6 }
0x23c9   :  { %v3693_v28 = vpop.xlane.xlu1 %3692 }
0x23ca   :  { %v3697_v13 = vmul.f32 0.03125, %v3693_v28 }
0x23cb   :  { %v3696_v23 = vpop.xlane.xlu0 %3695 }
0x23cc   :  { %v3699_v24 = vadd.f32 1e-05, %v3697_v13  ;;  %v3698_v4 = vmul.f32 0.03125, %v3696_v23 }
0x23ce   :  { %8678 = vrsqrt.f32 %v3699_v24  ;;  %v3700_v25 = vadd.f32 1e-05, %v3698_v4 }
0x23d0   :  { %8680 = vrsqrt.f32 %v3700_v25 }
0x23d8   :  { %v8679_v52 = vpop.eup %8678 }
0x23d9   :  { %v3703_v40 = vmul.f32 %v8679_v52, %v3687_v63  ;;  %v8568_v52 = vld [vmem:[%s11721_s19 + $0x40] sm:$0xff]  }
0x23da   :  { %v8681_v16 = vpop.eup %8680 }
0x23db   :  { %v3709_v12 = vmul.f32 %v3708_v17, %v3703_v40  ;;  %v3704_v31 = vmul.f32 %v8681_v16, %v3688_v38  ;;  %v10658_v40 = vld [vmem:[%s11721_s19 + $0x50] sm:$0xff]   ;;  %v10668_v16 = vld [vmem:[%s11721_s19 + $0x58] sm:$0xff]  }
0x23dd   :  { %v10632_v41 = vadd.f32 %v3714_v36, %v3709_v12  ;;  %v3710_v50 = vmul.f32 %v3708_v17, %v3704_v31  ;;  %v8572_v12 = vld [vmem:[%s11720_s18 + $0x20] sm:$0xff]  }
0x23de   :  { %8039 = vmatpush3.bf16.msra.mxu1 %v8572_v12 }
0x23df   :  { %v3717_v35 = vsel %vm418_vm1, %v10632_v41, 0.0  ;;  %v10636_v30 = vadd.f32 %v3714_v36, %v3710_v50  ;;  %v4010_v63 = vadd.f32 %v10369_v21, %v10632_v41  ;;  %v8570_v36 = vld [vmem:[%s11721_s19 + $0x48] sm:$0xff]   ;;  %8040 = vmatprep.subr.bf16.mxu1 %v11782_v43 }
0x23e0   :  { %3718 = vadd.xlane.f32.xlu1 %v3717_v35 }
0x23e1   :  { %v3720_v27 = vsel %vm418_vm1, %v10636_v30, 0.0  ;;  %v4011_v58 = vadd.f32 %v10373_v37, %v10636_v30 }
0x23e2   :  { %3721 = vadd.xlane.f32.xlu0 %v3720_v27 }
0x23e3   :  { %v4012_v38 = vpack.c.bf16 %v4011_v58, %v4010_v63 }
0x23e5   :  { %8075 = vmatmul.mubr.msk.bf16.vlgmr.msra.gmra.mrb[112].mxu0 %vm418_vm1, %v4012_v38 }
0x23e6   :  { %8086 = vmatprep.mubr.msk.bf16.mxu0 %vm9122_vm3, %v11782_v43 }
0x246d   :  { %v3719_v6 = vpop.xlane.xlu1 %3718 }
0x246e   :  { %v3723_v28 = vmul.f32 0.03125, %v3719_v6 }
0x246f   :  { %v3722_v13 = vpop.xlane.xlu0 %3721 }
0x2470   :  { %v3725_v23 = vsub.f32 %v10632_v41, %v3723_v28  ;;  %v3724_v24 = vmul.f32 0.03125, %v3722_v13 }
0x2472   :  { %v3726_v4 = vsub.f32 %v10636_v30, %v3724_v24  ;;  %v3727_v25 = vmul.f32 %v3725_v23, %v3725_v23 }
0x2474   :  { %v3729_v21 = vsel %vm418_vm1, %v3727_v25, 0.0  ;;  %v3728_v17 = vmul.f32 %v3726_v4, %v3726_v4 }
0x2475   :  { %3730 = vadd.xlane.f32.xlu1 %v3729_v21 }
0x2476   :  { %v3732_v37 = vsel %vm418_vm1, %v3728_v17, 0.0 }
0x2477   :  { %3733 = vadd.xlane.f32.xlu0 %v3732_v37 }
0x2486   :  { %3906 = vrot.lane.b32.xlu1 %v8568_v52, %s9125_s22 }
0x248a   :  { %3910 = vrot.lane.b32.xlu1 %v10658_v40, %s9125_s22 }
0x248d   :  { %3908 = vrot.lane.b32.xlu0 %v8570_v36, %s9125_s22 }
0x248e   :  { %3912 = vrot.lane.b32.xlu1 %v10668_v16, %s9125_s22 }
0x2491   :  { %4075 = vrot.lane.b32.xlu0 %v9732_v45, %s9112_s10  ;;  %v8573_v45 = vld [vmem:[%s11720_s18 + $0x28] sm:$0xff]  }
0x2492   :  { %4138 = vrot.lane.b32.xlu1 %v9796_v14, %s9112_s10  ;;  %8041 = vmatpush3.bf16.msra.mxu1 %v8573_v45 }
0x2493   :  { %8046 = vmatprep.subr.bf16.mxu1 %v11782_v43 }
0x2495   :  { %4077 = vrot.lane.b32.xlu0 %v9748_v1, %s9112_s10  ;;  %v10697_v1 = vld [vmem:[#allocation18 + $0x18] sm:$0xff] }
0x2496   :  { %4140 = vrot.lane.b32.xlu1 %v9812_v53, %s9112_s10  ;;  %v4016_v53 = vrot.slane %v10697_v1, %v9703_v18 }
0x2499   :  { %4079 = vrot.lane.b32.xlu0 %v9764_v32, %s9112_s10 }
0x249a   :  { %4142 = vrot.lane.b32.xlu1 %v9828_v34, %s9112_s10 }
0x249d   :  { %4081 = vrot.lane.b32.xlu0 %v9780_v54, %s9112_s10 }
0x249e   :  { %4144 = vrot.lane.b32.xlu1 %v9844_v22, %s9112_s10 }
0x24b8   :  { %v4066_v14 = vpop.f32.mrb[112].mxu0 }
0x24b9   :  { %v8076_v31 = vpop.f32.mrb[113].mxu0 }
0x24ba   :  { %v4069_v32 = vpop.f32.mrb[114].mxu0 }
0x24bb   :  { %v10701_v50 = vadd.f32 %v4069_v32, %v4016_v53  ;;  %v8077_v35 = vpop.f32.mrb[115].mxu0 }
0x2502   :  { %v3731_v34 = vpop.xlane.xlu1 %3730 }
0x2503   :  { %v3735_v27 = vmul.f32 0.03125, %v3731_v34 }
0x2504   :  { %v3734_v63 = vpop.xlane.xlu0 %3733 }
0x2505   :  { %v3737_v58 = vadd.f32 1e-05, %v3735_v27  ;;  %v3736_v38 = vmul.f32 0.03125, %v3734_v63 }
0x2507   :  { %8682 = vrsqrt.f32 %v3737_v58  ;;  %v3738_v54 = vadd.f32 1e-05, %v3736_v38 }
0x2508   :  { %v3909_v6 = vpop.permute.xlu0 %3908 }
0x2509   :  { %8684 = vrsqrt.f32 %v3738_v54 }
0x250c   :  { %v4076_v22 = vpop.permute.xlu0 %4075 }
0x250d   :  { %v4087_v28 = vsel %vm418_vm1, %v4076_v22, 0 }
0x250e   :  { %8079 = vmatpush3.bf16.xpose.msra.mxu0 %v4087_v28 }
0x250f   :  { %8080 = vmatprep.subr.bf16.mxu0 %v11782_v43 }
0x2510   :  { %v4078_v25 = vpop.permute.xlu0 %4077 }
0x2511   :  { %v8683_v13 = vpop.eup %8682  ;;  %v4090_v12 = vsel %vm418_vm1, %v4078_v25, 0 }
0x2512   :  { %v3741_v24 = vmul.f32 %v8683_v13, %v3725_v23 }
0x2513   :  { %v8685_v21 = vpop.eup %8684 }
0x2514   :  { %v3743_v17 = vmul.f32 %v3741_v24, %v10162_v59  ;;  %v3742_v37 = vmul.f32 %v8685_v21, %v3726_v4  ;;  %v4080_v35 = vpop.permute.xlu0 %4079  ;;  %v3907_v24 = vpop.permute.xlu1 %3906 }
0x2515   :  { %v4093_v23 = vsel %vm418_vm1, %v4080_v35, 0 }
0x2516   :  { %v3744_v45 = vmul.f32 %v3742_v37, %v10162_v59  ;;  %8081 = vmatpush3.bf16.xpose.msra.mxu0 %v4090_v12  ;;  %v3745_v31 = vadd.f32 %v3743_v17, %v10166_v3 }
0x2517   :  { %8082 = vmatprep.subr.bf16.mxu0 %v11782_v43 }
0x2518   :  { %v3746_v32 = vadd.f32 %v3744_v45, %v10166_v3  ;;  %v4082_v4 = vpop.permute.xlu0 %4081  ;;  %v3911_v25 = vpop.permute.xlu1 %3910 }
0x2519   :  { %v4096_v27 = vsel %vm418_vm1, %v4082_v4, 0 }
0x251a   :  { %v3763_v34 = vpack.c.bf16 %v3746_v32, %v3745_v31 }
0x251c   :  { %8043 = vmatmul.mubr.msk.bf16.vlgmr.msra.gmra.mrb[96].mxu1 %vm418_vm1, %v3763_v34  ;;  %v3913_v32 = vpop.permute.xlu1 %3912 }
0x251d   :  { %8047 = vmatpush3.bf16.msra.mxu1 %v8568_v52  ;;  %8054 = vmatprep.mubr.msk.bf16.mxu1 %vm9122_vm3, %v11782_v43  ;;  %v4067_v52 = vadd.f32 %v4066_v14, %v4016_v53 }
0x251e   :  { %8083 = vmatpush3.bf16.xpose.msra.mxu0 %v4093_v23  ;;  %8048 = vmatprep.subr.bf16.mxu1 %v11782_v43 }
0x251f   :  { %8084 = vmatprep.subr.bf16.mxu0 %v11782_v43  ;;  %v4073_v63 = vpack.c.bf16 %v4067_v52, %v4067_v52 }
0x2521   :  { %8049 = vmatpush3.bf16.msra.mxu1 %v8570_v36 }
0x2522   :  { %8050 = vmatprep.subr.bf16.mxu1 %v11782_v43 }
0x2525   :  { %8051 = vmatpush3.bf16.msra.mxu1 %v10658_v40  ;;  %v7046_v40 = vld [vmem:[%s11783_s21 + $0x8] sm:$0x7] }
0x2526   :  { %8085 = vmatpush3.bf16.xpose.msra.mxu0 %v4096_v27  ;;  %8052 = vmatprep.subr.bf16.mxu1 %v11782_v43  ;;  %v3767_v36 = vrot.slane %v7046_v40, %v9703_v18  ;;  %v3830_v27 = vrot.slane %v7046_v40, %v9706_v20 }
0x2527   :  { %8102 = vmatprep.subr.bf16.mxu0 %v11782_v43 }
0x2529   :  { %8053 = vmatpush3.bf16.msra.mxu1 %v10668_v16 }
0x252a   :  { %8058 = vmatprep.subr.bf16.mxu1 %v11782_v43 }
0x252d   :  { %8087 = vmatmul.mubr.msk.bf16.vlgmr.msra.gmra.mrb[116].mxu0 %vm418_vm1, %v4073_v63 }
0x252e   :  { %8110 = vmatprep.mubr.msk.bf16.mxu0 %vm9122_vm3, %v11782_v43 }
0x25ef   :  { %v3817_v58 = vpop.f32.mrb[96].mxu1 }
0x25f0   :  { %v10731_v14 = vadd.f32 %v3817_v58, %v3767_v36  ;;  %v8044_v53 = vpop.f32.mrb[97].mxu1 }
0x25f1   :  { %v3820_v38 = vpop.f32.mrb[98].mxu1 }
0x25f2   :  { %v10733_v16 = vadd.f32 %v3820_v38, %v3767_v36  ;;  %v8045_v54 = vpop.f32.mrb[99].mxu1  ;;  %v3824_v22 = vmax.f32 %v10731_v14, 0.0 }
0x25f4   :  { %v3825_v28 = vmax.f32 %v10733_v16, 0.0 }
0x25f6   :  { %v3826_v13 = vpack.c.bf16 %v3825_v28, %v3824_v22  ;;  %v4139_v28 = vpop.permute.xlu1 %4138 }
0x25f8   :  { %8055 = vmatmul.mubr.msk.bf16.vlgmr.msra.gmra.mrb[100].mxu1 %vm1377_vm7, %v3826_v13 }
0x25f9   :  { %8059 = vmatpush3.bf16.msra.mxu1 %v3907_v24  ;;  %8066 = vmatprep.mubr.msk.bf16.mxu1 %vm9122_vm3, %v11782_v43  ;;  %v4150_v24 = vsel %vm418_vm1, %v4139_v28, 0 }
0x25fa   :  { %8060 = vmatprep.subr.bf16.mxu1 %v11782_v43 }
0x25fd   :  { %8061 = vmatpush3.bf16.msra.mxu1 %v3909_v6 }
0x25fe   :  { %8062 = vmatprep.subr.bf16.mxu1 %v11782_v43 }
0x2600   :  { %v4132_v21 = vpop.f32.mrb[116].mxu0 }
0x2601   :  { %v4201_v17 = vmul.f32 0.17677669, %v4132_v21  ;;  %v8088_v37 = vpop.f32.mrb[117].mxu0  ;;  %8063 = vmatpush3.bf16.msra.mxu1 %v3911_v25 }
0x2602   :  { %v4135_v12 = vpop.f32.mrb[118].mxu0  ;;  %8064 = vmatprep.subr.bf16.mxu1 %v11782_v43  ;;  %v4074_v37 = vpack.c.bf16 %v10701_v50, %v10701_v50 }
0x2603   :  { %v8089_v45 = vpop.f32.mrb[119].mxu0  ;;  %v4203_v31 = vsel %vm1377_vm7, %v4201_v17, -inf }
0x2604   :  { %4204 = vmax.xlane.f32.xlu0 %v4203_v31 }
0x2605   :  { %8065 = vmatpush3.bf16.msra.mxu1 %v3913_v32 }
0x2606   :  { %8090 = vmatprep.subr.bf16.mxu1 %v11782_v43 }
0x2691   :  { %v4205_v35 = vpop.xlane.xlu0 %4204 }
0x2692   :  { %v4209_v6 = vsub.f32 %v4201_v17, %v4205_v35 }
0x2694   :  { %v4211_v34 = vmul.f32 1.442695, %v4209_v6 }
0x2696   :  { %8686 = vpow2.f32 %v4211_v34 }
0x26a0   :  { %v10745_v23 = vpop.eup %8686 }
0x26a1   :  { %v4215_v4 = vsel %vm1377_vm7, %v10745_v23, 0.0 }
0x26a2   :  { %4216 = vadd.xlane.f32.xlu0 %v4215_v4 }
0x26b8   :  { %4282 = vrot.lane.b32.xlu0 %v9790_v9, %s9112_s10 }
0x26bc   :  { %4231 = vrot.lane.b32.xlu0 %v9758_v19, %s9112_s10  ;;  %v4141_v19 = vpop.permute.xlu1 %4140 }
0x26bd   :  { %v4153_v9 = vsel %vm418_vm1, %v4141_v19, 0 }
0x26c0   :  { %v4143_v40 = vpop.permute.xlu1 %4142 }
0x26c1   :  { %v4156_v25 = vsel %vm418_vm1, %v4143_v40, 0 }
0x26c4   :  { %v4145_v21 = vpop.permute.xlu1 %4144 }
0x26c5   :  { %v4159_v17 = vsel %vm418_vm1, %v4145_v21, 0 }
0x26cb   :  { %v3892_v52 = vpop.f32.mrb[100].mxu1 }
0x26cc   :  { %v3893_v63 = vadd.f32 %v3892_v52, %v3830_v27  ;;  %v8056_v36 = vpop.f32.mrb[101].mxu1 }
0x26cd   :  { %v3895_v58 = vpop.f32.mrb[102].mxu1 }
0x26ce   :  { %v3896_v53 = vadd.f32 %v3895_v58, %v3830_v27  ;;  %v8057_v38 = vpop.f32.mrb[103].mxu1  ;;  %v3899_v54 = vmax.f32 %v3893_v63, 0.0 }
0x26d0   :  { %v3900_v22 = vmax.f32 %v3896_v53, 0.0 }
0x26d2   :  { %v3901_v13 = vpack.c.bf16 %v3900_v22, %v3899_v54 }
0x26d4   :  { %8067 = vmatmul.mubr.msk.bf16.vlgmr.msra.gmra.mrb[104].mxu1 %vm1377_vm7, %v3901_v13 }
0x26d5   :  { %8091 = vmatpush3.bf16.xpose.msra.mxu1 %v4150_v24  ;;  %8098 = vmatprep.mubr.msk.bf16.mxu1 %vm9122_vm3, %v11782_v43 }
0x26d6   :  { %8092 = vmatprep.subr.bf16.mxu1 %v11782_v43 }
0x26dd   :  { %8093 = vmatpush3.bf16.xpose.msra.mxu1 %v4153_v9 }
0x26de   :  { %8094 = vmatprep.subr.bf16.mxu1 %v11782_v43 }
0x26e5   :  { %8095 = vmatpush3.bf16.xpose.msra.mxu1 %v4156_v25 }
0x26e6   :  { %8096 = vmatprep.subr.bf16.mxu1 %v11782_v43 }
0x26ed   :  { %8097 = vmatpush3.bf16.xpose.msra.mxu1 %v4159_v17 }
0x26ee   :  { %8114 = vmatprep.subr.bf16.mxu1 %v11782_v43 }
0x26f4   :  { %8099 = vmatmul.mubr.msk.bf16.vlgmr.msra.gmra.mrb[108].mxu1 %vm418_vm1, %v4074_v37 }
0x26f5   :  { %8122 = vmatprep.mubr.msk.bf16.mxu1 %vm9122_vm3, %v11782_v43 }
0x272f   :  { %v4217_v12 = vpop.xlane.xlu0 %4216 }
0x2733   :  { %v4283_v45 = vpop.permute.xlu0 %4282 }
0x2734   :  { %8115 = vmatpush3.bf16.msra.mxu1 %v4283_v45 }
0x2735   :  { %8116 = vmatprep.subr.bf16.mxu1 %v11782_v43 }
0x27a7   :  { %v10771_v31 = vpop.f32.mrb[104].mxu1 }
0x27a8   :  { %v8068_v32 = vpop.f32.mrb[105].mxu1 }
0x27a9   :  { %v10773_v35 = vpop.f32.mrb[106].mxu1 }
0x27aa   :  { %v8069_v6 = vpop.f32.mrb[107].mxu1 }
0x27c7   :  { %v4195_v34 = vpop.f32.mrb[108].mxu1 }
0x27c8   :  { %v4202_v4 = vmul.f32 0.17677669, %v4195_v34  ;;  %v8100_v27 = vpop.f32.mrb[109].mxu1 }
0x27c9   :  { %v4198_v50 = vpop.f32.mrb[110].mxu1 }
0x27ca   :  { %v8101_v52 = vpop.f32.mrb[111].mxu1  ;;  %v4206_v63 = vsel %vm1377_vm7, %v4202_v4, -inf }
0x27cb   :  { %4207 = vmax.xlane.f32.xlu1 %v4206_v63 }
0x27dc   :  { %4227 = vrot.lane.b32.xlu1 %v9726_v42, %s9112_s10 }
0x27e0   :  { %4229 = vrot.lane.b32.xlu1 %v9742_v60, %s9112_s10  ;;  %v4232_v60 = vpop.permute.xlu0 %4231 }
0x27e4   :  { %4284 = vrot.lane.b32.xlu1 %v9806_v44, %s9112_s10 }
0x27e8   :  { %4286 = vrot.lane.b32.xlu1 %v9822_v11, %s9112_s10 }
0x27ec   :  { %4288 = vrot.lane.b32.xlu1 %v9838_v61, %s9112_s10 }
0x27f0   :  { %4344 = vrot.lane.b32.xlu1 %v10624_v7, %s9126_s0 }
0x2858   :  { %v4208_v36 = vpop.xlane.xlu1 %4207 }
0x2859   :  { %v4210_v58 = vsub.f32 %v4202_v4, %v4208_v36  ;;  %v4341_v4 = vrot.slane %v10697_v1, %v9706_v20 }
0x285b   :  { %v4213_v53 = vmul.f32 1.442695, %v4210_v58 }
0x285c   :  { %v4228_v38 = vpop.permute.xlu1 %4227 }
0x285d   :  { %8688 = vpow2.f32 %v4213_v53  ;;  %8103 = vmatpush3.bf16.msra.mxu0 %v4228_v38 }
0x285e   :  { %8104 = vmatprep.subr.bf16.mxu0 %v11782_v43  ;;  %8690 = vrcp.f32 %v4217_v12 }
0x2860   :  { %v4230_v42 = vpop.permute.xlu1 %4229 }
0x2861   :  { %8105 = vmatpush3.bf16.msra.mxu0 %v4230_v42 }
0x2862   :  { %8106 = vmatprep.subr.bf16.mxu0 %v11782_v43 }
0x2864   :  { %v4285_v44 = vpop.permute.xlu1 %4284 }
0x2865   :  { %8107 = vmatpush3.bf16.msra.mxu0 %v4232_v60  ;;  %8117 = vmatpush3.bf16.msra.mxu1 %v4285_v44 }
0x2866   :  { %8118 = vmatprep.subr.bf16.mxu1 %v11782_v43  ;;  %8108 = vmatprep.subr.bf16.mxu0 %v11782_v43 }
0x2867   :  { %v8689_v11 = vpop.eup %8688 }
0x2868   :  { %v4287_v61 = vpop.permute.xlu1 %4286  ;;  %v4218_v7 = vsel %vm1377_vm7, %v8689_v11, 0.0  ;;  %v8691_v22 = vpop.eup %8690 }
0x2869   :  { %4219 = vadd.xlane.f32.xlu0 %v4218_v7  ;;  %8119 = vmatpush3.bf16.msra.mxu1 %v4287_v61  ;;  %v4223_v13 = vmul.f32 %v8691_v22, %v10745_v23 }
0x286a   :  { %8120 = vmatprep.subr.bf16.mxu1 %v11782_v43 }
0x286b   :  { %v4225_v19 = vpack.c.bf16 %v4223_v13, %v4223_v13 }
0x286c   :  { %v4289_v54 = vpop.permute.xlu1 %4288 }
0x286d   :  { %8121 = vmatpush3.bf16.msra.mxu1 %v4289_v54 }
0x286e   :  { %8134 = vmatprep.subr.bf16.mxu1 %v11782_v43 }
0x2870   :  { %v4345_v23 = vpop.permute.xlu1 %4344 }
0x287f   :  { %4233 = vrot.lane.b32.xlu0 %v9774_v49, %s9112_s10 }
0x2883   :  { %4342 = vrot.lane.b32.xlu0 %v10617_v56, %s9126_s0 }
0x28f6   :  { %v4220_v28 = vpop.xlane.xlu0 %4219 }
0x28f7   :  { %8692 = vrcp.f32 %v4220_v28 }
0x28fa   :  { %v4234_v24 = vpop.permute.xlu0 %4233 }
0x28fb   :  { %8109 = vmatpush3.bf16.msra.mxu0 %v4234_v24 }
0x28fc   :  { %8126 = vmatprep.subr.bf16.mxu0 %v11782_v43 }
0x28fe   :  { %8111 = vmatmul.mubr.msk.bf16.vlgmr.msra.gmra.mrb[120].mxu0 %vm1377_vm7, %v4225_v19  ;;  %v4343_v56 = vpop.permute.xlu0 %4342 }
0x28ff   :  { %8130 = vmatprep.mubr.msk.bf16.mxu0 %vm9122_vm3, %v11782_v43  ;;  %8127 = vmatpush3.bf16.msra.mxu0 %v4343_v56  ;;  %v8577_v56 = vld [vmem:[%s11717_s15 + $0xc8] sm:$0xff]  }
0x2900   :  { %8128 = vmatprep.subr.bf16.mxu0 %v11782_v43 }
0x2901   :  { %v8693_v49 = vpop.eup %8692 }
0x2902   :  { %v4224_v9 = vmul.f32 %v8693_v49, %v8689_v11 }
0x2903   :  { %8129 = vmatpush3.bf16.msra.mxu0 %v4345_v23  ;;  %v8578_v23 = vld [vmem:[%s11717_s15 + $0xd0] sm:$0xff]  }
0x2904   :  { %v4226_v40 = vpack.c.bf16 %v4224_v9, %v4224_v9  ;;  %8142 = vmatprep.subr.bf16.mxu0 %v11782_v43  ;;  %v8575_v9 = vld [vmem:[%s11716_s14 + $0x38] sm:$0xff]  }
0x2906   :  { %8123 = vmatmul.mubr.msk.bf16.vlgmr.msra.gmra.mrb[112].mxu1 %vm1377_vm7, %v4226_v40  ;;  %v8576_v40 = vld [vmem:[%s11717_s15 + $0xc0] sm:$0xff]  }
0x2907   :  { %8138 = vmatprep.mubr.msk.bf16.mxu1 %vm9122_vm3, %v11782_v43 }
0x29d1   :  { %v4276_v25 = vpop.f32.mrb[120].mxu0 }
0x29d2   :  { %v8112_v21 = vpop.f32.mrb[121].mxu0 }
0x29d3   :  { %v4279_v17 = vpop.f32.mrb[122].mxu0  ;;  %v8580_v21 = vld [vmem:[%s11717_s15 + $0xe0] sm:$0xff]  }
0x29d4   :  { %v8113_v37 = vpop.f32.mrb[123].mxu0  ;;  %v8581_v17 = vld [vmem:[%s11717_s15 + $0xe8] sm:$0xff]  }
0x29d9   :  { %v4331_v12 = vpop.f32.mrb[112].mxu1 }
0x29da   :  { %v4337_v45 = vpack.c.bf16 %v4331_v12, %v4276_v25  ;;  %v8124_v32 = vpop.f32.mrb[113].mxu1  ;;  %v8579_v25 = vld [vmem:[%s11717_s15 + $0xd8] sm:$0xff]  }
0x29db   :  { %v4334_v6 = vpop.f32.mrb[114].mxu1 }
0x29dc   :  { %v8125_v34 = vpop.f32.mrb[115].mxu1  ;;  %8131 = vmatmul.mubr.msk.bf16.vlgmr.msra.gmra.mrb[124].mxu0 %vm418_vm1, %v4337_v45 }
0x29dd   :  { %8158 = vmatprep.mubr.msk.bf16.mxu0 %vm9122_vm3, %v11782_v43  ;;  %8143 = vmatpush3.bf16.msra.mxu0 %v8576_v40 }
0x29de   :  { %8144 = vmatprep.subr.bf16.mxu0 %v11782_v43 }
0x29e1   :  { %8145 = vmatpush3.bf16.msra.mxu0 %v8577_v56 }
0x29e2   :  { %8146 = vmatprep.subr.bf16.mxu0 %v11782_v43 }
0x29e5   :  { %8147 = vmatpush3.bf16.msra.mxu0 %v8578_v23 }
0x29e6   :  { %8148 = vmatprep.subr.bf16.mxu0 %v11782_v43 }
0x29e9   :  { %8149 = vmatpush3.bf16.msra.mxu0 %v8579_v25 }
0x29ea   :  { %8150 = vmatprep.subr.bf16.mxu0 %v11782_v43 }
0x29ed   :  { %8151 = vmatpush3.bf16.msra.mxu0 %v8580_v21 }
0x29ee   :  { %8152 = vmatprep.subr.bf16.mxu0 %v11782_v43 }
0x29f1   :  { %8153 = vmatpush3.bf16.msra.mxu0 %v8581_v17 }
0x29f2   :  { %8154 = vmatprep.subr.bf16.mxu0 %v11782_v43 }
0x2aaf   :  { %v4385_v27 = vpop.f32.mrb[124].mxu0 }
0x2ab0   :  { %v4386_v50 = vadd.f32 %v4385_v27, %v4341_v4  ;;  %v8132_v52 = vpop.f32.mrb[125].mxu0  ;;  %v4425_v27 = vrot.slane %v10697_v1, %v10029_v62 }
0x2ab1   :  { %v4388_v63 = vpop.f32.mrb[126].mxu0 }
0x2ab2   :  { %v4392_v36 = vmul.f32 %v4386_v50, %v9984_v48  ;;  %v4389_v58 = vadd.f32 %v4388_v63, %v4341_v4  ;;  %v8133_v53 = vpop.f32.mrb[127].mxu0 }
0x2ab4   :  { %v4393_v38 = vmul.f32 %v4389_v58, %v9987_v10  ;;  %v4394_v42 = vadd.f32 %v4392_v36, %v10632_v41  ;;  %v4431_v58 = vrot.slane %v10697_v1, %v10034_v39 }
0x2ab6   :  { %v4396_v60 = vsel %vm418_vm1, %v4394_v42, 0.0  ;;  %v4395_v44 = vadd.f32 %v4393_v38, %v10636_v30  ;;  %v8574_v30 = vld [vmem:[%s11716_s14 + $0x30] sm:$0xff]  }
0x2ab7   :  { %4397 = vadd.xlane.f32.xlu0 %v4396_v60  ;;  %8135 = vmatpush3.bf16.msra.mxu1 %v8574_v30  ;;  %v4523_v30 = vrot.slane %v10697_v1, %v9874_v57 }
0x2ab8   :  { %v4399_v11 = vsel %vm418_vm1, %v4395_v44, 0.0  ;;  %8136 = vmatprep.subr.bf16.mxu1 %v11782_v43 }
0x2ab9   :  { %4400 = vadd.xlane.f32.xlu1 %v4399_v11  ;;  %v8583_v11 = vld [vmem:[%s11717_s15 + $0xf8] sm:$0xff]  }
0x2abb   :  { %8137 = vmatpush3.bf16.msra.mxu1 %v8575_v9 }
0x2abc   :  { %8162 = vmatprep.subr.bf16.mxu1 %v11782_v43 }
0x2b44   :  { %v4398_v61 = vpop.xlane.xlu0 %4397 }
0x2b45   :  { %v4402_v7 = vmul.f32 0.03125, %v4398_v61  ;;  %v4443_v61 = vrot.slane %v10697_v1, %v10050_v26 }
0x2b46   :  { %v4401_v54 = vpop.xlane.xlu1 %4400 }
0x2b47   :  { %v4404_v22 = vsub.f32 %v4394_v42, %v4402_v7  ;;  %v4403_v28 = vmul.f32 0.03125, %v4401_v54 }
0x2b49   :  { %v4405_v13 = vsub.f32 %v4395_v44, %v4403_v28  ;;  %v4406_v24 = vmul.f32 %v4404_v22, %v4404_v22  ;;  %v8582_v44 = vld [vmem:[%s11717_s15 + $0xf0] sm:$0xff]  }
0x2b4a   :  { %8155 = vmatpush3.bf16.msra.mxu0 %v8582_v44 }
0x2b4b   :  { %v4408_v19 = vsel %vm418_vm1, %v4406_v24, 0.0  ;;  %v4407_v49 = vmul.f32 %v4405_v13, %v4405_v13  ;;  %8156 = vmatprep.subr.bf16.mxu0 %v11782_v43 }
0x2b4c   :  { %4409 = vadd.xlane.f32.xlu0 %v4408_v19 }
0x2b4d   :  { %v4411_v41 = vsel %vm418_vm1, %v4407_v49, 0.0 }
0x2b4e   :  { %8157 = vmatpush3.bf16.msra.mxu0 %v8583_v11 }
0x2b4f   :  { %8194 = vmatprep.subr.bf16.mxu0 %v11782_v43 }
0x2b50   :  { %4412 = vadd.xlane.f32.xlu0 %v4411_v41 }
0x2bd9   :  { %v4410_v37 = vpop.xlane.xlu0 %4409 }
0x2bda   :  { %v4414_v12 = vmul.f32 0.03125, %v4410_v37 }
0x2bdc   :  { %v4416_v45 = vadd.f32 1e-05, %v4414_v12 }
0x2bdd   :  { %v4413_v32 = vpop.xlane.xlu0 %4412 }
0x2bde   :  { %8694 = vrsqrt.f32 %v4416_v45  ;;  %v4415_v6 = vmul.f32 0.03125, %v4413_v32 }
0x2be0   :  { %v4417_v34 = vadd.f32 1e-05, %v4415_v6 }
0x2be2   :  { %8696 = vrsqrt.f32 %v4417_v34 }
0x2be8   :  { %v8695_v4 = vpop.eup %8694 }
0x2be9   :  { %v4420_v50 = vmul.f32 %v8695_v4, %v4404_v22 }
0x2beb   :  { %v4426_v63 = vmul.f32 %v4425_v27, %v4420_v50 }
0x2bec   :  { %v8697_v52 = vpop.eup %8696 }
0x2bed   :  { %v4421_v36 = vmul.f32 %v8697_v52, %v4405_v13  ;;  %v4432_v38 = vadd.f32 %v4431_v58, %v4426_v63 }
0x2bef   :  { %v4427_v53 = vmul.f32 %v4425_v27, %v4421_v36 }
0x2bf1   :  { %v4433_v42 = vadd.f32 %v4431_v58, %v4427_v53 }
0x2bf3   :  { %v4439_v60 = vpack.c.bf16 %v4433_v42, %v4432_v38 }
0x2bf5   :  { %8139 = vmatmul.mubr.msk.bf16.vlgmr.msra.gmra.mrb[116].mxu1 %vm418_vm1, %v4439_v60  ;;  %v10891_v60 = vld [vmem:[%s11713_s11 + $0x48] sm:$0xff]  }
0x2bf6   :  { %8166 = vmatprep.mubr.msk.bf16.mxu1 %vm9122_vm3, %v11782_v43 }
0x2cc8   :  { %v4493_v7 = vpop.f32.mrb[116].mxu1 }
0x2cc9   :  { %v4494_v54 = vadd.f32 %v4493_v7, %v4443_v61  ;;  %v8140_v22 = vpop.f32.mrb[117].mxu1 }
0x2cca   :  { %v4496_v28 = vpop.f32.mrb[118].mxu1 }
0x2ccb   :  { %v4497_v13 = vadd.f32 %v4496_v28, %v4443_v61  ;;  %v8141_v24 = vpop.f32.mrb[119].mxu1  ;;  %v4500_v19 = vmax.f32 %v4494_v54, 0.0  ;;  %v4646_v28 = vrot.slane %v10697_v1, %v10079_v47 }
0x2ccd   :  { %v4501_v49 = vmax.f32 %v4497_v13, 0.0 }
0x2ccf   :  { %v4519_v41 = vpack.c.bf16 %v4501_v49, %v4500_v19  ;;  %v4652_v19 = vrot.slane %v10697_v1, %v10082_v51 }
0x2cd1   :  { %8159 = vmatmul.mubr.bf16.vlgmr.msra.gmra.mrb[128].mxu0 %v4519_v41 }
0x2cd2   :  { %8198 = vmatprep.mubr.msk.bf16.mxu0 %vm9122_vm3, %v11782_v43 }
0x2da4   :  { %v4606_v9 = vpop.f32.mrb[128].mxu0 }
0x2da5   :  { %v4607_v40 = vadd.f32 %v4606_v9, %v4523_v30  ;;  %v8160_v56 = vpop.f32.mrb[129].mxu0 }
0x2da6   :  { %v4609_v23 = vpop.f32.mrb[130].mxu0 }
0x2da7   :  { %v4613_v25 = vmul.f32 %v4607_v40, %v9984_v48  ;;  %v4610_v21 = vadd.f32 %v4609_v23, %v4523_v30  ;;  %v8161_v17 = vpop.f32.mrb[131].mxu0 }
0x2da8   :  { %v10911_v17 = vld [vmem:[#allocation7 + $0x8] sm:$0xff] }
0x2da9   :  { %v4614_v37 = vmul.f32 %v4610_v21, %v9987_v10  ;;  %v4615_v12 = vadd.f32 %v4613_v25, %v4432_v38  ;;  %v10907_v21 = vld [vmem:[#allocation7] sm:$0xff] }
0x2dab   :  { %v4617_v45 = vsel %vm418_vm1, %v4615_v12, 0.0  ;;  %v4616_v32 = vadd.f32 %v4614_v37, %v4433_v42  ;;  %v10884_v42 = vld [vmem:[%s11713_s11 + $0x40] sm:$0xff]  }
0x2dac   :  { %4618 = vadd.xlane.f32.xlu1 %v4617_v45  ;;  %8195 = vmatpush3.bf16.msra.mxu0 %v10884_v42  ;;  %v5017_v45 = vsel %vm418_vm1, %v9734_v46, 0 }
0x2dad   :  { %v4620_v6 = vsel %vm418_vm1, %v4616_v32, 0.0  ;;  %8196 = vmatprep.subr.bf16.mxu0 %v11782_v43 }
0x2dae   :  { %4621 = vadd.xlane.f32.xlu0 %v4620_v6  ;;  %v5023_v6 = vsel %vm418_vm1, %v9766_v33, 0 }
0x2db0   :  { %8197 = vmatpush3.bf16.msra.mxu0 %v10891_v60 }
0x2db1   :  { %8202 = vmatprep.subr.bf16.mxu0 %v11782_v43 }
0x2e39   :  { %v4619_v34 = vpop.xlane.xlu1 %4618 }
0x2e3a   :  { %v4623_v4 = vmul.f32 0.03125, %v4619_v34  ;;  %v5026_v34 = vsel %vm418_vm1, %v9782_v55, 0 }
0x2e3b   :  { %v4622_v27 = vpop.xlane.xlu0 %4621 }
0x2e3c   :  { %v4625_v50 = vsub.f32 %v4615_v12, %v4623_v4  ;;  %v4624_v52 = vmul.f32 0.03125, %v4622_v27 }
0x2e3e   :  { %v4626_v63 = vsub.f32 %v4616_v32, %v4624_v52  ;;  %v4627_v36 = vmul.f32 %v4625_v50, %v4625_v50  ;;  %v5020_v32 = vsel %vm418_vm1, %v9750_v2, 0 }
0x2e40   :  { %v4629_v58 = vsel %vm418_vm1, %v4627_v36, 0.0  ;;  %v4628_v53 = vmul.f32 %v4626_v63, %v4626_v63 }
0x2e41   :  { %4630 = vadd.xlane.f32.xlu1 %v4629_v58 }
0x2e42   :  { %v4632_v38 = vsel %vm418_vm1, %v4628_v53, 0.0 }
0x2e43   :  { %4633 = vadd.xlane.f32.xlu0 %v4632_v38 }
0x2ece   :  { %v4631_v44 = vpop.xlane.xlu1 %4630 }
0x2ecf   :  { %v4635_v11 = vmul.f32 0.03125, %v4631_v44 }
0x2ed0   :  { %v4634_v61 = vpop.xlane.xlu0 %4633 }
0x2ed1   :  { %v4637_v7 = vadd.f32 1e-05, %v4635_v11  ;;  %v4636_v54 = vmul.f32 0.03125, %v4634_v61  ;;  %v8586_v11 = vld [vmem:[%s11720_s18 + $0x30] sm:$0xff]   ;;  %v8587_v61 = vld [vmem:[%s11720_s18 + $0x38] sm:$0xff]  }
0x2ed2   :  { %8163 = vmatpush3.bf16.msra.mxu1 %v8586_v11 }
0x2ed3   :  { %8698 = vrsqrt.f32 %v4637_v7  ;;  %v4638_v22 = vadd.f32 1e-05, %v4636_v54  ;;  %8164 = vmatprep.subr.bf16.mxu1 %v11782_v43  ;;  %v8588_v7 = vld [vmem:[%s11721_s19 + $0x68] sm:$0xff]  }
0x2ed4   :  { %v10946_v54 = vld [vmem:[#allocation18 + $0x20] sm:$0xff] }
0x2ed5   :  { %8700 = vrsqrt.f32 %v4638_v22  ;;  %v4954_v22 = vrot.slane %v10946_v54, %v9703_v18 }
0x2ed6   :  { %8165 = vmatpush3.bf16.msra.mxu1 %v8587_v61 }
0x2ed7   :  { %8170 = vmatprep.subr.bf16.mxu1 %v11782_v43 }
0x2edd   :  { %v8699_v13 = vpop.eup %8698 }
0x2ede   :  { %v4641_v24 = vmul.f32 %v8699_v13, %v4625_v50 }
0x2edf   :  { %v8701_v49 = vpop.eup %8700 }
0x2ee0   :  { %v4642_v41 = vmul.f32 %v8701_v49, %v4626_v63  ;;  %v4647_v30 = vmul.f32 %v4646_v28, %v4641_v24 }
0x2ee2   :  { %v10899_v9 = vadd.f32 %v4652_v19, %v4647_v30  ;;  %v4648_v40 = vmul.f32 %v4646_v28, %v4642_v41 }
0x2ee4   :  { %v4655_v56 = vsel %vm418_vm1, %v10899_v9, 0.0  ;;  %v10903_v23 = vadd.f32 %v4652_v19, %v4648_v40  ;;  %v4948_v1 = vadd.f32 %v10907_v21, %v10899_v9  ;;  %v11788_v40 = vld [vmem:[#allocation32_spill] sm:$0xff] }
0x2ee5   :  { %4656 = vadd.xlane.f32.xlu1 %v4655_v56  ;;  %v11789_v56 = vld [vmem:[#allocation33_spill] sm:$0xff] }
0x2ee6   :  { %v4658_v25 = vsel %vm418_vm1, %v10903_v23, 0.0  ;;  %v4949_v37 = vadd.f32 %v10911_v17, %v10903_v23 }
0x2ee7   :  { %4659 = vadd.xlane.f32.xlu0 %v4658_v25  ;;  %v11790_v25 = vld [vmem:[#allocation34_spill] sm:$0xff] }
0x2ee8   :  { %v4950_v12 = vpack.c.bf16 %v4949_v37, %v4948_v1 }
0x2eea   :  { %8199 = vmatmul.mubr.msk.bf16.vlgmr.msra.gmra.mrb[132].mxu0 %vm418_vm1, %v4950_v12 }
0x2eeb   :  { %8203 = vmatpush3.bf16.xpose.msra.mxu0 %v5017_v45  ;;  %8210 = vmatprep.mubr.msk.bf16.mxu0 %vm9122_vm3, %v11782_v43 }
0x2eec   :  { %8204 = vmatprep.subr.bf16.mxu0 %v11782_v43 }
0x2ef3   :  { %8205 = vmatpush3.bf16.xpose.msra.mxu0 %v5020_v32 }
0x2ef4   :  { %8206 = vmatprep.subr.bf16.mxu0 %v11782_v43 }
0x2efb   :  { %8207 = vmatpush3.bf16.xpose.msra.mxu0 %v5023_v6 }
0x2efc   :  { %8208 = vmatprep.subr.bf16.mxu0 %v11782_v43 }
0x2f03   :  { %8209 = vmatpush3.bf16.xpose.msra.mxu0 %v5026_v34 }
0x2f04   :  { %8226 = vmatprep.subr.bf16.mxu0 %v11782_v43 }
0x2f72   :  { %v4657_v4 = vpop.xlane.xlu1 %4656 }
0x2f73   :  { %v4661_v27 = vmul.f32 0.03125, %v4657_v4 }
0x2f74   :  { %v4660_v50 = vpop.xlane.xlu0 %4659 }
0x2f75   :  { %v4663_v52 = vsub.f32 %v10899_v9, %v4661_v27  ;;  %v4662_v63 = vmul.f32 0.03125, %v4660_v50 }
0x2f77   :  { %v4664_v36 = vsub.f32 %v10903_v23, %v4662_v63  ;;  %v4665_v58 = vmul.f32 %v4663_v52, %v4663_v52 }
0x2f79   :  { %v4667_v53 = vsel %vm418_vm1, %v4665_v58, 0.0  ;;  %v4666_v38 = vmul.f32 %v4664_v36, %v4664_v36  ;;  %v8589_v58 = vld [vmem:[%s11721_s19 + $0x60] sm:$0xff]  }
0x2f7a   :  { %4668 = vadd.xlane.f32.xlu1 %v4667_v53 }
0x2f7b   :  { %v4670_v44 = vsel %vm418_vm1, %v4666_v38, 0.0 }
0x2f7c   :  { %4671 = vadd.xlane.f32.xlu0 %v4670_v44 }
0x2f8b   :  { %4844 = vrot.lane.b32.xlu1 %v8589_v58, %s9125_s22 }
0x2f92   :  { %4846 = vrot.lane.b32.xlu0 %v8588_v7, %s9125_s22 }
0x2fbd   :  { %v5004_v28 = vpop.f32.mrb[132].mxu0 }
0x2fbe   :  { %v5005_v13 = vadd.f32 %v5004_v28, %v4954_v22  ;;  %v8200_v24 = vpop.f32.mrb[133].mxu0 }
0x2fbf   :  { %v5007_v19 = vpop.f32.mrb[134].mxu0 }
0x2fc0   :  { %v5011_v49 = vpack.c.bf16 %v5005_v13, %v5005_v13  ;;  %v10950_v41 = vadd.f32 %v5007_v19, %v4954_v22  ;;  %v8201_v30 = vpop.f32.mrb[135].mxu0  ;;  %v7113_v19 = vld [vmem:[%s11783_s21 + $0xc] sm:$0x7] }
0x2fc2   :  { %8211 = vmatmul.mubr.msk.bf16.vlgmr.msra.gmra.mrb[136].mxu0 %vm418_vm1, %v5011_v49  ;;  %v4705_v49 = vrot.slane %v7113_v19, %v9703_v18 }
0x2fc3   :  { %8227 = vmatpush3.bf16.msra.mxu0 %v9729_v29  ;;  %8234 = vmatprep.mubr.msk.bf16.mxu0 %vm9122_vm3, %v11782_v43 }
0x2fc4   :  { %8228 = vmatprep.subr.bf16.mxu0 %v11782_v43 }
0x2fc7   :  { %8229 = vmatpush3.bf16.msra.mxu0 %v11788_v40 }
0x2fc8   :  { %8230 = vmatprep.subr.bf16.mxu0 %v11782_v43 }
0x2fcb   :  { %8231 = vmatpush3.bf16.msra.mxu0 %v11789_v56 }
0x2fcc   :  { %8232 = vmatprep.subr.bf16.mxu0 %v11782_v43 }
0x2fcf   :  { %8233 = vmatpush3.bf16.msra.mxu0 %v11790_v25 }
0x2fd0   :  { %8250 = vmatprep.subr.bf16.mxu0 %v11782_v43 }
0x3007   :  { %v4669_v1 = vpop.xlane.xlu1 %4668 }
0x3008   :  { %v4673_v37 = vmul.f32 0.03125, %v4669_v1 }
0x3009   :  { %v4672_v12 = vpop.xlane.xlu0 %4671 }
0x300a   :  { %v4675_v45 = vadd.f32 1e-05, %v4673_v37  ;;  %v4674_v32 = vmul.f32 0.03125, %v4672_v12 }
0x300c   :  { %8702 = vrsqrt.f32 %v4675_v45  ;;  %v4676_v6 = vadd.f32 1e-05, %v4674_v32 }
0x300e   :  { %8704 = vrsqrt.f32 %v4676_v6 }
0x3016   :  { %v8703_v34 = vpop.eup %8702 }
0x3017   :  { %v4679_v4 = vmul.f32 %v8703_v34, %v4663_v52  ;;  %v8590_v52 = vld [vmem:[%s11721_s19 + $0x70] sm:$0xff]  }
0x3018   :  { %v8705_v27 = vpop.eup %8704  ;;  %4848 = vrot.lane.b32.xlu1 %v8590_v52, %s9125_s22 }
0x3019   :  { %v4681_v50 = vmul.f32 %v4679_v4, %v10162_v59  ;;  %v4680_v63 = vmul.f32 %v8705_v27, %v4664_v36  ;;  %v8591_v36 = vld [vmem:[%s11721_s19 + $0x78] sm:$0xff]   ;;  %v4845_v27 = vpop.permute.xlu1 %4844 }
0x301b   :  { %v4682_v53 = vmul.f32 %v4680_v63, %v10162_v59  ;;  %v4683_v38 = vadd.f32 %v4681_v50, %v10166_v3  ;;  %v4847_v50 = vpop.permute.xlu0 %4846 }
0x301c   :  { %4850 = vrot.lane.b32.xlu1 %v8591_v36, %s9125_s22 }
0x301d   :  { %v4684_v44 = vadd.f32 %v4682_v53, %v10166_v3 }
0x301f   :  { %v4701_v11 = vpack.c.bf16 %v4684_v44, %v4683_v38 }
0x3021   :  { %8167 = vmatmul.mubr.msk.bf16.vlgmr.msra.gmra.mrb[120].mxu1 %vm418_vm1, %v4701_v11 }
0x3022   :  { %8171 = vmatpush3.bf16.msra.mxu1 %v8589_v58  ;;  %8178 = vmatprep.mubr.msk.bf16.mxu1 %vm9122_vm3, %v11782_v43 }
0x3023   :  { %8172 = vmatprep.subr.bf16.mxu1 %v11782_v43 }
0x3026   :  { %8173 = vmatpush3.bf16.msra.mxu1 %v8588_v7 }
0x3027   :  { %8174 = vmatprep.subr.bf16.mxu1 %v11782_v43 }
0x302a   :  { %8175 = vmatpush3.bf16.msra.mxu1 %v8590_v52 }
0x302b   :  { %8176 = vmatprep.subr.bf16.mxu1 %v11782_v43 }
0x302e   :  { %8177 = vmatpush3.bf16.msra.mxu1 %v8591_v36 }
0x302f   :  { %8182 = vmatprep.subr.bf16.mxu1 %v11782_v43 }
0x308a   :  { %v4849_v11 = vpop.permute.xlu1 %4848 }
0x308e   :  { %v4851_v52 = vpop.permute.xlu1 %4850 }
0x3095   :  { %v5062_v61 = vpop.f32.mrb[136].mxu0 }
0x3096   :  { %v5123_v7 = vmul.f32 0.17677669, %v5062_v61  ;;  %v8212_v22 = vpop.f32.mrb[137].mxu0  ;;  %v4768_v61 = vrot.slane %v7113_v19, %v9706_v20  ;;  %v11791_v19 = vld [vmem:[#allocation36_spill] sm:$0xff] }
0x3097   :  { %v5065_v28 = vpop.f32.mrb[138].mxu0 }
0x3098   :  { %v8213_v13 = vpop.f32.mrb[139].mxu0  ;;  %v5125_v24 = vsel %vm1377_vm7, %v5123_v7, -inf }
0x3099   :  { %5126 = vmax.xlane.f32.xlu0 %v5125_v24 }
0x30f4   :  { %v4755_v30 = vpop.f32.mrb[120].mxu1 }
0x30f5   :  { %v10991_v1 = vadd.f32 %v4755_v30, %v4705_v49  ;;  %v8168_v37 = vpop.f32.mrb[121].mxu1 }
0x30f6   :  { %v4758_v12 = vpop.f32.mrb[122].mxu1 }
0x30f7   :  { %v10993_v45 = vadd.f32 %v4758_v12, %v4705_v49  ;;  %v8169_v32 = vpop.f32.mrb[123].mxu1  ;;  %v4762_v6 = vmax.f32 %v10991_v1, 0.0 }
0x30f9   :  { %v4763_v34 = vmax.f32 %v10993_v45, 0.0 }
0x30fb   :  { %v4764_v4 = vpack.c.bf16 %v4763_v34, %v4762_v6 }
0x30fd   :  { %8179 = vmatmul.mubr.msk.bf16.vlgmr.msra.gmra.mrb[124].mxu1 %vm1377_vm7, %v4764_v4  ;;  %v5072_v4 = vsel %vm418_vm1, %v11791_v19, 0 }
0x30fe   :  { %8183 = vmatpush3.bf16.msra.mxu1 %v4845_v27  ;;  %8190 = vmatprep.mubr.msk.bf16.mxu1 %vm9122_vm3, %v11782_v43  ;;  %v11792_v27 = vld [vmem:[#allocation38_spill] sm:$0xff] }
0x30ff   :  { %8184 = vmatprep.subr.bf16.mxu1 %v11782_v43 }
0x3102   :  { %8185 = vmatpush3.bf16.msra.mxu1 %v4847_v50  ;;  %v5075_v50 = vsel %vm418_vm1, %v11792_v27, 0 }
0x3103   :  { %8186 = vmatprep.subr.bf16.mxu1 %v11782_v43 }
0x3106   :  { %8187 = vmatpush3.bf16.msra.mxu1 %v4849_v11  ;;  %v11795_v11 = vld [vmem:[#allocation35_spill] sm:$0xff] }
0x3107   :  { %8188 = vmatprep.subr.bf16.mxu1 %v11782_v43 }
0x310a   :  { %8189 = vmatpush3.bf16.msra.mxu1 %v4851_v52  ;;  %v11796_v52 = vld [vmem:[#allocation37_spill] sm:$0xff] }
0x310b   :  { %8214 = vmatprep.subr.bf16.mxu1 %v11782_v43 }
0x3126   :  { %v5127_v63 = vpop.xlane.xlu0 %5126 }
0x3127   :  { %v5131_v58 = vsub.f32 %v5123_v7, %v5127_v63  ;;  %v11793_v63 = vld [vmem:[#allocation40_spill] sm:$0xff] }
0x3129   :  { %v5133_v53 = vmul.f32 1.442695, %v5131_v58  ;;  %v5078_v58 = vsel %vm418_vm1, %v11793_v63, 0 }
0x312b   :  { %8706 = vpow2.f32 %v5133_v53  ;;  %v11794_v53 = vld [vmem:[#allocation42_spill] sm:$0xff] }
0x3135   :  { %v8707_v38 = vpop.eup %8706 }
0x3136   :  { %v5137_v44 = vsel %vm1377_vm7, %v8707_v38, 0.0 }
0x3137   :  { %5138 = vadd.xlane.f32.xlu0 %v5137_v44  ;;  %v5012_v44 = vpack.c.bf16 %v10950_v41, %v10950_v41 }
0x31c4   :  { %v5139_v36 = vpop.xlane.xlu0 %5138 }
0x31c5   :  { %8708 = vrcp.f32 %v5139_v36  ;;  %v11797_v36 = vld [vmem:[#allocation39_spill] sm:$0xff] }
0x31cf   :  { %v8709_v22 = vpop.eup %8708 }
0x31d0   :  { %v5145_v7 = vmul.f32 %v8709_v22, %v8707_v38  ;;  %v4830_v28 = vpop.f32.mrb[124].mxu1  ;;  %v5081_v38 = vsel %vm418_vm1, %v11794_v53, 0 }
0x31d1   :  { %v4831_v13 = vadd.f32 %v4830_v28, %v4768_v61  ;;  %v8180_v24 = vpop.f32.mrb[125].mxu1 }
0x31d2   :  { %v4833_v49 = vpop.f32.mrb[126].mxu1  ;;  %v5147_v30 = vpack.c.bf16 %v5145_v7, %v5145_v7 }
0x31d3   :  { %v4834_v37 = vadd.f32 %v4833_v49, %v4768_v61  ;;  %v8181_v12 = vpop.f32.mrb[127].mxu1  ;;  %v4837_v32 = vmax.f32 %v4831_v13, 0.0  ;;  %v11798_v61 = vld [vmem:[#allocation41_spill] sm:$0xff] }
0x31d4   :  { %8235 = vmatmul.mubr.msk.bf16.vlgmr.msra.gmra.mrb[140].mxu0 %vm1377_vm7, %v5147_v30 }
0x31d5   :  { %v4838_v6 = vmax.f32 %v4834_v37, 0.0  ;;  %8254 = vmatprep.mubr.msk.bf16.mxu0 %vm9122_vm3, %v11782_v43 }
0x31d7   :  { %v4839_v34 = vpack.c.bf16 %v4838_v6, %v4837_v32 }
0x31d9   :  { %8191 = vmatmul.mubr.msk.bf16.vlgmr.msra.gmra.mrb[128].mxu1 %vm1377_vm7, %v4839_v34 }
0x31da   :  { %8215 = vmatpush3.bf16.xpose.msra.mxu1 %v5072_v4  ;;  %8222 = vmatprep.mubr.msk.bf16.mxu1 %vm9122_vm3, %v11782_v43 }
0x31db   :  { %8216 = vmatprep.subr.bf16.mxu1 %v11782_v43 }
0x31e2   :  { %8217 = vmatpush3.bf16.xpose.msra.mxu1 %v5075_v50 }
0x31e3   :  { %8218 = vmatprep.subr.bf16.mxu1 %v11782_v43 }
0x31ea   :  { %8219 = vmatpush3.bf16.xpose.msra.mxu1 %v5078_v58 }
0x31eb   :  { %8220 = vmatprep.subr.bf16.mxu1 %v11782_v43 }
0x31f2   :  { %8221 = vmatpush3.bf16.xpose.msra.mxu1 %v5081_v38 }
0x31f3   :  { %8238 = vmatprep.subr.bf16.mxu1 %v11782_v43 }
0x31f9   :  { %8223 = vmatmul.mubr.msk.bf16.vlgmr.msra.gmra.mrb[132].mxu1 %vm418_vm1, %v5012_v44 }
0x31fa   :  { %8239 = vmatpush3.bf16.msra.mxu1 %v11795_v11  ;;  %8246 = vmatprep.mubr.msk.bf16.mxu1 %vm9122_vm3, %v11782_v43 }
0x31fb   :  { %8240 = vmatprep.subr.bf16.mxu1 %v11782_v43 }
0x31fe   :  { %8241 = vmatpush3.bf16.msra.mxu1 %v11796_v52 }
0x31ff   :  { %8242 = vmatprep.subr.bf16.mxu1 %v11782_v43 }
0x3202   :  { %8243 = vmatpush3.bf16.msra.mxu1 %v11797_v36 }
0x3203   :  { %8244 = vmatprep.subr.bf16.mxu1 %v11782_v43 }
0x3206   :  { %8245 = vmatpush3.bf16.msra.mxu1 %v11798_v61 }
0x3207   :  { %8258 = vmatprep.subr.bf16.mxu1 %v11782_v43 }
0x32a7   :  { %v5186_v41 = vpop.f32.mrb[140].mxu0 }
0x32a8   :  { %v8236_v22 = vpop.f32.mrb[141].mxu0 }
0x32a9   :  { %v5189_v7 = vpop.f32.mrb[142].mxu0 }
0x32aa   :  { %v8237_v28 = vpop.f32.mrb[143].mxu0 }
0x32ac   :  { %v11037_v13 = vpop.f32.mrb[128].mxu1 }
0x32ad   :  { %v8192_v24 = vpop.f32.mrb[129].mxu1 }
0x32ae   :  { %v11039_v49 = vpop.f32.mrb[130].mxu1 }
0x32af   :  { %v8193_v30 = vpop.f32.mrb[131].mxu1 }
0x32cc   :  { %v5117_v37 = vpop.f32.mrb[132].mxu1 }
0x32cd   :  { %v5124_v12 = vmul.f32 0.17677669, %v5117_v37  ;;  %v8224_v32 = vpop.f32.mrb[133].mxu1 }
0x32ce   :  { %v5120_v6 = vpop.f32.mrb[134].mxu1 }
0x32cf   :  { %v8225_v34 = vpop.f32.mrb[135].mxu1  ;;  %v5128_v4 = vsel %vm1377_vm7, %v5124_v12, -inf }
0x32d0   :  { %5129 = vmax.xlane.f32.xlu1 %v5128_v4  ;;  %v5239_v4 = vrot.slane %v10946_v54, %v9706_v20 }
0x32e1   :  { %5240 = vrot.lane.b32.xlu1 %v10884_v42, %s9126_s0 }
0x335d   :  { %v5130_v50 = vpop.xlane.xlu1 %5129 }
0x335e   :  { %v5132_v58 = vsub.f32 %v5124_v12, %v5130_v50 }
0x3360   :  { %v5135_v38 = vmul.f32 1.442695, %v5132_v58 }
0x3361   :  { %v5241_v7 = vpop.permute.xlu1 %5240 }
0x3362   :  { %8710 = vpow2.f32 %v5135_v38  ;;  %8251 = vmatpush3.bf16.msra.mxu0 %v5241_v7 }
0x3363   :  { %8252 = vmatprep.subr.bf16.mxu0 %v11782_v43 }
0x336c   :  { %v8711_v44 = vpop.eup %8710 }
0x336d   :  { %v5140_v22 = vsel %vm1377_vm7, %v8711_v44, 0.0 }
0x336e   :  { %5141 = vadd.xlane.f32.xlu0 %v5140_v22 }
0x3384   :  { %5242 = vrot.lane.b32.xlu0 %v10891_v60, %s9126_s0 }
0x33fb   :  { %v5142_v28 = vpop.xlane.xlu0 %5141 }
0x33fc   :  { %8712 = vrcp.f32 %v5142_v28 }
0x33ff   :  { %v5243_v24 = vpop.permute.xlu0 %5242 }
0x3400   :  { %8253 = vmatpush3.bf16.msra.mxu0 %v5243_v24 }
0x3401   :  { %8266 = vmatprep.subr.bf16.mxu0 %v11782_v43 }
0x3406   :  { %v8713_v42 = vpop.eup %8712 }
0x3407   :  { %v5146_v30 = vmul.f32 %v8713_v42, %v8711_v44 }
0x3409   :  { %v5148_v37 = vpack.c.bf16 %v5146_v30, %v5146_v30 }
0x340b   :  { %8247 = vmatmul.mubr.msk.bf16.vlgmr.msra.gmra.mrb[136].mxu1 %vm1377_vm7, %v5148_v37 }
0x340c   :  { %8262 = vmatprep.mubr.msk.bf16.mxu1 %vm9122_vm3, %v11782_v43 }
0x34de   :  { %v5229_v12 = vpop.f32.mrb[136].mxu1 }
0x34df   :  { %v5235_v60 = vpack.c.bf16 %v5229_v12, %v5186_v41  ;;  %v8248_v32 = vpop.f32.mrb[137].mxu1 }
0x34e0   :  { %v5232_v6 = vpop.f32.mrb[138].mxu1 }
0x34e1   :  { %v8249_v34 = vpop.f32.mrb[139].mxu1  ;;  %8255 = vmatmul.mubr.msk.bf16.vlgmr.msra.gmra.mrb[144].mxu0 %vm418_vm1, %v5235_v60 }
0x34e2   :  { %8282 = vmatprep.mubr.msk.bf16.mxu0 %vm9122_vm3, %v11782_v43 }
0x35b4   :  { %v5283_v50 = vpop.f32.mrb[144].mxu0 }
0x35b5   :  { %v5284_v58 = vadd.f32 %v5283_v50, %v5239_v4  ;;  %v8256_v38 = vpop.f32.mrb[145].mxu0 }
0x35b6   :  { %v5286_v44 = vpop.f32.mrb[146].mxu0 }
0x35b7   :  { %v5290_v22 = vmul.f32 %v5284_v58, %v9984_v48  ;;  %v5287_v7 = vadd.f32 %v5286_v44, %v5239_v4  ;;  %v8257_v28 = vpop.f32.mrb[147].mxu0  ;;  %v8593_v44 = vld [vmem:[%s11716_s14 + $0x48] sm:$0xff]  }
0x35b8   :  { %v8596_v28 = vld [vmem:[%s11717_s15 + $0x110] sm:$0xff]  }
0x35b9   :  { %v5291_v41 = vmul.f32 %v5287_v7, %v9987_v10  ;;  %v5292_v24 = vadd.f32 %v5290_v22, %v10899_v9  ;;  %v8594_v22 = vld [vmem:[%s11717_s15 + $0x100] sm:$0xff]   ;;  %v8595_v7 = vld [vmem:[%s11717_s15 + $0x108] sm:$0xff]  }
0x35ba   :  { %8267 = vmatpush3.bf16.msra.mxu0 %v8594_v22  ;;  %v5329_v22 = vrot.slane %v10946_v54, %v10034_v39 }
0x35bb   :  { %v5294_v42 = vsel %vm418_vm1, %v5292_v24, 0.0  ;;  %v5293_v30 = vadd.f32 %v5291_v41, %v10903_v23  ;;  %v8592_v23 = vld [vmem:[%s11716_s14 + $0x40] sm:$0xff]   ;;  %8268 = vmatprep.subr.bf16.mxu0 %v11782_v43  ;;  %v8597_v41 = vld [vmem:[%s11717_s15 + $0x118] sm:$0xff]  }
0x35bc   :  { %5295 = vadd.xlane.f32.xlu1 %v5294_v42  ;;  %8259 = vmatpush3.bf16.msra.mxu1 %v8592_v23  ;;  %v8599_v42 = vld [vmem:[%s11717_s15 + $0x128] sm:$0xff]  }
0x35bd   :  { %v5297_v37 = vsel %vm418_vm1, %v5293_v30, 0.0  ;;  %8260 = vmatprep.subr.bf16.mxu1 %v11782_v43 }
0x35be   :  { %5298 = vadd.xlane.f32.xlu0 %v5297_v37  ;;  %8269 = vmatpush3.bf16.msra.mxu0 %v8595_v7 }
0x35bf   :  { %8270 = vmatprep.subr.bf16.mxu0 %v11782_v43 }
0x35c0   :  { %8261 = vmatpush3.bf16.msra.mxu1 %v8593_v44 }
0x35c1   :  { %8286 = vmatprep.subr.bf16.mxu1 %v11782_v43 }
0x35c2   :  { %8271 = vmatpush3.bf16.msra.mxu0 %v8596_v28 }
0x35c3   :  { %8272 = vmatprep.subr.bf16.mxu0 %v11782_v43 }
0x35c6   :  { %8273 = vmatpush3.bf16.msra.mxu0 %v8597_v41 }
0x35c7   :  { %8274 = vmatprep.subr.bf16.mxu0 %v11782_v43 }
0x3649   :  { %v5296_v12 = vpop.xlane.xlu1 %5295 }
0x364a   :  { %v5300_v60 = vmul.f32 0.03125, %v5296_v12 }
0x364b   :  { %v5299_v32 = vpop.xlane.xlu0 %5298 }
0x364c   :  { %v5302_v6 = vsub.f32 %v5292_v24, %v5300_v60  ;;  %v5301_v34 = vmul.f32 0.03125, %v5299_v32  ;;  %v8598_v24 = vld [vmem:[%s11717_s15 + $0x120] sm:$0xff]  }
0x364d   :  { %8275 = vmatpush3.bf16.msra.mxu0 %v8598_v24 }
0x364e   :  { %v5303_v50 = vsub.f32 %v5293_v30, %v5301_v34  ;;  %v5304_v4 = vmul.f32 %v5302_v6, %v5302_v6  ;;  %8276 = vmatprep.subr.bf16.mxu0 %v11782_v43 }
0x3650   :  { %v5306_v58 = vsel %vm418_vm1, %v5304_v4, 0.0  ;;  %v5305_v38 = vmul.f32 %v5303_v50, %v5303_v50  ;;  %v5323_v4 = vrot.slane %v10946_v54, %v10029_v62 }
0x3651   :  { %5307 = vadd.xlane.f32.xlu1 %v5306_v58  ;;  %8277 = vmatpush3.bf16.msra.mxu0 %v8599_v42  ;;  %v8600_v42 = vld [vmem:[%s11717_s15 + $0x130] sm:$0xff]  }
0x3652   :  { %v5309_v9 = vsel %vm418_vm1, %v5305_v38, 0.0  ;;  %8278 = vmatprep.subr.bf16.mxu0 %v11782_v43 }
0x3653   :  { %5310 = vadd.xlane.f32.xlu0 %v5309_v9 }
0x3655   :  { %8279 = vmatpush3.bf16.msra.mxu0 %v8600_v42 }
0x3656   :  { %8280 = vmatprep.subr.bf16.mxu0 %v11782_v43 }
0x36de   :  { %v5308_v30 = vpop.xlane.xlu1 %5307 }
0x36df   :  { %v5312_v37 = vmul.f32 0.03125, %v5308_v30 }
0x36e0   :  { %v5311_v12 = vpop.xlane.xlu0 %5310 }
0x36e1   :  { %v5314_v60 = vadd.f32 1e-05, %v5312_v37  ;;  %v5313_v32 = vmul.f32 0.03125, %v5311_v12 }
0x36e3   :  { %8714 = vrsqrt.f32 %v5314_v60  ;;  %v5315_v34 = vadd.f32 1e-05, %v5313_v32 }
0x36e5   :  { %8716 = vrsqrt.f32 %v5315_v34 }
0x36ed   :  { %v8715_v58 = vpop.eup %8714 }
0x36ee   :  { %v5318_v38 = vmul.f32 %v8715_v58, %v5302_v6  ;;  %v8601_v6 = vld [vmem:[%s11717_s15 + $0x138] sm:$0xff]  }
0x36ef   :  { %v8717_v9 = vpop.eup %8716  ;;  %8281 = vmatpush3.bf16.msra.mxu0 %v8601_v6 }
0x36f0   :  { %v5324_v23 = vmul.f32 %v5323_v4, %v5318_v38  ;;  %v5319_v44 = vmul.f32 %v8717_v9, %v5303_v50  ;;  %8318 = vmatprep.subr.bf16.mxu0 %v11782_v43  ;;  %v5341_v50 = vrot.slane %v10946_v54, %v10050_v26  ;;  %v5421_v9 = vrot.slane %v10946_v54, %v9874_v57 }
0x36f2   :  { %v5325_v7 = vmul.f32 %v5323_v4, %v5319_v44  ;;  %v5330_v28 = vadd.f32 %v5329_v22, %v5324_v23 }
0x36f4   :  { %v5331_v41 = vadd.f32 %v5329_v22, %v5325_v7 }
0x36f6   :  { %v5337_v24 = vpack.c.bf16 %v5331_v41, %v5330_v28 }
0x36f8   :  { %8263 = vmatmul.mubr.msk.bf16.vlgmr.msra.gmra.mrb[140].mxu1 %vm418_vm1, %v5337_v24 }
0x36f9   :  { %8290 = vmatprep.mubr.msk.bf16.mxu1 %vm9122_vm3, %v11782_v43 }
0x37cb   :  { %v5391_v30 = vpop.f32.mrb[140].mxu1 }
0x37cc   :  { %v5392_v37 = vadd.f32 %v5391_v30, %v5341_v50  ;;  %v8264_v12 = vpop.f32.mrb[141].mxu1 }
0x37cd   :  { %v5394_v60 = vpop.f32.mrb[142].mxu1 }
0x37ce   :  { %v5395_v32 = vadd.f32 %v5394_v60, %v5341_v50  ;;  %v8265_v34 = vpop.f32.mrb[143].mxu1  ;;  %v5398_v4 = vmax.f32 %v5392_v37, 0.0 }
0x37d0   :  { %v5399_v58 = vmax.f32 %v5395_v32, 0.0 }
0x37d2   :  { %v5417_v38 = vpack.c.bf16 %v5399_v58, %v5398_v4 }
0x37d4   :  { %8283 = vmatmul.mubr.bf16.vlgmr.msra.gmra.mrb[148].mxu0 %v5417_v38 }
0x37d5   :  { %8322 = vmatprep.mubr.msk.bf16.mxu0 %vm9122_vm3, %v11782_v43 }
0x38a7   :  { %v5504_v23 = vpop.f32.mrb[148].mxu0 }
0x38a8   :  { %v5505_v44 = vadd.f32 %v5504_v23, %v5421_v9  ;;  %v8284_v22 = vpop.f32.mrb[149].mxu0 }
0x38a9   :  { %v5507_v7 = vpop.f32.mrb[150].mxu0 }
0x38aa   :  { %v5511_v24 = vmul.f32 %v5505_v44, %v9984_v48  ;;  %v5508_v42 = vadd.f32 %v5507_v7, %v5421_v9  ;;  %v8285_v6 = vpop.f32.mrb[151].mxu0  ;;  %v11134_v7 = vld [vmem:[%s11713_s11 + $0x58] sm:$0xff]  }
0x38ac   :  { %v5512_v50 = vmul.f32 %v5508_v42, %v9987_v10  ;;  %v5513_v30 = vadd.f32 %v5511_v24, %v5330_v28 }
0x38ae   :  { %v5515_v37 = vsel %vm418_vm1, %v5513_v30, 0.0  ;;  %v5514_v12 = vadd.f32 %v5512_v50, %v5331_v41  ;;  %v11127_v41 = vld [vmem:[%s11713_s11 + $0x50] sm:$0xff]  }
0x38af   :  { %5516 = vadd.xlane.f32.xlu1 %v5515_v37  ;;  %8319 = vmatpush3.bf16.msra.mxu0 %v11127_v41 }
0x38b0   :  { %v5518_v60 = vsel %vm418_vm1, %v5514_v12, 0.0  ;;  %8320 = vmatprep.subr.bf16.mxu0 %v11782_v43 }
0x38b1   :  { %5519 = vadd.xlane.f32.xlu0 %v5518_v60 }
0x38b3   :  { %8321 = vmatpush3.bf16.msra.mxu0 %v11134_v7 }
0x38b4   :  { %8326 = vmatprep.subr.bf16.mxu0 %v11782_v43 }
0x393c   :  { %v5517_v32 = vpop.xlane.xlu1 %5516 }
0x393d   :  { %v5521_v34 = vmul.f32 0.03125, %v5517_v32 }
0x393e   :  { %v5520_v4 = vpop.xlane.xlu0 %5519 }
0x393f   :  { %v5523_v58 = vsub.f32 %v5513_v30, %v5521_v34  ;;  %v5522_v38 = vmul.f32 0.03125, %v5520_v4  ;;  %v5550_v34 = vrot.slane %v10946_v54, %v10082_v51 }
0x3941   :  { %v5524_v23 = vsub.f32 %v5514_v12, %v5522_v38  ;;  %v5525_v22 = vmul.f32 %v5523_v58, %v5523_v58  ;;  %v5544_v12 = vrot.slane %v10946_v54, %v10079_v47 }
0x3943   :  { %v5527_v9 = vsel %vm418_vm1, %v5525_v22, 0.0  ;;  %v5526_v44 = vmul.f32 %v5524_v23, %v5524_v23 }
0x3944   :  { %5528 = vadd.xlane.f32.xlu1 %v5527_v9 }
0x3945   :  { %v5530_v28 = vsel %vm418_vm1, %v5526_v44, 0.0 }
0x3946   :  { %5531 = vadd.xlane.f32.xlu0 %v5530_v28 }
0x39d1   :  { %v5529_v24 = vpop.xlane.xlu1 %5528 }
0x39d2   :  { %v5533_v42 = vmul.f32 0.03125, %v5529_v24 }
0x39d3   :  { %v5532_v6 = vpop.xlane.xlu0 %5531 }
0x39d4   :  { %v5535_v50 = vadd.f32 1e-05, %v5533_v42  ;;  %v5534_v30 = vmul.f32 0.03125, %v5532_v6 }
0x39d6   :  { %8718 = vrsqrt.f32 %v5535_v50  ;;  %v5536_v37 = vadd.f32 1e-05, %v5534_v30 }
0x39d8   :  { %8720 = vrsqrt.f32 %v5536_v37 }
0x39e0   :  { %v8719_v60 = vpop.eup %8718 }
0x39e1   :  { %v5539_v32 = vmul.f32 %v8719_v60, %v5523_v58 }
0x39e2   :  { %v8721_v4 = vpop.eup %8720 }
0x39e3   :  { %v5540_v38 = vmul.f32 %v8721_v4, %v5524_v23  ;;  %v5545_v22 = vmul.f32 %v5544_v12, %v5539_v32  ;;  %v8604_v4 = vld [vmem:[%s11721_s19 + $0x80] sm:$0xff]  }
0x39e5   :  { %v11142_v9 = vadd.f32 %v5550_v34, %v5545_v22  ;;  %v5546_v44 = vmul.f32 %v5544_v12, %v5540_v38  ;;  %v11168_v38 = vld [vmem:[%s11721_s19 + $0x90] sm:$0xff]   ;;  %v8606_v22 = vld [vmem:[%s11721_s19 + $0x88] sm:$0xff]  }
0x39e7   :  { %v5553_v28 = vsel %vm418_vm1, %v11142_v9, 0.0  ;;  %v11146_v24 = vadd.f32 %v5550_v34, %v5546_v44  ;;  %v5846_v58 = vadd.f32 %v10907_v21, %v11142_v9  ;;  %v11178_v44 = vld [vmem:[%s11721_s19 + $0x98] sm:$0xff]  }
0x39e8   :  { %5554 = vadd.xlane.f32.xlu1 %v5553_v28  ;;  %v8608_v28 = vld [vmem:[%s11720_s18 + $0x40] sm:$0xff]  }
0x39e9   :  { %v5556_v42 = vsel %vm418_vm1, %v11146_v24, 0.0  ;;  %v5847_v54 = vadd.f32 %v10911_v17, %v11146_v24  ;;  %8287 = vmatpush3.bf16.msra.mxu1 %v8608_v28 }
0x39ea   :  { %5557 = vadd.xlane.f32.xlu0 %v5556_v42  ;;  %8288 = vmatprep.subr.bf16.mxu1 %v11782_v43 }
0x39eb   :  { %v5848_v23 = vpack.c.bf16 %v5847_v54, %v5846_v58 }
0x39ed   :  { %8323 = vmatmul.mubr.msk.bf16.vlgmr.msra.gmra.mrb[152].mxu0 %vm418_vm1, %v5848_v23 }
0x39ee   :  { %8334 = vmatprep.mubr.msk.bf16.mxu0 %vm9122_vm3, %v11782_v43 }
0x3a75   :  { %v5555_v6 = vpop.xlane.xlu1 %5554 }
0x3a76   :  { %v5559_v50 = vmul.f32 0.03125, %v5555_v6 }
0x3a77   :  { %v5558_v30 = vpop.xlane.xlu0 %5557 }
0x3a78   :  { %v5561_v37 = vsub.f32 %v11142_v9, %v5559_v50  ;;  %v5560_v12 = vmul.f32 0.03125, %v5558_v30 }
0x3a7a   :  { %v5562_v60 = vsub.f32 %v11146_v24, %v5560_v12  ;;  %v5563_v32 = vmul.f32 %v5561_v37, %v5561_v37 }
0x3a7c   :  { %v5565_v21 = vsel %vm418_vm1, %v5563_v32, 0.0  ;;  %v5564_v34 = vmul.f32 %v5562_v60, %v5562_v60 }
0x3a7d   :  { %5566 = vadd.xlane.f32.xlu1 %v5565_v21 }
0x3a7e   :  { %v5568_v17 = vsel %vm418_vm1, %v5564_v34, 0.0 }
0x3a7f   :  { %5569 = vadd.xlane.f32.xlu0 %v5568_v17 }
0x3a8e   :  { %5742 = vrot.lane.b32.xlu1 %v8604_v4, %s9125_s22 }
0x3a92   :  { %5746 = vrot.lane.b32.xlu1 %v11168_v38, %s9125_s22 }
0x3a95   :  { %5744 = vrot.lane.b32.xlu0 %v8606_v22, %s9125_s22 }
0x3a96   :  { %5748 = vrot.lane.b32.xlu1 %v11178_v44, %s9125_s22 }
0x3a99   :  { %5915 = vrot.lane.b32.xlu0 %v9734_v46, %s9126_s0  ;;  %v8609_v46 = vld [vmem:[%s11720_s18 + $0x48] sm:$0xff]  }
0x3a9a   :  { %5982 = vrot.lane.b32.xlu1 %v11791_v19, %s9126_s0  ;;  %8289 = vmatpush3.bf16.msra.mxu1 %v8609_v46 }
0x3a9b   :  { %8294 = vmatprep.subr.bf16.mxu1 %v11782_v43 }
0x3a9d   :  { %5917 = vrot.lane.b32.xlu0 %v9750_v2, %s9126_s0  ;;  %v11207_v2 = vld [vmem:[#allocation18 + $0x28] sm:$0xff] }
0x3a9e   :  { %5984 = vrot.lane.b32.xlu1 %v11792_v27, %s9126_s0  ;;  %v5852_v27 = vrot.slane %v11207_v2, %v9703_v18 }
0x3aa1   :  { %5919 = vrot.lane.b32.xlu0 %v9766_v33, %s9126_s0 }
0x3aa2   :  { %5986 = vrot.lane.b32.xlu1 %v11793_v63, %s9126_s0 }
0x3aa5   :  { %5921 = vrot.lane.b32.xlu0 %v9782_v55, %s9126_s0 }
0x3aa6   :  { %5988 = vrot.lane.b32.xlu1 %v11794_v53, %s9126_s0 }
0x3ac0   :  { %v5902_v19 = vpop.f32.mrb[152].mxu0 }
0x3ac1   :  { %v8324_v42 = vpop.f32.mrb[153].mxu0 }
0x3ac2   :  { %v5905_v33 = vpop.f32.mrb[154].mxu0 }
0x3ac3   :  { %v11211_v58 = vadd.f32 %v5905_v33, %v5852_v27  ;;  %v8325_v54 = vpop.f32.mrb[155].mxu0 }
0x3b0a   :  { %v5567_v63 = vpop.xlane.xlu1 %5566 }
0x3b0b   :  { %v5571_v23 = vmul.f32 0.03125, %v5567_v63 }
0x3b0c   :  { %v5570_v6 = vpop.xlane.xlu0 %5569 }
0x3b0d   :  { %v5573_v50 = vadd.f32 1e-05, %v5571_v23  ;;  %v5572_v30 = vmul.f32 0.03125, %v5570_v6 }
0x3b0f   :  { %8722 = vrsqrt.f32 %v5573_v50  ;;  %v5574_v55 = vadd.f32 1e-05, %v5572_v30 }
0x3b10   :  { %v5745_v12 = vpop.permute.xlu0 %5744 }
0x3b11   :  { %8724 = vrsqrt.f32 %v5574_v55 }
0x3b14   :  { %v5916_v53 = vpop.permute.xlu0 %5915 }
0x3b15   :  { %v5927_v32 = vsel %vm418_vm1, %v5916_v53, 0 }
0x3b16   :  { %8327 = vmatpush3.bf16.xpose.msra.mxu0 %v5927_v32 }
0x3b17   :  { %8328 = vmatprep.subr.bf16.mxu0 %v11782_v43 }
0x3b18   :  { %v5918_v17 = vpop.permute.xlu0 %5917 }
0x3b19   :  { %v8723_v21 = vpop.eup %8722  ;;  %v5930_v33 = vsel %vm418_vm1, %v5918_v17, 0 }
0x3b1a   :  { %v5577_v34 = vmul.f32 %v8723_v21, %v5561_v37 }
0x3b1b   :  { %v8725_v28 = vpop.eup %8724 }
0x3b1c   :  { %v5579_v46 = vmul.f32 %v5577_v34, %v10162_v59  ;;  %v5578_v42 = vmul.f32 %v8725_v28, %v5562_v60  ;;  %v5920_v6 = vpop.permute.xlu0 %5919 }
0x3b1d   :  { %v5933_v37 = vsel %vm418_vm1, %v5920_v6, 0 }
0x3b1e   :  { %v5580_v54 = vmul.f32 %v5578_v42, %v10162_v59  ;;  %8329 = vmatpush3.bf16.xpose.msra.mxu0 %v5930_v33  ;;  %v5581_v63 = vadd.f32 %v5579_v46, %v10166_v3  ;;  %v5743_v46 = vpop.permute.xlu1 %5742 }
0x3b1f   :  { %8330 = vmatprep.subr.bf16.mxu0 %v11782_v43 }
0x3b20   :  { %v5582_v23 = vadd.f32 %v5580_v54, %v10166_v3  ;;  %v5922_v60 = vpop.permute.xlu0 %5921 }
0x3b21   :  { %v5936_v30 = vsel %vm418_vm1, %v5922_v60, 0 }
0x3b22   :  { %v5599_v50 = vpack.c.bf16 %v5582_v23, %v5581_v63  ;;  %v5747_v42 = vpop.permute.xlu1 %5746 }
0x3b24   :  { %8291 = vmatmul.mubr.msk.bf16.vlgmr.msra.gmra.mrb[144].mxu1 %vm418_vm1, %v5599_v50 }
0x3b25   :  { %8295 = vmatpush3.bf16.msra.mxu1 %v8604_v4  ;;  %8302 = vmatprep.mubr.msk.bf16.mxu1 %vm9122_vm3, %v11782_v43  ;;  %v5903_v4 = vadd.f32 %v5902_v19, %v5852_v27 }
0x3b26   :  { %8331 = vmatpush3.bf16.xpose.msra.mxu0 %v5933_v37  ;;  %8296 = vmatprep.subr.bf16.mxu1 %v11782_v43  ;;  %v5749_v37 = vpop.permute.xlu1 %5748 }
0x3b27   :  { %8332 = vmatprep.subr.bf16.mxu0 %v11782_v43  ;;  %v5909_v55 = vpack.c.bf16 %v5903_v4, %v5903_v4 }
0x3b29   :  { %8297 = vmatpush3.bf16.msra.mxu1 %v8606_v22 }
0x3b2a   :  { %8298 = vmatprep.subr.bf16.mxu1 %v11782_v43 }
0x3b2d   :  { %8299 = vmatpush3.bf16.msra.mxu1 %v11168_v38  ;;  %v11240_v38 = vld [vmem:[%s11783_s21 + $0x10] sm:$0x7] }
0x3b2e   :  { %8333 = vmatpush3.bf16.xpose.msra.mxu0 %v5936_v30  ;;  %8300 = vmatprep.subr.bf16.mxu1 %v11782_v43  ;;  %v5603_v22 = vrot.slane %v11240_v38, %v9703_v18 }
0x3b2f   :  { %8350 = vmatprep.subr.bf16.mxu0 %v11782_v43 }
0x3b31   :  { %8301 = vmatpush3.bf16.msra.mxu1 %v11178_v44 }
0x3b32   :  { %8306 = vmatprep.subr.bf16.mxu1 %v11782_v43 }
0x3b35   :  { %8335 = vmatmul.mubr.msk.bf16.vlgmr.msra.gmra.mrb[156].mxu0 %vm418_vm1, %v5909_v55 }
0x3b36   :  { %8358 = vmatprep.mubr.msk.bf16.mxu0 %vm9122_vm3, %v11782_v43 }
0x3bf7   :  { %v5653_v19 = vpop.f32.mrb[144].mxu1 }
0x3bf8   :  { %v11244_v27 = vadd.f32 %v5653_v19, %v5603_v22  ;;  %v8292_v44 = vpop.f32.mrb[145].mxu1 }
0x3bf9   :  { %v5656_v53 = vpop.f32.mrb[146].mxu1 }
0x3bfa   :  { %v11246_v32 = vadd.f32 %v5656_v53, %v5603_v22  ;;  %v8293_v21 = vpop.f32.mrb[147].mxu1  ;;  %v5660_v34 = vmax.f32 %v11244_v27, 0.0  ;;  %v5666_v22 = vrot.slane %v11240_v38, %v9706_v20 }
0x3bfc   :  { %v5661_v17 = vmax.f32 %v11246_v32, 0.0 }
0x3bfe   :  { %v5662_v28 = vpack.c.bf16 %v5661_v17, %v5660_v34 }
0x3c00   :  { %8303 = vmatmul.mubr.msk.bf16.vlgmr.msra.gmra.mrb[148].mxu1 %vm1377_vm7, %v5662_v28 }
0x3c01   :  { %8307 = vmatpush3.bf16.msra.mxu1 %v5743_v46  ;;  %8314 = vmatprep.mubr.msk.bf16.mxu1 %vm9122_vm3, %v11782_v43 }
0x3c02   :  { %8308 = vmatprep.subr.bf16.mxu1 %v11782_v43 }
0x3c05   :  { %8309 = vmatpush3.bf16.msra.mxu1 %v5745_v12 }
0x3c06   :  { %8310 = vmatprep.subr.bf16.mxu1 %v11782_v43 }
0x3c08   :  { %v5972_v33 = vpop.f32.mrb[156].mxu0 }
0x3c09   :  { %v6045_v54 = vmul.f32 0.17677669, %v5972_v33  ;;  %v8336_v63 = vpop.f32.mrb[157].mxu0  ;;  %8311 = vmatpush3.bf16.msra.mxu1 %v5747_v42  ;;  %v5983_v42 = vpop.permute.xlu1 %5982 }
0x3c0a   :  { %v5975_v23 = vpop.f32.mrb[158].mxu0  ;;  %8312 = vmatprep.subr.bf16.mxu1 %v11782_v43 }
0x3c0b   :  { %v8337_v6 = vpop.f32.mrb[159].mxu0  ;;  %v6047_v50 = vsel %vm1377_vm7, %v6045_v54, -inf }
0x3c0c   :  { %6048 = vmax.xlane.f32.xlu0 %v6047_v50 }
0x3c0d   :  { %8313 = vmatpush3.bf16.msra.mxu1 %v5749_v37  ;;  %v5910_v37 = vpack.c.bf16 %v11211_v58, %v11211_v58 }
0x3c0e   :  { %8338 = vmatprep.subr.bf16.mxu1 %v11782_v43 }
0x3c99   :  { %v6049_v60 = vpop.xlane.xlu0 %6048 }
0x3c9a   :  { %v6053_v12 = vsub.f32 %v6045_v54, %v6049_v60  ;;  %v5994_v54 = vsel %vm418_vm1, %v5983_v42, 0 }
0x3c9c   :  { %v6055_v30 = vmul.f32 1.442695, %v6053_v12 }
0x3c9e   :  { %8726 = vpow2.f32 %v6055_v30 }
0x3ca8   :  { %v11258_v4 = vpop.eup %8726 }
0x3ca9   :  { %v6059_v55 = vsel %vm1377_vm7, %v11258_v4, 0.0 }
0x3caa   :  { %6060 = vadd.xlane.f32.xlu0 %v6059_v55 }
0x3cc0   :  { %6134 = vrot.lane.b32.xlu0 %v11795_v11, %s9126_s0 }
0x3cc4   :  { %6079 = vrot.lane.b32.xlu0 %v11789_v56, %s9126_s0  ;;  %v5985_v56 = vpop.permute.xlu1 %5984 }
0x3cc5   :  { %v5997_v11 = vsel %vm418_vm1, %v5985_v56, 0 }
0x3cc8   :  { %v5987_v63 = vpop.permute.xlu1 %5986 }
0x3cc9   :  { %v6000_v23 = vsel %vm418_vm1, %v5987_v63, 0 }
0x3ccc   :  { %v5989_v6 = vpop.permute.xlu1 %5988 }
0x3ccd   :  { %v6003_v50 = vsel %vm418_vm1, %v5989_v6, 0 }
0x3cd3   :  { %v5728_v19 = vpop.f32.mrb[148].mxu1 }
0x3cd4   :  { %v5729_v44 = vadd.f32 %v5728_v19, %v5666_v22  ;;  %v8304_v53 = vpop.f32.mrb[149].mxu1 }
0x3cd5   :  { %v5731_v21 = vpop.f32.mrb[150].mxu1 }
0x3cd6   :  { %v5732_v34 = vadd.f32 %v5731_v21, %v5666_v22  ;;  %v8305_v17 = vpop.f32.mrb[151].mxu1  ;;  %v5735_v28 = vmax.f32 %v5729_v44, 0.0 }
0x3cd8   :  { %v5736_v46 = vmax.f32 %v5732_v34, 0.0 }
0x3cda   :  { %v5737_v33 = vpack.c.bf16 %v5736_v46, %v5735_v28 }
0x3cdc   :  { %8315 = vmatmul.mubr.msk.bf16.vlgmr.msra.gmra.mrb[152].mxu1 %vm1377_vm7, %v5737_v33 }
0x3cdd   :  { %8339 = vmatpush3.bf16.xpose.msra.mxu1 %v5994_v54  ;;  %8346 = vmatprep.mubr.msk.bf16.mxu1 %vm9122_vm3, %v11782_v43 }
0x3cde   :  { %8340 = vmatprep.subr.bf16.mxu1 %v11782_v43 }
0x3ce5   :  { %8341 = vmatpush3.bf16.xpose.msra.mxu1 %v5997_v11 }
0x3ce6   :  { %8342 = vmatprep.subr.bf16.mxu1 %v11782_v43 }
0x3ced   :  { %8343 = vmatpush3.bf16.xpose.msra.mxu1 %v6000_v23 }
0x3cee   :  { %8344 = vmatprep.subr.bf16.mxu1 %v11782_v43 }
0x3cf5   :  { %8345 = vmatpush3.bf16.xpose.msra.mxu1 %v6003_v50 }
0x3cf6   :  { %8362 = vmatprep.subr.bf16.mxu1 %v11782_v43 }
0x3cfc   :  { %8347 = vmatmul.mubr.msk.bf16.vlgmr.msra.gmra.mrb[156].mxu1 %vm418_vm1, %v5910_v37 }
0x3cfd   :  { %8370 = vmatprep.mubr.msk.bf16.mxu1 %vm9122_vm3, %v11782_v43 }
0x3d37   :  { %v6061_v60 = vpop.xlane.xlu0 %6060 }
0x3d3b   :  { %v6135_v12 = vpop.permute.xlu0 %6134 }
0x3d3c   :  { %8363 = vmatpush3.bf16.msra.mxu1 %v6135_v12 }
0x3d3d   :  { %8364 = vmatprep.subr.bf16.mxu1 %v11782_v43 }
0x3daf   :  { %v11285_v30 = vpop.f32.mrb[152].mxu1 }
0x3db0   :  { %v8316_v55 = vpop.f32.mrb[153].mxu1 }
0x3db1   :  { %v11287_v22 = vpop.f32.mrb[154].mxu1 }
0x3db2   :  { %v8317_v19 = vpop.f32.mrb[155].mxu1 }
0x3dcf   :  { %v6039_v44 = vpop.f32.mrb[156].mxu1 }
0x3dd0   :  { %v6046_v53 = vmul.f32 0.17677669, %v6039_v44  ;;  %v8348_v21 = vpop.f32.mrb[157].mxu1 }
0x3dd1   :  { %v6042_v58 = vpop.f32.mrb[158].mxu1 }
0x3dd2   :  { %v8349_v34 = vpop.f32.mrb[159].mxu1  ;;  %v6050_v17 = vsel %vm1377_vm7, %v6046_v53, -inf }
0x3dd3   :  { %6051 = vmax.xlane.f32.xlu1 %v6050_v17  ;;  %v6193_v17 = vrot.slane %v11207_v2, %v9706_v20 }
0x3de4   :  { %6075 = vrot.lane.b32.xlu1 %v9729_v29, %s9126_s0 }
0x3de8   :  { %6077 = vrot.lane.b32.xlu1 %v11788_v40, %s9126_s0  ;;  %v6080_v40 = vpop.permute.xlu0 %6079 }
0x3dec   :  { %6136 = vrot.lane.b32.xlu1 %v11796_v52, %s9126_s0 }
0x3df0   :  { %6138 = vrot.lane.b32.xlu1 %v11797_v36, %s9126_s0 }
0x3df4   :  { %6140 = vrot.lane.b32.xlu1 %v11798_v61, %s9126_s0 }
0x3df8   :  { %6196 = vrot.lane.b32.xlu1 %v11134_v7, %s9126_s0 }
0x3e60   :  { %v6052_v28 = vpop.xlane.xlu1 %6051 }
0x3e61   :  { %v6054_v46 = vsub.f32 %v6046_v53, %v6052_v28 }
0x3e63   :  { %v6057_v42 = vmul.f32 1.442695, %v6054_v46 }
0x3e64   :  { %v6076_v33 = vpop.permute.xlu1 %6075 }
0x3e65   :  { %8728 = vpow2.f32 %v6057_v42  ;;  %8351 = vmatpush3.bf16.msra.mxu0 %v6076_v33 }
0x3e66   :  { %8352 = vmatprep.subr.bf16.mxu0 %v11782_v43  ;;  %8730 = vrcp.f32 %v6061_v60 }
0x3e68   :  { %v6078_v29 = vpop.permute.xlu1 %6077 }
0x3e69   :  { %8353 = vmatpush3.bf16.msra.mxu0 %v6078_v29 }
0x3e6a   :  { %8354 = vmatprep.subr.bf16.mxu0 %v11782_v43 }
0x3e6c   :  { %v6137_v52 = vpop.permute.xlu1 %6136 }
0x3e6d   :  { %8355 = vmatpush3.bf16.msra.mxu0 %v6080_v40  ;;  %8365 = vmatpush3.bf16.msra.mxu1 %v6137_v52 }
0x3e6e   :  { %8366 = vmatprep.subr.bf16.mxu1 %v11782_v43  ;;  %8356 = vmatprep.subr.bf16.mxu0 %v11782_v43 }
0x3e6f   :  { %v8729_v36 = vpop.eup %8728 }
0x3e70   :  { %v6139_v61 = vpop.permute.xlu1 %6138  ;;  %v6062_v7 = vsel %vm1377_vm7, %v8729_v36, 0.0  ;;  %v8731_v56 = vpop.eup %8730 }
0x3e71   :  { %6063 = vadd.xlane.f32.xlu0 %v6062_v7  ;;  %8367 = vmatpush3.bf16.msra.mxu1 %v6139_v61  ;;  %v6067_v63 = vmul.f32 %v8731_v56, %v11258_v4 }
0x3e72   :  { %8368 = vmatprep.subr.bf16.mxu1 %v11782_v43 }
0x3e73   :  { %v6069_v6 = vpack.c.bf16 %v6067_v63, %v6067_v63 }
0x3e74   :  { %v6141_v54 = vpop.permute.xlu1 %6140 }
0x3e75   :  { %8369 = vmatpush3.bf16.msra.mxu1 %v6141_v54 }
0x3e76   :  { %8382 = vmatprep.subr.bf16.mxu1 %v11782_v43 }
0x3e78   :  { %v6197_v4 = vpop.permute.xlu1 %6196 }
0x3e87   :  { %6081 = vrot.lane.b32.xlu0 %v11790_v25, %s9126_s0 }
0x3e8b   :  { %6194 = vrot.lane.b32.xlu0 %v11127_v41, %s9126_s0 }
0x3efe   :  { %v6064_v11 = vpop.xlane.xlu0 %6063 }
0x3eff   :  { %8732 = vrcp.f32 %v6064_v11 }
0x3f02   :  { %v6082_v23 = vpop.permute.xlu0 %6081 }
0x3f03   :  { %8357 = vmatpush3.bf16.msra.mxu0 %v6082_v23 }
0x3f04   :  { %8374 = vmatprep.subr.bf16.mxu0 %v11782_v43 }
0x3f06   :  { %8359 = vmatmul.mubr.msk.bf16.vlgmr.msra.gmra.mrb[160].mxu0 %vm1377_vm7, %v6069_v6  ;;  %v6195_v41 = vpop.permute.xlu0 %6194 }
0x3f07   :  { %8378 = vmatprep.mubr.msk.bf16.mxu0 %vm9122_vm3, %v11782_v43  ;;  %8375 = vmatpush3.bf16.msra.mxu0 %v6195_v41 }
0x3f08   :  { %8376 = vmatprep.subr.bf16.mxu0 %v11782_v43 }
0x3f09   :  { %v8733_v25 = vpop.eup %8732 }
0x3f0a   :  { %v6068_v50 = vmul.f32 %v8733_v25, %v8729_v36 }
0x3f0b   :  { %8377 = vmatpush3.bf16.msra.mxu0 %v6197_v4 }
0x3f0c   :  { %v6070_v37 = vpack.c.bf16 %v6068_v50, %v6068_v50  ;;  %8390 = vmatprep.subr.bf16.mxu0 %v11782_v43 }
0x3f0e   :  { %8371 = vmatmul.mubr.msk.bf16.vlgmr.msra.gmra.mrb[160].mxu1 %vm1377_vm7, %v6070_v37 }
0x3f0f   :  { %8386 = vmatprep.mubr.msk.bf16.mxu1 %vm9122_vm3, %v11782_v43 }
0x3fd9   :  { %v6124_v60 = vpop.f32.mrb[160].mxu0 }
0x3fda   :  { %v8360_v12 = vpop.f32.mrb[161].mxu0 }
0x3fdb   :  { %v6127_v55 = vpop.f32.mrb[162].mxu0  ;;  %v8612_v12 = vld [vmem:[%s11717_s15 + $0x140] sm:$0xff]  }
0x3fdc   :  { %v8361_v19 = vpop.f32.mrb[163].mxu0  ;;  %v8613_v55 = vld [vmem:[%s11717_s15 + $0x148] sm:$0xff]  }
0x3fdd   :  { %v8614_v19 = vld [vmem:[%s11717_s15 + $0x150] sm:$0xff]  }
0x3fe1   :  { %v6183_v44 = vpop.f32.mrb[160].mxu1 }
0x3fe2   :  { %v6189_v53 = vpack.c.bf16 %v6183_v44, %v6124_v60  ;;  %v8372_v21 = vpop.f32.mrb[161].mxu1  ;;  %v8611_v60 = vld [vmem:[%s11716_s14 + $0x58] sm:$0xff]  }
0x3fe3   :  { %v6186_v58 = vpop.f32.mrb[162].mxu1  ;;  %v8615_v44 = vld [vmem:[%s11717_s15 + $0x158] sm:$0xff]   ;;  %v8617_v21 = vld [vmem:[%s11717_s15 + $0x168] sm:$0xff]  }
0x3fe4   :  { %v8373_v34 = vpop.f32.mrb[163].mxu1  ;;  %8379 = vmatmul.mubr.msk.bf16.vlgmr.msra.gmra.mrb[164].mxu0 %vm418_vm1, %v6189_v53  ;;  %v8616_v53 = vld [vmem:[%s11717_s15 + $0x160] sm:$0xff]  }
0x3fe5   :  { %8406 = vmatprep.mubr.msk.bf16.mxu0 %vm9122_vm3, %v11782_v43  ;;  %8391 = vmatpush3.bf16.msra.mxu0 %v8612_v12  ;;  %v6375_v12 = vrot.slane %v11207_v2, %v9874_v57 }
0x3fe6   :  { %8392 = vmatprep.subr.bf16.mxu0 %v11782_v43 }
0x3fe9   :  { %8393 = vmatpush3.bf16.msra.mxu0 %v8613_v55 }
0x3fea   :  { %8394 = vmatprep.subr.bf16.mxu0 %v11782_v43 }
0x3fed   :  { %8395 = vmatpush3.bf16.msra.mxu0 %v8614_v19 }
0x3fee   :  { %8396 = vmatprep.subr.bf16.mxu0 %v11782_v43 }
0x3ff1   :  { %8397 = vmatpush3.bf16.msra.mxu0 %v8615_v44 }
0x3ff2   :  { %8398 = vmatprep.subr.bf16.mxu0 %v11782_v43 }
0x3ff5   :  { %8399 = vmatpush3.bf16.msra.mxu0 %v8616_v53 }
0x3ff6   :  { %8400 = vmatprep.subr.bf16.mxu0 %v11782_v43 }
0x3ff9   :  { %8401 = vmatpush3.bf16.msra.mxu0 %v8617_v21 }
0x3ffa   :  { %8402 = vmatprep.subr.bf16.mxu0 %v11782_v43 }
0x40b7   :  { %v6237_v28 = vpop.f32.mrb[164].mxu0 }
0x40b8   :  { %v6238_v46 = vadd.f32 %v6237_v28, %v6193_v17  ;;  %v8380_v42 = vpop.f32.mrb[165].mxu0 }
0x40b9   :  { %v6240_v33 = vpop.f32.mrb[166].mxu0 }
0x40ba   :  { %v6244_v29 = vmul.f32 %v6238_v46, %v9984_v48  ;;  %v6241_v40 = vadd.f32 %v6240_v33, %v6193_v17  ;;  %v8381_v52 = vpop.f32.mrb[167].mxu0 }
0x40bc   :  { %v6245_v36 = vmul.f32 %v6241_v40, %v9987_v10  ;;  %v6246_v61 = vadd.f32 %v6244_v29, %v11142_v9  ;;  %v6277_v29 = vrot.slane %v11207_v2, %v10029_v62  ;;  %v8618_v62 = vld [vmem:[%s11717_s15 + $0x170] sm:$0xff]  }
0x40bd   :  { %8403 = vmatpush3.bf16.msra.mxu0 %v8618_v62 }
0x40be   :  { %v6248_v7 = vsel %vm418_vm1, %v6246_v61, 0.0  ;;  %v6247_v54 = vadd.f32 %v6245_v36, %v11146_v24  ;;  %v8610_v24 = vld [vmem:[%s11716_s14 + $0x50] sm:$0xff]   ;;  %8404 = vmatprep.subr.bf16.mxu0 %v11782_v43 }
0x40bf   :  { %6249 = vadd.xlane.f32.xlu0 %v6248_v7  ;;  %8383 = vmatpush3.bf16.msra.mxu1 %v8610_v24  ;;  %v6283_v7 = vrot.slane %v11207_v2, %v10034_v39  ;;  %v8619_v39 = vld [vmem:[%s11717_s15 + $0x178] sm:$0xff]  }
0x40c0   :  { %v6251_v56 = vsel %vm418_vm1, %v6247_v54, 0.0  ;;  %8384 = vmatprep.subr.bf16.mxu1 %v11782_v43 }
0x40c1   :  { %6252 = vadd.xlane.f32.xlu1 %v6251_v56  ;;  %8405 = vmatpush3.bf16.msra.mxu0 %v8619_v39 }
0x40c3   :  { %8385 = vmatpush3.bf16.msra.mxu1 %v8611_v60 }
0x40c4   :  { %8410 = vmatprep.subr.bf16.mxu1 %v11782_v43 }
0x414c   :  { %v6250_v11 = vpop.xlane.xlu0 %6249 }
0x414d   :  { %v6254_v63 = vmul.f32 0.03125, %v6250_v11 }
0x414e   :  { %v6253_v23 = vpop.xlane.xlu1 %6252 }
0x414f   :  { %v6256_v6 = vsub.f32 %v6246_v61, %v6254_v63  ;;  %v6255_v25 = vmul.f32 0.03125, %v6253_v23  ;;  %v6295_v23 = vrot.slane %v11207_v2, %v10050_v26 }
0x4151   :  { %v6257_v50 = vsub.f32 %v6247_v54, %v6255_v25  ;;  %v6258_v37 = vmul.f32 %v6256_v6, %v6256_v6 }
0x4153   :  { %v6260_v41 = vsel %vm418_vm1, %v6258_v37, 0.0  ;;  %v6259_v4 = vmul.f32 %v6257_v50, %v6257_v50 }
0x4154   :  { %6261 = vadd.xlane.f32.xlu0 %v6260_v41 }
0x4155   :  { %v6263_v9 = vsel %vm418_vm1, %v6259_v4, 0.0 }
0x4158   :  { %6264 = vadd.xlane.f32.xlu0 %v6263_v9 }
0x41e1   :  { %v6262_v58 = vpop.xlane.xlu0 %6261 }
0x41e2   :  { %v6266_v34 = vmul.f32 0.03125, %v6262_v58 }
0x41e4   :  { %v6268_v17 = vadd.f32 1e-05, %v6266_v34 }
0x41e5   :  { %v6265_v28 = vpop.xlane.xlu0 %6264 }
0x41e6   :  { %8734 = vrsqrt.f32 %v6268_v17  ;;  %v6267_v46 = vmul.f32 0.03125, %v6265_v28 }
0x41e8   :  { %v6269_v42 = vadd.f32 1e-05, %v6267_v46 }
0x41ea   :  { %8736 = vrsqrt.f32 %v6269_v42 }
0x41f0   :  { %v8735_v33 = vpop.eup %8734 }
0x41f1   :  { %v6272_v40 = vmul.f32 %v8735_v33, %v6256_v6 }
0x41f3   :  { %v6278_v36 = vmul.f32 %v6277_v29, %v6272_v40 }
0x41f4   :  { %v8737_v52 = vpop.eup %8736 }
0x41f5   :  { %v6273_v61 = vmul.f32 %v8737_v52, %v6257_v50  ;;  %v6284_v56 = vadd.f32 %v6283_v7, %v6278_v36 }
0x41f7   :  { %v6279_v54 = vmul.f32 %v6277_v29, %v6273_v61 }
0x41f9   :  { %v6285_v11 = vadd.f32 %v6283_v7, %v6279_v54 }
0x41fb   :  { %v6291_v63 = vpack.c.bf16 %v6285_v11, %v6284_v56 }
0x41fd   :  { %8387 = vmatmul.mubr.msk.bf16.vlgmr.msra.gmra.mrb[164].mxu1 %vm418_vm1, %v6291_v63 }
0x41fe   :  { %8414 = vmatprep.mubr.msk.bf16.mxu1 %vm9122_vm3, %v11782_v43 }
0x42d0   :  { %v6345_v6 = vpop.f32.mrb[164].mxu1 }
0x42d1   :  { %v6346_v25 = vadd.f32 %v6345_v6, %v6295_v23  ;;  %v8388_v50 = vpop.f32.mrb[165].mxu1  ;;  %v6498_v6 = vrot.slane %v11207_v2, %v10079_v47 }
0x42d2   :  { %v6348_v37 = vpop.f32.mrb[166].mxu1 }
0x42d3   :  { %v6349_v41 = vadd.f32 %v6348_v37, %v6295_v23  ;;  %v8389_v4 = vpop.f32.mrb[167].mxu1  ;;  %v6352_v9 = vmax.f32 %v6346_v25, 0.0  ;;  %v6504_v37 = vrot.slane %v11207_v2, %v10082_v51 }
0x42d5   :  { %v6353_v24 = vmax.f32 %v6349_v41, 0.0 }
0x42d7   :  { %v6371_v60 = vpack.c.bf16 %v6353_v24, %v6352_v9 }
0x42d9   :  { %8407 = vmatmul.mubr.bf16.vlgmr.msra.gmra.mrb[168].mxu0 %v6371_v60 }
0x43ac   :  { %v6458_v55 = vpop.f32.mrb[168].mxu0 }
0x43ad   :  { %v6459_v19 = vadd.f32 %v6458_v55, %v6375_v12  ;;  %v8408_v44 = vpop.f32.mrb[169].mxu0 }
0x43ae   :  { %v6461_v53 = vpop.f32.mrb[170].mxu0 }
0x43af   :  { %v6465_v21 = vmul.f32 %v6459_v19, %v9984_v48  ;;  %v6462_v26 = vadd.f32 %v6461_v53, %v6375_v12  ;;  %v8409_v58 = vpop.f32.mrb[171].mxu0 }
0x43b1   :  { %v6466_v34 = vmul.f32 %v6462_v26, %v9987_v10  ;;  %v6467_v17 = vadd.f32 %v6465_v21, %v6284_v56 }
0x43b3   :  { %v6469_v28 = vsel %vm418_vm1, %v6467_v17, 0.0  ;;  %v6468_v46 = vadd.f32 %v6466_v34, %v6285_v11 }
0x43b4   :  { %6470 = vadd.xlane.f32.xlu1 %v6469_v28  ;;  %v11413_v28 = vld [vmem:[%s11721_s19 + $0xa0] sm:$0xff]  }
0x43b5   :  { %v6472_v42 = vsel %vm418_vm1, %v6468_v46, 0.0 }
0x43b6   :  { %6473 = vadd.xlane.f32.xlu0 %v6472_v42  ;;  %v11425_v42 = vld [vmem:[%s11721_s19 + $0xa8] sm:$0xff]  }
0x4441   :  { %v6471_v33 = vpop.xlane.xlu1 %6470 }
0x4442   :  { %v6475_v29 = vmul.f32 0.03125, %v6471_v33  ;;  %v11432_v33 = vld [vmem:[%s11721_s19 + $0xb8] sm:$0xff]  }
0x4443   :  { %v6474_v40 = vpop.xlane.xlu0 %6473 }
0x4444   :  { %v6477_v52 = vsub.f32 %v6467_v17, %v6475_v29  ;;  %v6476_v36 = vmul.f32 0.03125, %v6474_v40  ;;  %v8822_v29 = vld [vmem:[%s11783_s21] sm:$0x7] }
0x4445   :  { %v2008_v40 = vrot.slane %v8822_v29, %v9874_v57 }
0x4446   :  { %v6478_v61 = vsub.f32 %v6468_v46, %v6476_v36  ;;  %v6479_v7 = vmul.f32 %v6477_v52, %v6477_v52  ;;  %v11420_v46 = vld [vmem:[%s11721_s19 + $0xb0] sm:$0xff]  }
0x4447   :  { %v11800_v36 = vld [vmem:[#allocation44_spill] sm:$0xff] }
0x4448   :  { %v6481_v48 = vsel %vm418_vm1, %v6479_v7, 0.0  ;;  %v6480_v54 = vmul.f32 %v6478_v61, %v6478_v61 }
0x4449   :  { %6482 = vadd.xlane.f32.xlu1 %v6481_v48  ;;  %v8624_v48 = vld [vmem:[%s11720_s18 + $0x50] sm:$0xff]  }
0x444a   :  { %v6484_v10 = vsel %vm418_vm1, %v6480_v54, 0.0  ;;  %v11802_v54 = vld [vmem:[#allocation46_spill] sm:$0xff]  ;;  %8411 = vmatpush3.bf16.msra.mxu1 %v8624_v48 }
0x444b   :  { %6485 = vadd.xlane.f32.xlu0 %v6484_v10  ;;  %v2062_v10 = vadd.f32 %v11802_v54, %v2008_v40  ;;  %8412 = vmatprep.subr.bf16.mxu1 %v11782_v43 }
0x44d6   :  { %v6483_v56 = vpop.xlane.xlu1 %6482 }
0x44d7   :  { %v6487_v11 = vmul.f32 0.03125, %v6483_v56  ;;  %v8823_v56 = vld [vmem:[%s11783_s21 + $0x4] sm:$0x7] }
0x44d8   :  { %v6486_v63 = vpop.xlane.xlu0 %6485 }
0x44d9   :  { %v6489_v62 = vadd.f32 1e-05, %v6487_v11  ;;  %v6488_v39 = vmul.f32 0.03125, %v6486_v63  ;;  %v2967_v11 = vrot.slane %v8823_v56, %v9874_v57  ;;  %v8625_v63 = vld [vmem:[%s11720_s18 + $0x58] sm:$0xff]  }
0x44da   :  { %8413 = vmatpush3.bf16.msra.mxu1 %v8625_v63 }
0x44db   :  { %8738 = vrsqrt.f32 %v6489_v62  ;;  %v6490_v23 = vadd.f32 1e-05, %v6488_v39  ;;  %8418 = vmatprep.subr.bf16.mxu1 %v11782_v43  ;;  %v3018_v62 = vadd.f32 %v10504_v5, %v2967_v11  ;;  %v3021_v39 = vadd.f32 %v10506_v8, %v2967_v11  ;;  %v8825_v8 = vld [vmem:[%s11783_s21 + $0xc] sm:$0x7] }
0x44dd   :  { %8740 = vrsqrt.f32 %v6490_v23  ;;  %v8824_v23 = vld [vmem:[%s11783_s21 + $0x8] sm:$0x7] }
0x44e5   :  { %v8739_v25 = vpop.eup %8738 }
0x44e6   :  { %v6493_v50 = vmul.f32 %v8739_v25, %v6477_v52  ;;  %v11799_v52 = vld [vmem:[#allocation43_spill] sm:$0xff] }
0x44e7   :  { %v8741_v41 = vpop.eup %8740 }
0x44e8   :  { %v6499_v4 = vmul.f32 %v6498_v6, %v6493_v50  ;;  %v6494_v9 = vmul.f32 %v8741_v41, %v6478_v61  ;;  %v11801_v61 = vld [vmem:[#allocation45_spill] sm:$0xff] }
0x44e9   :  { %v2059_v7 = vadd.f32 %v11801_v61, %v2008_v40 }
0x44ea   :  { %v6505_v24 = vadd.f32 %v6504_v37, %v6499_v4  ;;  %v6500_v60 = vmul.f32 %v6498_v6, %v6494_v9  ;;  %v4843_v6 = vrot.slane %v8825_v8, %v9874_v57 }
0x44ec   :  { %v6507_v12 = vsel %vm418_vm1, %v6505_v24, 0.0  ;;  %6793 = vst.msk [vmem:[#allocation22] sm:$0xff] %vm418_vm1, %v6505_v24  ;;  %v6506_v55 = vadd.f32 %v6504_v37, %v6500_v60 }
0x44ed   :  { %6508 = vadd.xlane.f32.xlu1 %v6507_v12 }
0x44ee   :  { %v6510_v19 = vsel %vm418_vm1, %v6506_v55, 0.0  ;;  %6794 = vst.msk [vmem:[#allocation22 + $0x8] sm:$0xff] %vm418_vm1, %v6506_v55 }
0x44ef   :  { %6511 = vadd.xlane.f32.xlu0 %v6510_v19 }
0x457a   :  { %v6509_v47 = vpop.xlane.xlu1 %6508 }
0x457b   :  { %v6513_v44 = vmul.f32 0.03125, %v6509_v47 }
0x457c   :  { %v6512_v53 = vpop.xlane.xlu0 %6511 }
0x457d   :  { %v11400_v51 = vsub.f32 %v6505_v24, %v6513_v44  ;;  %v6514_v2 = vmul.f32 0.03125, %v6512_v53 }
0x457f   :  { %v11402_v21 = vsub.f32 %v6506_v55, %v6514_v2  ;;  %v6517_v26 = vmul.f32 %v11400_v51, %v11400_v51 }
0x4581   :  { %v6519_v58 = vsel %vm418_vm1, %v6517_v26, 0.0  ;;  %v6518_v34 = vmul.f32 %v11402_v21, %v11402_v21 }
0x4582   :  { %6520 = vadd.xlane.f32.xlu1 %v6519_v58 }
0x4583   :  { %v6522_v17 = vsel %vm418_vm1, %v6518_v34, 0.0 }
0x4584   :  { %6523 = vadd.xlane.f32.xlu0 %v6522_v17 }
0x4593   :  { %6696 = vrot.lane.b32.xlu1 %v11413_v28, %s9125_s22 }
0x4597   :  { %6700 = vrot.lane.b32.xlu1 %v11420_v46, %s9125_s22 }
0x459a   :  { %6698 = vrot.lane.b32.xlu0 %v11425_v42, %s9125_s22 }
0x459b   :  { %6702 = vrot.lane.b32.xlu1 %v11432_v33, %s9125_s22 }
0x459e   :  { %2067 = vrot.lane.b32.xlu0 %v11799_v52, %s9125_s22 }
0x459f   :  { %2069 = vrot.lane.b32.xlu1 %v11800_v36, %s9125_s22 }
0x45a2   :  { %2075 = vrot.lane.b32.xlu0 %v2059_v7, %s9113_s1 }
0x45a3   :  { %2077 = vrot.lane.b32.xlu1 %v2062_v10, %s9113_s1 }
0x45a6   :  { %3026 = vrot.lane.b32.xlu0 %v10464_v0, %s9125_s22  ;;  %v3905_v0 = vrot.slane %v8824_v23, %v9874_v57 }
0x45a7   :  { %3028 = vrot.lane.b32.xlu1 %v10466_v15, %s9125_s22 }
0x45a8   :  { %v3956_v15 = vadd.f32 %v10771_v31, %v3905_v0  ;;  %v3959_v5 = vadd.f32 %v10773_v35, %v3905_v0  ;;  %v5741_v31 = vrot.slane %v11240_v38, %v9874_v57 }
0x45aa   :  { %3034 = vrot.lane.b32.xlu0 %v3018_v62, %s9113_s1  ;;  %v5792_v35 = vadd.f32 %v11285_v30, %v5741_v31  ;;  %v11803_v62 = vlaneseq }
0x45ab   :  { %3036 = vrot.lane.b32.xlu1 %v3021_v39, %s9113_s1 }
0x45ac   :  { %v11547_v39 = vand.u32 127, %v11803_v62 }
0x45ae   :  { %3964 = vrot.lane.b32.xlu0 %v10731_v14, %s9125_s22  ;;  %v4894_v14 = vadd.f32 %v11037_v13, %v4843_v6  ;;  %vm2087_vm9 = vcmp.lt.s32.totalorder %v11547_v39, 5  ;;  %vm2086_vm10 = vcmp.lt.s32.totalorder %v11547_v39, 2 }
0x45af   :  { %3966 = vrot.lane.b32.xlu1 %v10733_v16, %s9125_s22  ;;  %v4897_v16 = vadd.f32 %v11039_v49, %v4843_v6 }
0x45b2   :  { %3972 = vrot.lane.b32.xlu0 %v3956_v15, %s9113_s1 }
0x45b3   :  { %3974 = vrot.lane.b32.xlu1 %v3959_v5, %s9113_s1 }
0x45b6   :  { %4902 = vrot.lane.b32.xlu0 %v10991_v1, %s9125_s22  ;;  %v5795_v1 = vadd.f32 %v11287_v22, %v5741_v31 }
0x45b7   :  { %4904 = vrot.lane.b32.xlu1 %v10993_v45, %s9125_s22 }
0x45ba   :  { %4910 = vrot.lane.b32.xlu0 %v4894_v14, %s9113_s1 }
0x45bb   :  { %4912 = vrot.lane.b32.xlu1 %v4897_v16, %s9113_s1 }
0x45be   :  { %5800 = vrot.lane.b32.xlu0 %v11244_v27, %s9125_s22 }
0x45bf   :  { %5802 = vrot.lane.b32.xlu1 %v11246_v32, %s9125_s22 }
0x45c2   :  { %5808 = vrot.lane.b32.xlu0 %v5792_v35, %s9113_s1 }
0x45c3   :  { %5810 = vrot.lane.b32.xlu1 %v5795_v1, %s9113_s1 }
0x460f   :  { %v6521_v45 = vpop.xlane.xlu1 %6520 }
0x4610   :  { %v6525_v13 = vmul.f32 0.03125, %v6521_v45 }
0x4611   :  { %v6524_v49 = vpop.xlane.xlu0 %6523 }
0x4612   :  { %v6527_v25 = vadd.f32 1e-05, %v6525_v13  ;;  %v6526_v50 = vmul.f32 0.03125, %v6524_v49 }
0x4613   :  { %v11504_v38 = vpop.permute.xlu1 %6696 }
0x4614   :  { %8742 = vrsqrt.f32 %v6527_v25  ;;  %v6528_v27 = vadd.f32 1e-05, %v6526_v50 }
0x4615   :  { %v11506_v37 = vpop.permute.xlu0 %6698 }
0x4616   :  { %8744 = vrsqrt.f32 %v6528_v27 }
0x4617   :  { %v11508_v32 = vpop.permute.xlu1 %6700 }
0x4619   :  { %v2068_v30 = vpop.permute.xlu0 %2067 }
0x461b   :  { %v11510_v22 = vpop.permute.xlu1 %6702 }
0x461d   :  { %v2076_v41 = vpop.permute.xlu0 %2075 }
0x461e   :  { %v8743_v4 = vpop.eup %8742  ;;  %v11513_v9 = vsel %vm2081_vm8, %v2068_v30, %v2076_v41 }
0x461f   :  { %v6531_v24 = vmul.f32 %v8743_v4, %v11400_v51  ;;  %v6922_v60 = vmul.f32 -1.442695, %v11513_v9  ;;  %v2070_v12 = vpop.permute.xlu1 %2069 }
0x4620   :  { %v8745_v55 = vpop.eup %8744 }
0x4621   :  { %v6533_v19 = vmul.f32 %v6531_v24, %v10162_v59  ;;  %v6532_v47 = vmul.f32 %v8745_v55, %v11402_v21  ;;  %8746 = vpow2.f32 %v6922_v60  ;;  %v3027_v44 = vpop.permute.xlu0 %3026 }
0x4623   :  { %v6534_v53 = vmul.f32 %v6532_v47, %v10162_v59  ;;  %v2078_v2 = vpop.permute.xlu1 %2077  ;;  %v6535_v51 = vadd.f32 %v6533_v19, %v10166_v3 }
0x4624   :  { %v11521_v26 = vsel %vm2081_vm8, %v2070_v12, %v2078_v2 }
0x4625   :  { %v6923_v58 = vmul.f32 -1.442695, %v11521_v26  ;;  %v3035_v34 = vpop.permute.xlu0 %3034  ;;  %v6536_v17 = vadd.f32 %v6534_v53, %v10166_v3 }
0x4626   :  { %v11527_v29 = vsel %vm2081_vm8, %v3027_v44, %v3035_v34 }
0x4627   :  { %8748 = vpow2.f32 %v6923_v58  ;;  %v6989_v21 = vmul.f32 -1.442695, %v11527_v29  ;;  %v3029_v40 = vpop.permute.xlu1 %3028  ;;  %v6553_v52 = vpack.c.bf16 %v6536_v17, %v6535_v51 }
0x4629   :  { %8750 = vpow2.f32 %v6989_v21  ;;  %8415 = vmatmul.mubr.msk.bf16.vlgmr.msra.gmra.mrb[168].mxu1 %vm418_vm1, %v6553_v52  ;;  %v3965_v59 = vpop.permute.xlu0 %3964 }
0x462a   :  { %8419 = vmatpush3.bf16.msra.mxu1 %v11413_v28  ;;  %8426 = vmatprep.mubr.msk.bf16.mxu1 %vm9122_vm3, %v11782_v43  ;;  %8752 = vtanh.f32 %v11513_v9 }
0x462b   :  { %v8747_v36 = vpop.eup %8746  ;;  %v3037_v61 = vpop.permute.xlu1 %3036  ;;  %8420 = vmatprep.subr.bf16.mxu1 %v11782_v43 }
0x462c   :  { %v2096_v3 = vadd.f32 1.0, %v8747_v36  ;;  %v11536_v7 = vsel %vm2081_vm8, %v3029_v40, %v3037_v61 }
0x462d   :  { %v6990_v48 = vmul.f32 -1.442695, %v11536_v7  ;;  %v3973_v54 = vpop.permute.xlu0 %3972 }
0x462e   :  { %8754 = vrcp.f32 %v2096_v3  ;;  %v11541_v10 = vsel %vm2081_vm8, %v3965_v59, %v3973_v54  ;;  %8421 = vmatpush3.bf16.msra.mxu1 %v11425_v42 }
0x462f   :  { %8756 = vpow2.f32 %v6990_v48  ;;  %v7056_v28 = vmul.f32 -1.442695, %v11541_v10  ;;  %v3967_v56 = vpop.permute.xlu1 %3966  ;;  %8422 = vmatprep.subr.bf16.mxu1 %v11782_v43 }
0x4631   :  { %v8749_v11 = vpop.eup %8748  ;;  %8758 = vpow2.f32 %v7056_v28  ;;  %v4903_v63 = vpop.permute.xlu0 %4902 }
0x4632   :  { %v2097_v23 = vadd.f32 1.0, %v8749_v11  ;;  %8423 = vmatpush3.bf16.msra.mxu1 %v11420_v46  ;;  %8760 = vtanh.f32 %v11521_v26 }
0x4633   :  { %v8751_v0 = vpop.eup %8750  ;;  %v3975_v15 = vpop.permute.xlu1 %3974  ;;  %8424 = vmatprep.subr.bf16.mxu1 %v11782_v43 }
0x4634   :  { %8762 = vrcp.f32 %v2097_v23  ;;  %v3050_v42 = vadd.f32 1.0, %v8751_v0  ;;  %v11553_v5 = vsel %vm2081_vm8, %v3967_v56, %v3975_v15  ;;  %v8753_v14 = vpop.eup %8752 }
0x4635   :  { %8764 = vtanh.f32 %v11527_v29  ;;  %v7057_v8 = vmul.f32 -1.442695, %v11553_v5  ;;  %v4911_v6 = vpop.permute.xlu0 %4910 }
0x4636   :  { %8766 = vrcp.f32 %v3050_v42  ;;  %v11559_v46 = vsel %vm2081_vm8, %v4903_v63, %v4911_v6  ;;  %8425 = vmatpush3.bf16.msra.mxu1 %v11432_v33 }
0x4637   :  { %8768 = vpow2.f32 %v7057_v8  ;;  %v7123_v16 = vmul.f32 -1.442695, %v11559_v46  ;;  %v4905_v31 = vpop.permute.xlu1 %4904  ;;  %8430 = vmatprep.subr.bf16.mxu1 %v11782_v43 }
0x4638   :  { %v8755_v35 = vpop.eup %8754 }
0x4639   :  { %v8757_v1 = vpop.eup %8756  ;;  %v2102_v45 = vsel %vm2087_vm9, %v8753_v14, %v8755_v35  ;;  %8770 = vpow2.f32 %v7123_v16  ;;  %v5801_v13 = vpop.permute.xlu0 %5800 }
0x463a   :  { %v2104_v33 = vsel %vm2086_vm10, %v11513_v9, %v2102_v45  ;;  %v3051_v49 = vadd.f32 1.0, %v8757_v1  ;;  %8772 = vtanh.f32 %v11536_v7 }
0x463b   :  { %v8759_v25 = vpop.eup %8758  ;;  %v2107_v50 = vsel %vm2106_vm11, %v2104_v33, 0.0  ;;  %v4913_v27 = vpop.permute.xlu1 %4912 }
0x463c   :  { %2109 = vst [vmem:[#allocation21] sm:$0xff] %v2107_v50  ;;  %8774 = vrcp.f32 %v3051_v49  ;;  %v3988_v30 = vadd.f32 1.0, %v8759_v25  ;;  %v11573_v41 = vsel %vm2081_vm8, %v4905_v31, %v4913_v27  ;;  %v8761_v4 = vpop.eup %8760 }
0x463d   :  { %8776 = vtanh.f32 %v11541_v10  ;;  %v7124_v24 = vmul.f32 -1.442695, %v11573_v41  ;;  %v5809_v60 = vpop.permute.xlu0 %5808 }
0x463e   :  { %v8763_v9 = vpop.eup %8762  ;;  %8778 = vrcp.f32 %v3988_v30  ;;  %v11578_v12 = vsel %vm2081_vm8, %v5801_v13, %v5809_v60 }
0x463f   :  { %v8765_v55 = vpop.eup %8764  ;;  %v2103_v19 = vsel %vm2087_vm9, %v8761_v4, %v8763_v9  ;;  %8780 = vpow2.f32 %v7124_v24  ;;  %v7190_v47 = vmul.f32 -1.442695, %v11578_v12  ;;  %v5803_v44 = vpop.permute.xlu1 %5802 }
0x4640   :  { %v8767_v53 = vpop.eup %8766  ;;  %v2105_v2 = vsel %vm2086_vm10, %v11521_v26, %v2103_v19 }
0x4641   :  { %v8769_v58 = vpop.eup %8768  ;;  %v2108_v34 = vsel %vm2106_vm11, %v2105_v2, 0.0  ;;  %v3056_v51 = vsel %vm2087_vm9, %v8765_v55, %v8767_v53  ;;  %8782 = vpow2.f32 %v7190_v47  ;;  %v7247_v53 = vld [vmem:[%s11783_s21 + $0x14] sm:$0x7] }
0x4642   :  { %2110 = vst [vmem:[#allocation21 + $0x8] sm:$0xff] %v2108_v34  ;;  %v3058_v17 = vsel %vm2086_vm10, %v11527_v29, %v3056_v51  ;;  %v3989_v21 = vadd.f32 1.0, %v8769_v58  ;;  %8784 = vtanh.f32 %v11553_v5 }
0x4643   :  { %v8771_v40 = vpop.eup %8770  ;;  %v3060_v52 = vsel %vm2106_vm11, %v3058_v17, 0.0  ;;  %v5811_v59 = vpop.permute.xlu1 %5810 }
0x4644   :  { %3063 = vst [vmem:[#allocation21 + $0x10] sm:$0xff] %v3060_v52  ;;  %8786 = vrcp.f32 %v3989_v21  ;;  %v4926_v26 = vadd.f32 1.0, %v8771_v40  ;;  %v5815_v36 = vsel %vm2081_vm8, %v5803_v44, %v5811_v59  ;;  %v8773_v61 = vpop.eup %8772 }
0x4645   :  { %8788 = vtanh.f32 %v11559_v46  ;;  %v7191_v3 = vmul.f32 -1.442695, %v5815_v36 }
0x4646   :  { %v8775_v48 = vpop.eup %8774  ;;  %8790 = vrcp.f32 %v4926_v26 }
0x4647   :  { %v8777_v54 = vpop.eup %8776  ;;  %v3057_v29 = vsel %vm2087_vm9, %v8773_v61, %v8775_v48  ;;  %8792 = vpow2.f32 %v7191_v3 }
0x4648   :  { %v8779_v28 = vpop.eup %8778  ;;  %v3059_v56 = vsel %vm2086_vm10, %v11536_v7, %v3057_v29  ;;  %8794 = vtanh.f32 %v11573_v41 }
0x4649   :  { %v8781_v11 = vpop.eup %8780  ;;  %v3061_v63 = vsel %vm2106_vm11, %v3059_v56, 0.0  ;;  %v3994_v62 = vsel %vm2087_vm9, %v8777_v54, %v8779_v28 }
0x464a   :  { %3064 = vst [vmem:[#allocation21 + $0x18] sm:$0xff] %v3061_v63  ;;  %v3996_v23 = vsel %vm2086_vm10, %v11541_v10, %v3994_v62  ;;  %v4927_v0 = vadd.f32 1.0, %v8781_v11 }
0x464b   :  { %v8783_v15 = vpop.eup %8782  ;;  %v3998_v42 = vsel %vm2106_vm11, %v3996_v23, 0.0 }
0x464c   :  { %4001 = vst [vmem:[#allocation21 + $0x20] sm:$0xff] %v3998_v42  ;;  %8796 = vrcp.f32 %v4927_v0  ;;  %v5824_v7 = vadd.f32 1.0, %v8783_v15  ;;  %v8785_v8 = vpop.eup %8784 }
0x464d   :  { %8798 = vtanh.f32 %v11578_v12 }
0x464e   :  { %v8787_v6 = vpop.eup %8786  ;;  %8800 = vrcp.f32 %v5824_v7 }
0x464f   :  { %v8789_v14 = vpop.eup %8788  ;;  %v3995_v16 = vsel %vm2087_vm9, %v8785_v8, %v8787_v6  ;;  %8802 = vtanh.f32 %v5815_v36 }
0x4650   :  { %v8791_v31 = vpop.eup %8790  ;;  %v3997_v10 = vsel %vm2086_vm10, %v11553_v5, %v3995_v16 }
0x4651   :  { %v8793_v35 = vpop.eup %8792  ;;  %v3999_v1 = vsel %vm2106_vm11, %v3997_v10, 0.0  ;;  %v4932_v45 = vsel %vm2087_vm9, %v8789_v14, %v8791_v31 }
0x4652   :  { %4002 = vst [vmem:[#allocation21 + $0x28] sm:$0xff] %v3999_v1  ;;  %v4934_v13 = vsel %vm2086_vm10, %v11559_v46, %v4932_v45  ;;  %v5825_v33 = vadd.f32 1.0, %v8793_v35  ;;  %v8795_v25 = vpop.eup %8794 }
0x4653   :  { %v4936_v49 = vsel %vm2106_vm11, %v4934_v13, 0.0 }
0x4654   :  { %4939 = vst [vmem:[#allocation21 + $0x30] sm:$0xff] %v4936_v49  ;;  %8804 = vrcp.f32 %v5825_v33 }
0x4656   :  { %v8797_v50 = vpop.eup %8796 }
0x4657   :  { %v8799_v5 = vpop.eup %8798  ;;  %v4933_v27 = vsel %vm2087_vm9, %v8795_v25, %v8797_v50 }
0x4658   :  { %v8801_v30 = vpop.eup %8800  ;;  %v4935_v4 = vsel %vm2086_vm10, %v11573_v41, %v4933_v27 }
0x4659   :  { %v4937_v24 = vsel %vm2106_vm11, %v4935_v4, 0.0  ;;  %v5830_v46 = vsel %vm2087_vm9, %v8799_v5, %v8801_v30  ;;  %v8803_v55 = vpop.eup %8802 }
0x465a   :  { %4940 = vst [vmem:[#allocation21 + $0x38] sm:$0xff] %v4937_v24  ;;  %v5832_v60 = vsel %vm2086_vm10, %v11578_v12, %v5830_v46  ;;  %v6557_v12 = vrot.slane %v7247_v53, %v9703_v18  ;;  %v6620_v18 = vrot.slane %v7247_v53, %v9706_v20 }
0x465b   :  { %v5834_v9 = vsel %vm2106_vm11, %v5832_v60, 0.0 }
0x465c   :  { %5837 = vst [vmem:[#allocation21 + $0x40] sm:$0xff] %v5834_v9 }
0x465e   :  { %v8805_v19 = vpop.eup %8804 }
0x465f   :  { %v5831_v47 = vsel %vm2087_vm9, %v8803_v55, %v8805_v19 }
0x4660   :  { %v5833_v41 = vsel %vm2086_vm10, %v5815_v36, %v5831_v47 }
0x4661   :  { %v5835_v44 = vsel %vm2106_vm11, %v5833_v41, 0.0 }
0x4662   :  { %5838 = vst [vmem:[#allocation21 + $0x48] sm:$0xff] %v5835_v44 }
0x46fc   :  { %v6607_v2 = vpop.f32.mrb[168].mxu1 }
0x46fd   :  { %v6608_v58 = vadd.f32 %v6607_v2, %v6557_v12  ;;  %v8416_v34 = vpop.f32.mrb[169].mxu1 }
0x46fe   :  { %v6610_v51 = vpop.f32.mrb[170].mxu1 }
0x46ff   :  { %v6611_v17 = vadd.f32 %v6610_v51, %v6557_v12  ;;  %6754 = vrot.lane.b32.xlu0 %v6608_v58, %s9125_s22  ;;  %v8417_v21 = vpop.f32.mrb[171].mxu1  ;;  %v6614_v40 = vmax.f32 %v6608_v58, 0.0 }
0x4701   :  { %v6615_v52 = vmax.f32 %v6611_v17, 0.0  ;;  %6756 = vrot.lane.b32.xlu1 %v6611_v17, %s9125_s22  ;;  %s9127_s22 = smov [#allocation22]  }
0x4702   :  { %s6812_s21 = sshll.u32 %s9127_s22, 4  ;;  %s6813_s21 = int_to_ptr.vmem [resolvable:$true] %s6812_s21 }
0x4703   :  { %v6616_v59 = vpack.c.bf16 %v6615_v52, %v6614_v40  ;;  %s9046_s12 = scalar_lea.vmem %s6813_s21, 256  ;;  %p9051_p11 = scmp.lt.s32.totalorder %s6813_s21, %s6813_s21 }
0x4704   :  { %p9047_p10 = scmp.ne.s32.totalorder %s6813_s21, %s9046_s12  ;;  %p9052_p12 = scmp.lt.s32.totalorder %s9046_s12, %s9046_s12 }
0x4705   :  { %8427 = vmatmul.mubr.msk.bf16.vlgmr.msra.gmra.mrb[172].mxu1 %vm1377_vm7, %v6616_v59 }
0x4706   :  { %8431 = vmatpush3.bf16.msra.mxu1 %v11504_v38  ;;  %8438 = vmatprep.mubr.msk.bf16.mxu1 %vm9122_vm3, %v11782_v43  ;;  %p9053_p13 = por %p9052_p12, %p9051_p11 }
0x4707   :  { %8432 = vmatprep.subr.bf16.mxu1 %v11782_v43 }
0x4708   :  { %p9054_p0 = pnand %p9053_p13, %p9047_p10 }
0x470a   :  { %8433 = vmatpush3.bf16.msra.mxu1 %v11506_v37  ;;  %v6695_v37 = vrot.slane %v7247_v53, %v9874_v57 }
0x470b   :  { %8434 = vmatprep.subr.bf16.mxu1 %v11782_v43 }
0x470e   :  { %8435 = vmatpush3.bf16.msra.mxu1 %v11508_v32 }
0x470f   :  { %8436 = vmatprep.subr.bf16.mxu1 %v11782_v43 }
0x4712   :  { %8437 = vmatpush3.bf16.msra.mxu1 %v11510_v22 }
0x47d8   :  { %v6682_v26 = vpop.f32.mrb[172].mxu1 }
0x47d9   :  { %v6683_v36 = vadd.f32 %v6682_v26, %v6620_v18  ;;  %v8428_v38 = vpop.f32.mrb[173].mxu1 }
0x47da   :  { %v6685_v61 = vpop.f32.mrb[174].mxu1 }
0x47db   :  { %v6686_v3 = vadd.f32 %v6685_v61, %v6620_v18  ;;  %v8429_v48 = vpop.f32.mrb[175].mxu1  ;;  %v6689_v54 = vmax.f32 %v6683_v36, 0.0 }
0x47dd   :  { %v6690_v29 = vmax.f32 %v6686_v3, 0.0 }
0x47df   :  { %v6691_v28 = vpack.c.bf16 %v6690_v29, %v6689_v54 }
0x47e1   :  { %8439 = vmatmul.mubr.msk.bf16.vlgmr.msra.gmra.mrb[176].mxu1 %vm1377_vm7, %v6691_v28 }
0x48b4   :  { %v6745_v32 = vpop.f32.mrb[176].mxu1 }
0x48b5   :  { %v6746_v56 = vadd.f32 %v6745_v32, %v6695_v37  ;;  %v8440_v43 = vpop.f32.mrb[177].mxu1 }
0x48b6   :  { %v6748_v11 = vpop.f32.mrb[178].mxu1 }
0x48b7   :  { %v6749_v22 = vadd.f32 %v6748_v11, %v6695_v37  ;;  %6762 = vrot.lane.b32.xlu0 %v6746_v56, %s9113_s1  ;;  %v8441_v20 = vpop.f32.mrb[179].mxu1 }
0x48b9   :  { %6764 = vrot.lane.b32.xlu1 %v6749_v22, %s9113_s1 }
0x48ba   :  { %9057 = shalt.err (!%p9054_p0)
}
0x48bb   :  { %s11804_s25 = sld [smem:[#allocation57_spill]] }
0x48c1   :  { %s9058_s15 = scalar_lea.hbm %s11804_s25, 256 }
0x48c2   :  { %p9059_p1 = scmp.ne.s32.totalorder %s11804_s25, %s9058_s15  ;;  %p9062_p2 = scmp.lt.u32.totalorder %s9058_s15, %s11804_s25 }
0x48c4   :  { %p9064_p3 = pnand %p9062_p2, %p9059_p1 }
0x48c6   :  { %9067 = shalt.err (!%p9064_p3)
}
0x48c7   :  { %6818 = dma.vmem_to_hbm [thread:$0]  %s6813_s21, 256, %s11804_s25, [#allocation23], %s9107_s28, %s9107_s28, %s9108_s29   ;;  %v6755_v57 = vpop.permute.xlu0 %6754  ;;  %v6757_v63 = vpop.permute.xlu1 %6756 }
0x48c8   :  { %s9128_s13 = smov [#allocation21]  }
0x48c9   :  { %s6800_s6 = sshll.u32 %s9128_s13, 4  ;;  %s6801_s6 = int_to_ptr.vmem [resolvable:$true] %s6800_s6 }
0x48ca   :  { %s9068_s20 = scalar_lea.vmem %s6801_s6, 1536  ;;  %p9073_p5 = scmp.lt.s32.totalorder %s6801_s6, %s6801_s6 }
0x48cb   :  { %p9069_p4 = scmp.ne.s32.totalorder %s6801_s6, %s9068_s20  ;;  %p9074_p6 = scmp.lt.s32.totalorder %s9068_s20, %s9068_s20 }
0x48cd   :  { %p9075_p7 = por %p9074_p6, %p9073_p5 }
0x48cf   :  { %p9076_p8 = pnand %p9075_p7, %p9069_p4 }
0x4929   :  { %v6763_v62 = vpop.permute.xlu0 %6762 }
0x492a   :  { %v6768_v23 = vsel %vm2081_vm8, %v6755_v57, %v6763_v62 }
0x492b   :  { %v7257_v0 = vmul.f32 -1.442695, %v6768_v23  ;;  %v6765_v15 = vpop.permute.xlu1 %6764 }
0x492c   :  { %v6769_v42 = vsel %vm2081_vm8, %v6757_v63, %v6765_v15 }
0x492d   :  { %8806 = vpow2.f32 %v7257_v0  ;;  %v7258_v7 = vmul.f32 -1.442695, %v6769_v42 }
0x492f   :  { %8808 = vpow2.f32 %v7258_v7 }
0x4930   :  { %8810 = vtanh.f32 %v6768_v23 }
0x4937   :  { %v8807_v8 = vpop.eup %8806 }
0x4938   :  { %v6778_v6 = vadd.f32 1.0, %v8807_v8 }
0x4939   :  { %v8809_v14 = vpop.eup %8808 }
0x493a   :  { %8812 = vrcp.f32 %v6778_v6  ;;  %v6779_v16 = vadd.f32 1.0, %v8809_v14  ;;  %v8811_v31 = vpop.eup %8810 }
0x493b   :  { %8814 = vtanh.f32 %v6769_v42 }
0x493c   :  { %8816 = vrcp.f32 %v6779_v16 }
0x4944   :  { %v8813_v10 = vpop.eup %8812 }
0x4945   :  { %v8815_v35 = vpop.eup %8814  ;;  %v6784_v1 = vsel %vm2087_vm9, %v8811_v31, %v8813_v10 }
0x4946   :  { %v8817_v45 = vpop.eup %8816  ;;  %v6786_v13 = vsel %vm2086_vm10, %v6768_v23, %v6784_v1 }
0x4947   :  { %v6788_v33 = vsel %vm2106_vm11, %v6786_v13, 0.0  ;;  %v6785_v49 = vsel %vm2087_vm9, %v8815_v35, %v8817_v45 }
0x4948   :  { %6791 = vst [vmem:[#allocation21 + $0x50] sm:$0xff] %v6788_v33  ;;  %v6787_v25 = vsel %vm2086_vm10, %v6769_v42, %v6785_v49 }
0x4949   :  { %v6789_v50 = vsel %vm2106_vm11, %v6787_v25, 0.0 }
0x494a   :  { %6792 = vst [vmem:[#allocation21 + $0x58] sm:$0xff] %v6789_v50 }
0x494b   :  { %9079 = shalt.err (!%p9076_p8)
}
0x494c   :  { %s11805_s10 = sld [smem:[#allocation56_spill]] }
0x4952   :  { %s9080_s24 = scalar_lea.hbm %s11805_s10, 1536 }
0x4953   :  { %p9081_p9 = scmp.ne.s32.totalorder %s11805_s10, %s9080_s24  ;;  %p9084_p10 = scmp.lt.u32.totalorder %s9080_s24, %s11805_s10 }
0x4955   :  { %p9086_p11 = pnand %p9084_p10, %p9081_p9 }
0x4957   :  { %9089 = shalt.err (!%p9086_p11)
}
0x4958   :  { %6806 = dma.vmem_to_hbm [thread:$0]  %s6801_s6, 1536, %s11805_s10, [#allocation6], %s9107_s28, %s9107_s28, %s9108_s29  }
0x4959   :  { %9102 = dma.done.wait [#allocation6], 1536  }
0x495a   :  { %9103 = vsyncadd [#allocation6], 4294965760 }
0x495b   :  { %9104 = dma.done.wait [#allocation23], 256  }
0x495c   :  { %9105 = vsyncadd [#allocation23], 4294967040 }
0x495d   :  { %6829 = vsyncpa [#allocation5], 1 }
0x495e   :  { %6830 = vsyncpa [#allocation8], 1 }
0x495f   :  { %6831 = vsyncpa [#allocation11], 1 }
0x4960   :  { %6832 = vsyncpa [#allocation14], 1 }
0x4961   :  { %6833 = vsyncpa [#allocation17], 1 }
0x4962   :  { %6834 = vsyncpa [#allocation20], 1 }
0x4963   :  { %6835 = vsyncpa [#allocation6], 1 }
0x4964   :  { %6836 = vsyncpa [#allocation23], 1 }

</bundles_post_ra>
